<compile_context>
chip_gen: v5e
topology: v5e:2x2
jax: 0.10.0
libtpu: 0.0.40
codegen_flags: <defaults>
</compile_context>

<pallas_src>
import functools

import jax
import jax.numpy as jnp
from jax.experimental import pallas as pl
from jax.experimental.pallas import tpu as pltpu


def _round_up(x, m):
    return ((x + m - 1) // m) * m


# ----------------------------------------------------------------------------
# Fused per-level kernel: num_layers x (dw3x3 + pw1x1(+BN folded) + swish)
# followed by the header (dw3x3 + pw1x1 + bias), all resident in VMEM.
# ----------------------------------------------------------------------------
def _level_kernel(x_ref, dw_ref, pw_ref, b_ref, pwh_ref, bh_ref, o_ref,
                  buf_a, buf_b, *, h, w, wp, c, coutp, num_layers, row_chunk):
    # ---- zero both padded scratches: border rows (0, h+1) and columns >= w
    # must be exact zeros to realize the TF 'same' padding structurally.
    buf_a[...] = jnp.zeros_like(buf_a)
    buf_b[...] = jnp.zeros_like(buf_b)

    # ---- load the level input (bf16 NHWC) into scratch A's interior in f32.
    buf_a[1:h + 1, 0:w, :] = x_ref[0].astype(jnp.float32)

    # column-validity mask (True for real columns, False for the zero pad).
    col_valid = jax.lax.broadcasted_iota(jnp.int32, (1, wp, 1), 1) < w

    # static row chunks (bounds vreg pressure; chunking is VMEM-only, no DMA).
    chunks = []
    r0 = 0
    while r0 < h:
        rh = min(row_chunk, h - r0)
        chunks.append((r0, rh))
        r0 += rh

    bufs = (buf_a, buf_b)
    for layer in range(num_layers + 1):
        src = bufs[layer % 2]
        dst = bufs[(layer + 1) % 2]
        is_header = layer == num_layers

        dwl = dw_ref[layer]                                   # (9, c) f32
        taps_w = [dwl[t][None, None, :] for t in range(9)]    # hoisted broadcasts
        if is_header:
            pw = pwh_ref[...]                                 # (c, coutp) bf16
            bias = bh_ref[...]                                # (1, coutp) f32
        else:
            pw = pw_ref[layer]                                # (c, c) bf16
            bias = b_ref[layer]                               # (1, c) f32

        for (r0, rh) in chunks:
            # ---- depthwise 3x3, 'same' pad.  Row taps = free major-axis
            # slices of the padded scratch; column taps = XLU rolls (the zero
            # pad columns make the circular wrap land on zeros).
            acc = None
            for kh in range(3):
                rows = src[r0 + kh:r0 + kh + rh, :, :]        # (rh, wp, c) f32
                for kw in range(3):
                    if kw == 1:
                        tap = rows
                    else:
                        tap = pltpu.roll(rows, shift=(1 - kw) % wp, axis=1)
                    contrib = tap * taps_w[kh * 3 + kw]
                    acc = contrib if acc is None else acc + contrib

            # ---- pointwise 1x1 as one MXU matmul (bf16 in, f32 accumulate).
            lhs = acc.reshape(rh * wp, c).astype(jnp.bfloat16)
            z = jnp.dot(lhs, pw, preferred_element_type=jnp.float32) + bias

            if is_header:
                z = z.reshape(rh, wp, coutp)
                o_ref[0, r0:r0 + rh, :, :] = z[:, 0:w, :]
            else:
                z = z * jax.nn.sigmoid(z)                     # swish
                z = z.reshape(rh, wp, c)
                # re-zero the pad columns so the next depthwise sees exact
                # 'same' padding (where, not multiply, so inf/NaN can't leak).
                z = jnp.where(col_valid, z, 0.0)
                dst[r0 + 1:r0 + rh + 1, :, :] = z


@functools.lru_cache(maxsize=None)
def _build_level_call(n, h, w, c, coutp, num_layers):
    assert num_layers >= 1, "fused path expects at least one separable layer"
    wp = ((w + 8) // 8) * 8          # >= w+1 and a multiple of 8
    kern = functools.partial(_level_kernel, h=h, w=w, wp=wp, c=c, coutp=coutp,
                             num_layers=num_layers, row_chunk=8)
    return pl.pallas_call(
        kern,
        out_shape=jax.ShapeDtypeStruct((n, h, w, coutp), jnp.float32),
        grid=(n,),
        in_specs=[
            pl.BlockSpec((1, h, w, c), lambda i: (i, 0, 0, 0)),          # x
            pl.BlockSpec((num_layers + 1, 9, c), lambda i: (0, 0, 0)),   # dw taps
            pl.BlockSpec((num_layers, c, c), lambda i: (0, 0, 0)),       # pw (BN folded)
            pl.BlockSpec((num_layers, 1, c), lambda i: (0, 0, 0)),       # folded bias
            pl.BlockSpec((c, coutp), lambda i: (0, 0)),                  # header pw
            pl.BlockSpec((1, coutp), lambda i: (0, 0)),                  # header bias
        ],
        out_specs=pl.BlockSpec((1, h, w, coutp), lambda i: (i, 0, 0, 0)),
        scratch_shapes=[pltpu.VMEM((h + 2, wp, c), jnp.float32),
                        pltpu.VMEM((h + 2, wp, c), jnp.float32)],
        compiler_params=pltpu.CompilerParams(
            dimension_semantics=("parallel",)),
    )


# ----------------------------------------------------------------------------
# Regressor forward (Pallas) — accepts a list of 5 NCHW f32 feature maps.
# ----------------------------------------------------------------------------
def regressor_forward(inputs_nchw, params, num_layers):
    header = params["header"]
    c, cout = header["pw_w"].shape
    coutp = _round_up(cout, 128)     # lane-dense header store; slice in wrapper

    # depthwise taps for all layers + header, stacked: (L+1, 9, C) f32
    dw_all = jnp.stack(
        [params["conv_list"][i]["dw_w"] for i in range(num_layers)]
        + [header["dw_w"]]).astype(jnp.float32)
    # header pointwise / bias, zero-padded to coutp
    pw_head = jnp.zeros((c, coutp), jnp.float32).at[:, :cout].set(
        header["pw_w"]).astype(jnp.bfloat16)
    b_head = jnp.zeros((1, coutp), jnp.float32).at[0, :cout].set(header["pw_b"])

    feats = []
    for lvl, x_nchw in enumerate(inputs_nchw):
        # fold per-level BatchNorm (eval) into each layer's pointwise conv.
        pw_l, b_l = [], []
        for i in range(num_layers):
            conv = params["conv_list"][i]
            bn = params["bn_list"][lvl][i]
            pw_l.append(conv["pw_w"] * bn["scale"][None, :])
            b_l.append((conv["pw_b"] * bn["scale"] + bn["shift"])[None, :])
        pw_layers = jnp.stack(pw_l).astype(jnp.bfloat16)      # (L, C, C)
        b_layers = jnp.stack(b_l).astype(jnp.float32)         # (L, 1, C)

        # NCHW -> NHWC + bf16 cast once per level (single XLA op).
        feat = jnp.transpose(x_nchw, (0, 2, 3, 1)).astype(jnp.bfloat16)
        n, h, w, _ = feat.shape

        out = _build_level_call(n, h, w, c, coutp, num_layers)(
            feat, dw_all, pw_layers, b_layers, pw_head, b_head)

        out = out[..., :cout]
        # matches torch: permute(0,2,3,1).view(N, H*W*A, 4)
        feats.append(out.reshape(n, h * w * (cout // 4), 4))
    return jnp.concatenate(feats, axis=1)


# ----------------------------------------------------------------------------
# Pure-JAX f32 reference (module semantics) for correctness checking.
# ----------------------------------------------------------------------------
def _ref_separable(x, dw_w, pw_w, pw_b):
    n, h, w, c = x.shape
    xp = jnp.pad(x, ((0, 0), (1, 1), (1, 1), (0, 0)))
    acc = jnp.zeros_like(x)
    for kh in range(3):
        for kw in range(3):
            acc = acc + xp[:, kh:kh + h, kw:kw + w, :] * dw_w[kh * 3 + kw]
    return jnp.einsum("nhwc,cd->nhwd", acc, pw_w,
                      preferred_element_type=jnp.float32) + pw_b


def regressor_reference(inputs_nchw, params, num_layers):
    swish = lambda v: v * jax.nn.sigmoid(v)
    feats = []
    for lvl, x_nchw in enumerate(inputs_nchw):
        feat = jnp.transpose(x_nchw, (0, 2, 3, 1)).astype(jnp.float32)
        for i in range(num_layers):
            conv = params["conv_list"][i]
            bn = params["bn_list"][lvl][i]
            y = _ref_separable(feat, conv["dw_w"], conv["pw_w"], conv["pw_b"])
            feat = swish(y * bn["scale"] + bn["shift"])
        head = params["header"]
        y = _ref_separable(feat, head["dw_w"], head["pw_w"], head["pw_b"])
        n, h, w, c4 = y.shape
        feats.append(y.reshape(n, h * w * (c4 // 4), 4))
    return jnp.concatenate(feats, axis=1)


# ----------------------------------------------------------------------------
# Deterministic parameter init (shapes dictated by the module's __init__)
# ----------------------------------------------------------------------------
def make_params(key, c, num_anchors, num_layers, num_levels=5, bn_eps=1e-3):
    kc, kb, kh = jax.random.split(key, 3)

    conv_list = []
    for i in range(num_layers):
        k1, k2, k3 = jax.random.split(jax.random.fold_in(kc, i), 3)
        conv_list.append(dict(
            # depthwise torch weight (C,1,3,3) -> (9, C)
            dw_w=0.25 * jax.random.normal(k1, (9, c), jnp.float32),
            # pointwise torch weight (C,C,1,1) -> (Cin, Cout)
            pw_w=jax.random.normal(k2, (c, c), jnp.float32) / jnp.sqrt(float(c)),
            pw_b=0.05 * jax.random.normal(k3, (c,), jnp.float32),
        ))

    bn_list = []
    for j in range(num_levels):
        level = []
        for i in range(num_layers):
            k1, k2, k3, k4 = jax.random.split(
                jax.random.fold_in(kb, j * num_layers + i), 4)
            gamma = 1.0 + 0.1 * jax.random.normal(k1, (c,), jnp.float32)
            beta = 0.1 * jax.random.normal(k2, (c,), jnp.float32)
            mean = 0.1 * jax.random.normal(k3, (c,), jnp.float32)
            var = 0.5 + 0.2 * jnp.abs(jax.random.normal(k4, (c,), jnp.float32))
            scale = gamma * jax.lax.rsqrt(var + bn_eps)
            shift = beta - mean * scale
            level.append(dict(scale=scale, shift=shift))
        bn_list.append(level)

    k1, k2, k3 = jax.random.split(kh, 3)
    cout = num_anchors * 4
    header = dict(
        dw_w=0.25 * jax.random.normal(k1, (9, c), jnp.float32),
        pw_w=jax.random.normal(k2, (c, cout), jnp.float32) / jnp.sqrt(float(c)),
        pw_b=0.05 * jax.random.normal(k3, (cout,), jnp.float32),
    )
    return dict(conv_list=conv_list, bn_list=bn_list, header=header)


if __name__ == "__main__":
    IN_CHANNELS = 64       # EfficientDet-D0 head width
    NUM_ANCHORS = 9
    NUM_LAYERS = 2
    BATCH = 2
    SIZES = [16, 8, 8, 4, 4]   # 5 pyramid levels (small demo shapes)

    key = jax.random.PRNGKey(0)
    kx, kp = jax.random.split(key)
    xkeys = jax.random.split(kx, len(SIZES))
    inputs = [jax.random.normal(xkeys[i], (BATCH, IN_CHANNELS, s, s), jnp.float32)
              for i, s in enumerate(SIZES)]
    params = make_params(kp, IN_CHANNELS, NUM_ANCHORS, NUM_LAYERS)

    out = jax.block_until_ready(regressor_forward(inputs, params, NUM_LAYERS))
    ref = jax.block_until_ready(regressor_reference(inputs, params, NUM_LAYERS))

    total_anchors = sum(s * s * NUM_ANCHORS for s in SIZES)
    assert out.shape == (BATCH, total_anchors, 4), out.shape
    max_err = float(jnp.max(jnp.abs(out.astype(jnp.float32) - ref)))
    assert jnp.allclose(out.astype(jnp.float32), ref, rtol=3e-2, atol=3e-2), max_err

    print("KERNEL_OK")
</pallas_src>

<mosaic_0001>
module attributes {stable_mosaic.version = 11 : i64} {
  func.func @_level_kernel(%arg0: i32, %arg1: memref<1x16x16x64xbf16, #tpu.memory_space<vmem>>, %arg2: memref<3x9x64xf32, #tpu.memory_space<vmem>>, %arg3: memref<2x64x64xbf16, #tpu.memory_space<vmem>>, %arg4: memref<2x1x64xf32, #tpu.memory_space<vmem>>, %arg5: memref<64x128xbf16, #tpu.memory_space<vmem>>, %arg6: memref<1x128xf32, #tpu.memory_space<vmem>>, %arg7: memref<1x16x16x128xf32, #tpu.memory_space<vmem>>, %arg8: memref<18x24x64xf32, #tpu.memory_space<vmem>>, %arg9: memref<18x24x64xf32, #tpu.memory_space<vmem>>) attributes {dimension_semantics = [#tpu.dimension_semantics<parallel>], iteration_bounds = array<i64: 2>, scalar_prefetch = 0 : i64, scratch_operands = 2 : i64, tpu.core_type = #tpu.core_type<tc>, window_params = [{transform_indices = @transform_0, window_bounds = array<i64: 1, 16, 16, 64>}, {pipeline_mode = #tpu.pipeline_mode<synchronous>, transform_indices = @transform_1, window_bounds = array<i64: 3, 9, 64>}, {pipeline_mode = #tpu.pipeline_mode<synchronous>, transform_indices = @transform_2, window_bounds = array<i64: 2, 64, 64>}, {pipeline_mode = #tpu.pipeline_mode<synchronous>, transform_indices = @transform_3, window_bounds = array<i64: 2, 1, 64>}, {pipeline_mode = #tpu.pipeline_mode<synchronous>, transform_indices = @transform_4, window_bounds = array<i64: 64, 128>}, {pipeline_mode = #tpu.pipeline_mode<synchronous>, transform_indices = @transform_5, window_bounds = array<i64: 1, 128>}, {transform_indices = @transform_6, window_bounds = array<i64: 1, 16, 16, 128>}]} {
    %cst = arith.constant 0.000000e+00 : f32
    %0 = vector.broadcast %cst : f32 to vector<18x24x64xf32>
    %c0 = arith.constant 0 : index
    %c0_0 = arith.constant 0 : index
    %c0_1 = arith.constant 0 : index
    %1 = vector.load %arg8[%c0, %c0_0, %c0_1] : memref<18x24x64xf32, #tpu.memory_space<vmem>>, vector<18x24x64xf32>
    tpu.vector_store %arg8[%c0, %c0_0, %c0_1], %0 {strides = array<i32>} : memref<18x24x64xf32, #tpu.memory_space<vmem>>, vector<18x24x64xf32>,
    %cst_2 = arith.constant 0.000000e+00 : f32
    %2 = vector.broadcast %cst_2 : f32 to vector<18x24x64xf32>
    %c0_3 = arith.constant 0 : index
    %c0_4 = arith.constant 0 : index
    %c0_5 = arith.constant 0 : index
    %3 = vector.load %arg9[%c0_3, %c0_4, %c0_5] : memref<18x24x64xf32, #tpu.memory_space<vmem>>, vector<18x24x64xf32>
    tpu.vector_store %arg9[%c0_3, %c0_4, %c0_5], %2 {strides = array<i32>} : memref<18x24x64xf32, #tpu.memory_space<vmem>>, vector<18x24x64xf32>,
    %c0_6 = arith.constant 0 : index
    %c0_7 = arith.constant 0 : index
    %c0_8 = arith.constant 0 : index
    %c0_9 = arith.constant 0 : index
    %4 = vector.load %arg1[%c0_6, %c0_7, %c0_8, %c0_9] : memref<1x16x16x64xbf16, #tpu.memory_space<vmem>>, vector<1x16x16x64xbf16>
    %5 = vector.shape_cast %4 : vector<1x16x16x64xbf16> to vector<16x16x64xbf16>
    %6 = arith.extf %5 : vector<16x16x64xbf16> to vector<16x16x64xf32>
    %c1 = arith.constant 1 : index
    %c0_10 = arith.constant 0 : index
    %c0_11 = arith.constant 0 : index
    %7 = vector.load %arg8[%c1, %c0_10, %c0_11] : memref<18x24x64xf32, #tpu.memory_space<vmem>>, vector<16x16x64xf32>
    tpu.vector_store %arg8[%c1, %c0_10, %c0_11], %6 {strides = array<i32>} : memref<18x24x64xf32, #tpu.memory_space<vmem>>, vector<16x16x64xf32>,
    %8 = tpu.iota {dimensions = array<i32: 1>} : vector<1x24x1xi32>
    %c16_i32 = arith.constant 16 : i32
    %9 = vector.broadcast %c16_i32 : i32 to vector<1x24x1xi32>
    %10 = arith.cmpi slt, %8, %9 : vector<1x24x1xi32>
    %c0_12 = arith.constant 0 : index
    %c0_13 = arith.constant 0 : index
    %c0_14 = arith.constant 0 : index
    %11 = vector.load %arg2[%c0_12, %c0_13, %c0_14] : memref<3x9x64xf32, #tpu.memory_space<vmem>>, vector<1x9x64xf32>
    %12 = vector.shape_cast %11 : vector<1x9x64xf32> to vector<9x64xf32>
    %13 = vector.extract_strided_slice %12 {offsets = [0, 0], sizes = [1, 64], strides = [1, 1]} : vector<9x64xf32> to vector<1x64xf32>
    %14 = vector.shape_cast %13 : vector<1x64xf32> to vector<64xf32>
    %15 = vector.shape_cast %14 : vector<64xf32> to vector<1x1x64xf32>
    %16 = vector.extract_strided_slice %12 {offsets = [1, 0], sizes = [1, 64], strides = [1, 1]} : vector<9x64xf32> to vector<1x64xf32>
    %17 = vector.shape_cast %16 : vector<1x64xf32> to vector<64xf32>
    %18 = vector.shape_cast %17 : vector<64xf32> to vector<1x1x64xf32>
    %19 = vector.extract_strided_slice %12 {offsets = [2, 0], sizes = [1, 64], strides = [1, 1]} : vector<9x64xf32> to vector<1x64xf32>
    %20 = vector.shape_cast %19 : vector<1x64xf32> to vector<64xf32>
    %21 = vector.shape_cast %20 : vector<64xf32> to vector<1x1x64xf32>
    %22 = vector.extract_strided_slice %12 {offsets = [3, 0], sizes = [1, 64], strides = [1, 1]} : vector<9x64xf32> to vector<1x64xf32>
    %23 = vector.shape_cast %22 : vector<1x64xf32> to vector<64xf32>
    %24 = vector.shape_cast %23 : vector<64xf32> to vector<1x1x64xf32>
    %25 = vector.extract_strided_slice %12 {offsets = [4, 0], sizes = [1, 64], strides = [1, 1]} : vector<9x64xf32> to vector<1x64xf32>
    %26 = vector.shape_cast %25 : vector<1x64xf32> to vector<64xf32>
    %27 = vector.shape_cast %26 : vector<64xf32> to vector<1x1x64xf32>
    %28 = vector.extract_strided_slice %12 {offsets = [5, 0], sizes = [1, 64], strides = [1, 1]} : vector<9x64xf32> to vector<1x64xf32>
    %29 = vector.shape_cast %28 : vector<1x64xf32> to vector<64xf32>
    %30 = vector.shape_cast %29 : vector<64xf32> to vector<1x1x64xf32>
    %31 = vector.extract_strided_slice %12 {offsets = [6, 0], sizes = [1, 64], strides = [1, 1]} : vector<9x64xf32> to vector<1x64xf32>
    %32 = vector.shape_cast %31 : vector<1x64xf32> to vector<64xf32>
    %33 = vector.shape_cast %32 : vector<64xf32> to vector<1x1x64xf32>
    %34 = vector.extract_strided_slice %12 {offsets = [7, 0], sizes = [1, 64], strides = [1, 1]} : vector<9x64xf32> to vector<1x64xf32>
    %35 = vector.shape_cast %34 : vector<1x64xf32> to vector<64xf32>
    %36 = vector.shape_cast %35 : vector<64xf32> to vector<1x1x64xf32>
    %37 = vector.extract_strided_slice %12 {offsets = [8, 0], sizes = [1, 64], strides = [1, 1]} : vector<9x64xf32> to vector<1x64xf32>
    %38 = vector.shape_cast %37 : vector<1x64xf32> to vector<64xf32>
    %39 = vector.shape_cast %38 : vector<64xf32> to vector<1x1x64xf32>
    %c0_15 = arith.constant 0 : index
    %c0_16 = arith.constant 0 : index
    %c0_17 = arith.constant 0 : index
    %40 = vector.load %arg3[%c0_15, %c0_16, %c0_17] : memref<2x64x64xbf16, #tpu.memory_space<vmem>>, vector<1x64x64xbf16>
    %41 = vector.shape_cast %40 : vector<1x64x64xbf16> to vector<64x64xbf16>
    %c0_18 = arith.constant 0 : index
    %c0_19 = arith.constant 0 : index
    %c0_20 = arith.constant 0 : index
    %42 = vector.load %arg4[%c0_18, %c0_19, %c0_20] : memref<2x1x64xf32, #tpu.memory_space<vmem>>, vector<1x1x64xf32>
    %43 = vector.shape_cast %42 : vector<1x1x64xf32> to vector<1x64xf32>
    %c0_21 = arith.constant 0 : index
    %c0_22 = arith.constant 0 : index
    %c0_23 = arith.constant 0 : index
    %44 = vector.load %arg8[%c0_21, %c0_22, %c0_23] : memref<18x24x64xf32, #tpu.memory_space<vmem>>, vector<8x24x64xf32>
    %c1_i32 = arith.constant 1 : i32
    %45 = tpu.dynamic_rotate %44 by %c1_i32 dim 1 : vector<8x24x64xf32>, i32 -> vector<8x24x64xf32>
    %46 = vector.broadcast %15 : vector<1x1x64xf32> to vector<8x24x64xf32>
    %47 = arith.mulf %45, %46 : vector<8x24x64xf32>
    %48 = vector.broadcast %18 : vector<1x1x64xf32> to vector<8x24x64xf32>
    %49 = arith.mulf %44, %48 : vector<8x24x64xf32>
    %50 = arith.addf %47, %49 : vector<8x24x64xf32>
    %c23_i32 = arith.constant 23 : i32
    %51 = tpu.dynamic_rotate %44 by %c23_i32 dim 1 : vector<8x24x64xf32>, i32 -> vector<8x24x64xf32>
    %52 = vector.broadcast %21 : vector<1x1x64xf32> to vector<8x24x64xf32>
    %53 = arith.mulf %51, %52 : vector<8x24x64xf32>
    %54 = arith.addf %50, %53 : vector<8x24x64xf32>
    %c1_24 = arith.constant 1 : index
    %c0_25 = arith.constant 0 : index
    %c0_26 = arith.constant 0 : index
    %55 = vector.load %arg8[%c1_24, %c0_25, %c0_26] : memref<18x24x64xf32, #tpu.memory_space<vmem>>, vector<8x24x64xf32>
    %c1_i32_27 = arith.constant 1 : i32
    %56 = tpu.dynamic_rotate %55 by %c1_i32_27 dim 1 : vector<8x24x64xf32>, i32 -> vector<8x24x64xf32>
    %57 = vector.broadcast %24 : vector<1x1x64xf32> to vector<8x24x64xf32>
    %58 = arith.mulf %56, %57 : vector<8x24x64xf32>
    %59 = arith.addf %54, %58 : vector<8x24x64xf32>
    %60 = vector.broadcast %27 : vector<1x1x64xf32> to vector<8x24x64xf32>
    %61 = arith.mulf %55, %60 : vector<8x24x64xf32>
    %62 = arith.addf %59, %61 : vector<8x24x64xf32>
    %c23_i32_28 = arith.constant 23 : i32
    %63 = tpu.dynamic_rotate %55 by %c23_i32_28 dim 1 : vector<8x24x64xf32>, i32 -> vector<8x24x64xf32>
    %64 = vector.broadcast %30 : vector<1x1x64xf32> to vector<8x24x64xf32>
    %65 = arith.mulf %63, %64 : vector<8x24x64xf32>
    %66 = arith.addf %62, %65 : vector<8x24x64xf32>
    %c2 = arith.constant 2 : index
    %c0_29 = arith.constant 0 : index
    %c0_30 = arith.constant 0 : index
    %67 = vector.load %arg8[%c2, %c0_29, %c0_30] : memref<18x24x64xf32, #tpu.memory_space<vmem>>, vector<8x24x64xf32>
    %c1_i32_31 = arith.constant 1 : i32
    %68 = tpu.dynamic_rotate %67 by %c1_i32_31 dim 1 : vector<8x24x64xf32>, i32 -> vector<8x24x64xf32>
    %69 = vector.broadcast %33 : vector<1x1x64xf32> to vector<8x24x64xf32>
    %70 = arith.mulf %68, %69 : vector<8x24x64xf32>
    %71 = arith.addf %66, %70 : vector<8x24x64xf32>
    %72 = vector.broadcast %36 : vector<1x1x64xf32> to vector<8x24x64xf32>
    %73 = arith.mulf %67, %72 : vector<8x24x64xf32>
    %74 = arith.addf %71, %73 : vector<8x24x64xf32>
    %c23_i32_32 = arith.constant 23 : i32
    %75 = tpu.dynamic_rotate %67 by %c23_i32_32 dim 1 : vector<8x24x64xf32>, i32 -> vector<8x24x64xf32>
    %76 = vector.broadcast %39 : vector<1x1x64xf32> to vector<8x24x64xf32>
    %77 = arith.mulf %75, %76 : vector<8x24x64xf32>
    %78 = arith.addf %74, %77 : vector<8x24x64xf32>
    %79 = vector.shape_cast %78 : vector<8x24x64xf32> to vector<192x64xf32>
    %80 = arith.truncf %79 : vector<192x64xf32> to vector<192x64xbf16>
    %cst_33 = arith.constant dense<0.000000e+00> : vector<192x64xf32>
    %81 = tpu.matmul %80, %41, %cst_33 {dimension_numbers = #tpu.dot_dimension_numbers<[1], [0], [0], [1], [0, 0, 1, 1], [], []>} : vector<192x64xbf16>, vector<64x64xbf16>, vector<192x64xf32> -> vector<192x64xf32>
    %82 = vector.broadcast %43 : vector<1x64xf32> to vector<192x64xf32>
    %83 = arith.addf %81, %82 : vector<192x64xf32>
    %84 = arith.negf %83 : vector<192x64xf32>
    %85 = math.exp %84 : vector<192x64xf32>
    %cst_34 = arith.constant 1.000000e+00 : f32
    %86 = vector.broadcast %cst_34 : f32 to vector<192x64xf32>
    %87 = arith.addf %86, %85 : vector<192x64xf32>
    %88 = arith.divf %86, %87 : vector<192x64xf32>
    %89 = arith.mulf %83, %88 : vector<192x64xf32>
    %90 = vector.shape_cast %89 : vector<192x64xf32> to vector<8x24x64xf32>
    %cst_35 = arith.constant 0.000000e+00 : f32
    %91 = vector.shape_cast %10 : vector<1x24x1xi1> to vector<1x24x1xi1>
    %92 = vector.broadcast %91 : vector<1x24x1xi1> to vector<8x24x64xi1>
    %93 = vector.broadcast %cst_35 : f32 to vector<8x24x64xf32>
    %94 = arith.select %92, %90, %93 : vector<8x24x64xi1>, vector<8x24x64xf32>
    %c1_36 = arith.constant 1 : index
    %c0_37 = arith.constant 0 : index
    %c0_38 = arith.constant 0 : index
    %95 = vector.load %arg9[%c1_36, %c0_37, %c0_38] : memref<18x24x64xf32, #tpu.memory_space<vmem>>, vector<8x24x64xf32>
    tpu.vector_store %arg9[%c1_36, %c0_37, %c0_38], %94 {strides = array<i32>} : memref<18x24x64xf32, #tpu.memory_space<vmem>>, vector<8x24x64xf32>,
    %c8 = arith.constant 8 : index
    %c0_39 = arith.constant 0 : index
    %c0_40 = arith.constant 0 : index
    %96 = vector.load %arg8[%c8, %c0_39, %c0_40] : memref<18x24x64xf32, #tpu.memory_space<vmem>>, vector<8x24x64xf32>
    %c1_i32_41 = arith.constant 1 : i32
    %97 = tpu.dynamic_rotate %96 by %c1_i32_41 dim 1 : vector<8x24x64xf32>, i32 -> vector<8x24x64xf32>
    %98 = vector.broadcast %15 : vector<1x1x64xf32> to vector<8x24x64xf32>
    %99 = arith.mulf %97, %98 : vector<8x24x64xf32>
    %100 = vector.broadcast %18 : vector<1x1x64xf32> to vector<8x24x64xf32>
    %101 = arith.mulf %96, %100 : vector<8x24x64xf32>
    %102 = arith.addf %99, %101 : vector<8x24x64xf32>
    %c23_i32_42 = arith.constant 23 : i32
    %103 = tpu.dynamic_rotate %96 by %c23_i32_42 dim 1 : vector<8x24x64xf32>, i32 -> vector<8x24x64xf32>
    %104 = vector.broadcast %21 : vector<1x1x64xf32> to vector<8x24x64xf32>
    %105 = arith.mulf %103, %104 : vector<8x24x64xf32>
    %106 = arith.addf %102, %105 : vector<8x24x64xf32>
    %c9 = arith.constant 9 : index
    %c0_43 = arith.constant 0 : index
    %c0_44 = arith.constant 0 : index
    %107 = vector.load %arg8[%c9, %c0_43, %c0_44] : memref<18x24x64xf32, #tpu.memory_space<vmem>>, vector<8x24x64xf32>
    %c1_i32_45 = arith.constant 1 : i32
    %108 = tpu.dynamic_rotate %107 by %c1_i32_45 dim 1 : vector<8x24x64xf32>, i32 -> vector<8x24x64xf32>
    %109 = vector.broadcast %24 : vector<1x1x64xf32> to vector<8x24x64xf32>
    %110 = arith.mulf %108, %109 : vector<8x24x64xf32>
    %111 = arith.addf %106, %110 : vector<8x24x64xf32>
    %112 = vector.broadcast %27 : vector<1x1x64xf32> to vector<8x24x64xf32>
    %113 = arith.mulf %107, %112 : vector<8x24x64xf32>
    %114 = arith.addf %111, %113 : vector<8x24x64xf32>
    %c23_i32_46 = arith.constant 23 : i32
    %115 = tpu.dynamic_rotate %107 by %c23_i32_46 dim 1 : vector<8x24x64xf32>, i32 -> vector<8x24x64xf32>
    %116 = vector.broadcast %30 : vector<1x1x64xf32> to vector<8x24x64xf32>
    %117 = arith.mulf %115, %116 : vector<8x24x64xf32>
    %118 = arith.addf %114, %117 : vector<8x24x64xf32>
    %c10 = arith.constant 10 : index
    %c0_47 = arith.constant 0 : index
    %c0_48 = arith.constant 0 : index
    %119 = vector.load %arg8[%c10, %c0_47, %c0_48] : memref<18x24x64xf32, #tpu.memory_space<vmem>>, vector<8x24x64xf32>
    %c1_i32_49 = arith.constant 1 : i32
    %120 = tpu.dynamic_rotate %119 by %c1_i32_49 dim 1 : vector<8x24x64xf32>, i32 -> vector<8x24x64xf32>
    %121 = vector.broadcast %33 : vector<1x1x64xf32> to vector<8x24x64xf32>
    %122 = arith.mulf %120, %121 : vector<8x24x64xf32>
    %123 = arith.addf %118, %122 : vector<8x24x64xf32>
    %124 = vector.broadcast %36 : vector<1x1x64xf32> to vector<8x24x64xf32>
    %125 = arith.mulf %119, %124 : vector<8x24x64xf32>
    %126 = arith.addf %123, %125 : vector<8x24x64xf32>
    %c23_i32_50 = arith.constant 23 : i32
    %127 = tpu.dynamic_rotate %119 by %c23_i32_50 dim 1 : vector<8x24x64xf32>, i32 -> vector<8x24x64xf32>
    %128 = vector.broadcast %39 : vector<1x1x64xf32> to vector<8x24x64xf32>
    %129 = arith.mulf %127, %128 : vector<8x24x64xf32>
    %130 = arith.addf %126, %129 : vector<8x24x64xf32>
    %131 = vector.shape_cast %130 : vector<8x24x64xf32> to vector<192x64xf32>
    %132 = arith.truncf %131 : vector<192x64xf32> to vector<192x64xbf16>
    %cst_51 = arith.constant dense<0.000000e+00> : vector<192x64xf32>
    %133 = tpu.matmul %132, %41, %cst_51 {dimension_numbers = #tpu.dot_dimension_numbers<[1], [0], [0], [1], [0, 0, 1, 1], [], []>} : vector<192x64xbf16>, vector<64x64xbf16>, vector<192x64xf32> -> vector<192x64xf32>
    %134 = vector.broadcast %43 : vector<1x64xf32> to vector<192x64xf32>
    %135 = arith.addf %133, %134 : vector<192x64xf32>
    %136 = arith.negf %135 : vector<192x64xf32>
    %137 = math.exp %136 : vector<192x64xf32>
    %cst_52 = arith.constant 1.000000e+00 : f32
    %138 = vector.broadcast %cst_52 : f32 to vector<192x64xf32>
    %139 = arith.addf %138, %137 : vector<192x64xf32>
    %140 = arith.divf %138, %139 : vector<192x64xf32>
    %141 = arith.mulf %135, %140 : vector<192x64xf32>
    %142 = vector.shape_cast %141 : vector<192x64xf32> to vector<8x24x64xf32>
    %cst_53 = arith.constant 0.000000e+00 : f32
    %143 = vector.shape_cast %10 : vector<1x24x1xi1> to vector<1x24x1xi1>
    %144 = vector.broadcast %143 : vector<1x24x1xi1> to vector<8x24x64xi1>
    %145 = vector.broadcast %cst_53 : f32 to vector<8x24x64xf32>
    %146 = arith.select %144, %142, %145 : vector<8x24x64xi1>, vector<8x24x64xf32>
    %c9_54 = arith.constant 9 : index
    %c0_55 = arith.constant 0 : index
    %c0_56 = arith.constant 0 : index
    %147 = vector.load %arg9[%c9_54, %c0_55, %c0_56] : memref<18x24x64xf32, #tpu.memory_space<vmem>>, vector<8x24x64xf32>
    tpu.vector_store %arg9[%c9_54, %c0_55, %c0_56], %146 {strides = array<i32>} : memref<18x24x64xf32, #tpu.memory_space<vmem>>, vector<8x24x64xf32>,
    %c1_57 = arith.constant 1 : index
    %c0_58 = arith.constant 0 : index
    %c0_59 = arith.constant 0 : index
    %148 = vector.load %arg2[%c1_57, %c0_58, %c0_59] : memref<3x9x64xf32, #tpu.memory_space<vmem>>, vector<1x9x64xf32>
    %149 = vector.shape_cast %148 : vector<1x9x64xf32> to vector<9x64xf32>
    %150 = vector.extract_strided_slice %149 {offsets = [0, 0], sizes = [1, 64], strides = [1, 1]} : vector<9x64xf32> to vector<1x64xf32>
    %151 = vector.shape_cast %150 : vector<1x64xf32> to vector<64xf32>
    %152 = vector.shape_cast %151 : vector<64xf32> to vector<1x1x64xf32>
    %153 = vector.extract_strided_slice %149 {offsets = [1, 0], sizes = [1, 64], strides = [1, 1]} : vector<9x64xf32> to vector<1x64xf32>
    %154 = vector.shape_cast %153 : vector<1x64xf32> to vector<64xf32>
    %155 = vector.shape_cast %154 : vector<64xf32> to vector<1x1x64xf32>
    %156 = vector.extract_strided_slice %149 {offsets = [2, 0], sizes = [1, 64], strides = [1, 1]} : vector<9x64xf32> to vector<1x64xf32>
    %157 = vector.shape_cast %156 : vector<1x64xf32> to vector<64xf32>
    %158 = vector.shape_cast %157 : vector<64xf32> to vector<1x1x64xf32>
    %159 = vector.extract_strided_slice %149 {offsets = [3, 0], sizes = [1, 64], strides = [1, 1]} : vector<9x64xf32> to vector<1x64xf32>
    %160 = vector.shape_cast %159 : vector<1x64xf32> to vector<64xf32>
    %161 = vector.shape_cast %160 : vector<64xf32> to vector<1x1x64xf32>
    %162 = vector.extract_strided_slice %149 {offsets = [4, 0], sizes = [1, 64], strides = [1, 1]} : vector<9x64xf32> to vector<1x64xf32>
    %163 = vector.shape_cast %162 : vector<1x64xf32> to vector<64xf32>
    %164 = vector.shape_cast %163 : vector<64xf32> to vector<1x1x64xf32>
    %165 = vector.extract_strided_slice %149 {offsets = [5, 0], sizes = [1, 64], strides = [1, 1]} : vector<9x64xf32> to vector<1x64xf32>
    %166 = vector.shape_cast %165 : vector<1x64xf32> to vector<64xf32>
    %167 = vector.shape_cast %166 : vector<64xf32> to vector<1x1x64xf32>
    %168 = vector.extract_strided_slice %149 {offsets = [6, 0], sizes = [1, 64], strides = [1, 1]} : vector<9x64xf32> to vector<1x64xf32>
    %169 = vector.shape_cast %168 : vector<1x64xf32> to vector<64xf32>
    %170 = vector.shape_cast %169 : vector<64xf32> to vector<1x1x64xf32>
    %171 = vector.extract_strided_slice %149 {offsets = [7, 0], sizes = [1, 64], strides = [1, 1]} : vector<9x64xf32> to vector<1x64xf32>
    %172 = vector.shape_cast %171 : vector<1x64xf32> to vector<64xf32>
    %173 = vector.shape_cast %172 : vector<64xf32> to vector<1x1x64xf32>
    %174 = vector.extract_strided_slice %149 {offsets = [8, 0], sizes = [1, 64], strides = [1, 1]} : vector<9x64xf32> to vector<1x64xf32>
    %175 = vector.shape_cast %174 : vector<1x64xf32> to vector<64xf32>
    %176 = vector.shape_cast %175 : vector<64xf32> to vector<1x1x64xf32>
    %c1_60 = arith.constant 1 : index
    %c0_61 = arith.constant 0 : index
    %c0_62 = arith.constant 0 : index
    %177 = vector.load %arg3[%c1_60, %c0_61, %c0_62] : memref<2x64x64xbf16, #tpu.memory_space<vmem>>, vector<1x64x64xbf16>
    %178 = vector.shape_cast %177 : vector<1x64x64xbf16> to vector<64x64xbf16>
    %c1_63 = arith.constant 1 : index
    %c0_64 = arith.constant 0 : index
    %c0_65 = arith.constant 0 : index
    %179 = vector.load %arg4[%c1_63, %c0_64, %c0_65] : memref<2x1x64xf32, #tpu.memory_space<vmem>>, vector<1x1x64xf32>
    %180 = vector.shape_cast %179 : vector<1x1x64xf32> to vector<1x64xf32>
    %c0_66 = arith.constant 0 : index
    %c0_67 = arith.constant 0 : index
    %c0_68 = arith.constant 0 : index
    %181 = vector.load %arg9[%c0_66, %c0_67, %c0_68] : memref<18x24x64xf32, #tpu.memory_space<vmem>>, vector<8x24x64xf32>
    %c1_i32_69 = arith.constant 1 : i32
    %182 = tpu.dynamic_rotate %181 by %c1_i32_69 dim 1 : vector<8x24x64xf32>, i32 -> vector<8x24x64xf32>
    %183 = vector.broadcast %152 : vector<1x1x64xf32> to vector<8x24x64xf32>
    %184 = arith.mulf %182, %183 : vector<8x24x64xf32>
    %185 = vector.broadcast %155 : vector<1x1x64xf32> to vector<8x24x64xf32>
    %186 = arith.mulf %181, %185 : vector<8x24x64xf32>
    %187 = arith.addf %184, %186 : vector<8x24x64xf32>
    %c23_i32_70 = arith.constant 23 : i32
    %188 = tpu.dynamic_rotate %181 by %c23_i32_70 dim 1 : vector<8x24x64xf32>, i32 -> vector<8x24x64xf32>
    %189 = vector.broadcast %158 : vector<1x1x64xf32> to vector<8x24x64xf32>
    %190 = arith.mulf %188, %189 : vector<8x24x64xf32>
    %191 = arith.addf %187, %190 : vector<8x24x64xf32>
    %c1_71 = arith.constant 1 : index
    %c0_72 = arith.constant 0 : index
    %c0_73 = arith.constant 0 : index
    %192 = vector.load %arg9[%c1_71, %c0_72, %c0_73] : memref<18x24x64xf32, #tpu.memory_space<vmem>>, vector<8x24x64xf32>
    %c1_i32_74 = arith.constant 1 : i32
    %193 = tpu.dynamic_rotate %192 by %c1_i32_74 dim 1 : vector<8x24x64xf32>, i32 -> vector<8x24x64xf32>
    %194 = vector.broadcast %161 : vector<1x1x64xf32> to vector<8x24x64xf32>
    %195 = arith.mulf %193, %194 : vector<8x24x64xf32>
    %196 = arith.addf %191, %195 : vector<8x24x64xf32>
    %197 = vector.broadcast %164 : vector<1x1x64xf32> to vector<8x24x64xf32>
    %198 = arith.mulf %192, %197 : vector<8x24x64xf32>
    %199 = arith.addf %196, %198 : vector<8x24x64xf32>
    %c23_i32_75 = arith.constant 23 : i32
    %200 = tpu.dynamic_rotate %192 by %c23_i32_75 dim 1 : vector<8x24x64xf32>, i32 -> vector<8x24x64xf32>
    %201 = vector.broadcast %167 : vector<1x1x64xf32> to vector<8x24x64xf32>
    %202 = arith.mulf %200, %201 : vector<8x24x64xf32>
    %203 = arith.addf %199, %202 : vector<8x24x64xf32>
    %c2_76 = arith.constant 2 : index
    %c0_77 = arith.constant 0 : index
    %c0_78 = arith.constant 0 : index
    %204 = vector.load %arg9[%c2_76, %c0_77, %c0_78] : memref<18x24x64xf32, #tpu.memory_space<vmem>>, vector<8x24x64xf32>
    %c1_i32_79 = arith.constant 1 : i32
    %205 = tpu.dynamic_rotate %204 by %c1_i32_79 dim 1 : vector<8x24x64xf32>, i32 -> vector<8x24x64xf32>
    %206 = vector.broadcast %170 : vector<1x1x64xf32> to vector<8x24x64xf32>
    %207 = arith.mulf %205, %206 : vector<8x24x64xf32>
    %208 = arith.addf %203, %207 : vector<8x24x64xf32>
    %209 = vector.broadcast %173 : vector<1x1x64xf32> to vector<8x24x64xf32>
    %210 = arith.mulf %204, %209 : vector<8x24x64xf32>
    %211 = arith.addf %208, %210 : vector<8x24x64xf32>
    %c23_i32_80 = arith.constant 23 : i32
    %212 = tpu.dynamic_rotate %204 by %c23_i32_80 dim 1 : vector<8x24x64xf32>, i32 -> vector<8x24x64xf32>
    %213 = vector.broadcast %176 : vector<1x1x64xf32> to vector<8x24x64xf32>
    %214 = arith.mulf %212, %213 : vector<8x24x64xf32>
    %215 = arith.addf %211, %214 : vector<8x24x64xf32>
    %216 = vector.shape_cast %215 : vector<8x24x64xf32> to vector<192x64xf32>
    %217 = arith.truncf %216 : vector<192x64xf32> to vector<192x64xbf16>
    %cst_81 = arith.constant dense<0.000000e+00> : vector<192x64xf32>
    %218 = tpu.matmul %217, %178, %cst_81 {dimension_numbers = #tpu.dot_dimension_numbers<[1], [0], [0], [1], [0, 0, 1, 1], [], []>} : vector<192x64xbf16>, vector<64x64xbf16>, vector<192x64xf32> -> vector<192x64xf32>
    %219 = vector.broadcast %180 : vector<1x64xf32> to vector<192x64xf32>
    %220 = arith.addf %218, %219 : vector<192x64xf32>
    %221 = arith.negf %220 : vector<192x64xf32>
    %222 = math.exp %221 : vector<192x64xf32>
    %cst_82 = arith.constant 1.000000e+00 : f32
    %223 = vector.broadcast %cst_82 : f32 to vector<192x64xf32>
    %224 = arith.addf %223, %222 : vector<192x64xf32>
    %225 = arith.divf %223, %224 : vector<192x64xf32>
    %226 = arith.mulf %220, %225 : vector<192x64xf32>
    %227 = vector.shape_cast %226 : vector<192x64xf32> to vector<8x24x64xf32>
    %cst_83 = arith.constant 0.000000e+00 : f32
    %228 = vector.shape_cast %10 : vector<1x24x1xi1> to vector<1x24x1xi1>
    %229 = vector.broadcast %228 : vector<1x24x1xi1> to vector<8x24x64xi1>
    %230 = vector.broadcast %cst_83 : f32 to vector<8x24x64xf32>
    %231 = arith.select %229, %227, %230 : vector<8x24x64xi1>, vector<8x24x64xf32>
    %c1_84 = arith.constant 1 : index
    %c0_85 = arith.constant 0 : index
    %c0_86 = arith.constant 0 : index
    %232 = vector.load %arg8[%c1_84, %c0_85, %c0_86] : memref<18x24x64xf32, #tpu.memory_space<vmem>>, vector<8x24x64xf32>
    tpu.vector_store %arg8[%c1_84, %c0_85, %c0_86], %231 {strides = array<i32>} : memref<18x24x64xf32, #tpu.memory_space<vmem>>, vector<8x24x64xf32>,
    %c8_87 = arith.constant 8 : index
    %c0_88 = arith.constant 0 : index
    %c0_89 = arith.constant 0 : index
    %233 = vector.load %arg9[%c8_87, %c0_88, %c0_89] : memref<18x24x64xf32, #tpu.memory_space<vmem>>, vector<8x24x64xf32>
    %c1_i32_90 = arith.constant 1 : i32
    %234 = tpu.dynamic_rotate %233 by %c1_i32_90 dim 1 : vector<8x24x64xf32>, i32 -> vector<8x24x64xf32>
    %235 = vector.broadcast %152 : vector<1x1x64xf32> to vector<8x24x64xf32>
    %236 = arith.mulf %234, %235 : vector<8x24x64xf32>
    %237 = vector.broadcast %155 : vector<1x1x64xf32> to vector<8x24x64xf32>
    %238 = arith.mulf %233, %237 : vector<8x24x64xf32>
    %239 = arith.addf %236, %238 : vector<8x24x64xf32>
    %c23_i32_91 = arith.constant 23 : i32
    %240 = tpu.dynamic_rotate %233 by %c23_i32_91 dim 1 : vector<8x24x64xf32>, i32 -> vector<8x24x64xf32>
    %241 = vector.broadcast %158 : vector<1x1x64xf32> to vector<8x24x64xf32>
    %242 = arith.mulf %240, %241 : vector<8x24x64xf32>
    %243 = arith.addf %239, %242 : vector<8x24x64xf32>
    %c9_92 = arith.constant 9 : index
    %c0_93 = arith.constant 0 : index
    %c0_94 = arith.constant 0 : index
    %244 = vector.load %arg9[%c9_92, %c0_93, %c0_94] : memref<18x24x64xf32, #tpu.memory_space<vmem>>, vector<8x24x64xf32>
    %c1_i32_95 = arith.constant 1 : i32
    %245 = tpu.dynamic_rotate %244 by %c1_i32_95 dim 1 : vector<8x24x64xf32>, i32 -> vector<8x24x64xf32>
    %246 = vector.broadcast %161 : vector<1x1x64xf32> to vector<8x24x64xf32>
    %247 = arith.mulf %245, %246 : vector<8x24x64xf32>
    %248 = arith.addf %243, %247 : vector<8x24x64xf32>
    %249 = vector.broadcast %164 : vector<1x1x64xf32> to vector<8x24x64xf32>
    %250 = arith.mulf %244, %249 : vector<8x24x64xf32>
    %251 = arith.addf %248, %250 : vector<8x24x64xf32>
    %c23_i32_96 = arith.constant 23 : i32
    %252 = tpu.dynamic_rotate %244 by %c23_i32_96 dim 1 : vector<8x24x64xf32>, i32 -> vector<8x24x64xf32>
    %253 = vector.broadcast %167 : vector<1x1x64xf32> to vector<8x24x64xf32>
    %254 = arith.mulf %252, %253 : vector<8x24x64xf32>
    %255 = arith.addf %251, %254 : vector<8x24x64xf32>
    %c10_97 = arith.constant 10 : index
    %c0_98 = arith.constant 0 : index
    %c0_99 = arith.constant 0 : index
    %256 = vector.load %arg9[%c10_97, %c0_98, %c0_99] : memref<18x24x64xf32, #tpu.memory_space<vmem>>, vector<8x24x64xf32>
    %c1_i32_100 = arith.constant 1 : i32
    %257 = tpu.dynamic_rotate %256 by %c1_i32_100 dim 1 : vector<8x24x64xf32>, i32 -> vector<8x24x64xf32>
    %258 = vector.broadcast %170 : vector<1x1x64xf32> to vector<8x24x64xf32>
    %259 = arith.mulf %257, %258 : vector<8x24x64xf32>
    %260 = arith.addf %255, %259 : vector<8x24x64xf32>
    %261 = vector.broadcast %173 : vector<1x1x64xf32> to vector<8x24x64xf32>
    %262 = arith.mulf %256, %261 : vector<8x24x64xf32>
    %263 = arith.addf %260, %262 : vector<8x24x64xf32>
    %c23_i32_101 = arith.constant 23 : i32
    %264 = tpu.dynamic_rotate %256 by %c23_i32_101 dim 1 : vector<8x24x64xf32>, i32 -> vector<8x24x64xf32>
    %265 = vector.broadcast %176 : vector<1x1x64xf32> to vector<8x24x64xf32>
    %266 = arith.mulf %264, %265 : vector<8x24x64xf32>
    %267 = arith.addf %263, %266 : vector<8x24x64xf32>
    %268 = vector.shape_cast %267 : vector<8x24x64xf32> to vector<192x64xf32>
    %269 = arith.truncf %268 : vector<192x64xf32> to vector<192x64xbf16>
    %cst_102 = arith.constant dense<0.000000e+00> : vector<192x64xf32>
    %270 = tpu.matmul %269, %178, %cst_102 {dimension_numbers = #tpu.dot_dimension_numbers<[1], [0], [0], [1], [0, 0, 1, 1], [], []>} : vector<192x64xbf16>, vector<64x64xbf16>, vector<192x64xf32> -> vector<192x64xf32>
    %271 = vector.broadcast %180 : vector<1x64xf32> to vector<192x64xf32>
    %272 = arith.addf %270, %271 : vector<192x64xf32>
    %273 = arith.negf %272 : vector<192x64xf32>
    %274 = math.exp %273 : vector<192x64xf32>
    %cst_103 = arith.constant 1.000000e+00 : f32
    %275 = vector.broadcast %cst_103 : f32 to vector<192x64xf32>
    %276 = arith.addf %275, %274 : vector<192x64xf32>
    %277 = arith.divf %275, %276 : vector<192x64xf32>
    %278 = arith.mulf %272, %277 : vector<192x64xf32>
    %279 = vector.shape_cast %278 : vector<192x64xf32> to vector<8x24x64xf32>
    %cst_104 = arith.constant 0.000000e+00 : f32
    %280 = vector.shape_cast %10 : vector<1x24x1xi1> to vector<1x24x1xi1>
    %281 = vector.broadcast %280 : vector<1x24x1xi1> to vector<8x24x64xi1>
    %282 = vector.broadcast %cst_104 : f32 to vector<8x24x64xf32>
    %283 = arith.select %281, %279, %282 : vector<8x24x64xi1>, vector<8x24x64xf32>
    %c9_105 = arith.constant 9 : index
    %c0_106 = arith.constant 0 : index
    %c0_107 = arith.constant 0 : index
    %284 = vector.load %arg8[%c9_105, %c0_106, %c0_107] : memref<18x24x64xf32, #tpu.memory_space<vmem>>, vector<8x24x64xf32>
    tpu.vector_store %arg8[%c9_105, %c0_106, %c0_107], %283 {strides = array<i32>} : memref<18x24x64xf32, #tpu.memory_space<vmem>>, vector<8x24x64xf32>,
    %c2_108 = arith.constant 2 : index
    %c0_109 = arith.constant 0 : index
    %c0_110 = arith.constant 0 : index
    %285 = vector.load %arg2[%c2_108, %c0_109, %c0_110] : memref<3x9x64xf32, #tpu.memory_space<vmem>>, vector<1x9x64xf32>
    %286 = vector.shape_cast %285 : vector<1x9x64xf32> to vector<9x64xf32>
    %287 = vector.extract_strided_slice %286 {offsets = [0, 0], sizes = [1, 64], strides = [1, 1]} : vector<9x64xf32> to vector<1x64xf32>
    %288 = vector.shape_cast %287 : vector<1x64xf32> to vector<64xf32>
    %289 = vector.shape_cast %288 : vector<64xf32> to vector<1x1x64xf32>
    %290 = vector.extract_strided_slice %286 {offsets = [1, 0], sizes = [1, 64], strides = [1, 1]} : vector<9x64xf32> to vector<1x64xf32>
    %291 = vector.shape_cast %290 : vector<1x64xf32> to vector<64xf32>
    %292 = vector.shape_cast %291 : vector<64xf32> to vector<1x1x64xf32>
    %293 = vector.extract_strided_slice %286 {offsets = [2, 0], sizes = [1, 64], strides = [1, 1]} : vector<9x64xf32> to vector<1x64xf32>
    %294 = vector.shape_cast %293 : vector<1x64xf32> to vector<64xf32>
    %295 = vector.shape_cast %294 : vector<64xf32> to vector<1x1x64xf32>
    %296 = vector.extract_strided_slice %286 {offsets = [3, 0], sizes = [1, 64], strides = [1, 1]} : vector<9x64xf32> to vector<1x64xf32>
    %297 = vector.shape_cast %296 : vector<1x64xf32> to vector<64xf32>
    %298 = vector.shape_cast %297 : vector<64xf32> to vector<1x1x64xf32>
    %299 = vector.extract_strided_slice %286 {offsets = [4, 0], sizes = [1, 64], strides = [1, 1]} : vector<9x64xf32> to vector<1x64xf32>
    %300 = vector.shape_cast %299 : vector<1x64xf32> to vector<64xf32>
    %301 = vector.shape_cast %300 : vector<64xf32> to vector<1x1x64xf32>
    %302 = vector.extract_strided_slice %286 {offsets = [5, 0], sizes = [1, 64], strides = [1, 1]} : vector<9x64xf32> to vector<1x64xf32>
    %303 = vector.shape_cast %302 : vector<1x64xf32> to vector<64xf32>
    %304 = vector.shape_cast %303 : vector<64xf32> to vector<1x1x64xf32>
    %305 = vector.extract_strided_slice %286 {offsets = [6, 0], sizes = [1, 64], strides = [1, 1]} : vector<9x64xf32> to vector<1x64xf32>
    %306 = vector.shape_cast %305 : vector<1x64xf32> to vector<64xf32>
    %307 = vector.shape_cast %306 : vector<64xf32> to vector<1x1x64xf32>
    %308 = vector.extract_strided_slice %286 {offsets = [7, 0], sizes = [1, 64], strides = [1, 1]} : vector<9x64xf32> to vector<1x64xf32>
    %309 = vector.shape_cast %308 : vector<1x64xf32> to vector<64xf32>
    %310 = vector.shape_cast %309 : vector<64xf32> to vector<1x1x64xf32>
    %311 = vector.extract_strided_slice %286 {offsets = [8, 0], sizes = [1, 64], strides = [1, 1]} : vector<9x64xf32> to vector<1x64xf32>
    %312 = vector.shape_cast %311 : vector<1x64xf32> to vector<64xf32>
    %313 = vector.shape_cast %312 : vector<64xf32> to vector<1x1x64xf32>
    %c0_111 = arith.constant 0 : index
    %c0_112 = arith.constant 0 : index
    %314 = vector.load %arg5[%c0_111, %c0_112] : memref<64x128xbf16, #tpu.memory_space<vmem>>, vector<64x128xbf16>
    %c0_113 = arith.constant 0 : index
    %c0_114 = arith.constant 0 : index
    %315 = vector.load %arg6[%c0_113, %c0_114] : memref<1x128xf32, #tpu.memory_space<vmem>>, vector<1x128xf32>
    %c0_115 = arith.constant 0 : index
    %c0_116 = arith.constant 0 : index
    %c0_117 = arith.constant 0 : index
    %316 = vector.load %arg8[%c0_115, %c0_116, %c0_117] : memref<18x24x64xf32, #tpu.memory_space<vmem>>, vector<8x24x64xf32>
    %c1_i32_118 = arith.constant 1 : i32
    %317 = tpu.dynamic_rotate %316 by %c1_i32_118 dim 1 : vector<8x24x64xf32>, i32 -> vector<8x24x64xf32>
    %318 = vector.broadcast %289 : vector<1x1x64xf32> to vector<8x24x64xf32>
    %319 = arith.mulf %317, %318 : vector<8x24x64xf32>
    %320 = vector.broadcast %292 : vector<1x1x64xf32> to vector<8x24x64xf32>
    %321 = arith.mulf %316, %320 : vector<8x24x64xf32>
    %322 = arith.addf %319, %321 : vector<8x24x64xf32>
    %c23_i32_119 = arith.constant 23 : i32
    %323 = tpu.dynamic_rotate %316 by %c23_i32_119 dim 1 : vector<8x24x64xf32>, i32 -> vector<8x24x64xf32>
    %324 = vector.broadcast %295 : vector<1x1x64xf32> to vector<8x24x64xf32>
    %325 = arith.mulf %323, %324 : vector<8x24x64xf32>
    %326 = arith.addf %322, %325 : vector<8x24x64xf32>
    %c1_120 = arith.constant 1 : index
    %c0_121 = arith.constant 0 : index
    %c0_122 = arith.constant 0 : index
    %327 = vector.load %arg8[%c1_120, %c0_121, %c0_122] : memref<18x24x64xf32, #tpu.memory_space<vmem>>, vector<8x24x64xf32>
    %c1_i32_123 = arith.constant 1 : i32
    %328 = tpu.dynamic_rotate %327 by %c1_i32_123 dim 1 : vector<8x24x64xf32>, i32 -> vector<8x24x64xf32>
    %329 = vector.broadcast %298 : vector<1x1x64xf32> to vector<8x24x64xf32>
    %330 = arith.mulf %328, %329 : vector<8x24x64xf32>
    %331 = arith.addf %326, %330 : vector<8x24x64xf32>
    %332 = vector.broadcast %301 : vector<1x1x64xf32> to vector<8x24x64xf32>
    %333 = arith.mulf %327, %332 : vector<8x24x64xf32>
    %334 = arith.addf %331, %333 : vector<8x24x64xf32>
    %c23_i32_124 = arith.constant 23 : i32
    %335 = tpu.dynamic_rotate %327 by %c23_i32_124 dim 1 : vector<8x24x64xf32>, i32 -> vector<8x24x64xf32>
    %336 = vector.broadcast %304 : vector<1x1x64xf32> to vector<8x24x64xf32>
    %337 = arith.mulf %335, %336 : vector<8x24x64xf32>
    %338 = arith.addf %334, %337 : vector<8x24x64xf32>
    %c2_125 = arith.constant 2 : index
    %c0_126 = arith.constant 0 : index
    %c0_127 = arith.constant 0 : index
    %339 = vector.load %arg8[%c2_125, %c0_126, %c0_127] : memref<18x24x64xf32, #tpu.memory_space<vmem>>, vector<8x24x64xf32>
    %c1_i32_128 = arith.constant 1 : i32
    %340 = tpu.dynamic_rotate %339 by %c1_i32_128 dim 1 : vector<8x24x64xf32>, i32 -> vector<8x24x64xf32>
    %341 = vector.broadcast %307 : vector<1x1x64xf32> to vector<8x24x64xf32>
    %342 = arith.mulf %340, %341 : vector<8x24x64xf32>
    %343 = arith.addf %338, %342 : vector<8x24x64xf32>
    %344 = vector.broadcast %310 : vector<1x1x64xf32> to vector<8x24x64xf32>
    %345 = arith.mulf %339, %344 : vector<8x24x64xf32>
    %346 = arith.addf %343, %345 : vector<8x24x64xf32>
    %c23_i32_129 = arith.constant 23 : i32
    %347 = tpu.dynamic_rotate %339 by %c23_i32_129 dim 1 : vector<8x24x64xf32>, i32 -> vector<8x24x64xf32>
    %348 = vector.broadcast %313 : vector<1x1x64xf32> to vector<8x24x64xf32>
    %349 = arith.mulf %347, %348 : vector<8x24x64xf32>
    %350 = arith.addf %346, %349 : vector<8x24x64xf32>
    %351 = vector.shape_cast %350 : vector<8x24x64xf32> to vector<192x64xf32>
    %352 = arith.truncf %351 : vector<192x64xf32> to vector<192x64xbf16>
    %cst_130 = arith.constant dense<0.000000e+00> : vector<192x128xf32>
    %353 = tpu.matmul %352, %314, %cst_130 {dimension_numbers = #tpu.dot_dimension_numbers<[1], [0], [0], [1], [0, 0, 1, 1], [], []>} : vector<192x64xbf16>, vector<64x128xbf16>, vector<192x128xf32> -> vector<192x128xf32>
    %354 = vector.broadcast %315 : vector<1x128xf32> to vector<192x128xf32>
    %355 = arith.addf %353, %354 : vector<192x128xf32>
    %356 = vector.shape_cast %355 : vector<192x128xf32> to vector<8x24x128xf32>
    %357 = vector.extract_strided_slice %356 {offsets = [0, 0, 0], sizes = [8, 16, 128], strides = [1, 1, 1]} : vector<8x24x128xf32> to vector<8x16x128xf32>
    %c0_131 = arith.constant 0 : index
    %c0_132 = arith.constant 0 : index
    %c0_133 = arith.constant 0 : index
    %c0_134 = arith.constant 0 : index
    %358 = vector.load %arg7[%c0_131, %c0_132, %c0_133, %c0_134] : memref<1x16x16x128xf32, #tpu.memory_space<vmem>>, vector<1x8x16x128xf32>
    %359 = vector.shape_cast %358 : vector<1x8x16x128xf32> to vector<8x16x128xf32>
    %360 = vector.shape_cast %357 : vector<8x16x128xf32> to vector<1x8x16x128xf32>
    tpu.vector_store %arg7[%c0_131, %c0_132, %c0_133, %c0_134], %360 {strides = array<i32>} : memref<1x16x16x128xf32, #tpu.memory_space<vmem>>, vector<1x8x16x128xf32>,
    %c8_135 = arith.constant 8 : index
    %c0_136 = arith.constant 0 : index
    %c0_137 = arith.constant 0 : index
    %361 = vector.load %arg8[%c8_135, %c0_136, %c0_137] : memref<18x24x64xf32, #tpu.memory_space<vmem>>, vector<8x24x64xf32>
    %c1_i32_138 = arith.constant 1 : i32
    %362 = tpu.dynamic_rotate %361 by %c1_i32_138 dim 1 : vector<8x24x64xf32>, i32 -> vector<8x24x64xf32>
    %363 = vector.broadcast %289 : vector<1x1x64xf32> to vector<8x24x64xf32>
    %364 = arith.mulf %362, %363 : vector<8x24x64xf32>
    %365 = vector.broadcast %292 : vector<1x1x64xf32> to vector<8x24x64xf32>
    %366 = arith.mulf %361, %365 : vector<8x24x64xf32>
    %367 = arith.addf %364, %366 : vector<8x24x64xf32>
    %c23_i32_139 = arith.constant 23 : i32
    %368 = tpu.dynamic_rotate %361 by %c23_i32_139 dim 1 : vector<8x24x64xf32>, i32 -> vector<8x24x64xf32>
    %369 = vector.broadcast %295 : vector<1x1x64xf32> to vector<8x24x64xf32>
    %370 = arith.mulf %368, %369 : vector<8x24x64xf32>
    %371 = arith.addf %367, %370 : vector<8x24x64xf32>
    %c9_140 = arith.constant 9 : index
    %c0_141 = arith.constant 0 : index
    %c0_142 = arith.constant 0 : index
    %372 = vector.load %arg8[%c9_140, %c0_141, %c0_142] : memref<18x24x64xf32, #tpu.memory_space<vmem>>, vector<8x24x64xf32>
    %c1_i32_143 = arith.constant 1 : i32
    %373 = tpu.dynamic_rotate %372 by %c1_i32_143 dim 1 : vector<8x24x64xf32>, i32 -> vector<8x24x64xf32>
    %374 = vector.broadcast %298 : vector<1x1x64xf32> to vector<8x24x64xf32>
    %375 = arith.mulf %373, %374 : vector<8x24x64xf32>
    %376 = arith.addf %371, %375 : vector<8x24x64xf32>
    %377 = vector.broadcast %301 : vector<1x1x64xf32> to vector<8x24x64xf32>
    %378 = arith.mulf %372, %377 : vector<8x24x64xf32>
    %379 = arith.addf %376, %378 : vector<8x24x64xf32>
    %c23_i32_144 = arith.constant 23 : i32
    %380 = tpu.dynamic_rotate %372 by %c23_i32_144 dim 1 : vector<8x24x64xf32>, i32 -> vector<8x24x64xf32>
    %381 = vector.broadcast %304 : vector<1x1x64xf32> to vector<8x24x64xf32>
    %382 = arith.mulf %380, %381 : vector<8x24x64xf32>
    %383 = arith.addf %379, %382 : vector<8x24x64xf32>
    %c10_145 = arith.constant 10 : index
    %c0_146 = arith.constant 0 : index
    %c0_147 = arith.constant 0 : index
    %384 = vector.load %arg8[%c10_145, %c0_146, %c0_147] : memref<18x24x64xf32, #tpu.memory_space<vmem>>, vector<8x24x64xf32>
    %c1_i32_148 = arith.constant 1 : i32
    %385 = tpu.dynamic_rotate %384 by %c1_i32_148 dim 1 : vector<8x24x64xf32>, i32 -> vector<8x24x64xf32>
    %386 = vector.broadcast %307 : vector<1x1x64xf32> to vector<8x24x64xf32>
    %387 = arith.mulf %385, %386 : vector<8x24x64xf32>
    %388 = arith.addf %383, %387 : vector<8x24x64xf32>
    %389 = vector.broadcast %310 : vector<1x1x64xf32> to vector<8x24x64xf32>
    %390 = arith.mulf %384, %389 : vector<8x24x64xf32>
    %391 = arith.addf %388, %390 : vector<8x24x64xf32>
    %c23_i32_149 = arith.constant 23 : i32
    %392 = tpu.dynamic_rotate %384 by %c23_i32_149 dim 1 : vector<8x24x64xf32>, i32 -> vector<8x24x64xf32>
    %393 = vector.broadcast %313 : vector<1x1x64xf32> to vector<8x24x64xf32>
    %394 = arith.mulf %392, %393 : vector<8x24x64xf32>
    %395 = arith.addf %391, %394 : vector<8x24x64xf32>
    %396 = vector.shape_cast %395 : vector<8x24x64xf32> to vector<192x64xf32>
    %397 = arith.truncf %396 : vector<192x64xf32> to vector<192x64xbf16>
    %cst_150 = arith.constant dense<0.000000e+00> : vector<192x128xf32>
    %398 = tpu.matmul %397, %314, %cst_150 {dimension_numbers = #tpu.dot_dimension_numbers<[1], [0], [0], [1], [0, 0, 1, 1], [], []>} : vector<192x64xbf16>, vector<64x128xbf16>, vector<192x128xf32> -> vector<192x128xf32>
    %399 = vector.broadcast %315 : vector<1x128xf32> to vector<192x128xf32>
    %400 = arith.addf %398, %399 : vector<192x128xf32>
    %401 = vector.shape_cast %400 : vector<192x128xf32> to vector<8x24x128xf32>
    %402 = vector.extract_strided_slice %401 {offsets = [0, 0, 0], sizes = [8, 16, 128], strides = [1, 1, 1]} : vector<8x24x128xf32> to vector<8x16x128xf32>
    %c0_151 = arith.constant 0 : index
    %c8_152 = arith.constant 8 : index
    %c0_153 = arith.constant 0 : index
    %c0_154 = arith.constant 0 : index
    %403 = vector.load %arg7[%c0_151, %c8_152, %c0_153, %c0_154] : memref<1x16x16x128xf32, #tpu.memory_space<vmem>>, vector<1x8x16x128xf32>
    %404 = vector.shape_cast %403 : vector<1x8x16x128xf32> to vector<8x16x128xf32>
    %405 = vector.shape_cast %402 : vector<8x16x128xf32> to vector<1x8x16x128xf32>
    tpu.vector_store %arg7[%c0_151, %c8_152, %c0_153, %c0_154], %405 {strides = array<i32>} : memref<1x16x16x128xf32, #tpu.memory_space<vmem>>, vector<1x8x16x128xf32>,
    return
  }
  func.func @transform_0(%arg0: i32) -> (i32, i32, i32, i32) {
    %c0_i32 = arith.constant 0 : i32
    %c0_i32_0 = arith.constant 0 : i32
    %c0_i32_1 = arith.constant 0 : i32
    %c0_i32_2 = arith.constant 0 : i32
    return %arg0, %c0_i32, %c0_i32_0, %c0_i32_1 : i32, i32, i32, i32
  }
  func.func @transform_1(%arg0: i32) -> (i32, i32, i32) {
    %c0_i32 = arith.constant 0 : i32
    %c0_i32_0 = arith.constant 0 : i32
    %c0_i32_1 = arith.constant 0 : i32
    %c0_i32_2 = arith.constant 0 : i32
    return %c0_i32, %c0_i32_0, %c0_i32_1 : i32, i32, i32
  }
  func.func @transform_2(%arg0: i32) -> (i32, i32, i32) {
    %c0_i32 = arith.constant 0 : i32
    %c0_i32_0 = arith.constant 0 : i32
    %c0_i32_1 = arith.constant 0 : i32
    %c0_i32_2 = arith.constant 0 : i32
    return %c0_i32, %c0_i32_0, %c0_i32_1 : i32, i32, i32
  }
  func.func @transform_3(%arg0: i32) -> (i32, i32, i32) {
    %c0_i32 = arith.constant 0 : i32
    %c0_i32_0 = arith.constant 0 : i32
    %c0_i32_1 = arith.constant 0 : i32
    %c0_i32_2 = arith.constant 0 : i32
    return %c0_i32, %c0_i32_0, %c0_i32_1 : i32, i32, i32
  }
  func.func @transform_4(%arg0: i32) -> (i32, i32) {
    %c0_i32 = arith.constant 0 : i32
    %c0_i32_0 = arith.constant 0 : i32
    %c0_i32_1 = arith.constant 0 : i32
    return %c0_i32, %c0_i32_0 : i32, i32
  }
  func.func @transform_5(%arg0: i32) -> (i32, i32) {
    %c0_i32 = arith.constant 0 : i32
    %c0_i32_0 = arith.constant 0 : i32
    %c0_i32_1 = arith.constant 0 : i32
    return %c0_i32, %c0_i32_0 : i32, i32
  }
  func.func @transform_6(%arg0: i32) -> (i32, i32, i32, i32) {
    %c0_i32 = arith.constant 0 : i32
    %c0_i32_0 = arith.constant 0 : i32
    %c0_i32_1 = arith.constant 0 : i32
    %c0_i32_2 = arith.constant 0 : i32
    return %arg0, %c0_i32, %c0_i32_0, %c0_i32_1 : i32, i32, i32, i32
  }
}

</mosaic_0001>

<bundles_post_ra>
// kernel: tpu_custom_call.1
= control target key start
LH: loop header
LB: loop body
LE: loop exit
PB: predicated region body
PF: predicated region fallthrough
CT: control target
= control target key end

     0   :  { %11 = vsyncpa [#allocation5], 0  ;;  %s17021_s0 = inlined_call_operand.hbm [shape: bf16[2,16,16,64], index: 0, kind: input, shape index: {}]   ;;  %s17022_s1 = inlined_call_operand.vmem [shape: f32[3,9,64], index: 1, kind: input, shape index: {}]   ;;  %s17023_s2 = inlined_call_operand.vmem [shape: bf16[2,64,64], index: 2, kind: input, shape index: {}]   ;;  %s17024_s3 = inlined_call_operand.vmem [shape: f32[2,1,64], index: 3, kind: input, shape index: {}]   ;;  %s17025_s4 = inlined_call_operand.hbm [shape: bf16[64,128], index: 4, kind: input, shape index: {}]   ;;  %s17026_s5 = inlined_call_operand.vmem [shape: f32[1,128], index: 5, kind: input, shape index: {}]   ;;  %s17027_s6 = inlined_call_operand.hbm [shape: f32[2,16,16,128], index: 6, kind: output, shape index: {}]  }
   0x1   :  { %13 = vsyncpa [#allocation5 + $0x1], 0 }
   0x2   :  { %14 = vsyncpa [#allocation8], 0 }
   0x3   :  { %15 = vsyncpa [#allocation6], 0 }
   0x4   :  { %17 = vsyncpa [#allocation6 + $0x1], 0  ;;  %s9083_s21 = smov 0   ;;  %s9085_s22 = smov 0  }
   0x5   :  { %s9087_s23 = smov 0   ;;  %s9089_s24 = smov 0  }
   0x6 LB: > { %s9104_s25 = sadd.s32 4294967295, %s9040_s24   ;;  %s8203_s26 = sadd.s32 4294967294, %s9040_s24   ;;  %s9040_s24 = sphi %s9089_s24, %s18216_s24   ;;  %s9036_s23 = sphi %s9087_s23, %s18215_s23   ;;  %s9032_s22 = sphi %s9085_s22, %s18214_s22   ;;  %s9028_s21 = sphi %s9083_s21, %s18213_s21  }
   0x7   : > { %p43_p0 = scmp.ne.s32.totalorder %s9032_s22, %s9028_s21  ;;  %p44_p1 = scmp.eq.s32.totalorder %s9104_s25, 0 }
   0x8   : > { %p172_p2 = scmp.eq.s32.totalorder %s9104_s25, 1  ;;  %p178_p3 = scmp.eq.s32.totalorder %s8203_s26, 1 }
   0x9   : > { %p9113_p4 = por %p44_p1, %p43_p0  ;;  %p8204_p5 = scmp.ge.s32.totalorder %s9040_s24, 1 }
   0xa   : > { %p9118_p6 = por %p178_p3, %p43_p0  ;;  %p185_p7 = scmp.lt.s32.totalorder %s9040_s24, 3 }
   0xb   : > { %s205_s7 = sshll.u32 %s17025_s4, 4  ;;  %s9042_s9 = smov [#allocation7]   ;;  %s206_s7 = int_to_ptr.hbm [resolvable:$true] %s205_s7 }
   0xc   : > { %p9126_p8 = pnand %p8204_p5, %p185_p7  ;;  %s207_s10 = sshll.u32 %s9042_s9, 4  ;;  %s208_s10 = int_to_ptr.vmem [resolvable:$true] %s207_s10 }
   0xd   : > { %s9136_s11 = sadd.s32 1, %s9040_s24   ;;  %s17028_s12 = smov 64  }
   0xe   : > { %p8573_p9 = pneg %p9126_p8  ;;  %s17029_s13 = smov 4  }
   0xf   : > { %s27_s14 = ssub.s32 %s9040_s24, %s9136_s11  ;;  %s30_s15 = sadd.s32 1, %s9036_s23 }
  0x10   : > { %p8574_p10 = pnand %p8573_p9, %p44_p1  ;;  %p28_p12 = scmp.eq.s32.totalorder %s27_s14, 0 }
  0x11   : > { %p37_p13 = scmp.ne.s32.totalorder %s9036_s23, %s9032_s22  ;;  %p38_p0 = scmp.eq.s32.totalorder %s9040_s24, 0 }
  0x12   : > { %8576 = dma.hbm_to_vmem [thread:$0]  (!%p8574_p10), %s206_s7, 512, %s208_s10, [#allocation8], %s17028_s12, %s17028_s12, %s17029_s13  }
  0x13   : > { %s9148_s16 = scalar_select %p28_p12, %s9036_s23, %s30_s15  }
  0x14   : > { %p9152_p3 = por %p172_p2, %p37_p13  ;;  %p8586_p5 = scmp.lt.s32.totalorder %s9040_s24, 2 }
  0x15   : > { %s224_s18 = sand.u32 1, %s9036_s23   ;;  %s8464_s19 = sshll.u32 %s9040_s24, 7 }
  0x16   : > { %p39_p7 = por %p38_p0, %p37_p13  ;;  %s8207_s20 = sshll.u32 %s224_s18, 7 }
  0x17   : > { %s233_s30 = scalar_lea.hbm %s17021_s0, %s8464_s19  ;;  %s228_s9 = scalar_lea.vmem [#allocation4], %s8207_s20 }
  0x18   : > { %s234_s7 = sshll.u32 %s233_s30, 4  ;;  %s236_s10 = sshll.u32 %s228_s9, 4  ;;  %s235_s7 = int_to_ptr.hbm [resolvable:$true] %s234_s7  ;;  %s237_s10 = int_to_ptr.vmem [resolvable:$true] %s236_s10 }
  0x19   : > { %p9162_p9 = pnand %p8586_p5, %p39_p7  ;;  %s225_s15 = scalar_lea.sflag [#allocation5], %s224_s18 }
  0x1a   : > { %s8940_s12 = sshra.s32 %s235_s7, 4  ;;  %s8947_s20 = scalar_lea.hbm %s17021_s0, 256  ;;  %s8941_s12 = int_to_ptr.hbm [resolvable:$true] %s8940_s12 }
  0x1b   : > { %s8942_s13 = scalar_lea.hbm %s8941_s12, 128  ;;  %p8944_p10 = pneg %p9162_p9 }
  0x1c   : > { %p8943_p2 = scmp.ne.s32.totalorder %s8941_s12, %s8942_s13  ;;  %p8948_p0 = scmp.lt.s32.totalorder %s8941_s12, %s17021_s0 }
  0x1d   : > { %p8949_p5 = scmp.lt.s32.totalorder %s8947_s20, %s8942_s13 }
  0x1e   : > { %p8945_p12 = pnand %p8944_p10, %p8943_p2 }
  0x1f   : > { %p8950_p7 = por %p8949_p5, %p8948_p0 }
  0x20   : > { %p8946_p13 = pneg %p8945_p12 }
  0x22   : > { %p8951_p11 = pnand %p8950_p7, %p8946_p13 }
  0x24   : > { %8954 = shalt.err (!%p8951_p11)
}
  0x25   : > { %s17373_s18 = smov 4   ;;  %s17374_s9 = smov 64  }
  0x26   : > { %8580 = dma.hbm_to_vmem [thread:$0]  (!%p9162_p9), %s235_s7, 2048, %s237_s10, %s225_s15, %s17374_s9, %s17374_s9, %s17373_s18  }
  0x27   : > { %248 = sbr.rel (%p9126_p8) target bundleno = 1507 (0x5e3), region = 44 }
  0x2c   : > { %s9182_s19 = sand.u32 1, %s9032_s22  }
  0x2d   : > { %s8211_s12 = sshll.u32 %s9182_s19, 7  ;;  %s251_s13 = scalar_lea.sflag [#allocation5], %s9182_s19 }
  0x2e   : > { %s9186_s26 = scalar_lea.vmem [#allocation4], %s8211_s12 }
  0x2f   : > { %9015 = dma.done.wait (%p9113_p4), %s251_s13, 2048  }
  0x30   : > { %9017 = vsyncadd (%p9113_p4), %s251_s13, 4294965248 }
  0x31   : > { %9019 = dma.done.wait (%p44_p1), [#allocation8], 512  }
  0x32   : > { %9021 = vsyncadd (%p44_p1), [#allocation8], 4294966784  ;;  %vm290_vm0 = vcmask 523264   ;;  %v496_v0 = vlaneseq  ;;  %v17037_v1 = vmov 0.0   ;;  %v8468_v3 = vld [vmem:[%s17023_s2 + $0x18] sm:$0xff]  ;;  %v8467_v4 = vld [vmem:[%s17023_s2 + $0x10] sm:$0xff] }
  0x33   : > { %291 = vst.msk [vmem:[#allocation2] sm:$0xff] %vm290_vm0, %v17037_v1  ;;  %v8479_v5 = vld [vmem:[%s9186_s26] sm:$0xff]   ;;  %v8542_v6 = vld [vmem:[%s9186_s26 + $0x8] sm:$0xff]   ;;  %1373 = vmatpush.bf16.msra.mxu0 %v8468_v3  ;;  %8557 = vmatpush.bf16.msra.mxu2 %v8468_v3  ;;  %s8213_s10 = sshll.u32 %s9182_s19, 8  ;;  %s8477_s13 = sshll.u32 %s9104_s25, 8 }
  0x34   : > { %292 = vst.msk [vmem:[#allocation2 + $0x8] sm:$0xff] %vm290_vm0, %v17037_v1  ;;  %v9204_v2 = vshrl.u32 %v496_v0, 7  ;;  %v8480_v7 = vunpack.c.l.bf16 %v8479_v5  ;;  %v8481_v8 = vunpack.c.h.bf16 %v8479_v5  ;;  %v8484_v9 = vunpack.c.l.bf16 %v8542_v6  ;;  %v503_v11 = vld [vmem:[%s17022_s1] sm:$0xff]  ;;  %2796 = vmatpush.bf16.msra.mxu1 %v8468_v3  ;;  %8561 = vmatpush.bf16.msra.mxu3 %v8468_v3  ;;  %v8466_v26 = vld [vmem:[%s17023_s2 + $0x8] sm:$0xff]  ;;  %s15750_s20 = scalar_lea.vmem [#allocation9], %s8213_s10  ;;  %s8116_s7 = scalar_lea.hbm %s17027_s6, %s8477_s13 }
  0x35   : > { %293 = vst.msk [vmem:[#allocation2 + $0x10] sm:$0xff] %vm290_vm0, %v17037_v1  ;;  %v8485_v10 = vunpack.c.h.bf16 %v8542_v6  ;;  %v9236_v16 = vperm.slane %v503_v11, 0  ;;  %v9238_v17 = vperm.slane %v503_v11, 1  ;;  %v9251_v25 = vperm.slane %v503_v11, 2  ;;  %v8465_v39 = vld [vmem:[%s17023_s2] sm:$0xff]  ;;  %s8117_s10 = sshll.u32 %s15750_s20, 4  ;;  %s8118_s10 = int_to_ptr.vmem [resolvable:$true] %s8117_s10 }
  0x36   : > { %294 = vst.msk [vmem:[#allocation2 + $0x18] sm:$0xff] %vm290_vm0, %v17037_v1  ;;  %vm17130_vm1 = vcmp.lt.s32.totalorder %v9204_v2, 1  ;;  %vm17137_vm2 = vcmp.lt.s32.totalorder %v9204_v2, 7  ;;  %v9290_v41 = vperm.slane %v503_v11, 4  ;;  %v9296_v43 = vperm.slane %v503_v11, 3  ;;  %s8119_s14 = sshll.u32 %s8116_s7, 4  ;;  %s8120_s14 = int_to_ptr.hbm [resolvable:$true] %s8119_s14 }
  0x37   : > { %295 = vst.msk [vmem:[#allocation2 + $0x20] sm:$0xff] %vm290_vm0, %v17037_v1  ;;  %1374 = vmatpush.bf16.msra.mxu0 %v8467_v4  ;;  %8558 = vmatpush.bf16.msra.mxu2 %v8467_v4  ;;  %v9299_v45 = vperm.slane %v503_v11, 5  ;;  %v9301_v46 = vperm.slane %v503_v11, 6  ;;  %v9310_v51 = vperm.slane %v503_v11, 7  ;;  %s8105_s15 = scalar_lea.sflag [#allocation6], %s9182_s19  ;;  %s8984_s29 = sshra.s32 %s8120_s14, 4  ;;  %s8985_s29 = int_to_ptr.hbm [resolvable:$true] %s8984_s29 }
  0x38   : > { %296 = vst.msk [vmem:[#allocation2 + $0x28] sm:$0xff] %vm290_vm0, %v17037_v1  ;;  %2797 = vmatpush.bf16.msra.mxu1 %v8467_v4  ;;  %8562 = vmatpush.bf16.msra.mxu3 %v8467_v4  ;;  %s8986_s25 = scalar_lea.hbm %s8985_s29, 256  ;;  %s8990_s9 = scalar_lea.hbm %s17027_s6, 512 }
  0x39   : > { %297 = vst.msk [vmem:[#allocation2 + $0x30] sm:$0xff] %vm290_vm0, %v17037_v1  ;;  %p8987_p1 = scmp.ne.s32.totalorder %s8985_s29, %s8986_s25  ;;  %p8991_p11 = scmp.lt.s32.totalorder %s8985_s29, %s17027_s6 }
  0x3a   : > { %298 = vst.msk [vmem:[#allocation2 + $0x38] sm:$0xff] %vm290_vm0, %v17037_v1  ;;  %v9229_v12 = vld [vmem:[#allocation2] sm:$0xff]  ;;  %p8992_p9 = scmp.lt.s32.totalorder %s8990_s9, %s8986_s25 }
  0x3b   : > { %299 = vst.msk [vmem:[#allocation2 + $0x40] sm:$0xff] %vm290_vm0, %v17037_v1  ;;  %v9231_v13 = vld [vmem:[#allocation2 + $0x8] sm:$0xff]  ;;  %v538_v15 = vrot.slane %v9229_v12, 7  ;;  %v661_v18 = vrot.slane %v9229_v12, 1  ;;  %v613_v23 = vmul.f32 %v9238_v17, %v9229_v12  ;;  %1375 = vmatpush.bf16.msra.mxu0 %v8466_v26  ;;  %8559 = vmatpush.bf16.msra.mxu2 %v8466_v26  ;;  %p8988_p4 = pnand %p8987_p1, %p9152_p3 }
  0x3c   : > { %v9233_v14 = vld [vmem:[#allocation2 + $0x10] sm:$0xff]  ;;  %464 = vst.msk [vmem:[#allocation2 + $0x18] sm:$0xff] %vm290_vm0, %v8480_v7  ;;  %v546_v19 = vrot.slane %v9231_v13, 7  ;;  %v669_v21 = vrot.slane %v9231_v13, 1  ;;  %v614_v24 = vmul.f32 %v9238_v17, %v9231_v13  ;;  %2798 = vmatpush.bf16.msra.mxu1 %v8466_v26  ;;  %8563 = vmatpush.bf16.msra.mxu3 %v8466_v26  ;;  %p8993_p2 = por %p8992_p9, %p8991_p11 }
  0x3d   : > { %v554_v20 = vrot.slane %v9233_v14, 7  ;;  %v677_v22 = vrot.slane %v9233_v14, 1  ;;  %465 = vst.msk [vmem:[#allocation2 + $0x20] sm:$0xff] %vm290_vm0, %v8481_v8  ;;  %p8989_p8 = pneg %p8988_p4 }
  0x3e   : > { %466 = vst.msk [vmem:[#allocation2 + $0x30] sm:$0xff] %vm290_vm0, %v8484_v9  ;;  %v571_v27 = vsel %vm17130_vm1, %v538_v15, %v546_v19  ;;  %v694_v32 = vsel %vm17137_vm2, %v661_v18, %v669_v21 }
  0x3f   : > { %v579_v28 = vsel %vm17130_vm1, %v554_v20, %v538_v15  ;;  %v686_v29 = vsel %vm17137_vm2, %v669_v21, %v677_v22  ;;  %467 = vst.msk [vmem:[#allocation2 + $0x38] sm:$0xff] %vm290_vm0, %v8485_v10  ;;  %v589_v31 = vmul.f32 %v9236_v16, %v571_v27  ;;  %v9276_v33 = vld [vmem:[#allocation2 + $0x28] sm:$0xff]  ;;  %v711_v36 = vmul.f32 %v9251_v25, %v694_v32  ;;  %p8994_p10 = pnand %p8993_p2, %p8989_p8 }
  0x40   : > { %v588_v30 = vmul.f32 %v9236_v16, %v579_v28  ;;  %300 = vst.msk [vmem:[#allocation2 + $0x48] sm:$0xff] %vm290_vm0, %v17037_v1  ;;  %v712_v37 = vmul.f32 %v9251_v25, %v686_v29  ;;  %v799_v40 = vrot.slane %v9276_v33, 7  ;;  %v945_v44 = vrot.slane %v9276_v33, 1  ;;  %1376 = vmatpush.bf16.msra.mxu0 %v8465_v39  ;;  %8560 = vmatpush.bf16.msra.mxu2 %v8465_v39  ;;  %v9390_v27 = vld [vmem:[%s17022_s1 + $0x8] ss:$0 sm:$0xff] }
  0x41   : > { %v638_v35 = vadd.f32 %v614_v24, %v589_v31  ;;  %301 = vst.msk [vmem:[#allocation2 + $0x50] sm:$0xff] %vm290_vm0, %v17037_v1  ;;  %2799 = vmatpush.bf16.msra.mxu1 %v8465_v39  ;;  %8564 = vmatpush.bf16.msra.mxu3 %v8465_v39  ;;  %v702_v13 = vsel %vm17137_vm2, %v677_v22, %v661_v18 }
  0x42   : > { %v637_v34 = vadd.f32 %v613_v23, %v588_v30  ;;  %v9282_v38 = vld [vmem:[#allocation2 + $0x40] sm:$0xff]  ;;  %17375 = vst [vmem:[#allocation13_spill] sm:$0xff] %v9290_v41 }
  0x43   : > { %302 = vst.msk [vmem:[#allocation2 + $0x58] sm:$0xff] %vm290_vm0, %v17037_v1  ;;  %v9294_v42 = vld [vmem:[#allocation2 + $0x18] sm:$0xff]  ;;  %v1067_v50 = vrot.slane %v9282_v38, 7  ;;  %v736_v53 = vadd.f32 %v712_v37, %v638_v35  ;;  %v1213_v61 = vrot.slane %v9282_v38, 1 }
  0x44   : > { %17376 = vst [vmem:[#allocation14_spill] sm:$0xff] %v9299_v45  ;;  %v9305_v47 = vld [vmem:[#allocation2 + $0x20] sm:$0xff]  ;;  %v783_v48 = vrot.slane %v9294_v42, 7  ;;  %v929_v49 = vrot.slane %v9294_v42, 1  ;;  %v735_v52 = vadd.f32 %v711_v36, %v637_v34  ;;  %v881_v58 = vmul.f32 %v9290_v41, %v9294_v42 }
  0x45   : > { %17377 = vst [vmem:[#allocation15_spill] sm:$0xff] %v9301_v46  ;;  %v791_v54 = vrot.slane %v9305_v47, 7  ;;  %v937_v55 = vrot.slane %v9305_v47, 1  ;;  %v9316_v56 = vld [vmem:[#allocation2 + $0x30] sm:$0xff]  ;;  %v882_v5 = vmul.f32 %v9290_v41, %v9305_v47 }
  0x46   : > { %303 = vst.msk [vmem:[#allocation2 + $0x60] sm:$0xff] %vm290_vm0, %v17037_v1  ;;  %v9324_v57 = vsel %vm17130_vm1, %v799_v40, %v783_v48  ;;  %v9328_v59 = vld [vmem:[#allocation2 + $0x38] sm:$0xff]  ;;  %v1051_v60 = vrot.slane %v9316_v56, 7  ;;  %v1197_v7 = vrot.slane %v9316_v56, 1  ;;  %v1149_v32 = vmul.f32 %v9310_v51, %v9316_v56 }
  0x47   : > { %17378 = vst [vmem:[#allocation16_spill] sm:$0xff] %v9310_v51  ;;  %v9338_v62 = vsel %vm17130_vm1, %v783_v48, %v791_v54  ;;  %v832_v63 = vmul.f32 %v9296_v43, %v9324_v57  ;;  %v9346_v0 = vsel %vm17137_vm2, %v937_v55, %v945_v44  ;;  %v9352_v3 = vsel %vm17137_vm2, %v929_v49, %v937_v55 }
  0x48   : > { %304 = vst.msk [vmem:[#allocation2 + $0x68] sm:$0xff] %vm290_vm0, %v17037_v1  ;;  %v833_v4 = vmul.f32 %v9296_v43, %v9338_v62  ;;  %v1059_v6 = vrot.slane %v9328_v59, 7  ;;  %v978_v9 = vmul.f32 %v9299_v45, %v9352_v3  ;;  %v9370_v10 = vsel %vm17130_vm1, %v1067_v50, %v1051_v60 }
  0x49   : > { %17379 = vst [vmem:[#allocation17_spill] sm:$0xff] %v9316_v56  ;;  %v856_v8 = vadd.f32 %v832_v63, %v735_v52  ;;  %v1205_v11 = vrot.slane %v9328_v59, 1  ;;  %v979_v21 = vmul.f32 %v9299_v45, %v9346_v0  ;;  %v1100_v26 = vmul.f32 %v9301_v46, %v9370_v10 }
  0x4a   : > { %305 = vst.msk [vmem:[#allocation2 + $0x70] sm:$0xff] %vm290_vm0, %v17037_v1  ;;  %v857_v15 = vadd.f32 %v833_v4, %v736_v53  ;;  %v9381_v23 = vsel %vm17130_vm1, %v1051_v60, %v1059_v6  ;;  %v1150_v36 = vmul.f32 %v9310_v51, %v9328_v59  ;;  %v563_v4 = vsel %vm17130_vm1, %v546_v19, %v554_v20 }
  0x4b   : > { %306 = vst.msk [vmem:[#allocation2 + $0x78] sm:$0xff] %vm290_vm0, %v17037_v1  ;;  %v905_v24 = vadd.f32 %v881_v58, %v856_v8  ;;  %v1101_v29 = vmul.f32 %v9301_v46, %v9381_v23  ;;  %v9400_v30 = vsel %vm17137_vm2, %v1197_v7, %v1205_v11  ;;  %v9410_v34 = vsel %vm17137_vm2, %v1205_v11, %v1213_v61 }
  0x4c   : > { %307 = vst.msk [vmem:[#allocation2 + $0x80] sm:$0xff] %vm290_vm0, %v17037_v1  ;;  %v906_v28 = vadd.f32 %v882_v5, %v857_v15  ;;  %v1246_v39 = vmul.f32 %v9390_v27, %v9400_v30  ;;  %v1247_v52 = vmul.f32 %v9390_v27, %v9410_v34  ;;  %v8544_v5 = vld [vmem:[%s9186_s26 + $0x18] sm:$0xff]   ;;  %v590_v8 = vmul.f32 %v9236_v16, %v563_v4 }
  0x4d   : > { %308 = vst.msk [vmem:[#allocation2 + $0x88] sm:$0xff] %vm290_vm0, %v17037_v1  ;;  %v1002_v31 = vadd.f32 %v978_v9, %v905_v24  ;;  %v591_v9 = vmul.f32 %v9324_v57, %v9236_v16  ;;  %v615_v11 = vmul.f32 %v9238_v17, %v9233_v14  ;;  %v616_v15 = vmul.f32 %v9294_v42, %v9238_v17  ;;  %v8545_v24 = vld [vmem:[%s9186_s26 + $0x20] sm:$0xff]  }
  0x4e   : > { %17380 = vst [vmem:[#allocation18_spill] sm:$0xff] %v9370_v10  ;;  %v1003_v35 = vadd.f32 %v979_v21, %v906_v28  ;;  %v713_v57 = vmul.f32 %v9251_v25, %v702_v13  ;;  %v714_v21 = vmul.f32 %v9352_v3, %v9251_v25  ;;  %v8492_v12 = vunpack.c.l.bf16 %v8544_v5 }
  0x4f   : > { %309 = vst.msk [vmem:[#allocation2 + $0x90] sm:$0xff] %vm290_vm0, %v17037_v1  ;;  %v1124_v37 = vadd.f32 %v1100_v26, %v1002_v31  ;;  %v639_v19 = vadd.f32 %v615_v11, %v590_v8  ;;  %v640_v20 = vadd.f32 %v616_v15, %v591_v9  ;;  %v9645_v14 = vsel %vm17130_vm1, %v791_v54, %v799_v40  ;;  %v9709_v11 = vld [vmem:[#allocation2 + $0x58] sm:$0xff] }
  0x50   : > { %310 = vst.msk [vmem:[#allocation2 + $0x98] sm:$0xff] %vm290_vm0, %v17037_v1  ;;  %v1125_v48 = vadd.f32 %v1101_v29, %v1003_v35  ;;  %v834_v3 = vmul.f32 %v9296_v43, %v9645_v14  ;;  %v835_v26 = vmul.f32 %v9370_v10, %v9296_v43  ;;  %v8493_v28 = vunpack.c.h.bf16 %v8544_v5  ;;  %v8546_v29 = vld [vmem:[%s9186_s26 + $0x28] sm:$0xff]   ;;  %v8543_v35 = vld [vmem:[%s9186_s26 + $0x10] sm:$0xff]  }
  0x51   : > { %311 = vst.msk [vmem:[#allocation2 + $0xa0] sm:$0xff] %vm290_vm0, %v17037_v1  ;;  %v1173_v53 = vadd.f32 %v1149_v32, %v1124_v37  ;;  %v737_v18 = vadd.f32 %v713_v57, %v639_v19  ;;  %v738_v22 = vadd.f32 %v714_v21, %v640_v20  ;;  %v8496_v40 = vunpack.c.l.bf16 %v8545_v24 }
  0x52   : > { %17381 = vst [vmem:[#allocation19_spill] sm:$0xff] %v9400_v30  ;;  %v1174_v55 = vadd.f32 %v1150_v36, %v1125_v48  ;;  %v883_v31 = vmul.f32 %v9290_v41, %v9276_v33  ;;  %v8497_v32 = vunpack.c.h.bf16 %v8545_v24  ;;  %v884_v37 = vmul.f32 %v9316_v56, %v9290_v41 }
  0x53   : > { %312 = vst.msk [vmem:[#allocation2 + $0xa8] sm:$0xff] %vm290_vm0, %v17037_v1  ;;  %v1270_v58 = vadd.f32 %v1246_v39, %v1173_v53  ;;  %v858_v54 = vadd.f32 %v834_v3, %v737_v18  ;;  %v859_v36 = vadd.f32 %v835_v26, %v738_v22  ;;  %v9671_v39 = vsel %vm17137_vm2, %v945_v44, %v929_v49 }
  0x54   : > { %313 = vst.msk [vmem:[#allocation2 + $0xb0] sm:$0xff] %vm290_vm0, %v17037_v1  ;;  %v1271_v60 = vadd.f32 %v1247_v52, %v1174_v55  ;;  %v8500_v48 = vunpack.c.l.bf16 %v8546_v29  ;;  %v9674_v52 = vld [vmem:[#allocation2 + $0x70] sm:$0xff]  ;;  %v980_v55 = vmul.f32 %v9299_v45, %v9671_v39  ;;  %v9679_v42 = vld [vmem:[#allocation2 + $0x88] sm:$0xff]  ;;  %v9687_v44 = vsel %vm17130_vm1, %v1059_v6, %v1067_v50 }
  0x55   : > { %314 = vst.msk [vmem:[#allocation2 + $0xb8] sm:$0xff] %vm290_vm0, %v17037_v1  ;;  %v907_v53 = vadd.f32 %v883_v31, %v858_v54  ;;  %v9695_v49 = vsel %vm17137_vm2, %v1213_v61, %v1197_v7  ;;  %v1102_v5 = vmul.f32 %v9301_v46, %v9687_v44  ;;  %v1151_v50 = vmul.f32 %v9310_v51, %v9282_v38  ;;  %v8547_v6 = vld [vmem:[%s9186_s26 + $0x30] sm:$0xff]  }
  0x56   : > { %315 = vst.msk [vmem:[#allocation2 + $0xc0] sm:$0xff] %vm290_vm0, %v17037_v1  ;;  %v1294_v63 = vpack.c.bf16 %v1271_v60, %v1270_v58  ;;  %v8501_v58 = vunpack.c.h.bf16 %v8546_v29  ;;  %v17033_v8 = vrot.slane %v9674_v52, 7  ;;  %v8489_v9 = vunpack.c.h.bf16 %v8543_v35 }
  0x57   : > { %316 = vst.msk [vmem:[#allocation2 + $0xc8] sm:$0xff] %vm290_vm0, %v17037_v1  ;;  %v1004_v4 = vadd.f32 %v980_v55, %v907_v53  ;;  %v908_v61 = vadd.f32 %v884_v37, %v859_v36  ;;  %v981_v7 = vmul.f32 %v9400_v30, %v9299_v45  ;;  %v17030_v15 = vrot.slane %v9674_v52, 1 }
  0x58   : > { %317 = vst.msk [vmem:[#allocation2 + $0xd0] sm:$0xff] %vm290_vm0, %v17037_v1  ;;  %8230 = vmatmul.msk.bf16.vlgmr.msra.gmra.mxu0 %vm290_vm0, %v1294_v63  ;;  %v9698_v60 = vld [vmem:[#allocation2 + $0xa0] sm:$0xff]  ;;  %v8488_v63 = vunpack.c.l.bf16 %v8543_v35  ;;  %v17034_v13 = vrot.slane %v9679_v42, 7  ;;  %v1248_v20 = vmul.f32 %v9390_v27, %v9695_v49  ;;  %v17041_v21 = vrot.slane %v9679_v42, 1 }
  0x59   : > { %318 = vst.msk [vmem:[#allocation2 + $0xd8] sm:$0xff] %vm290_vm0, %v17037_v1  ;;  %v1126_v19 = vadd.f32 %v1102_v5, %v1004_v4  ;;  %v8504_v18 = vunpack.c.l.bf16 %v8547_v6  ;;  %v8505_v26 = vunpack.c.h.bf16 %v8547_v6  ;;  %v9735_v54 = vmul.f32 %v9290_v41, %v9679_v42 }
  0x5a   : > { %319 = vst.msk [vmem:[#allocation2 + $0xe0] sm:$0xff] %vm290_vm0, %v17037_v1  ;;  %v9761_v5 = vmul.f32 %v9338_v62, %v9236_v16 }
  0x5b   : > { %320 = vst.msk [vmem:[#allocation2 + $0xe8] sm:$0xff] %vm290_vm0, %v17037_v1  ;;  %v1175_v3 = vadd.f32 %v1151_v50, %v1126_v19 }
  0x5c   : > { %321 = vst.msk [vmem:[#allocation2 + $0xf0] sm:$0xff] %vm290_vm0, %v17037_v1  ;;  %v9716_v57 = vld [vmem:[#allocation2 + $0xb8] sm:$0xff] }
  0x5d   : > { %322 = vst.msk [vmem:[#allocation2 + $0xf8] sm:$0xff] %vm290_vm0, %v17037_v1  ;;  %v9748_v53 = vadd.f32 %v1248_v20, %v1175_v3 }
  0x5e   : > { %323 = vst.msk [vmem:[#allocation2 + $0x100] sm:$0xff] %vm290_vm0, %v17037_v1 }
  0x5f   : > { %324 = vst.msk [vmem:[#allocation2 + $0x108] sm:$0xff] %vm290_vm0, %v17037_v1 }
  0x60   : > { %325 = vst.msk [vmem:[#allocation2 + $0x110] sm:$0xff] %vm290_vm0, %v17037_v1 }
  0x61   : > { %326 = vst.msk [vmem:[#allocation2 + $0x118] sm:$0xff] %vm290_vm0, %v17037_v1 }
  0x62   : > { %327 = vst.msk [vmem:[#allocation2 + $0x120] sm:$0xff] %vm290_vm0, %v17037_v1 }
  0x63   : > { %328 = vst.msk [vmem:[#allocation2 + $0x128] sm:$0xff] %vm290_vm0, %v17037_v1 }
  0x64   : > { %329 = vst.msk [vmem:[#allocation2 + $0x130] sm:$0xff] %vm290_vm0, %v17037_v1 }
  0x65   : > { %330 = vst.msk [vmem:[#allocation2 + $0x138] sm:$0xff] %vm290_vm0, %v17037_v1 }
  0x66   : > { %331 = vst.msk [vmem:[#allocation2 + $0x140] sm:$0xff] %vm290_vm0, %v17037_v1 }
  0x67   : > { %332 = vst.msk [vmem:[#allocation2 + $0x148] sm:$0xff] %vm290_vm0, %v17037_v1 }
  0x68   : > { %333 = vst.msk [vmem:[#allocation2 + $0x150] sm:$0xff] %vm290_vm0, %v17037_v1 }
  0x69   : > { %334 = vst.msk [vmem:[#allocation2 + $0x158] sm:$0xff] %vm290_vm0, %v17037_v1 }
  0x6a   : > { %335 = vst.msk [vmem:[#allocation2 + $0x160] sm:$0xff] %vm290_vm0, %v17037_v1 }
  0x6b   : > { %336 = vst.msk [vmem:[#allocation2 + $0x168] sm:$0xff] %vm290_vm0, %v17037_v1 }
  0x6c   : > { %337 = vst.msk [vmem:[#allocation2 + $0x170] sm:$0xff] %vm290_vm0, %v17037_v1 }
  0x6d   : > { %338 = vst.msk [vmem:[#allocation2 + $0x178] sm:$0xff] %vm290_vm0, %v17037_v1 }
  0x6e   : > { %339 = vst.msk [vmem:[#allocation2 + $0x180] sm:$0xff] %vm290_vm0, %v17037_v1 }
  0x6f   : > { %340 = vst.msk [vmem:[#allocation2 + $0x188] sm:$0xff] %vm290_vm0, %v17037_v1 }
  0x70   : > { %341 = vst.msk [vmem:[#allocation2 + $0x190] sm:$0xff] %vm290_vm0, %v17037_v1 }
  0x71   : > { %342 = vst.msk [vmem:[#allocation2 + $0x198] sm:$0xff] %vm290_vm0, %v17037_v1 }
  0x72   : > { %343 = vst.msk [vmem:[#allocation2 + $0x1a0] sm:$0xff] %vm290_vm0, %v17037_v1 }
  0x73   : > { %344 = vst.msk [vmem:[#allocation2 + $0x1a8] sm:$0xff] %vm290_vm0, %v17037_v1 }
  0x74   : > { %345 = vst.msk [vmem:[#allocation3] sm:$0xff] %vm290_vm0, %v17037_v1 }
  0x75   : > { %346 = vst.msk [vmem:[#allocation3 + $0x8] sm:$0xff] %vm290_vm0, %v17037_v1 }
  0x76   : > { %347 = vst.msk [vmem:[#allocation3 + $0x10] sm:$0xff] %vm290_vm0, %v17037_v1 }
  0x77   : > { %348 = vst.msk [vmem:[#allocation3 + $0x18] sm:$0xff] %vm290_vm0, %v17037_v1 }
  0x78   : > { %349 = vst.msk [vmem:[#allocation3 + $0x20] sm:$0xff] %vm290_vm0, %v17037_v1 }
  0x79   : > { %350 = vst.msk [vmem:[#allocation3 + $0x28] sm:$0xff] %vm290_vm0, %v17037_v1 }
  0x7a   : > { %351 = vst.msk [vmem:[#allocation3 + $0x30] sm:$0xff] %vm290_vm0, %v17037_v1 }
  0x7b   : > { %352 = vst.msk [vmem:[#allocation3 + $0x38] sm:$0xff] %vm290_vm0, %v17037_v1 }
  0x7c   : > { %353 = vst.msk [vmem:[#allocation3 + $0x40] sm:$0xff] %vm290_vm0, %v17037_v1 }
  0x7d   : > { %354 = vst.msk [vmem:[#allocation3 + $0x48] sm:$0xff] %vm290_vm0, %v17037_v1 }
  0x7e   : > { %355 = vst.msk [vmem:[#allocation3 + $0x50] sm:$0xff] %vm290_vm0, %v17037_v1 }
  0x7f   : > { %356 = vst.msk [vmem:[#allocation3 + $0x58] sm:$0xff] %vm290_vm0, %v17037_v1 }
  0x80   : > { %357 = vst.msk [vmem:[#allocation3 + $0x60] sm:$0xff] %vm290_vm0, %v17037_v1 }
  0x81   : > { %358 = vst.msk [vmem:[#allocation3 + $0x68] sm:$0xff] %vm290_vm0, %v17037_v1 }
  0x82   : > { %359 = vst.msk [vmem:[#allocation3 + $0x70] sm:$0xff] %vm290_vm0, %v17037_v1 }
  0x83   : > { %360 = vst.msk [vmem:[#allocation3 + $0x78] sm:$0xff] %vm290_vm0, %v17037_v1 }
  0x84   : > { %361 = vst.msk [vmem:[#allocation3 + $0x80] sm:$0xff] %vm290_vm0, %v17037_v1 }
  0x85   : > { %362 = vst.msk [vmem:[#allocation3 + $0x88] sm:$0xff] %vm290_vm0, %v17037_v1 }
  0x86   : > { %363 = vst.msk [vmem:[#allocation3 + $0x90] sm:$0xff] %vm290_vm0, %v17037_v1 }
  0x87   : > { %364 = vst.msk [vmem:[#allocation3 + $0x98] sm:$0xff] %vm290_vm0, %v17037_v1 }
  0x88   : > { %365 = vst.msk [vmem:[#allocation3 + $0xa0] sm:$0xff] %vm290_vm0, %v17037_v1 }
  0x89   : > { %366 = vst.msk [vmem:[#allocation3 + $0xa8] sm:$0xff] %vm290_vm0, %v17037_v1 }
  0x8a   : > { %367 = vst.msk [vmem:[#allocation3 + $0xb0] sm:$0xff] %vm290_vm0, %v17037_v1 }
  0x8b   : > { %368 = vst.msk [vmem:[#allocation3 + $0xb8] sm:$0xff] %vm290_vm0, %v17037_v1 }
  0x8c   : > { %369 = vst.msk [vmem:[#allocation3 + $0xc0] sm:$0xff] %vm290_vm0, %v17037_v1 }
  0x8d   : > { %370 = vst.msk [vmem:[#allocation3 + $0xc8] sm:$0xff] %vm290_vm0, %v17037_v1 }
  0x8e   : > { %371 = vst.msk [vmem:[#allocation3 + $0xd0] sm:$0xff] %vm290_vm0, %v17037_v1 }
  0x8f   : > { %372 = vst.msk [vmem:[#allocation3 + $0xd8] sm:$0xff] %vm290_vm0, %v17037_v1 }
  0x90   : > { %373 = vst.msk [vmem:[#allocation3 + $0xe0] sm:$0xff] %vm290_vm0, %v17037_v1 }
  0x91   : > { %374 = vst.msk [vmem:[#allocation3 + $0xe8] sm:$0xff] %vm290_vm0, %v17037_v1 }
  0x92   : > { %375 = vst.msk [vmem:[#allocation3 + $0xf0] sm:$0xff] %vm290_vm0, %v17037_v1 }
  0x93   : > { %376 = vst.msk [vmem:[#allocation3 + $0xf8] sm:$0xff] %vm290_vm0, %v17037_v1 }
  0x94   : > { %377 = vst.msk [vmem:[#allocation3 + $0x100] sm:$0xff] %vm290_vm0, %v17037_v1 }
  0x95   : > { %378 = vst.msk [vmem:[#allocation3 + $0x108] sm:$0xff] %vm290_vm0, %v17037_v1 }
  0x96   : > { %379 = vst.msk [vmem:[#allocation3 + $0x110] sm:$0xff] %vm290_vm0, %v17037_v1 }
  0x97   : > { %380 = vst.msk [vmem:[#allocation3 + $0x118] sm:$0xff] %vm290_vm0, %v17037_v1 }
  0x98   : > { %381 = vst.msk [vmem:[#allocation3 + $0x120] sm:$0xff] %vm290_vm0, %v17037_v1 }
  0x99   : > { %382 = vst.msk [vmem:[#allocation3 + $0x128] sm:$0xff] %vm290_vm0, %v17037_v1 }
  0x9a   : > { %383 = vst.msk [vmem:[#allocation3 + $0x130] sm:$0xff] %vm290_vm0, %v17037_v1 }
  0x9b   : > { %384 = vst.msk [vmem:[#allocation3 + $0x138] sm:$0xff] %vm290_vm0, %v17037_v1 }
  0x9c   : > { %385 = vst.msk [vmem:[#allocation3 + $0x140] sm:$0xff] %vm290_vm0, %v17037_v1 }
  0x9d   : > { %386 = vst.msk [vmem:[#allocation3 + $0x148] sm:$0xff] %vm290_vm0, %v17037_v1 }
  0x9e   : > { %387 = vst.msk [vmem:[#allocation3 + $0x150] sm:$0xff] %vm290_vm0, %v17037_v1 }
  0x9f   : > { %388 = vst.msk [vmem:[#allocation3 + $0x158] sm:$0xff] %vm290_vm0, %v17037_v1 }
  0xa0   : > { %389 = vst.msk [vmem:[#allocation3 + $0x160] sm:$0xff] %vm290_vm0, %v17037_v1 }
  0xa1   : > { %390 = vst.msk [vmem:[#allocation3 + $0x168] sm:$0xff] %vm290_vm0, %v17037_v1 }
  0xa2   : > { %391 = vst.msk [vmem:[#allocation3 + $0x170] sm:$0xff] %vm290_vm0, %v17037_v1 }
  0xa3   : > { %392 = vst.msk [vmem:[#allocation3 + $0x178] sm:$0xff] %vm290_vm0, %v17037_v1 }
  0xa4   : > { %393 = vst.msk [vmem:[#allocation3 + $0x180] sm:$0xff] %vm290_vm0, %v17037_v1 }
  0xa5   : > { %394 = vst.msk [vmem:[#allocation3 + $0x188] sm:$0xff] %vm290_vm0, %v17037_v1 }
  0xa6   : > { %395 = vst.msk [vmem:[#allocation3 + $0x190] sm:$0xff] %vm290_vm0, %v17037_v1 }
  0xa7   : > { %396 = vst.msk [vmem:[#allocation3 + $0x198] sm:$0xff] %vm290_vm0, %v17037_v1 }
  0xa8   : > { %397 = vst.msk [vmem:[#allocation3 + $0x1a0] sm:$0xff] %vm290_vm0, %v17037_v1 }
  0xa9   : > { %398 = vst.msk [vmem:[#allocation3 + $0x1a8] sm:$0xff] %vm290_vm0, %v17037_v1 }
  0xaa   : > { %1951 = vst.msk [vmem:[#allocation3 + $0x28] sm:$0xff] %vm290_vm0, %v17037_v1 }
  0xab   : > { %1954 = vst.msk [vmem:[#allocation3 + $0x40] sm:$0xff] %vm290_vm0, %v17037_v1 }
  0xac   : > { %1957 = vst.msk [vmem:[#allocation3 + $0x58] sm:$0xff] %vm290_vm0, %v17037_v1 }
  0xad   : > { %1960 = vst.msk [vmem:[#allocation3 + $0x70] sm:$0xff] %vm290_vm0, %v17037_v1 }
  0xae   : > { %1963 = vst.msk [vmem:[#allocation3 + $0x88] sm:$0xff] %vm290_vm0, %v17037_v1 }
  0xaf   : > { %1966 = vst.msk [vmem:[#allocation3 + $0xa0] sm:$0xff] %vm290_vm0, %v17037_v1 }
  0xb0   : > { %1969 = vst.msk [vmem:[#allocation3 + $0xb8] sm:$0xff] %vm290_vm0, %v17037_v1 }
  0xb1   : > { %1972 = vst.msk [vmem:[#allocation3 + $0xd0] sm:$0xff] %vm290_vm0, %v17037_v1 }
  0xb2   : > { %3368 = vst.msk [vmem:[#allocation3 + $0xe8] sm:$0xff] %vm290_vm0, %v17037_v1 }
  0xb3   : > { %3371 = vst.msk [vmem:[#allocation3 + $0x100] sm:$0xff] %vm290_vm0, %v17037_v1 }
  0xb4   : > { %3374 = vst.msk [vmem:[#allocation3 + $0x118] sm:$0xff] %vm290_vm0, %v17037_v1 }
  0xb5   : > { %3377 = vst.msk [vmem:[#allocation3 + $0x130] sm:$0xff] %vm290_vm0, %v17037_v1 }
  0xb6   : > { %3380 = vst.msk [vmem:[#allocation3 + $0x148] sm:$0xff] %vm290_vm0, %v17037_v1 }
  0xb7   : > { %3383 = vst.msk [vmem:[#allocation3 + $0x160] sm:$0xff] %vm290_vm0, %v17037_v1 }
  0xb8   : > { %3386 = vst.msk [vmem:[#allocation3 + $0x178] sm:$0xff] %vm290_vm0, %v17037_v1 }
  0xb9   : > { %3389 = vst.msk [vmem:[#allocation3 + $0x190] sm:$0xff] %vm290_vm0, %v17037_v1 }
  0xba   : > { %470 = vst.msk [vmem:[#allocation2 + $0x60] sm:$0xff] %vm290_vm0, %v8492_v12 }
  0xbb   : > { %17382 = vst [vmem:[#allocation20_spill] sm:$0xff] %v9674_v52 }
  0xbc   : > { %471 = vst.msk [vmem:[#allocation2 + $0x68] sm:$0xff] %vm290_vm0, %v8493_v28  ;;  %v9726_v28 = vmul.f32 %v9238_v17, %v9674_v52 }
  0xbd   : > { %472 = vst.msk [vmem:[#allocation2 + $0x78] sm:$0xff] %vm290_vm0, %v8496_v40  ;;  %v9731_v40 = vadd.f32 %v981_v7, %v908_v61 }
  0xbe   : > { %17383 = vst [vmem:[#allocation21_spill] sm:$0xff] %v9698_v60 }
  0xbf   : > { %473 = vst.msk [vmem:[#allocation2 + $0x80] sm:$0xff] %vm290_vm0, %v8497_v32  ;;  %v9740_v32 = vmul.f32 %v9310_v51, %v9698_v60 }
  0xc0   : > { %474 = vst.msk [vmem:[#allocation2 + $0x90] sm:$0xff] %vm290_vm0, %v8500_v48 }
  0xc1   : > { %17384 = vst [vmem:[#allocation22_spill] sm:$0xff] %v9716_v57  ;;  %v9728_v29 = vld [vmem:[#allocation2 + $0x60] sm:$0xff] }
  0xc2   : > { %475 = vst.msk [vmem:[#allocation2 + $0x98] sm:$0xff] %vm290_vm0, %v8501_v58  ;;  %v542_v36 = vrot.slane %v9728_v29, 7  ;;  %v625_v37 = vmul.f32 %v9238_v17, %v9728_v29  ;;  %v17031_v48 = vrot.slane %v9728_v29, 1 }
  0xc3   : > { %468 = vst.msk [vmem:[#allocation2 + $0x48] sm:$0xff] %vm290_vm0, %v8488_v63  ;;  %v9742_v35 = vld [vmem:[#allocation2 + $0x68] sm:$0xff] }
  0xc4   : > { %17385 = vst [vmem:[#allocation23_spill] sm:$0xff] %v9728_v29  ;;  %v17032_v55 = vrot.slane %v9742_v35, 7  ;;  %v626_v58 = vmul.f32 %v9238_v17, %v9742_v35  ;;  %v673_v63 = vrot.slane %v9742_v35, 1  ;;  %v9756_v4 = vld [vmem:[#allocation2 + $0x78] sm:$0xff]  ;;  %v9767_v50 = vsel %vm17130_vm1, %v17033_v8, %v542_v36 }
  0xc5   : > { %469 = vst.msk [vmem:[#allocation2 + $0x50] sm:$0xff] %vm290_vm0, %v8489_v9  ;;  %v787_v9 = vrot.slane %v9756_v4, 7  ;;  %v893_v61 = vmul.f32 %v9290_v41, %v9756_v4  ;;  %v600_v19 = vmul.f32 %v9236_v16, %v9767_v50 }
  0xc6   : > { %17386 = vst [vmem:[#allocation24_spill] sm:$0xff] %v9742_v35  ;;  %v9769_v6 = vld [vmem:[#allocation2 + $0x80] sm:$0xff]  ;;  %v9780_v62 = vsel %vm17130_vm1, %v542_v36, %v17032_v55  ;;  %v9788_v20 = vsel %vm17137_vm2, %v673_v63, %v17030_v15 }
  0xc7   : > { %4832 = vst.msk [vmem:[#allocation2 + $0x28] sm:$0xff] %vm290_vm0, %v17037_v1  ;;  %v9796_v3 = vld [vmem:[#allocation2 + $0x90] sm:$0xff]  ;;  %v724_v31 = vmul.f32 %v9251_v25, %v9788_v20  ;;  %v17035_v15 = vrot.slane %v9769_v6, 7  ;;  %v894_v55 = vmul.f32 %v9290_v41, %v9769_v6  ;;  %v941_v8 = vrot.slane %v9769_v6, 1 }
  0xc8   : > { %476 = vst.msk [vmem:[#allocation2 + $0xa8] sm:$0xff] %vm290_vm0, %v8504_v18  ;;  %v9794_v18 = vsel %vm17137_vm2, %v17031_v48, %v673_v63  ;;  %v649_v63 = vadd.f32 %v625_v37, %v600_v19  ;;  %v827_v48 = vsel %vm17130_vm1, %v17034_v13, %v787_v9  ;;  %v1055_v13 = vrot.slane %v9796_v3, 7 }
  0xc9   : > { %17387 = vst [vmem:[#allocation25_spill] sm:$0xff] %v9767_v50  ;;  %v723_v36 = vmul.f32 %v9251_v25, %v9794_v18  ;;  %v9816_v22 = vld [vmem:[#allocation2 + $0x98] sm:$0xff]  ;;  %v9824_v37 = vsel %vm17130_vm1, %v787_v9, %v17035_v15  ;;  %v844_v19 = vmul.f32 %v9296_v43, %v827_v48  ;;  %v17393_v9 = vrot.slane %v9756_v4, 1 }
  0xca   : > { %477 = vst.msk [vmem:[#allocation2 + $0xb0] sm:$0xff] %vm290_vm0, %v8505_v26  ;;  %v601_v26 = vmul.f32 %v9236_v16, %v9780_v62  ;;  %v845_v7 = vmul.f32 %v9296_v43, %v9824_v37  ;;  %v1209_v56 = vrot.slane %v9816_v22, 1 }
  0xcb   : > { %17388 = vst [vmem:[#allocation26_spill] sm:$0xff] %v9780_v62  ;;  %v747_v12 = vadd.f32 %v723_v36, %v649_v63  ;;  %v17046_v63 = vrot.slane %v9816_v22, 7  ;;  %v17394_v62 = vrot.slane %v9698_v60, 7 }
  0xcc   : > { %17389 = vst [vmem:[#allocation27_spill] sm:$0xff] %v9788_v20  ;;  %v650_v24 = vadd.f32 %v626_v58, %v601_v26  ;;  %v9836_v58 = vsel %vm17137_vm2, %v941_v8, %v17041_v21  ;;  %v965_v26 = vsel %vm17137_vm2, %v17393_v9, %v941_v8  ;;  %v1161_v8 = vmul.f32 %v9310_v51, %v9796_v3 }
  0xcd   : > { %17390 = vst [vmem:[#allocation28_spill] sm:$0xff] %v9794_v18  ;;  %v990_v20 = vmul.f32 %v9299_v45, %v965_v26  ;;  %v991_v36 = vmul.f32 %v9299_v45, %v9836_v58  ;;  %v868_v18 = vadd.f32 %v844_v19, %v747_v12  ;;  %v9852_v21 = vsel %vm17130_vm1, %v17394_v62, %v1055_v13 }
  0xce   : > { %4835 = vst.msk [vmem:[#allocation2 + $0x40] sm:$0xff] %vm290_vm0, %v17037_v1  ;;  %v748_v15 = vadd.f32 %v724_v31, %v650_v24  ;;  %v1162_v24 = vmul.f32 %v9310_v51, %v9816_v22  ;;  %v9858_v31 = vld [vmem:[#allocation2 + $0x50] sm:$0xff]  ;;  %v9864_v12 = vsel %vm17130_vm1, %v1055_v13, %v17046_v63  ;;  %v1112_v19 = vmul.f32 %v9301_v46, %v9852_v21 }
  0xcf   : > { %4847 = vst.msk [vmem:[#allocation2 + $0xa0] sm:$0xff] %vm290_vm0, %v17037_v1  ;;  %v17049_v62 = vrot.slane %v9796_v3, 1  ;;  %v917_v50 = vadd.f32 %v893_v61, %v868_v18  ;;  %v1113_v30 = vmul.f32 %v9301_v46, %v9864_v12  ;;  %v17055_v63 = vrot.slane %v9858_v31, 1 }
  0xd0   : > { %4838 = vst.msk [vmem:[#allocation2 + $0x58] sm:$0xff] %vm290_vm0, %v17037_v1  ;;  %v869_v9 = vadd.f32 %v845_v7, %v748_v15 }
  0xd1   : > { %17391 = vst [vmem:[#allocation29_spill] sm:$0xff] %v9824_v37  ;;  %v17397_v37 = vrot.slane %v9698_v60, 1  ;;  %v9887_v18 = vsel %vm17137_vm2, %v17049_v62, %v1209_v56 }
  0xd2   : > { %4850 = vst.msk [vmem:[#allocation2 + $0xb8] sm:$0xff] %vm290_vm0, %v17037_v1  ;;  %v9846_v1 = vld [vmem:[#allocation2 + $0x48] sm:$0xff]  ;;  %v918_v15 = vadd.f32 %v894_v55, %v869_v9  ;;  %v17399_v55 = vrot.slane %v9709_v11, 7 }
  0xd3   : > { %17392 = vst [vmem:[#allocation30_spill] sm:$0xff] %v9836_v58  ;;  %v17052_v10 = vrot.slane %v9846_v1, 7  ;;  %v1152_v7 = vmul.f32 %v9310_v51, %v9846_v1  ;;  %v1014_v58 = vadd.f32 %v990_v20, %v917_v50  ;;  %v9881_v61 = vsel %vm17137_vm2, %v1209_v56, %v17397_v37 }
  0xd4   : > { %17395 = vst [vmem:[#allocation31_spill] sm:$0xff] %v9858_v31  ;;  %v1015_v50 = vadd.f32 %v991_v36, %v918_v15  ;;  %v1258_v20 = vmul.f32 %v9390_v27, %v9887_v18  ;;  %v1259_v37 = vmul.f32 %v9390_v27, %v9881_v61  ;;  %v17401_v62 = vrot.slane %v9846_v1, 1 }
  0xd5   : > { %17396 = vst [vmem:[#allocation32_spill] sm:$0xff] %v9864_v12  ;;  %v9895_v9 = vsel %vm17130_vm1, %v17399_v55, %v17052_v10  ;;  %v1136_v56 = vadd.f32 %v1112_v19, %v1014_v58  ;;  %v17402_v36 = vrot.slane %v9674_v52, 7  ;;  %v17403_v15 = vrot.slane %v9742_v35, 7 }
  0xd6   : > { %17398 = vst [vmem:[#allocation33_spill] sm:$0xff] %v9881_v61  ;;  %v1103_v13 = vmul.f32 %v9301_v46, %v9895_v9  ;;  %v9909_v12 = vsel %vm17137_vm2, %v17401_v62, %v17055_v63  ;;  %v603_v10 = vmul.f32 %v827_v48, %v9236_v16  ;;  %v628_v61 = vmul.f32 %v9756_v4, %v9238_v17 }
  0xd7   : > { %17400 = vst [vmem:[#allocation34_spill] sm:$0xff] %v9895_v9  ;;  %v9917_v55 = vsel %vm17130_vm1, %v17403_v15, %v17402_v36  ;;  %v1137_v9 = vadd.f32 %v1113_v30, %v1015_v50  ;;  %v1249_v19 = vmul.f32 %v9390_v27, %v9909_v12  ;;  %v1185_v63 = vadd.f32 %v1161_v8, %v1136_v56 }
  0xd8   : > { %17404 = vst [vmem:[#allocation35_spill] sm:$0xff] %v9917_v55  ;;  %v1127_v58 = vadd.f32 %v1103_v13, %v9731_v40  ;;  %v602_v62 = vmul.f32 %v9236_v16, %v9917_v55  ;;  %v17405_v35 = vrot.slane %v9728_v29, 1  ;;  %v17406_v36 = vrot.slane %v9674_v52, 1 }
  0xd9   : > { %v726_v30 = vmul.f32 %v965_v26, %v9251_v25  ;;  %v1186_v40 = vadd.f32 %v1162_v24, %v1137_v9  ;;  %v1282_v56 = vadd.f32 %v1258_v20, %v1185_v63  ;;  %v652_v15 = vadd.f32 %v628_v61, %v603_v10  ;;  %v9951_v9 = vld [vmem:[#allocation2 + $0xa8] sm:$0xff] }
  0xda   : > { %v9933_v48 = vsel %vm17137_vm2, %v17406_v36, %v17405_v35  ;;  %v1176_v13 = vadd.f32 %v1152_v7, %v1127_v58  ;;  %v651_v50 = vadd.f32 %v9726_v28, %v602_v62  ;;  %v17408_v55 = vrot.slane %v9679_v42, 7 }
  0xdb   : > { %17407 = vst [vmem:[#allocation36_spill] sm:$0xff] %v9933_v48  ;;  %v725_v8 = vmul.f32 %v9251_v25, %v9933_v48  ;;  %v17409_v29 = vrot.slane %v9769_v6, 7  ;;  %v847_v35 = vmul.f32 %v9852_v21, %v9296_v43  ;;  %v1283_v26 = vadd.f32 %v1259_v37, %v1186_v40 }
  0xdc   : > { %v1273_v24 = vadd.f32 %v1249_v19, %v1176_v13  ;;  %v750_v10 = vadd.f32 %v726_v30, %v652_v15  ;;  %v896_v63 = vmul.f32 %v9796_v3, %v9290_v41  ;;  %v17410_v61 = vrot.slane %v9756_v4, 1 }
  0xdd   : > { %v9945_v52 = vsel %vm17130_vm1, %v17409_v29, %v17408_v55  ;;  %v749_v7 = vadd.f32 %v725_v8, %v651_v50  ;;  %v17411_v29 = vrot.slane %v9679_v42, 1  ;;  %v993_v37 = vmul.f32 %v9887_v18, %v9299_v45  ;;  %v9965_v55 = vld [vmem:[#allocation2 + $0xb0] sm:$0xff] }
  0xde   : > { %v846_v28 = vmul.f32 %v9296_v43, %v9945_v52  ;;  %v1300_v58 = vpack.c.bf16 %v1283_v26, %v1282_v56  ;;  %v1295_v19 = vpack.c.bf16 %v1273_v24, %v9748_v53  ;;  %v871_v30 = vadd.f32 %v847_v35, %v750_v10 }
  0xdf   : > { %v9961_v20 = vsel %vm17137_vm2, %v17411_v29, %v17410_v61  ;;  %v17064_v4 = vrot.slane %v9951_v9, 7  ;;  %v17412_v40 = vrot.slane %v9698_v60, 7  ;;  %v17413_v13 = vrot.slane %v9816_v22, 7 }
  0xe0   : > { %v870_v62 = vadd.f32 %v846_v28, %v749_v7  ;;  %v992_v36 = vmul.f32 %v9299_v45, %v9961_v20  ;;  %v1164_v8 = vmul.f32 %v9310_v51, %v9951_v9  ;;  %8236 = vmatmul.msk.bf16.vlgmr.msra.gmra.mxu2 %vm290_vm0, %v1300_v58  ;;  %8231 = vmatmul.msk.bf16.gmra.mxu0 %vm290_vm0, %v1295_v19  ;;  %v17062_v15 = vrot.slane %v9951_v9, 1 }
  0xe1   : > { %v9977_v50 = vsel %vm17130_vm1, %v17413_v13, %v17412_v40  ;;  %v17063_v35 = vrot.slane %v9965_v55, 1  ;;  %v920_v26 = vadd.f32 %v896_v63, %v871_v30  ;;  %v17415_v24 = vrot.slane %v9716_v57, 7 }
  0xe2   : > { %17414 = vst [vmem:[#allocation37_spill] sm:$0xff] %v9977_v50  ;;  %v919_v53 = vadd.f32 %v9735_v54, %v870_v62  ;;  %v1114_v56 = vmul.f32 %v9301_v46, %v9977_v50  ;;  %v17416_v28 = vrot.slane %v9796_v3, 1  ;;  %v17417_v54 = vrot.slane %v9698_v60, 1 }
  0xe3   : > { %v9994_v7 = vsel %vm17130_vm1, %v17415_v24, %v17064_v4  ;;  %v593_v61 = vmul.f32 %v9645_v14, %v9236_v16  ;;  %v10014_v58 = vsel %vm17137_vm2, %v17062_v15, %v17063_v35  ;;  %v1017_v62 = vadd.f32 %v993_v37, %v920_v26 }
  0xe4   : > { %v10002_v10 = vsel %vm17137_vm2, %v17417_v54, %v17416_v28  ;;  %v1016_v63 = vadd.f32 %v992_v36, %v919_v53  ;;  %v1115_v29 = vmul.f32 %v9301_v46, %v9994_v7  ;;  %v1261_v30 = vmul.f32 %v9390_v27, %v10014_v58 }
  0xe5   : > { %17418 = vst [vmem:[#allocation38_spill] sm:$0xff] %v10002_v10  ;;  %v1260_v19 = vmul.f32 %v9390_v27, %v10002_v10  ;;  %v617_v14 = vmul.f32 %v9305_v47, %v9238_v17  ;;  %v618_v36 = vmul.f32 %v9276_v33, %v9238_v17  ;;  %v715_v13 = vmul.f32 %v9346_v0, %v9251_v25 }
  0xe6   : > { %v1138_v40 = vadd.f32 %v1114_v56, %v1016_v63  ;;  %v716_v53 = vmul.f32 %v9671_v39, %v9251_v25  ;;  %v836_v24 = vmul.f32 %v9381_v23, %v9296_v43  ;;  %v1139_v37 = vadd.f32 %v1115_v29, %v1017_v62 }
  0xe7   : > { %v641_v26 = vadd.f32 %v617_v14, %v9761_v5  ;;  %v642_v28 = vadd.f32 %v618_v36, %v593_v61  ;;  %v837_v47 = vmul.f32 %v9687_v44, %v9296_v43  ;;  %v885_v33 = vmul.f32 %v9328_v59, %v9290_v41 }
  0xe8   : > { %v1187_v54 = vadd.f32 %v9740_v32, %v1138_v40  ;;  %v886_v0 = vmul.f32 %v9282_v38, %v9290_v41  ;;  %v982_v39 = vmul.f32 %v9410_v34, %v9299_v45  ;;  %v1188_v56 = vadd.f32 %v1164_v8, %v1139_v37  ;;  %v10048_v8 = vld [vmem:[#allocation2 + $0xd0] sm:$0xff] }
  0xe9   : > { %v739_v63 = vadd.f32 %v715_v13, %v641_v26  ;;  %v740_v29 = vadd.f32 %v716_v53, %v642_v28  ;;  %v983_v5 = vmul.f32 %v9695_v49, %v9299_v45  ;;  %v1060_v62 = vrot.slane %v9858_v31, 7 }
  0xea   : > { %v1284_v61 = vadd.f32 %v1260_v19, %v1187_v54  ;;  %v1153_v32 = vmul.f32 %v9310_v51, %v9858_v31  ;;  %v1154_v14 = vmul.f32 %v9310_v51, %v9709_v11  ;;  %v1285_v36 = vadd.f32 %v1261_v30, %v1188_v56  ;;  %v17422_v30 = vld [vmem:[#allocation29_spill] sm:$0xff] }
  0xeb   : > { %v860_v40 = vadd.f32 %v836_v24, %v739_v63  ;;  %v861_v15 = vadd.f32 %v837_v47, %v740_v29  ;;  %v1214_v35 = vrot.slane %v9709_v11, 1  ;;  %v17419_v13 = vrot.slane %v9709_v11, 7 }
  0xec   : > { %v17420_v53 = vrot.slane %v9846_v1, 7  ;;  %v604_v24 = vmul.f32 %v17422_v30, %v9236_v16  ;;  %v605_v26 = vmul.f32 %v9945_v52, %v9236_v16  ;;  %v17423_v28 = vmov 0.0  }
  0xed   : > { %v10054_v19 = vsel %vm17130_vm1, %v1060_v62, %v17419_v13  ;;  %4853 = vst.msk [vmem:[#allocation2 + $0xd0] sm:$0xff] %vm290_vm0, %v17423_v28  ;;  %v1301_v47 = vpack.c.bf16 %v1285_v36, %v1284_v61  ;;  %v909_v54 = vadd.f32 %v885_v33, %v860_v40  ;;  %v910_v56 = vadd.f32 %v886_v0, %v861_v15 }
  0xee   : > { %v10060_v37 = vsel %vm17130_vm1, %v17420_v53, %v1060_v62  ;;  %v1105_v29 = vmul.f32 %v9301_v46, %v10054_v19  ;;  %v17424_v62 = vrot.slane %v9858_v31, 1  ;;  %v17426_v52 = vrot.slane %v9846_v1, 1 }
  0xef   : > { %17421 = vst [vmem:[#allocation39_spill] sm:$0xff] %v10060_v37  ;;  %v1104_v63 = vmul.f32 %v9301_v46, %v10060_v37  ;;  %v629_v15 = vmul.f32 %v9769_v6, %v9238_v17  ;;  %v1006_v33 = vadd.f32 %v982_v39, %v909_v54  ;;  %v1007_v0 = vadd.f32 %v983_v5, %v910_v56  ;;  %v17428_v39 = vld [vmem:[#allocation32_spill] sm:$0xff] }
  0xf0   : > { %v10076_v13 = vsel %vm17137_vm2, %v17424_v62, %v1214_v35  ;;  %v10082_v53 = vsel %vm17137_vm2, %v1214_v35, %v17426_v52  ;;  %v630_v40 = vmul.f32 %v9679_v42, %v9238_v17  ;;  %v17427_v62 = vld [vmem:[#allocation30_spill] sm:$0xff]  ;;  %v728_v35 = vmul.f32 %v9961_v20, %v9251_v25  ;;  %8237 = vmatmul.msk.bf16.gmra.mxu2 %vm290_vm0, %v1301_v47 }
  0xf1   : > { %17425 = vst [vmem:[#allocation29_spill] sm:$0xff] %v10076_v13  ;;  %v1250_v61 = vmul.f32 %v9390_v27, %v10076_v13  ;;  %v1251_v36 = vmul.f32 %v9390_v27, %v10082_v53  ;;  %v653_v30 = vadd.f32 %v629_v15, %v604_v24  ;;  %v727_v4 = vmul.f32 %v17427_v62, %v9251_v25  ;;  %v10105_v15 = vld [vmem:[#allocation2 + $0x70] sm:$0xff] }
  0xf2   : > { %v1128_v52 = vadd.f32 %v1104_v63, %v1006_v33  ;;  %v1129_v6 = vadd.f32 %v1105_v29, %v1007_v0  ;;  %v848_v5 = vmul.f32 %v17428_v39, %v9296_v43  ;;  %v849_v54 = vmul.f32 %v9977_v50, %v9296_v43  ;;  %v17429_v29 = vld [vmem:[#allocation33_spill] sm:$0xff]  ;;  %4841 = vst.msk [vmem:[#allocation2 + $0x70] sm:$0xff] %vm290_vm0, %v17423_v28 }
  0xf3   : > { %v654_v56 = vadd.f32 %v630_v40, %v605_v26  ;;  %v751_v48 = vadd.f32 %v727_v4, %v653_v30  ;;  %v897_v42 = vmul.f32 %v9816_v22, %v9290_v41  ;;  %v898_v24 = vmul.f32 %v9698_v60, %v9290_v41 }
  0xf4   : > { %v1177_v20 = vadd.f32 %v1153_v32, %v1128_v52  ;;  %v1178_v63 = vadd.f32 %v1154_v14, %v1129_v6  ;;  %v994_v33 = vmul.f32 %v17429_v29, %v9299_v45  ;;  %v995_v0 = vmul.f32 %v10002_v10, %v9299_v45 }
  0xf5   : > { %v752_v4 = vadd.f32 %v728_v35, %v654_v56  ;;  %v872_v26 = vadd.f32 %v848_v5, %v751_v48  ;;  %v1064_v47 = vrot.slane %v9965_v55, 7  ;;  %v1165_v40 = vmul.f32 %v9310_v51, %v9965_v55 }
  0xf6   : > { %v1274_v30 = vadd.f32 %v1250_v61, %v1177_v20  ;;  %v1275_v62 = vadd.f32 %v1251_v36, %v1178_v63  ;;  %v1166_v32 = vmul.f32 %v9310_v51, %v9716_v57  ;;  %v1218_v14 = vrot.slane %v9716_v57, 1 }
  0xf7   : > { %v873_v52 = vadd.f32 %v849_v54, %v752_v4  ;;  %v921_v6 = vadd.f32 %v897_v42, %v872_v26  ;;  %v17430_v10 = vrot.slane %v9716_v57, 7  ;;  %v17432_v48 = vrot.slane %v9951_v9, 7 }
  0xf8   : > { %v1296_v61 = vpack.c.bf16 %v1275_v62, %v1274_v30  ;;  %v17433_v56 = vrot.slane %v9965_v55, 1  ;;  %v17436_v4 = vrot.slane %v9951_v9, 1  ;;  %v595_v62 = vmul.f32 %v9381_v23, %v9236_v16 }
  0xf9   : > { %v10123_v35 = vsel %vm17130_vm1, %v1064_v47, %v17430_v10  ;;  %v10129_v5 = vsel %vm17130_vm1, %v17432_v48, %v1064_v47  ;;  %v10141_v10 = vld [vmem:[#allocation2 + $0x88] sm:$0xff]  ;;  %v922_v20 = vadd.f32 %v898_v24, %v873_v52  ;;  %v1018_v63 = vadd.f32 %v994_v33, %v921_v6 }
  0xfa   : > { %17431 = vst [vmem:[#allocation30_spill] sm:$0xff] %v10123_v35  ;;  %v1116_v36 = vmul.f32 %v9301_v46, %v10129_v5  ;;  %v1117_v54 = vmul.f32 %v9301_v46, %v10123_v35  ;;  %v10139_v42 = vsel %vm17137_vm2, %v17433_v56, %v1218_v14  ;;  %v10147_v26 = vsel %vm17137_vm2, %v1218_v14, %v17436_v4  ;;  %v17438_v24 = vld [vmem:[#allocation18_spill] sm:$0xff]  ;;  %v17439_v14 = vld [vmem:[#allocation17_spill] sm:$0xff]  ;;  %v17440_v4 = vld [vmem:[#allocation19_spill] sm:$0xff] }
  0xfb   : > { %17434 = vst [vmem:[#allocation32_spill] sm:$0xff] %v10139_v42  ;;  %v1262_v47 = vmul.f32 %v9390_v27, %v10139_v42  ;;  %8232 = vmatmul.msk.bf16.gmra.mxu0 %vm290_vm0, %v1296_v61  ;;  %v1263_v30 = vmul.f32 %v9390_v27, %v10147_v26  ;;  %v594_v33 = vmul.f32 %v17438_v24, %v9236_v16  ;;  %v17441_v24 = vld [vmem:[#allocation34_spill] sm:$0xff] }
  0xfc   : > { %17435 = vst [vmem:[#allocation33_spill] sm:$0xff] %v10141_v10  ;;  %v619_v52 = vmul.f32 %v17439_v14, %v9238_v17  ;;  %v1019_v6 = vadd.f32 %v995_v0, %v922_v20  ;;  %v1140_v48 = vadd.f32 %v1116_v36, %v1018_v63  ;;  %v620_v56 = vmul.f32 %v9328_v59, %v9238_v17 }
  0xfd   : > { %17437 = vst [vmem:[#allocation40_spill] sm:$0xff] %v10147_v26  ;;  %v717_v61 = vmul.f32 %v17440_v4, %v9251_v25  ;;  %v718_v26 = vmul.f32 %v9410_v34, %v9251_v25  ;;  %v838_v35 = vmul.f32 %v17441_v24, %v9296_v43  ;;  %v839_v23 = vmul.f32 %v10060_v37, %v9296_v43  ;;  %v17442_v37 = vld [vmem:[#allocation25_spill] sm:$0xff] }
  0xfe   : > { %4844 = vst.msk [vmem:[#allocation2 + $0x88] sm:$0xff] %vm290_vm0, %v17423_v28  ;;  %v643_v57 = vadd.f32 %v619_v52, %v594_v33  ;;  %v1141_v14 = vadd.f32 %v1117_v54, %v1019_v6  ;;  %v1189_v0 = vadd.f32 %v1165_v40, %v1140_v48  ;;  %v644_v36 = vadd.f32 %v620_v56, %v595_v62  ;;  %v8548_v54 = vld [vmem:[%s9186_s26 + $0x38] sm:$0xff]   ;;  %v17443_v6 = vld [vmem:[#allocation26_spill] sm:$0xff]  ;;  %v17444_v48 = vld [vmem:[#allocation23_spill] sm:$0xff] }
  0xff   : > { %v887_v59 = vmul.f32 %v9846_v1, %v9290_v41  ;;  %v888_v63 = vmul.f32 %v9858_v31, %v9290_v41  ;;  %v984_v33 = vmul.f32 %v9909_v12, %v9299_v45  ;;  %v985_v34 = vmul.f32 %v10076_v13, %v9299_v45  ;;  %v17446_v13 = vld [vmem:[#allocation28_spill] sm:$0xff] }
 0x100   : > { %v741_v20 = vadd.f32 %v717_v61, %v643_v57  ;;  %v1190_v52 = vadd.f32 %v1166_v32, %v1141_v14  ;;  %v1286_v4 = vadd.f32 %v1262_v47, %v1189_v0  ;;  %v742_v60 = vadd.f32 %v718_v26, %v644_v36  ;;  %v17445_v61 = vld [vmem:[#allocation24_spill] sm:$0xff]  ;;  %v17447_v26 = vld [vmem:[#allocation27_spill] sm:$0xff] }
 0x101   : > { %v1106_v40 = vmul.f32 %v9301_v46, %v17442_v37  ;;  %v1107_v57 = vmul.f32 %v9301_v46, %v17443_v6  ;;  %v1155_v56 = vmul.f32 %v9310_v51, %v17444_v48  ;;  %v1156_v31 = vmul.f32 %v9310_v51, %v17445_v61 }
 0x102   : > { %v862_v62 = vadd.f32 %v838_v35, %v741_v20  ;;  %v1287_v50 = vadd.f32 %v1263_v30, %v1190_v52  ;;  %v863_v10 = vadd.f32 %v839_v23, %v742_v60  ;;  %v1252_v32 = vmul.f32 %v9390_v27, %v17446_v13  ;;  %v10211_v23 = vld [vmem:[#allocation2 + $0xe8] sm:$0xff] }
 0x103   : > { %v1253_v47 = vmul.f32 %v9390_v27, %v17447_v26  ;;  %v8508_v14 = vunpack.c.l.bf16 %v8548_v54  ;;  %v8509_v35 = vunpack.c.h.bf16 %v8548_v54  ;;  %v606_v0 = vmul.f32 %v9852_v21, %v9236_v16  ;;  %6247 = vst.msk [vmem:[#allocation2 + $0xe8] sm:$0xff] %vm290_vm0, %v17423_v28 }
 0x104   : > { %v911_v37 = vadd.f32 %v887_v59, %v862_v62  ;;  %v1302_v36 = vpack.c.bf16 %v1287_v50, %v1286_v4  ;;  %v912_v20 = vadd.f32 %v888_v63, %v863_v10  ;;  %v607_v6 = vmul.f32 %v17428_v39, %v9236_v16 }
 0x105   : > { %v631_v60 = vmul.f32 %v9796_v3, %v9238_v17  ;;  %478 = vst.msk [vmem:[#allocation2 + $0xc0] sm:$0xff] %vm290_vm0, %v8508_v14  ;;  %v632_v27 = vmul.f32 %v9816_v22, %v9238_v17  ;;  %v729_v13 = vmul.f32 %v9887_v18, %v9251_v25  ;;  %v730_v21 = vmul.f32 %v17429_v29, %v9251_v25 }
 0x106   : > { %v1008_v30 = vadd.f32 %v984_v33, %v911_v37  ;;  %8238 = vmatmul.msk.bf16.gmra.mxu2 %vm290_vm0, %v1302_v36  ;;  %v1009_v50 = vadd.f32 %v985_v34, %v912_v20  ;;  %479 = vst.msk [vmem:[#allocation2 + $0xc8] sm:$0xff] %vm290_vm0, %v8509_v35  ;;  %v850_v3 = vmul.f32 %v9994_v7, %v9296_v43  ;;  %v17092_v10 = vrot.slane %v10048_v8, 7 }
 0x107   : > { %v655_v39 = vadd.f32 %v631_v60, %v606_v0  ;;  %v656_v59 = vadd.f32 %v632_v27, %v607_v6  ;;  %v851_v18 = vmul.f32 %v10129_v5, %v9296_v43  ;;  %v899_v29 = vmul.f32 %v9951_v9, %v9290_v41  ;;  %v10234_v0 = vld [vmem:[#allocation2 + $0x100] sm:$0xff] }
 0x108   : > { %v1130_v22 = vadd.f32 %v1106_v40, %v1008_v30  ;;  %v1131_v63 = vadd.f32 %v1107_v57, %v1009_v50  ;;  %v900_v34 = vmul.f32 %v9965_v55, %v9290_v41  ;;  %v996_v52 = vmul.f32 %v10014_v58, %v9299_v45  ;;  %6250 = vst.msk [vmem:[#allocation2 + $0x100] sm:$0xff] %vm290_vm0, %v17423_v28  ;;  %v10250_v60 = vld [vmem:[#allocation2 + $0x60] sm:$0xff] }
 0x109   : > { %v753_v33 = vadd.f32 %v729_v13, %v655_v39  ;;  %v754_v40 = vadd.f32 %v730_v21, %v656_v59  ;;  %v997_v54 = vmul.f32 %v10139_v42, %v9299_v45  ;;  %v17087_v62 = vrot.slane %v10048_v8, 1 }
 0x10a   : > { %v1179_v4 = vadd.f32 %v1155_v56, %v1130_v22  ;;  %v1180_v48 = vadd.f32 %v1156_v31, %v1131_v63  ;;  %v596_v26 = vmul.f32 %v9687_v44, %v9236_v16  ;;  %v597_v57 = vmul.f32 %v17441_v24, %v9236_v16 }
 0x10b   : > { %v874_v61 = vadd.f32 %v850_v3, %v753_v33  ;;  %v875_v14 = vadd.f32 %v851_v18, %v754_v40  ;;  %v621_v35 = vmul.f32 %v9282_v38, %v9238_v17  ;;  %v622_v56 = vmul.f32 %v9846_v1, %v9238_v17  ;;  %v10291_v40 = vld [vmem:[%s17022_s1 + $0x8] ss:$0 sm:$0xff] }
 0x10c   : > { %v1276_v37 = vadd.f32 %v1252_v32, %v1179_v4  ;;  %v1277_v36 = vadd.f32 %v1253_v47, %v1180_v48  ;;  %v10236_v31 = vld [vmem:[#allocation2 + $0xc0] sm:$0xff]  ;;  %v719_v44 = vmul.f32 %v9695_v49, %v9251_v25  ;;  %v720_v24 = vmul.f32 %v9909_v12, %v9251_v25 }
 0x10d   : > { %v923_v20 = vadd.f32 %v899_v29, %v874_v61  ;;  %v924_v32 = vadd.f32 %v900_v34, %v875_v14  ;;  %v10244_v38 = vld [vmem:[#allocation2 + $0xc8] sm:$0xff]  ;;  %v1057_v1 = vrot.slane %v10236_v31, 7  ;;  %v1167_v47 = vmul.f32 %v9310_v51, %v10236_v31 }
 0x10e   : > { %v17088_v6 = vrot.slane %v10236_v31, 1  ;;  %v1297_v30 = vpack.c.bf16 %v1277_v36, %v1276_v37  ;;  %v17090_v27 = vrot.slane %v10244_v38, 7  ;;  %v1168_v12 = vmul.f32 %v9310_v51, %v10244_v38 }
 0x10f   : > { %v1020_v49 = vadd.f32 %v996_v52, %v923_v20  ;;  %v1021_v13 = vadd.f32 %v997_v54, %v924_v32  ;;  %v10259_v21 = vsel %vm17130_vm1, %v17092_v10, %v1057_v1  ;;  %v1211_v50 = vrot.slane %v10244_v38, 1  ;;  %v10286_v52 = vld [vmem:[#allocation2 + $0x68] sm:$0xff] }
 0x110   : > { %v645_v39 = vadd.f32 %v621_v35, %v596_v26  ;;  %8233 = vmatmul.msk.bf16.gmra.mxu0 %vm290_vm0, %v1297_v30  ;;  %v10267_v3 = vsel %vm17130_vm1, %v1057_v1, %v17090_v27  ;;  %v1118_v22 = vmul.f32 %v9301_v46, %v10259_v21  ;;  %v646_v59 = vadd.f32 %v622_v56, %v597_v57  ;;  %v10302_v35 = vld [vmem:[#allocation2 + $0x78] sm:$0xff] }
 0x111   : > { %17448 = vst [vmem:[#allocation18_spill] sm:$0xff] %v10267_v3  ;;  %v17081_v18 = vrot.slane %v10250_v60, 7  ;;  %v1119_v29 = vmul.f32 %v9301_v46, %v10267_v3  ;;  %v10278_v63 = vsel %vm17137_vm2, %v1211_v50, %v17087_v62  ;;  %v10284_v33 = vsel %vm17137_vm2, %v17088_v6, %v1211_v50  ;;  %v10422_v6 = vld [vmem:[#allocation2 + $0x118] sm:$0xff] }
 0x112   : > { %17449 = vst [vmem:[#allocation17_spill] sm:$0xff] %v10278_v63  ;;  %v743_v34 = vadd.f32 %v719_v44, %v645_v39  ;;  %v1142_v4 = vadd.f32 %v1118_v22, %v1020_v49  ;;  %v1264_v54 = vmul.f32 %v10291_v40, %v10284_v33  ;;  %v1265_v48 = vmul.f32 %v10291_v40, %v10278_v63 }
 0x113   : > { %v744_v61 = vadd.f32 %v720_v24, %v646_v59  ;;  %v1143_v26 = vadd.f32 %v1119_v29, %v1021_v13  ;;  %v17086_v57 = vrot.slane %v10105_v15, 7  ;;  %v840_v37 = vmul.f32 %v10054_v19, %v9296_v43  ;;  %v10325_v59 = vld [vmem:[#allocation2 + $0x80] sm:$0xff]  ;;  %6253 = vst.msk [vmem:[#allocation2 + $0x118] sm:$0xff] %vm290_vm0, %v17423_v28 }
 0x114   : > { %v889_v14 = vmul.f32 %v9709_v11, %v9290_v41  ;;  %v1191_v56 = vadd.f32 %v1167_v47, %v1142_v4  ;;  %v890_v36 = vmul.f32 %v9290_v41, %v10250_v60  ;;  %v17079_v20 = vrot.slane %v10250_v60, 1  ;;  %v17450_v29 = vld [vmem:[#allocation33_spill] sm:$0xff] }
 0x115   : > { %v17080_v44 = vrot.slane %v10286_v52, 1  ;;  %v1192_v24 = vadd.f32 %v1168_v12, %v1143_v26  ;;  %v826_v32 = vsel %vm17130_vm1, %v17086_v57, %v17081_v18  ;;  %v864_v1 = vadd.f32 %v840_v37, %v743_v34  ;;  %v17452_v37 = vld [vmem:[#allocation20_spill] sm:$0xff] }
 0x116   : > { %v986_v47 = vmul.f32 %v10082_v53, %v9299_v45  ;;  %v1288_v30 = vadd.f32 %v1264_v54, %v1191_v56  ;;  %v841_v49 = vmul.f32 %v9296_v43, %v826_v32  ;;  %v17082_v13 = vrot.slane %v10302_v35, 7  ;;  %v17451_v54 = vld [vmem:[#allocation35_spill] sm:$0xff] }
 0x117   : > { %v964_v12 = vsel %vm17137_vm2, %v17079_v20, %v17080_v44  ;;  %v1289_v50 = vadd.f32 %v1265_v48, %v1192_v24  ;;  %v913_v39 = vadd.f32 %v889_v14, %v864_v1  ;;  %v17085_v34 = vrot.slane %v17450_v29, 7  ;;  %v8549_v20 = vld [vmem:[%s9186_s26 + $0x40] sm:$0xff]   ;;  %v8550_v44 = vld [vmem:[%s9186_s26 + $0x48] sm:$0xff]  }
 0x118   : > { %v987_v22 = vmul.f32 %v9299_v45, %v964_v12  ;;  %v865_v4 = vadd.f32 %v841_v49, %v744_v61  ;;  %v1108_v26 = vmul.f32 %v9301_v46, %v17451_v54  ;;  %v1157_v56 = vmul.f32 %v9310_v51, %v17452_v37  ;;  %v17453_v54 = vld [vmem:[#allocation36_spill] sm:$0xff] }
 0x119   : > { %v1158_v32 = vmul.f32 %v9310_v51, %v10302_v35  ;;  %v1303_v48 = vpack.c.bf16 %v1289_v50, %v1288_v30  ;;  %v1010_v14 = vadd.f32 %v986_v47, %v913_v39  ;;  %v1094_v61 = vsel %vm17130_vm1, %v17085_v34, %v17082_v13 }
 0x11a   : > { %v17083_v24 = vrot.slane %v10302_v35, 1  ;;  %v914_v1 = vadd.f32 %v890_v36, %v865_v4  ;;  %v1109_v49 = vmul.f32 %v9301_v46, %v1094_v61  ;;  %v17084_v12 = vrot.slane %v10325_v59, 1 }
 0x11b   : > { %v1254_v37 = vmul.f32 %v10291_v40, %v17453_v54  ;;  %8239 = vmatmul.msk.bf16.gmra.mxu2 %vm290_vm0, %v1303_v48  ;;  %v1132_v47 = vadd.f32 %v1108_v26, %v1010_v14  ;;  %v8512_v30 = vunpack.c.l.bf16 %v8549_v20  ;;  %v8513_v50 = vunpack.c.h.bf16 %v8549_v20 }
 0x11c   : > { %v8516_v39 = vunpack.c.l.bf16 %v8550_v44  ;;  %v1011_v18 = vadd.f32 %v987_v22, %v914_v1  ;;  %v1232_v36 = vsel %vm17137_vm2, %v17083_v24, %v17084_v12  ;;  %v8517_v4 = vunpack.c.h.bf16 %v8550_v44  ;;  %v17454_v12 = vld [vmem:[#allocation37_spill] sm:$0xff] }
 0x11d   : > { %v2046_v61 = vmul.f32 %v10259_v21, %v9236_v16  ;;  %v1181_v13 = vadd.f32 %v1157_v56, %v1132_v47  ;;  %v1255_v54 = vmul.f32 %v10291_v40, %v1232_v36  ;;  %480 = vst.msk [vmem:[#allocation2 + $0xd8] sm:$0xff] %vm290_vm0, %v8512_v30  ;;  %v2047_v20 = vmul.f32 %v10267_v3, %v9236_v16 }
 0x11e   : > { %v2070_v22 = vmul.f32 %v10236_v31, %v9238_v17  ;;  %v1133_v26 = vadd.f32 %v1109_v49, %v1011_v18  ;;  %481 = vst.msk [vmem:[#allocation2 + $0xe0] sm:$0xff] %vm290_vm0, %v8513_v50  ;;  %v2071_v44 = vmul.f32 %v10244_v38, %v9238_v17  ;;  %v2166_v48 = vmul.f32 %v10284_v33, %v9251_v25 }
 0x11f   : > { %v2167_v56 = vmul.f32 %v10278_v63, %v9251_v25  ;;  %v1278_v14 = vadd.f32 %v1254_v37, %v1181_v13  ;;  %482 = vst.msk [vmem:[#allocation2 + $0xf0] sm:$0xff] %vm290_vm0, %v8516_v39  ;;  %v17089_v47 = vrot.slane %v10211_v23, 7  ;;  %v17093_v30 = vrot.slane %v10211_v23, 1  ;;  %v17455_v37 = vld [vmem:[#allocation21_spill] sm:$0xff] }
 0x120   : > { %v2094_v1 = vadd.f32 %v2070_v22, %v2046_v61  ;;  %v1182_v18 = vadd.f32 %v1158_v32, %v1133_v26  ;;  %483 = vst.msk [vmem:[#allocation2 + $0xf8] sm:$0xff] %vm290_vm0, %v8517_v4  ;;  %v2095_v49 = vadd.f32 %v2071_v44, %v2047_v20  ;;  %v17100_v50 = vrot.slane %v10234_v0, 7  ;;  %v17456_v4 = vld [vmem:[#allocation38_spill] sm:$0xff] }
 0x121   : > { %v608_v34 = vmul.f32 %v17454_v12, %v9236_v16  ;;  %v609_v13 = vmul.f32 %v9994_v7, %v9236_v16  ;;  %v633_v39 = vmul.f32 %v17455_v37, %v9238_v17  ;;  %v634_v32 = vmul.f32 %v9951_v9, %v9238_v17  ;;  %v17457_v12 = vld [vmem:[#allocation30_spill] sm:$0xff] }
 0x122   : > { %v2190_v24 = vadd.f32 %v2166_v48, %v2094_v1  ;;  %v1279_v61 = vadd.f32 %v1255_v54, %v1182_v18  ;;  %v2191_v22 = vadd.f32 %v2167_v56, %v2095_v49  ;;  %v731_v20 = vmul.f32 %v17456_v4, %v9251_v25  ;;  %v17458_v56 = vld [vmem:[#allocation22_spill] sm:$0xff] }
 0x123   : > { %v657_v26 = vadd.f32 %v633_v39, %v608_v34  ;;  %v732_v44 = vmul.f32 %v10014_v58, %v9251_v25  ;;  %v852_v48 = vmul.f32 %v17457_v12, %v9296_v43  ;;  %v853_v7 = vmul.f32 %v10259_v21, %v9296_v43 }
 0x124   : > { %v1298_v1 = vpack.c.bf16 %v1279_v61, %v1278_v14  ;;  %v10391_v37 = vld [vmem:[#allocation2 + $0xd8] sm:$0xff]  ;;  %v658_v54 = vadd.f32 %v634_v32, %v609_v13  ;;  %v901_v9 = vmul.f32 %v17458_v56, %v9290_v41  ;;  %v902_v18 = vmul.f32 %v10236_v31, %v9290_v41 }
 0x125   : > { %v10397_v34 = vld [vmem:[#allocation2 + $0xe0] sm:$0xff]  ;;  %v2239_v58 = vrot.slane %v10391_v37, 7  ;;  %v2335_v49 = vmul.f32 %v10391_v37, %v9290_v41  ;;  %v17094_v39 = vrot.slane %v10391_v37, 1  ;;  %v755_v21 = vadd.f32 %v731_v20, %v657_v26 }
 0x126   : > { %8234 = vmatmul.msk.bf16.gmra.mxu0 %vm290_vm0, %v1298_v1  ;;  %v17091_v14 = vrot.slane %v10397_v34, 7  ;;  %v2336_v13 = vmul.f32 %v10397_v34, %v9290_v41  ;;  %v2391_v61 = vrot.slane %v10397_v34, 1  ;;  %v10408_v32 = vld [vmem:[#allocation2 + $0xf0] sm:$0xff]  ;;  %v756_v4 = vadd.f32 %v732_v44, %v658_v54 }
 0x127   : > { %v10414_v57 = vsel %vm17130_vm1, %v17089_v47, %v2239_v58  ;;  %v10416_v62 = vld [vmem:[#allocation2 + $0xf8] sm:$0xff]  ;;  %v2504_v20 = vrot.slane %v10408_v32, 7  ;;  %v2600_v26 = vmul.f32 %v10408_v32, %v9310_v51  ;;  %v17462_v42 = vrot.slane %v10234_v0, 1 }
 0x128   : > { %v10428_v44 = vsel %vm17130_vm1, %v2239_v58, %v17091_v14  ;;  %v2287_v54 = vmul.f32 %v10414_v57, %v9296_v43  ;;  %v10436_v47 = vsel %vm17137_vm2, %v2391_v61, %v17093_v30  ;;  %v10442_v27 = vsel %vm17137_vm2, %v17094_v39, %v2391_v61 }
 0x129   : > { %17459 = vst [vmem:[#allocation19_spill] sm:$0xff] %v10428_v44  ;;  %v2288_v58 = vmul.f32 %v10428_v44, %v9296_v43  ;;  %v2431_v14 = vmul.f32 %v10442_v27, %v9299_v45  ;;  %v2432_v10 = vmul.f32 %v10436_v47, %v9299_v45  ;;  %v17103_v30 = vrot.slane %v10416_v62, 7 }
 0x12a   : > { %17460 = vst [vmem:[#allocation34_spill] sm:$0xff] %v10436_v47  ;;  %v2311_v1 = vadd.f32 %v2287_v54, %v2190_v24  ;;  %v10457_v61 = vsel %vm17130_vm1, %v17100_v50, %v2504_v20  ;;  %v2601_v39 = vmul.f32 %v10416_v62, %v9310_v51  ;;  %v2656_v36 = vrot.slane %v10416_v62, 1 }
 0x12b   : > { %v2312_v44 = vadd.f32 %v2288_v58, %v2191_v22  ;;  %v10466_v47 = vsel %vm17130_vm1, %v2504_v20, %v17103_v30  ;;  %v2552_v24 = vmul.f32 %v10457_v61, %v9301_v46  ;;  %v876_v54 = vadd.f32 %v852_v48, %v755_v21 }
 0x12c   : > { %17461 = vst [vmem:[#allocation25_spill] sm:$0xff] %v10466_v47  ;;  %v2359_v63 = vadd.f32 %v2335_v49, %v2311_v1  ;;  %v2553_v50 = vmul.f32 %v10466_v47, %v9301_v46  ;;  %v10476_v3 = vsel %vm17137_vm2, %v2656_v36, %v17462_v42  ;;  %v17463_v22 = vrot.slane %v10408_v32, 1  ;;  %v17464_v47 = vld [vmem:[#allocation40_spill] sm:$0xff] }
 0x12d   : > { %v2360_v58 = vadd.f32 %v2336_v13, %v2312_v44  ;;  %v2697_v49 = vmul.f32 %v10291_v40, %v10476_v3  ;;  %v877_v21 = vadd.f32 %v853_v7, %v756_v4  ;;  %v925_v30 = vadd.f32 %v901_v9, %v876_v54 }
 0x12e   : > { %v10482_v20 = vsel %vm17137_vm2, %v17463_v22, %v2656_v36  ;;  %v2455_v1 = vadd.f32 %v2431_v14, %v2359_v63  ;;  %v998_v42 = vmul.f32 %v17464_v47, %v9299_v45  ;;  %v999_v56 = vmul.f32 %v10284_v33, %v9299_v45 }
 0x12f   : > { %v2696_v48 = vmul.f32 %v10291_v40, %v10482_v20  ;;  %v2456_v28 = vadd.f32 %v2432_v10, %v2360_v58  ;;  %v926_v12 = vadd.f32 %v902_v18, %v877_v21  ;;  %v17465_v36 = vrot.slane %v10048_v8, 7 }
 0x130   : > { %v17466_v13 = vrot.slane %v10244_v38, 7  ;;  %v1121_v63 = vmul.f32 %v10414_v57, %v9301_v46  ;;  %v2576_v7 = vadd.f32 %v2552_v24, %v2455_v1  ;;  %v1022_v9 = vadd.f32 %v998_v42, %v925_v30 }
 0x131   : > { %v1169_v10 = vmul.f32 %v9310_v51, %v10048_v8  ;;  %v2577_v33 = vadd.f32 %v2553_v50, %v2456_v28  ;;  %v1023_v18 = vadd.f32 %v999_v56, %v926_v12  ;;  %v1170_v4 = vmul.f32 %v10391_v37, %v9310_v51  ;;  %v17469_v56 = vld [vmem:[#allocation39_spill] sm:$0xff] }
 0x132   : > { %v10498_v44 = vsel %vm17130_vm1, %v17466_v13, %v17465_v36  ;;  %v17467_v54 = vrot.slane %v10236_v31, 1  ;;  %v17468_v22 = vrot.slane %v10048_v8, 1  ;;  %v2624_v30 = vadd.f32 %v2600_v26, %v2576_v7  ;;  %v17470_v13 = vld [vmem:[#allocation31_spill] sm:$0xff] }
 0x133   : > { %v1120_v14 = vmul.f32 %v9301_v46, %v10498_v44  ;;  %v1267_v28 = vmul.f32 %v10291_v40, %v10442_v27  ;;  %v2625_v50 = vadd.f32 %v2601_v39, %v2577_v33  ;;  %v1145_v12 = vadd.f32 %v1121_v63, %v1023_v18 }
 0x134   : > { %v10514_v58 = vsel %vm17137_vm2, %v17468_v22, %v17467_v54  ;;  %v598_v1 = vmul.f32 %v17469_v56, %v9236_v16  ;;  %v599_v31 = vmul.f32 %v10054_v19, %v9236_v16  ;;  %v2720_v42 = vadd.f32 %v2696_v48, %v2624_v30  ;;  %v17471_v54 = vld [vmem:[#allocation29_spill] sm:$0xff] }
 0x135   : > { %v1144_v24 = vadd.f32 %v1120_v14, %v1022_v9  ;;  %v1266_v21 = vmul.f32 %v10291_v40, %v10514_v58  ;;  %v623_v26 = vmul.f32 %v17470_v13, %v9238_v17  ;;  %v624_v7 = vmul.f32 %v9709_v11, %v9238_v17 }
 0x136   : > { %v2721_v9 = vadd.f32 %v2697_v49, %v2625_v50  ;;  %v1194_v14 = vadd.f32 %v1170_v4, %v1145_v12  ;;  %v721_v39 = vmul.f32 %v17471_v54, %v9251_v25  ;;  %v722_v63 = vmul.f32 %v10082_v53, %v9251_v25 }
 0x137   : > { %v1193_v36 = vadd.f32 %v1169_v10, %v1144_v24  ;;  %v647_v18 = vadd.f32 %v623_v26, %v598_v1  ;;  %v648_v22 = vadd.f32 %v624_v7, %v599_v31  ;;  %v794_v19 = vrot.slane %v10286_v52, 7 }
 0x138   : > { %v2744_v48 = vpack.c.bf16 %v2721_v9, %v2720_v42  ;;  %v1291_v10 = vadd.f32 %v1267_v28, %v1194_v14  ;;  %v891_v30 = vmul.f32 %v9290_v41, %v10286_v52  ;;  %v892_v11 = vmul.f32 %v9290_v41, %v10105_v15 }
 0x139   : > { %v1290_v33 = vadd.f32 %v1266_v21, %v1193_v36  ;;  %v745_v49 = vadd.f32 %v721_v39, %v647_v18  ;;  %v746_v4 = vadd.f32 %v722_v63, %v648_v22  ;;  %v17472_v24 = vrot.slane %v10105_v15, 7  ;;  %v8551_v39 = vld [vmem:[%s9186_s26 + $0x50] sm:$0xff]  }
 0x13a   : > { %v17473_v21 = vrot.slane %v10250_v60, 7  ;;  %8266 = vmatmul.msk.bf16.vlgmr.msra.gmra.mxu1 %vm290_vm0, %v2744_v48  ;;  %v948_v1 = vrot.slane %v10105_v15, 1  ;;  %v1062_v31 = vrot.slane %v10325_v59, 7  ;;  %v1159_v42 = vmul.f32 %v9310_v51, %v10325_v59 }
 0x13b   : > { %v810_v53 = vsel %vm17130_vm1, %v794_v19, %v17472_v24  ;;  %v1304_v28 = vpack.c.bf16 %v1291_v10, %v1290_v33  ;;  %v1160_v36 = vmul.f32 %v9310_v51, %v17450_v29  ;;  %v1216_v13 = vrot.slane %v17450_v29, 1 }
 0x13c   : > { %v818_v50 = vsel %vm17130_vm1, %v17473_v21, %v794_v19  ;;  %v843_v56 = vmul.f32 %v9296_v43, %v810_v53  ;;  %v17474_v9 = vrot.slane %v10286_v52, 1  ;;  %v17475_v15 = vrot.slane %v10250_v60, 1 }
 0x13d   : > { %v842_v12 = vmul.f32 %v9296_v43, %v818_v50  ;;  %8240 = vmatmul.msk.bf16.gmra.mxu2 %vm290_vm0, %v1304_v28  ;;  %v17476_v18 = vrot.slane %v17450_v29, 7  ;;  %v17477_v52 = vrot.slane %v10302_v35, 7  ;;  %v17479_v29 = vrot.slane %v10302_v35, 1 }
 0x13e   : > { %v867_v7 = vadd.f32 %v843_v56, %v746_v4  ;;  %v956_v14 = vsel %vm17137_vm2, %v17474_v9, %v948_v1  ;;  %v972_v54 = vsel %vm17137_vm2, %v948_v1, %v17475_v15  ;;  %v17478_v4 = vrot.slane %v10325_v59, 1 }
 0x13f   : > { %v866_v26 = vadd.f32 %v842_v12, %v745_v49  ;;  %v988_v63 = vmul.f32 %v9299_v45, %v956_v14  ;;  %v989_v33 = vmul.f32 %v9299_v45, %v972_v54  ;;  %v1078_v22 = vsel %vm17130_vm1, %v1062_v31, %v17476_v18 }
 0x140   : > { %v1086_v19 = vsel %vm17130_vm1, %v17477_v52, %v1062_v31  ;;  %v916_v60 = vadd.f32 %v892_v11, %v867_v7  ;;  %v1111_v49 = vmul.f32 %v9301_v46, %v1078_v22  ;;  %v1224_v24 = vsel %vm17137_vm2, %v17478_v4, %v1216_v13 }
 0x141   : > { %v915_v48 = vadd.f32 %v891_v30, %v866_v26  ;;  %v1110_v10 = vmul.f32 %v9301_v46, %v1086_v19  ;;  %v1240_v53 = vsel %vm17137_vm2, %v1216_v13, %v17479_v29  ;;  %v8520_v21 = vunpack.c.l.bf16 %v8551_v39 }
 0x142   : > { %v8521_v50 = vunpack.c.h.bf16 %v8551_v39  ;;  %v1013_v12 = vadd.f32 %v989_v33, %v916_v60  ;;  %v1256_v30 = vmul.f32 %v10291_v40, %v1224_v24  ;;  %v1257_v11 = vmul.f32 %v10291_v40, %v1240_v53 }
 0x143   : > { %v1012_v28 = vadd.f32 %v988_v63, %v915_v48  ;;  %484 = vst.msk [vmem:[#allocation2 + $0x108] sm:$0xff] %vm290_vm0, %v8520_v21  ;;  %v2048_v59 = vmul.f32 %v10498_v44, %v9236_v16  ;;  %v2049_v56 = vmul.f32 %v10414_v57, %v9236_v16  ;;  %v2072_v35 = vmul.f32 %v10048_v8, %v9238_v17 }
 0x144   : > { %v2073_v1 = vmul.f32 %v10391_v37, %v9238_v17  ;;  %v1135_v13 = vadd.f32 %v1111_v49, %v1013_v12  ;;  %485 = vst.msk [vmem:[#allocation2 + $0x110] sm:$0xff] %vm290_vm0, %v8521_v50  ;;  %v2168_v26 = vmul.f32 %v10514_v58, %v9251_v25  ;;  %v2169_v7 = vmul.f32 %v10442_v27, %v9251_v25 }
 0x145   : > { %v1134_v31 = vadd.f32 %v1110_v10, %v1012_v28  ;;  %v2096_v9 = vadd.f32 %v2072_v35, %v2048_v59  ;;  %v17480_v57 = vrot.slane %v10211_v23, 7  ;;  %v17481_v15 = vrot.slane %v10397_v34, 7 }
 0x146   : > { %v2097_v14 = vadd.f32 %v2073_v1, %v2049_v56  ;;  %v2290_v39 = vmul.f32 %v10457_v61, %v9296_v43  ;;  %v1184_v33 = vadd.f32 %v1160_v36, %v1135_v13  ;;  %v2337_v27 = vmul.f32 %v10211_v23, %v9290_v41 }
 0x147   : > { %v10607_v54 = vsel %vm17130_vm1, %v17481_v15, %v17480_v57  ;;  %v1183_v63 = vadd.f32 %v1159_v42, %v1134_v31  ;;  %v2192_v22 = vadd.f32 %v2168_v26, %v2096_v9  ;;  %v2338_v19 = vmul.f32 %v10408_v32, %v9290_v41 }
 0x148   : > { %v2289_v18 = vmul.f32 %v10607_v54, %v9296_v43  ;;  %v2193_v52 = vadd.f32 %v2169_v7, %v2097_v14  ;;  %v17482_v48 = vrot.slane %v10391_v37, 1  ;;  %v17483_v60 = vrot.slane %v10211_v23, 1 }
 0x149   : > { %v1280_v42 = vadd.f32 %v1256_v30, %v1183_v63  ;;  %v1281_v36 = vadd.f32 %v1257_v11, %v1184_v33  ;;  %v2434_v4 = vmul.f32 %v10482_v20, %v9299_v45  ;;  %v2521_v53 = vrot.slane %v10422_v6, 7 }
 0x14a   : > { %v10623_v10 = vsel %vm17137_vm2, %v17483_v60, %v17482_v48  ;;  %v2313_v24 = vadd.f32 %v2289_v18, %v2192_v22  ;;  %v2314_v29 = vadd.f32 %v2290_v39, %v2193_v52  ;;  %v17484_v37 = vrot.slane %v10234_v0, 7  ;;  %v10638_v12 = vld [vmem:[#allocation2 + $0x108] sm:$0xff]  ;;  %v10682_v22 = vld [vmem:[#allocation2 + $0x130] sm:$0xff] }
 0x14b   : > { %v2433_v49 = vmul.f32 %v10623_v10, %v9299_v45  ;;  %v17485_v21 = vrot.slane %v10416_v62, 7  ;;  %v1299_v28 = vpack.c.bf16 %v1281_v36, %v1280_v42  ;;  %v2602_v11 = vmul.f32 %v10234_v0, %v9310_v51  ;;  %v10652_v13 = vld [vmem:[#allocation2 + $0x110] sm:$0xff]  ;;  %v17488_v48 = vld [vmem:[#allocation30_spill] sm:$0xff] }
 0x14c   : > { %v17486_v59 = vrot.slane %v10408_v32, 1  ;;  %v17487_v56 = vrot.slane %v10234_v0, 1  ;;  %v2361_v1 = vadd.f32 %v2337_v27, %v2313_v24  ;;  %v2362_v31 = vadd.f32 %v2338_v19, %v2314_v29  ;;  %v17491_v24 = vld [vmem:[#allocation18_spill] sm:$0xff] }
 0x14d   : > { %v10636_v50 = vsel %vm17130_vm1, %v17485_v21, %v17484_v37  ;;  %v2505_v26 = vrot.slane %v10638_v12, 7  ;;  %v2603_v7 = vmul.f32 %v10638_v12, %v9310_v51  ;;  %8235 = vmatmul.msk.bf16.gmra.mxu0 %vm290_vm0, %v1299_v28  ;;  %v2649_v9 = vrot.slane %v10638_v12, 1 }
 0x14e   : > { %v2554_v30 = vmul.f32 %v10636_v50, %v9301_v46  ;;  %v10650_v35 = vsel %vm17137_vm2, %v17487_v56, %v17486_v59  ;;  %v2657_v14 = vrot.slane %v10652_v13, 1  ;;  %v2457_v15 = vadd.f32 %v2433_v49, %v2361_v1  ;;  %v17490_v49 = vld [vmem:[#allocation22_spill] sm:$0xff]  ;;  %v17492_v1 = vld [vmem:[#allocation32_spill] sm:$0xff] }
 0x14f   : > { %v2698_v57 = vmul.f32 %v10291_v40, %v10650_v35  ;;  %v2458_v39 = vadd.f32 %v2434_v4, %v2362_v31  ;;  %v10668_v63 = vsel %vm17130_vm1, %v2521_v53, %v2505_v26  ;;  %v635_v33 = vmul.f32 %v9965_v55, %v9238_v17 }
 0x150   : > { %v2555_v18 = vmul.f32 %v10668_v63, %v9301_v46  ;;  %v10680_v27 = vsel %vm17137_vm2, %v2649_v9, %v2657_v14  ;;  %v2578_v52 = vadd.f32 %v2554_v30, %v2457_v15  ;;  %v610_v55 = vmul.f32 %v10129_v5, %v9236_v16 }
 0x151   : > { %v2699_v19 = vmul.f32 %v10291_v40, %v10680_v27  ;;  %v611_v60 = vmul.f32 %v17488_v48, %v9236_v16  ;;  %v17489_v42 = vmov 0.0   ;;  %v636_v4 = vmul.f32 %v17490_v49, %v9238_v17 }
 0x152   : > { %6256 = vst.msk [vmem:[#allocation2 + $0x130] sm:$0xff] %vm290_vm0, %v17489_v42  ;;  %v2579_v36 = vadd.f32 %v2555_v18, %v2458_v39  ;;  %v854_v29 = vmul.f32 %v17491_v24, %v9296_v43  ;;  %v2626_v37 = vadd.f32 %v2602_v11, %v2578_v52  ;;  %v659_v21 = vadd.f32 %v635_v33, %v610_v55  ;;  %v17493_v33 = vld [vmem:[#allocation17_spill] sm:$0xff] }
 0x153   : > { %v855_v28 = vmul.f32 %v10498_v44, %v9296_v43  ;;  %v903_v5 = vmul.f32 %v10244_v38, %v9290_v41  ;;  %v660_v59 = vadd.f32 %v636_v4, %v611_v60  ;;  %v733_v31 = vmul.f32 %v17492_v1, %v9251_v25  ;;  %v17494_v38 = vld [vmem:[#allocation19_spill] sm:$0xff] }
 0x154   : > { %v2627_v30 = vadd.f32 %v2603_v7, %v2579_v36  ;;  %v2722_v56 = vadd.f32 %v2698_v57, %v2626_v37  ;;  %v734_v15 = vmul.f32 %v17464_v47, %v9251_v25  ;;  %v904_v39 = vmul.f32 %v10048_v8, %v9290_v41 }
 0x155   : > { %v1000_v18 = vmul.f32 %v17493_v33, %v9299_v45  ;;  %v1001_v44 = vmul.f32 %v10514_v58, %v9299_v45  ;;  %v1122_v7 = vmul.f32 %v17494_v38, %v9301_v46  ;;  %v757_v57 = vadd.f32 %v733_v31, %v659_v21 }
 0x156   : > { %v2723_v11 = vadd.f32 %v2699_v19, %v2627_v30  ;;  %v758_v52 = vadd.f32 %v734_v15, %v660_v59  ;;  %v1123_v55 = vmul.f32 %v10607_v54, %v9301_v46  ;;  %v1171_v47 = vmul.f32 %v10397_v34, %v9310_v51  ;;  %v17495_v19 = vld [vmem:[#allocation34_spill] sm:$0xff] }
 0x157   : > { %v1172_v8 = vmul.f32 %v10211_v23, %v9310_v51  ;;  %v1268_v60 = vmul.f32 %v10291_v40, %v17495_v19  ;;  %v1269_v58 = vmul.f32 %v10291_v40, %v10623_v10  ;;  %v878_v36 = vadd.f32 %v854_v29, %v757_v57 }
 0x158   : > { %v2745_v48 = vpack.c.bf16 %v2723_v11, %v2722_v56  ;;  %v879_v49 = vadd.f32 %v855_v28, %v758_v52  ;;  %v2050_v4 = vmul.f32 %v17494_v38, %v9236_v16  ;;  %v2051_v24 = vmul.f32 %v10607_v54, %v9236_v16  ;;  %v17496_v56 = vld [vmem:[#allocation25_spill] sm:$0xff] }
 0x159   : > { %v2074_v37 = vmul.f32 %v10397_v34, %v9238_v17  ;;  %v2075_v21 = vmul.f32 %v10211_v23, %v9238_v17  ;;  %v2170_v30 = vmul.f32 %v17495_v19, %v9251_v25  ;;  %v2171_v29 = vmul.f32 %v10623_v10, %v9251_v25 }
 0x15a   : > { %8267 = vmatmul.msk.bf16.gmra.mxu1 %vm290_vm0, %v2745_v48  ;;  %v927_v28 = vadd.f32 %v903_v5, %v878_v36  ;;  %v928_v59 = vadd.f32 %v904_v39, %v879_v49  ;;  %v2291_v1 = vmul.f32 %v17496_v56, %v9296_v43  ;;  %v2292_v54 = vmul.f32 %v10636_v50, %v9296_v43  ;;  %v8472_v48 = vld [vmem:[%s17023_s2 + $0x38] sm:$0xff] }
 0x15b   : > { %v2098_v31 = vadd.f32 %v2074_v37, %v2050_v4  ;;  %v2099_v15 = vadd.f32 %v2075_v21, %v2051_v24  ;;  %v2339_v34 = vmul.f32 %v10416_v62, %v9290_v41  ;;  %v2340_v23 = vmul.f32 %v10234_v0, %v9290_v41  ;;  %4261 = vmatpush.bf16.msrb.mxu2 %v8472_v48 }
 0x15c   : > { %v1024_v11 = vadd.f32 %v1000_v18, %v927_v28  ;;  %v1025_v33 = vadd.f32 %v1001_v44, %v928_v59  ;;  %v2435_v10 = vmul.f32 %v10476_v3, %v9299_v45  ;;  %v2436_v5 = vmul.f32 %v10650_v35, %v9299_v45  ;;  %5676 = vmatpush.bf16.msrb.mxu3 %v8472_v48 }
 0x15d   : > { %v2194_v39 = vadd.f32 %v2170_v30, %v2098_v31  ;;  %v2195_v38 = vadd.f32 %v2171_v29, %v2099_v15  ;;  %v2513_v57 = vrot.slane %v10652_v13, 7  ;;  %v2604_v52 = vmul.f32 %v10652_v13, %v9310_v51  ;;  %v8552_v29 = vld [vmem:[%s9186_s26 + $0x58] sm:$0xff]  }
 0x15e   : > { %v1146_v18 = vadd.f32 %v1122_v7, %v1024_v11  ;;  %v1147_v44 = vadd.f32 %v1123_v55, %v1025_v33  ;;  %v2605_v19 = vmul.f32 %v10422_v6, %v9310_v51  ;;  %v2665_v36 = vrot.slane %v10422_v6, 1 }
 0x15f   : > { %v2315_v49 = vadd.f32 %v2291_v1, %v2194_v39  ;;  %v2316_v4 = vadd.f32 %v2292_v54, %v2195_v38  ;;  %v10760_v24 = vsel %vm17130_vm1, %v2513_v57, %v2521_v53  ;;  %v10766_v37 = vsel %vm17130_vm1, %v2505_v26, %v2513_v57  ;;  %v10809_v38 = vld [vmem:[%s17024_s3] ss:$0 sm:$0xff] }
 0x160   : > { %v1195_v7 = vadd.f32 %v1171_v47, %v1146_v18  ;;  %v1196_v55 = vadd.f32 %v1172_v8, %v1147_v44  ;;  %v2556_v21 = vmul.f32 %v10766_v37, %v9301_v46  ;;  %v2557_v30 = vmul.f32 %v10760_v24, %v9301_v46  ;;  %v8553_v44 = vld [vmem:[%s9186_s26 + $0x60] sm:$0xff]  }
 0x161   : > { %v2363_v28 = vadd.f32 %v2339_v34, %v2315_v49  ;;  %v2364_v53 = vadd.f32 %v2340_v23, %v2316_v4  ;;  %v10777_v59 = vsel %vm17137_vm2, %v2657_v14, %v2665_v36  ;;  %v10783_v26 = vsel %vm17137_vm2, %v2665_v36, %v2649_v9  ;;  %v1378_v14 = vpop.f32.mrf.mxu0 }
 0x162   : > { %v1292_v47 = vadd.f32 %v1268_v60, %v1195_v7  ;;  %v1293_v8 = vadd.f32 %v1269_v58, %v1196_v55  ;;  %v2700_v1 = vmul.f32 %v10291_v40, %v10777_v59  ;;  %v2701_v54 = vmul.f32 %v10291_v40, %v10783_v26 }
 0x163   : > { %v2459_v31 = vadd.f32 %v2435_v10, %v2363_v28  ;;  %v2460_v15 = vadd.f32 %v2436_v5, %v2364_v53  ;;  %v8524_v34 = vunpack.c.l.bf16 %v8552_v29  ;;  %v8525_v23 = vunpack.c.h.bf16 %v8552_v29 }
 0x164   : > { %v1305_v11 = vpack.c.bf16 %v1293_v8, %v1292_v47  ;;  %v2052_v33 = vmul.f32 %v10457_v61, %v9236_v16  ;;  %v2053_v9 = vmul.f32 %v17496_v56, %v9236_v16  ;;  %v2076_v60 = vmul.f32 %v10408_v32, %v9238_v17 }
 0x165   : > { %v2580_v58 = vadd.f32 %v2556_v21, %v2459_v31  ;;  %v2581_v39 = vadd.f32 %v2557_v30, %v2460_v15  ;;  %486 = vst.msk [vmem:[#allocation2 + $0x120] sm:$0xff] %vm290_vm0, %v8524_v34  ;;  %v2077_v10 = vmul.f32 %v10416_v62, %v9238_v17  ;;  %v2172_v5 = vmul.f32 %v10482_v20, %v9251_v25  ;;  %v10811_v62 = vld [vmem:[#allocation2 + $0x148] sm:$0xff] }
 0x166   : > { %8241 = vmatmul.msk.bf16.gmra.mxu2 %vm290_vm0, %v1305_v11  ;;  %487 = vst.msk [vmem:[#allocation2 + $0x128] sm:$0xff] %vm290_vm0, %v8525_v23  ;;  %v2100_v61 = vadd.f32 %v2076_v60, %v2052_v33  ;;  %v2173_v56 = vmul.f32 %v10476_v3, %v9251_v25  ;;  %v2293_v32 = vmul.f32 %v10668_v63, %v9296_v43  ;;  %v2522_v4 = vrot.slane %v10682_v22, 7 }
 0x167   : > { %v2628_v57 = vadd.f32 %v2604_v52, %v2580_v58  ;;  %v2629_v20 = vadd.f32 %v2605_v19, %v2581_v39  ;;  %v2101_v48 = vadd.f32 %v2077_v10, %v2053_v9  ;;  %v2294_v18 = vmul.f32 %v10766_v37, %v9296_v43  ;;  %6259 = vst.msk [vmem:[#allocation2 + $0x148] sm:$0xff] %vm290_vm0, %v17489_v42 }
 0x168   : > { %v2196_v3 = vadd.f32 %v2172_v5, %v2100_v61  ;;  %v2341_v36 = vmul.f32 %v10638_v12, %v9290_v41  ;;  %v2342_v49 = vmul.f32 %v10652_v13, %v9290_v41  ;;  %v2437_v55 = vmul.f32 %v10680_v27, %v9299_v45 }
 0x169   : > { %v2724_v7 = vadd.f32 %v2700_v1, %v2628_v57  ;;  %v2725_v52 = vadd.f32 %v2701_v54, %v2629_v20  ;;  %v2197_v19 = vadd.f32 %v2173_v56, %v2101_v48  ;;  %v2438_v30 = vmul.f32 %v10777_v59, %v9299_v45  ;;  %v10847_v58 = vpop.f32.mrf.mxu0 }
 0x16a   : > { %v2317_v21 = vadd.f32 %v2293_v32, %v2196_v3  ;;  %v10828_v29 = vadd.f32 %v10809_v38, %v1378_v14  ;;  %v8528_v28 = vunpack.c.l.bf16 %v8553_v44  ;;  %v2666_v8 = vrot.slane %v10682_v22, 1 }
 0x16b   : > { %v2746_v53 = vpack.c.bf16 %v2725_v52, %v2724_v7  ;;  %v2318_v47 = vadd.f32 %v2294_v18, %v2197_v19  ;;  %v8529_v31 = vunpack.c.h.bf16 %v8553_v44  ;;  %v2054_v34 = vmul.f32 %v10636_v50, %v9236_v16  ;;  %v10849_v50 = vld [vmem:[#allocation2 + $0x160] sm:$0xff] }
 0x16c   : > { %v2365_v15 = vadd.f32 %v2341_v36, %v2317_v21  ;;  %v10831_v1 = vld [vmem:[#allocation2 + $0x120] sm:$0xff]  ;;  %v8242_v54 = vmul.f32 -1.442695, %v10828_v29  ;;  %488 = vst.msk [vmem:[#allocation2 + $0x138] sm:$0xff] %vm290_vm0, %v8528_v28  ;;  %v2055_v23 = vmul.f32 %v10668_v63, %v9236_v16  ;;  %v2078_v60 = vmul.f32 %v10234_v0, %v9238_v17 }
 0x16d   : > { %8268 = vmatmul.msk.bf16.gmra.mxu1 %vm290_vm0, %v2746_v53  ;;  %v2366_v14 = vadd.f32 %v2342_v49, %v2318_v47  ;;  %v10840_v11 = vld [vmem:[#allocation2 + $0x128] sm:$0xff]  ;;  %v2506_v33 = vrot.slane %v10831_v1, 7  ;;  %v2650_v9 = vrot.slane %v10831_v1, 1  ;;  %489 = vst.msk [vmem:[#allocation2 + $0x140] sm:$0xff] %vm290_vm0, %v8529_v31  ;;  %v2606_v10 = vmul.f32 %v10831_v1, %v9310_v51 }
 0x16e   : > { %v2461_v39 = vadd.f32 %v2437_v55, %v2365_v15  ;;  %v2514_v63 = vrot.slane %v10840_v11, 7  ;;  %v2658_v5 = vrot.slane %v10840_v11, 1  ;;  %6262 = vst.msk [vmem:[#allocation2 + $0x160] sm:$0xff] %vm290_vm0, %v17489_v42  ;;  %8633 = vpow2.f32 %v8242_v54 }
 0x16f   : > { %v2462_v61 = vadd.f32 %v2438_v30, %v2366_v14  ;;  %v10861_v0 = vsel %vm17130_vm1, %v2522_v4, %v2506_v33  ;;  %v2079_v56 = vmul.f32 %v10638_v12, %v9238_v17  ;;  %v2607_v18 = vmul.f32 %v10840_v11, %v9310_v51 }
 0x170   : > { %v10867_v32 = vsel %vm17130_vm1, %v2506_v33, %v2514_v63  ;;  %v2558_v57 = vmul.f32 %v10861_v0, %v9301_v46  ;;  %v10875_v20 = vsel %vm17137_vm2, %v2658_v5, %v2666_v8  ;;  %v10881_v48 = vsel %vm17137_vm2, %v2650_v9, %v2658_v5 }
 0x171   : > { %v2559_v12 = vmul.f32 %v10867_v32, %v9301_v46  ;;  %v2702_v44 = vmul.f32 %v10291_v40, %v10881_v48  ;;  %v2102_v3 = vadd.f32 %v2078_v60, %v2054_v34  ;;  %v2103_v49 = vadd.f32 %v2079_v56, %v2055_v23  ;;  %v1383_v14 = vpop.f32.mrf.mxu0 }
 0x172   : > { %v2582_v36 = vadd.f32 %v2558_v57, %v2461_v39  ;;  %v2174_v7 = vmul.f32 %v10650_v35, %v9251_v25  ;;  %v2175_v52 = vmul.f32 %v10680_v27, %v9251_v25  ;;  %v2703_v55 = vmul.f32 %v10291_v40, %v10875_v20 }
 0x173   : > { %v2583_v19 = vadd.f32 %v2559_v12, %v2462_v61  ;;  %v2295_v21 = vmul.f32 %v10760_v24, %v9296_v43  ;;  %v2296_v30 = vmul.f32 %v10861_v0, %v9296_v43  ;;  %v10899_v28 = vld [vmem:[#allocation2 + $0x138] sm:$0xff]  ;;  %v2343_v35 = vmul.f32 %v10422_v6, %v9290_v41 }
 0x174   : > { %v2630_v53 = vadd.f32 %v2606_v10, %v2582_v36  ;;  %v2198_v47 = vadd.f32 %v2174_v7, %v2102_v3  ;;  %v2199_v31 = vadd.f32 %v2175_v52, %v2103_v49  ;;  %v8634_v15 = vpop.eup %8633  ;;  %v2344_v54 = vmul.f32 %v10831_v1, %v9290_v41  ;;  %v1408_v36 = vpop.f32.mrf.mxu2  ;;  %v8554_v52 = vld [vmem:[%s9186_s26 + $0x68] sm:$0xff]  }
 0x175   : > { %v2631_v27 = vadd.f32 %v2607_v18, %v2583_v19  ;;  %v2439_v34 = vmul.f32 %v10783_v26, %v9299_v45  ;;  %v2507_v23 = vrot.slane %v10899_v28, 7  ;;  %v10908_v60 = vadd.f32 1.0, %v8634_v15 }
 0x176   : > { %v2726_v33 = vadd.f32 %v2702_v44, %v2630_v53  ;;  %v2319_v39 = vadd.f32 %v2295_v21, %v2198_v47  ;;  %v2320_v10 = vadd.f32 %v2296_v30, %v2199_v31  ;;  %v2440_v61 = vmul.f32 %v10881_v48, %v9299_v45  ;;  %v10936_v21 = vld [vmem:[#allocation2 + $0x140] sm:$0xff] }
 0x177   : > { %v2727_v5 = vadd.f32 %v2703_v55, %v2631_v27  ;;  %v17112_v56 = vrot.slane %v10811_v62, 7  ;;  %v10917_v57 = vsel %vm17130_vm1, %v2514_v63, %v2522_v4  ;;  %8635 = vrcp.f32 %v10908_v60 }
 0x178   : > { %v2367_v18 = vadd.f32 %v2343_v35, %v2319_v39  ;;  %v2368_v44 = vadd.f32 %v2344_v54, %v2320_v10  ;;  %v1543_v49 = vand.u32 2147483647, %v10908_v60  ;;  %v2560_v4 = vmul.f32 %v10917_v57, %v9301_v46 }
 0x179   : > { %v2747_v12 = vpack.c.bf16 %v2727_v5, %v2726_v33  ;;  %v10926_v3 = vsel %vm17130_vm1, %v17112_v56, %v2507_v23  ;;  %v2608_v7 = vmul.f32 %v10682_v22, %v9310_v51  ;;  %v2609_v30 = vmul.f32 %v10899_v28, %v9310_v51 }
 0x17a   : > { %v2561_v63 = vmul.f32 %v10926_v3, %v9301_v46  ;;  %v2463_v19 = vadd.f32 %v2439_v34, %v2367_v18  ;;  %v2464_v55 = vadd.f32 %v2440_v61, %v2368_v44  ;;  %v17110_v53 = vrot.slane %v10899_v28, 1 }
 0x17b   : > { %v2659_v47 = vrot.slane %v10936_v21, 1  ;;  %v10948_v31 = vsel %vm17137_vm2, %v2666_v8, %v2650_v9  ;;  %v10952_v35 = vadd.f32 %v10809_v38, %v10847_v58  ;;  %v10955_v15 = vadd.f32 %v10809_v38, %v1408_v36 }
 0x17c   : > { %vm1539_vm3 = vweird.f32 %v10908_v60  ;;  %v1545_v27 = vand.u32 2147483648, %v10908_v60  ;;  %v2584_v54 = vadd.f32 %v2560_v4, %v2463_v19  ;;  %v2585_v34 = vadd.f32 %v2561_v63, %v2464_v55 }
 0x17d   : > { %8269 = vmatmul.msk.bf16.gmra.mxu1 %vm290_vm0, %v2747_v12  ;;  %v8532_v14 = vunpack.c.l.bf16 %v8554_v52  ;;  %v8636_v33 = vpop.eup %8635  ;;  %v10964_v8 = vsel %vm17137_vm2, %v17110_v53, %v2659_v47  ;;  %v8243_v9 = vmul.f32 -1.442695, %v10952_v35  ;;  %v8254_v58 = vmul.f32 -1.442695, %v10955_v15 }
 0x17e   : > { %v8533_v39 = vunpack.c.h.bf16 %v8554_v52  ;;  %v1535_v10 = vmul.f32 %v8636_v33, %v10908_v60  ;;  %v2632_v5 = vadd.f32 %v2608_v7, %v2584_v54  ;;  %v2633_v61 = vadd.f32 %v2609_v30, %v2585_v34  ;;  %v10985_v52 = vpop.f32.mrf.mxu2 }
 0x17f   : > { %v2704_v12 = vmul.f32 %v10291_v40, %v10948_v31  ;;  %490 = vst.msk [vmem:[#allocation2 + $0x150] sm:$0xff] %vm290_vm0, %v8532_v14  ;;  %v2705_v18 = vmul.f32 %v10291_v40, %v10964_v8  ;;  %8637 = vpow2.f32 %v8243_v9  ;;  %v2058_v44 = vmul.f32 %v10861_v0, %v9236_v16 }
 0x180   : > { %491 = vst.msk [vmem:[#allocation2 + $0x158] sm:$0xff] %vm290_vm0, %v8533_v39  ;;  %v2059_v36 = vmul.f32 %v10867_v32, %v9236_v16  ;;  %v1536_v4 = vsub.f32 1.0, %v1535_v10  ;;  %vm10979_vm4 = vcmp.eq.f32.partialorder %v1543_v49, 8.507059e+37  ;;  %8639 = vpow2.f32 %v8254_v58 }
 0x181   : > { %v2082_v7 = vmul.f32 %v10831_v1, %v9238_v17  ;;  %vm1540_vm5 = vweird.f32 %v8636_v33  ;;  %v2083_v40 = vmul.f32 %v10840_v11, %v9238_v17  ;;  %v2178_v0 = vmul.f32 %v10881_v48, %v9251_v25 }
 0x182   : > { %v2179_v19 = vmul.f32 %v10875_v20, %v9251_v25  ;;  %v1537_v49 = vmul.f32 %v8636_v33, %v1536_v4  ;;  %v17111_v30 = vrot.slane %v10936_v21, 7  ;;  %v2299_v54 = vmul.f32 %v10926_v3, %v9296_v43  ;;  %vm1541_vm6 = vmor %vm1539_vm3, %vm1540_vm5 }
 0x183   : > { %v2106_v55 = vadd.f32 %v2082_v7, %v2058_v44  ;;  %v1546_v1 = vor.u32 1.1754944e-38, %v1545_v27  ;;  %v2728_v34 = vadd.f32 %v2704_v12, %v2632_v5  ;;  %v2729_v14 = vadd.f32 %v2705_v18, %v2633_v61 }
 0x184   : > { %v2107_v9 = vadd.f32 %v2083_v40, %v2059_v36  ;;  %v1538_v58 = vadd.f32 %v8636_v33, %v1537_v49  ;;  %v11002_v48 = vsel %vm17130_vm1, %v2507_v23, %v17111_v30  ;;  %v17109_v10 = vrot.slane %v10811_v62, 1 }
 0x185   : > { %v2202_v39 = vadd.f32 %v2178_v0, %v2106_v55  ;;  %v8638_v44 = vpop.eup %8637  ;;  %v2300_v5 = vmul.f32 %v11002_v48, %v9296_v43  ;;  %v2347_v61 = vmul.f32 %v10899_v28, %v9290_v41  ;;  %v2348_v12 = vmul.f32 %v10936_v21, %v9290_v41 }
 0x186   : > { %v2203_v27 = vadd.f32 %v2179_v19, %v2107_v9  ;;  %v8640_v18 = vpop.eup %8639  ;;  %v1542_v23 = vsel %vm1541_vm6, %v8636_v33, %v1538_v58  ;;  %v11014_v36 = vadd.f32 1.0, %v8638_v44  ;;  %v11020_v60 = vsel %vm17137_vm2, %v2659_v47, %v17109_v10  ;;  %v1413_v63 = vpop.f32.mrf.mxu2 }
 0x187   : > { %v2323_v4 = vadd.f32 %v2299_v54, %v2202_v39  ;;  %v1547_v7 = vsel %vm10979_vm4, %v1546_v1, %v1542_v23  ;;  %v2748_v40 = vpack.c.bf16 %v2729_v14, %v2728_v34  ;;  %v11024_v0 = vadd.f32 1.0, %v8640_v18  ;;  %v11032_v54 = vld [vmem:[#allocation2 + $0x150] sm:$0xff]  ;;  %v11034_v47 = vld [vmem:[#allocation2 + $0x158] sm:$0xff] }
 0x188   : > { %v2324_v19 = vadd.f32 %v2300_v5, %v2203_v27  ;;  %v1894_v49 = vmul.f32 %v1547_v7, %v10828_v29  ;;  %8641 = vrcp.f32 %v11014_v36  ;;  %v2443_v33 = vmul.f32 %v10964_v8, %v9299_v45 }
 0x189   : > { %v2444_v55 = vmul.f32 %v11020_v60, %v9299_v45  ;;  %v1560_v34 = vand.u32 2147483648, %v11014_v36  ;;  %8643 = vrcp.f32 %v11024_v0  ;;  %v17108_v29 = vrot.slane %v10849_v50, 7 }
 0x18a   : > { %1949 = vst.msk [vmem:[#allocation3 + $0x18] sm:$0xff] %vm290_vm0, %v1894_v49  ;;  %v1723_v14 = vand.u32 2147483647, %v11024_v0  ;;  %v1725_v9 = vand.u32 2147483648, %v11024_v0  ;;  %v2371_v58 = vadd.f32 %v2347_v61, %v2323_v4  ;;  %v2372_v39 = vadd.f32 %v2348_v12, %v2324_v19 }
 0x18b   : > { %v11043_v44 = vor.u32 1.1754944e-38, %v1560_v34  ;;  %vm1719_vm7 = vweird.f32 %v11024_v0  ;;  %v2508_v27 = vrot.slane %v11032_v54, 7  ;;  %v17107_v5 = vrot.slane %v11034_v47, 7 }
 0x18c   : > { %v11049_v18 = vor.u32 1.1754944e-38, %v1725_v9  ;;  %v2467_v23 = vadd.f32 %v2443_v33, %v2371_v58  ;;  %v2468_v7 = vadd.f32 %v2444_v55, %v2372_v39  ;;  %v2612_v49 = vmul.f32 %v11032_v54, %v9310_v51 }
 0x18d   : > { %8270 = vmatmul.msk.bf16.gmra.mxu1 %vm290_vm0, %v2748_v40  ;;  %vm1554_vm8 = vweird.f32 %v11014_v36  ;;  %v11058_v61 = vsel %vm17130_vm1, %v2508_v27, %v17107_v5  ;;  %v11064_v12 = vsel %vm17130_vm1, %v17108_v29, %v2508_v27  ;;  %v2613_v4 = vmul.f32 %v11034_v47, %v9310_v51  ;;  %v8471_v27 = vld [vmem:[%s17023_s2 + $0x30] sm:$0xff]  ;;  %v11089_v29 = vpop.f32.mrf.mxu0 }
 0x18e   : > { %v2652_v40 = vrot.slane %v11032_v54, 1  ;;  %v8642_v19 = vpop.eup %8641  ;;  %vm11069_vm9 = vcmp.eq.f32.partialorder %v1723_v14, 8.507059e+37  ;;  %v2564_v55 = vmul.f32 %v11064_v12, %v9301_v46  ;;  %v2565_v63 = vmul.f32 %v11058_v61, %v9301_v46  ;;  %4262 = vmatpush.bf16.msrb.mxu2 %v8471_v27  ;;  %5677 = vmatpush.bf16.msrb.mxu3 %v8471_v27 }
 0x18f   : > { %v2660_v34 = vrot.slane %v11034_v47, 1  ;;  %v17114_v9 = vrot.slane %v10849_v50, 1  ;;  %v8644_v58 = vpop.eup %8643  ;;  %v1550_v39 = vmul.f32 %v8642_v19, %v11014_v36  ;;  %vm1555_vm10 = vweird.f32 %v8642_v19 }
 0x190   : > { %v11082_v14 = vadd.f32 %v10809_v38, %v10985_v52  ;;  %v2056_v5 = vmul.f32 %v10766_v37, %v9236_v16  ;;  %v1715_v10 = vmul.f32 %v8644_v58, %v11024_v0  ;;  %vm1720_vm11 = vweird.f32 %v8644_v58  ;;  %vm1556_vm13 = vmor %vm1554_vm8, %vm1555_vm10 }
 0x191   : > { %v2588_v53 = vadd.f32 %v2564_v55, %v2467_v23  ;;  %v2589_v30 = vadd.f32 %v2565_v63, %v2468_v7  ;;  %v1551_v56 = vsub.f32 1.0, %v1550_v39  ;;  %v11096_v52 = vsel %vm17137_vm2, %v2660_v34, %v17114_v9  ;;  %v11108_v55 = vld [vmem:[%s17022_s1 + $0x8] ss:$0 sm:$0xff]  ;;  %vm11123_vm12 = vmor %vm1719_vm7, %vm1720_vm11 }
 0x192   : > { %v11102_v1 = vsel %vm17137_vm2, %v2652_v40, %v2660_v34  ;;  %v8255_v37 = vmul.f32 -1.442695, %v11082_v14  ;;  %v1716_v42 = vsub.f32 1.0, %v1715_v10  ;;  %v2709_v34 = vmul.f32 %v11108_v55, %v11096_v52 }
 0x193   : > { %v2636_v23 = vadd.f32 %v2612_v49, %v2588_v53  ;;  %v2637_v7 = vadd.f32 %v2613_v4, %v2589_v30  ;;  %v2708_v63 = vmul.f32 %v11108_v55, %v11102_v1  ;;  %v1552_v39 = vmul.f32 %v8642_v19, %v1551_v56 }
 0x194   : > { %8645 = vpow2.f32 %v8255_v37  ;;  %v2057_v9 = vmul.f32 %v10760_v24, %v9236_v16  ;;  %v1717_v27 = vmul.f32 %v8644_v58, %v1716_v42  ;;  %v2080_v53 = vmul.f32 %v10652_v13, %v9238_v17 }
 0x195   : > { %v2732_v10 = vadd.f32 %v2708_v63, %v2636_v23  ;;  %v2081_v30 = vmul.f32 %v10422_v6, %v9238_v17  ;;  %v1553_v49 = vadd.f32 %v8642_v19, %v1552_v39  ;;  %v2733_v4 = vadd.f32 %v2709_v34, %v2637_v7 }
 0x196   : > { %v2176_v24 = vmul.f32 %v10777_v59, %v9251_v25  ;;  %v2177_v42 = vmul.f32 %v10783_v26, %v9251_v25  ;;  %v1718_v6 = vadd.f32 %v8644_v58, %v1717_v27  ;;  %v2104_v13 = vadd.f32 %v2080_v53, %v2056_v5 }
 0x197   : > { %v2105_v37 = vadd.f32 %v2081_v30, %v2057_v9  ;;  %v2297_v0 = vmul.f32 %v10867_v32, %v9296_v43  ;;  %v1557_v23 = vsel %vm1556_vm13, %v8642_v19, %v1553_v49  ;;  %v17503_v63 = vand.u32 2147483647, %v11014_v36  ;;  %v11152_v19 = vpop.f32.mrf.mxu0  ;;  %v11170_v49 = vpop.f32.mrf.mxu2 }
 0x198   : > { %v2750_v7 = vpack.c.bf16 %v2733_v4, %v2732_v10  ;;  %v2298_v59 = vmul.f32 %v10917_v57, %v9296_v43  ;;  %v1722_v39 = vsel %vm11123_vm12, %v8644_v58, %v1718_v6  ;;  %v2200_v34 = vadd.f32 %v2176_v24, %v2104_v13  ;;  %v8555_v13 = vld [vmem:[%s9186_s26 + $0x70] sm:$0xff]  }
 0x199   : > { %vm1559_vm14 = vcmp.eq.f32.partialorder %v17503_v63, 8.507059e+37  ;;  %v2201_v27 = vadd.f32 %v2177_v42, %v2105_v37  ;;  %v1727_v32 = vsel %vm11069_vm9, %v11049_v18, %v1722_v39  ;;  %v2345_v36 = vmul.f32 %v10840_v11, %v9290_v41 }
 0x19a   : > { %v1562_v26 = vsel %vm1559_vm14, %v11043_v44, %v1557_v23  ;;  %v8646_v5 = vpop.eup %8645  ;;  %8272 = vmatmul.msk.bf16.vlgmr.msra.gmra.mxu3 %vm290_vm0, %v2750_v7  ;;  %v2346_v44 = vmul.f32 %v10682_v22, %v9290_v41  ;;  %v1906_v58 = vmul.f32 %v1727_v32, %v10955_v15  ;;  %v2321_v53 = vadd.f32 %v2297_v0, %v2200_v34 }
 0x19b   : > { %v1895_v9 = vmul.f32 %v1562_v26, %v10952_v35  ;;  %v11155_v10 = vadd.f32 1.0, %v8646_v5  ;;  %v2322_v35 = vadd.f32 %v2298_v59, %v2201_v27  ;;  %v2441_v18 = vmul.f32 %v10875_v20, %v9299_v45 }
 0x19c   : > { %v2442_v11 = vmul.f32 %v10948_v31, %v9299_v45  ;;  %v17504_v33 = vrot.slane %v10811_v62, 7  ;;  %v17505_v30 = vrot.slane %v10936_v21, 7  ;;  %1961 = vst.msk [vmem:[#allocation3 + $0x78] sm:$0xff] %vm290_vm0, %v1906_v58  ;;  %v2562_v20 = vmul.f32 %v11002_v48, %v9301_v46 }
 0x19d   : > { %1950 = vst.msk [vmem:[#allocation3 + $0x20] sm:$0xff] %vm290_vm0, %v1895_v9  ;;  %8647 = vrcp.f32 %v11155_v10  ;;  %v2610_v56 = vmul.f32 %v10936_v21, %v9310_v51  ;;  %vm1734_vm15 = vweird.f32 %v11155_v10  ;;  %v1738_v4 = vand.u32 2147483647, %v11155_v10 }
 0x19e   : > { %v11168_v15 = vsel %vm17130_vm1, %v17505_v30, %v17504_v33  ;;  %v2369_v24 = vadd.f32 %v2345_v36, %v2321_v53  ;;  %v2370_v42 = vadd.f32 %v2346_v44, %v2322_v35  ;;  %v1740_v37 = vand.u32 2147483648, %v11155_v10 }
 0x19f   : > { %v2563_v6 = vmul.f32 %v11168_v15, %v9301_v46  ;;  %v2611_v0 = vmul.f32 %v10811_v62, %v9310_v51  ;;  %v17506_v23 = vrot.slane %v10899_v28, 1  ;;  %v17507_v63 = vrot.slane %v10811_v62, 1 }
 0x1a0   : > { %v2706_v59 = vmul.f32 %v11108_v55, %v11020_v60  ;;  %v2465_v26 = vadd.f32 %v2441_v18, %v2369_v24  ;;  %v2466_v39 = vadd.f32 %v2442_v11, %v2370_v42  ;;  %v11200_v27 = vadd.f32 %v10809_v38, %v11089_v29  ;;  %v1390_v18 = vpop.f32.mrf.mxu0  ;;  %v1418_v42 = vpop.f32.mrf.mxu2 }
 0x1a1   : > { %v11192_v7 = vsel %vm17137_vm2, %v17507_v63, %v17506_v23  ;;  %v8536_v5 = vunpack.c.l.bf16 %v8555_v13  ;;  %v8537_v9 = vunpack.c.h.bf16 %v8555_v13  ;;  %v2060_v32 = vmul.f32 %v10917_v57, %v9236_v16  ;;  %v11226_v23 = vld [vmem:[#allocation2 + $0x178] sm:$0xff] }
 0x1a2   : > { %v2707_v34 = vmul.f32 %v11108_v55, %v11192_v7  ;;  %v2061_v36 = vmul.f32 %v10926_v3, %v9236_v16  ;;  %vm11206_vm3 = vcmp.eq.f32.partialorder %v1738_v4, 8.507059e+37  ;;  %v2586_v58 = vadd.f32 %v2562_v20, %v2465_v26  ;;  %17510 = vst [vmem:[#allocation26_spill] sm:$0xff] %v11226_v23 }
 0x1a3   : > { %v2587_v53 = vadd.f32 %v2563_v6, %v2466_v39  ;;  %v8245_v35 = vmul.f32 -1.442695, %v11200_v27  ;;  %v2084_v29 = vmul.f32 %v10682_v22, %v9238_v17  ;;  %v8648_v11 = vpop.eup %8647  ;;  %v1741_v33 = vor.u32 1.1754944e-38, %v1740_v37  ;;  %492 = vst.msk [vmem:[#allocation2 + $0x168] sm:$0xff] %vm290_vm0, %v8536_v5 }
 0x1a4   : > { %v2085_v57 = vmul.f32 %v10899_v28, %v9238_v17  ;;  %v2180_v3 = vmul.f32 %v10948_v31, %v9251_v25  ;;  %v2181_v30 = vmul.f32 %v10964_v8, %v9251_v25  ;;  %v1730_v20 = vmul.f32 %v8648_v11, %v11155_v10  ;;  %493 = vst.msk [vmem:[#allocation2 + $0x170] sm:$0xff] %vm290_vm0, %v8537_v9 }
 0x1a5   : > { %v2634_v4 = vadd.f32 %v2610_v56, %v2586_v58  ;;  %v2635_v24 = vadd.f32 %v2611_v0, %v2587_v53  ;;  %v2301_v22 = vmul.f32 %v11168_v15, %v9296_v43  ;;  %8649 = vpow2.f32 %v8245_v35 }
 0x1a6   : > { %v2108_v6 = vadd.f32 %v2084_v29, %v2060_v32  ;;  %v2109_v13 = vadd.f32 %v2085_v57, %v2061_v36  ;;  %v2302_v28 = vmul.f32 %v11064_v12, %v9296_v43  ;;  %v1731_v31 = vsub.f32 1.0, %v1730_v20 }
 0x1a7   : > { %vm1735_vm4 = vweird.f32 %v8648_v11  ;;  %v2730_v37 = vadd.f32 %v2706_v59, %v2634_v4  ;;  %v2731_v8 = vadd.f32 %v2707_v34, %v2635_v24  ;;  %v2349_v63 = vmul.f32 %v10811_v62, %v9290_v41 }
 0x1a8   : > { %v2204_v56 = vadd.f32 %v2180_v3, %v2108_v6  ;;  %v2205_v0 = vadd.f32 %v2181_v30, %v2109_v13  ;;  %v2350_v26 = vmul.f32 %v11032_v54, %v9290_v41  ;;  %v1732_v39 = vmul.f32 %v8648_v11, %v1731_v31  ;;  %vm11238_vm5 = vmor %vm1734_vm15, %vm1735_vm4 }
 0x1a9   : > { %v2749_v5 = vpack.c.bf16 %v2731_v8, %v2730_v37  ;;  %v2445_v9 = vmul.f32 %v11192_v7, %v9299_v45  ;;  %v2446_v32 = vmul.f32 %v11102_v1, %v9299_v45  ;;  %v2525_v58 = vrot.slane %v11226_v23, 7 }
 0x1aa   : > { %v2325_v34 = vadd.f32 %v2301_v22, %v2204_v56  ;;  %v2326_v36 = vadd.f32 %v2302_v28, %v2205_v0  ;;  %v17513_v53 = vrot.slane %v10849_v50, 7  ;;  %v17514_v35 = vrot.slane %v11034_v47, 7  ;;  %v11252_v10 = vld [vmem:[#allocation2 + $0x168] sm:$0xff]  ;;  %v1420_v56 = vpop.f32.mrf.mxu2 }
 0x1ab   : > { %v1733_v18 = vadd.f32 %v8648_v11, %v1732_v39  ;;  %8271 = vmatmul.msk.bf16.gmra.mxu1 %vm290_vm0, %v2749_v5  ;;  %v2614_v3 = vmul.f32 %v10849_v50, %v9310_v51  ;;  %v17516_v30 = vrot.slane %v10849_v50, 1  ;;  %v8650_v4 = vpop.eup %8649  ;;  %v11266_v6 = vld [vmem:[#allocation2 + $0x170] sm:$0xff]  ;;  %v2509_v13 = vrot.slane %v11252_v10, 7 }
 0x1ac   : > { %v11249_v29 = vsel %vm17130_vm1, %v17514_v35, %v17513_v53  ;;  %v2373_v24 = vadd.f32 %v2349_v63, %v2325_v34  ;;  %v2374_v22 = vadd.f32 %v2350_v26, %v2326_v36  ;;  %v11271_v28 = vadd.f32 %v10809_v38, %v11152_v19 }
 0x1ad   : > { %17515 = vst [vmem:[#allocation23_spill] sm:$0xff] %v11249_v29  ;;  %v2566_v57 = vmul.f32 %v11249_v29, %v9301_v46  ;;  %v11264_v20 = vsel %vm17137_vm2, %v17516_v30, %v2652_v40  ;;  %v1737_v31 = vsel %vm11238_vm5, %v8648_v11, %v1733_v18  ;;  %v11275_v37 = vadd.f32 1.0, %v8650_v4 }
 0x1ae   : > { %17517 = vst [vmem:[#allocation24_spill] sm:$0xff] %v11264_v20  ;;  %v17115_v8 = vrot.slane %v11252_v10, 1  ;;  %v17116_v40 = vrot.slane %v11266_v6, 1  ;;  %v1742_v0 = vsel %vm11206_vm3, %v1741_v33, %v1737_v31  ;;  %v2469_v63 = vadd.f32 %v2445_v9, %v2373_v24  ;;  %v11303_v9 = vpop.f32.mrf.mxu0 }
 0x1af   : > { %v2470_v26 = vadd.f32 %v2446_v32, %v2374_v22  ;;  %v11287_v19 = vsel %vm17130_vm1, %v2525_v58, %v2509_v13  ;;  %v1907_v11 = vmul.f32 %v1742_v0, %v11082_v14  ;;  %8651 = vrcp.f32 %v11275_v37 }
 0x1b0   : > { %v2567_v39 = vmul.f32 %v11287_v19, %v9301_v46  ;;  %v2590_v5 = vadd.f32 %v2566_v57, %v2469_v63  ;;  %v2615_v44 = vmul.f32 %v11252_v10, %v9310_v51  ;;  %v11301_v33 = vsel %vm17137_vm2, %v17115_v8, %v17116_v40  ;;  %v8470_v57 = vld [vmem:[%s17023_s2 + $0x28] sm:$0xff] }
 0x1b1   : > { %1962 = vst.msk [vmem:[#allocation3 + $0x80] sm:$0xff] %vm290_vm0, %v1907_v11  ;;  %v1588_v14 = vand.u32 2147483647, %v11275_v37  ;;  %v2710_v32 = vmul.f32 %v11108_v55, %v11264_v20  ;;  %v8246_v59 = vmul.f32 -1.442695, %v11271_v28  ;;  %v2711_v53 = vmul.f32 %v11108_v55, %v11301_v33  ;;  %4263 = vmatpush.bf16.msrb.mxu2 %v8470_v57  ;;  %5678 = vmatpush.bf16.msrb.mxu3 %v8470_v57 }
 0x1b2   : > { %v2591_v34 = vadd.f32 %v2567_v39, %v2470_v26  ;;  %v2638_v36 = vadd.f32 %v2614_v3, %v2590_v5  ;;  %v11314_v35 = vadd.f32 %v10809_v38, %v11170_v49  ;;  %v11317_v18 = vadd.f32 %v10809_v38, %v1418_v42 }
 0x1b3   : > { %8653 = vpow2.f32 %v8246_v59  ;;  %v2062_v30 = vmul.f32 %v11002_v48, %v9236_v16  ;;  %v2063_v3 = vmul.f32 %v11168_v15, %v9236_v16  ;;  %v2086_v49 = vmul.f32 %v10936_v21, %v9238_v17  ;;  %v11338_v21 = vld [vmem:[#allocation2 + $0x190] sm:$0xff] }
 0x1b4   : > { %v2639_v4 = vadd.f32 %v2615_v44, %v2591_v34  ;;  %v2734_v24 = vadd.f32 %v2710_v32, %v2638_v36  ;;  %v8257_v22 = vmul.f32 -1.442695, %v11314_v35  ;;  %v8258_v42 = vmul.f32 -1.442695, %v11317_v18  ;;  %17518 = vst [vmem:[#allocation28_spill] sm:$0xff] %v11338_v21 }
 0x1b5   : > { %v8652_v31 = vpop.eup %8651  ;;  %v2087_v56 = vmul.f32 %v10811_v62, %v9238_v17  ;;  %v2182_v48 = vmul.f32 %v11020_v60, %v9251_v25  ;;  %v2183_v15 = vmul.f32 %v11192_v7, %v9251_v25  ;;  %v1590_v63 = vand.u32 2147483648, %v11275_v37 }
 0x1b6   : > { %v1580_v0 = vmul.f32 %v8652_v31, %v11275_v37  ;;  %v2735_v26 = vadd.f32 %v2711_v53, %v2639_v4  ;;  %8655 = vpow2.f32 %v8257_v22  ;;  %v2110_v11 = vadd.f32 %v2086_v49, %v2062_v30  ;;  %v11347_v32 = vpop.f32.mrf.mxu0 }
 0x1b7   : > { %8657 = vpow2.f32 %v8258_v42  ;;  %v2111_v39 = vadd.f32 %v2087_v56, %v2063_v3  ;;  %v2303_v62 = vmul.f32 %v11058_v61, %v9296_v43  ;;  %v17519_v5 = vmov 0.0  }
 0x1b8   : > { %6268 = vst.msk [vmem:[#allocation2 + $0x190] sm:$0xff] %vm290_vm0, %v17519_v5  ;;  %v1581_v60 = vsub.f32 1.0, %v1580_v0  ;;  %vm1584_vm6 = vweird.f32 %v11275_v37  ;;  %v2751_v7 = vpack.c.bf16 %v2735_v26, %v2734_v24  ;;  %v2304_v44 = vmul.f32 %v11249_v29, %v9296_v43 }
 0x1b9   : > { %v8654_v59 = vpop.eup %8653  ;;  %vm1585_vm7 = vweird.f32 %v8652_v31  ;;  %vm11349_vm8 = vcmp.eq.f32.partialorder %v1588_v14, 8.507059e+37  ;;  %v2206_v36 = vadd.f32 %v2182_v48, %v2110_v11  ;;  %v2207_v53 = vadd.f32 %v2183_v15, %v2111_v39 }
 0x1ba   : > { %v1582_v57 = vmul.f32 %v8652_v31, %v1581_v60  ;;  %8273 = vmatmul.msk.bf16.gmra.mxu3 %vm290_vm0, %v2751_v7  ;;  %v11354_v30 = vadd.f32 1.0, %v8654_v59  ;;  %v2351_v3 = vmul.f32 %v11034_v47, %v9290_v41  ;;  %v2352_v4 = vmul.f32 %v10849_v50, %v9290_v41  ;;  %vm1586_vm9 = vmor %vm1584_vm6, %vm1585_vm7 }
 0x1bb   : > { %v1591_v24 = vor.u32 1.1754944e-38, %v1590_v63  ;;  %v2327_v22 = vadd.f32 %v2303_v62, %v2206_v36  ;;  %v2328_v49 = vadd.f32 %v2304_v44, %v2207_v53  ;;  %v2517_v14 = vrot.slane %v11266_v6, 7 }
 0x1bc   : > { %v8656_v42 = vpop.eup %8655  ;;  %v1583_v56 = vadd.f32 %v8652_v31, %v1582_v57  ;;  %8659 = vrcp.f32 %v11354_v30  ;;  %v2447_v48 = vmul.f32 %v11096_v52, %v9299_v45  ;;  %v2448_v15 = vmul.f32 %v11264_v20, %v9299_v45 }
 0x1bd   : > { %v8658_v0 = vpop.eup %8657  ;;  %v1605_v63 = vand.u32 2147483648, %v11354_v30  ;;  %v11370_v26 = vadd.f32 1.0, %v8656_v42  ;;  %v2616_v11 = vmul.f32 %v11266_v6, %v9310_v51  ;;  %v2617_v39 = vmul.f32 %v11226_v23, %v9310_v51 }
 0x1be   : > { %v1587_v62 = vsel %vm1586_vm9, %v8652_v31, %v1583_v56  ;;  %v11376_v60 = vadd.f32 1.0, %v8658_v0  ;;  %v2375_v7 = vadd.f32 %v2351_v3, %v2327_v22  ;;  %v2376_v44 = vadd.f32 %v2352_v4, %v2328_v49  ;;  %v1398_v34 = vpop.f32.mrf.mxu0  ;;  %v8556_v56 = vld [vmem:[%s9186_s26 + $0x78] sm:$0xff]  }
 0x1bf   : > { %v1592_v59 = vsel %vm11349_vm8, %v1591_v24, %v1587_v62  ;;  %v1603_v37 = vand.u32 2147483647, %v11354_v30  ;;  %8661 = vrcp.f32 %v11370_v26  ;;  %v11386_v36 = vsel %vm17130_vm1, %v2517_v14, %v2525_v58  ;;  %v1423_v24 = vpop.f32.mrf.mxu2 }
 0x1c0   : > { %17522 = vst [vmem:[#allocation27_spill] sm:$0xff] %v11386_v36  ;;  %v1897_v53 = vmul.f32 %v1592_v59, %v11200_v27  ;;  %v1768_v31 = vand.u32 2147483647, %v11370_v26  ;;  %v1770_v57 = vand.u32 2147483648, %v11370_v26  ;;  %8663 = vrcp.f32 %v11376_v60 }
 0x1c1   : > { %vm1599_vm10 = vweird.f32 %v11354_v30  ;;  %v1606_v3 = vor.u32 1.1754944e-38, %v1605_v63  ;;  %vm1764_vm11 = vweird.f32 %v11370_v26  ;;  %v1783_v4 = vand.u32 2147483647, %v11376_v60 }
 0x1c2   : > { %v1785_v58 = vand.u32 2147483648, %v11376_v60  ;;  %v8660_v22 = vpop.eup %8659  ;;  %1952 = vst.msk [vmem:[#allocation3 + $0x30] sm:$0xff] %vm290_vm0, %v1897_v53  ;;  %vm1779_vm12 = vweird.f32 %v11376_v60  ;;  %v2471_v27 = vadd.f32 %v2447_v48, %v2375_v7  ;;  %v2472_v49 = vadd.f32 %v2448_v15, %v2376_v44 }
 0x1c3   : > { %v11402_v42 = vsel %vm17130_vm1, %v2509_v13, %v2517_v14  ;;  %v1595_v0 = vmul.f32 %v8660_v22, %v11354_v30  ;;  %vm1600_vm13 = vweird.f32 %v8660_v22  ;;  %vm11406_vm14 = vcmp.eq.f32.partialorder %v1603_v37, 8.507059e+37 }
 0x1c4   : > { %v1771_v62 = vor.u32 1.1754944e-38, %v1770_v57  ;;  %v11410_v59 = vor.u32 1.1754944e-38, %v1785_v58  ;;  %vm11412_vm15 = vcmp.eq.f32.partialorder %v1768_v31, 8.507059e+37  ;;  %v2568_v15 = vmul.f32 %v11402_v42, %v9301_v46  ;;  %vm1601_vm6 = vmor %vm1599_vm10, %vm1600_vm13 }
 0x1c5   : > { %v2569_v13 = vmul.f32 %v11386_v36, %v9301_v46  ;;  %v2669_v14 = vrot.slane %v11226_v23, 1  ;;  %v11423_v7 = vadd.f32 %v10809_v38, %v11303_v9  ;;  %v8662_v44 = vpop.eup %8661  ;;  %v1596_v37 = vsub.f32 1.0, %v1595_v0 }
 0x1c6   : > { %vm11425_vm3 = vcmp.eq.f32.partialorder %v1783_v4, 8.507059e+37  ;;  %v11431_v31 = vadd.f32 %v10809_v38, %v11347_v32  ;;  %v8540_v57 = vunpack.c.l.bf16 %v8556_v56  ;;  %v8541_v34 = vunpack.c.h.bf16 %v8556_v56  ;;  %v8664_v58 = vpop.eup %8663 }
 0x1c7   : > { %v1760_v8 = vmul.f32 %v8662_v44, %v11370_v26  ;;  %vm1765_vm4 = vweird.f32 %v8662_v44  ;;  %v2592_v40 = vadd.f32 %v2568_v15, %v2471_v27  ;;  %v2593_v23 = vadd.f32 %v2569_v13, %v2472_v49 }
 0x1c8   : > { %v1597_v9 = vmul.f32 %v8660_v22, %v1596_v37  ;;  %v1775_v36 = vmul.f32 %v8664_v58, %v11376_v60  ;;  %vm1780_vm5 = vweird.f32 %v8664_v58  ;;  %v17529_v4 = vrot.slane %v11266_v6, 1  ;;  %494 = vst.msk [vmem:[#allocation2 + $0x180] sm:$0xff] %vm290_vm0, %v8540_v57  ;;  %v11453_v57 = vpop.f32.mrf.mxu1  ;;  %vm11466_vm7 = vmor %vm1764_vm11, %vm1765_vm4 }
 0x1c9   : > { %v1761_v32 = vsub.f32 1.0, %v1760_v8  ;;  %v2640_v56 = vadd.f32 %v2616_v11, %v2592_v40  ;;  %v2641_v20 = vadd.f32 %v2617_v39, %v2593_v23  ;;  %v17530_v29 = vrot.slane %v11252_v10, 1  ;;  %495 = vst.msk [vmem:[#allocation2 + $0x188] sm:$0xff] %vm290_vm0, %v8541_v34  ;;  %v11470_v34 = vpop.f32.mrf.mxu2  ;;  %vm11477_vm8 = vmor %vm1779_vm12, %vm1780_vm5 }
 0x1ca   : > { %v11439_v0 = vsel %vm17137_vm2, %v17529_v4, %v2669_v14  ;;  %v1598_v49 = vadd.f32 %v8660_v22, %v1597_v9  ;;  %v1776_v15 = vsub.f32 1.0, %v1775_v36  ;;  %v8249_v8 = vmul.f32 -1.442695, %v11431_v31 }
 0x1cb   : > { %v11446_v27 = vsel %vm17137_vm2, %v2669_v14, %v17530_v29  ;;  %v2712_v13 = vmul.f32 %v11108_v55, %v11439_v0  ;;  %v1762_v23 = vmul.f32 %v8662_v44, %v1761_v32  ;;  %v8248_v29 = vmul.f32 -1.442695, %v11423_v7 }
 0x1cc   : > { %v2713_v37 = vmul.f32 %v11108_v55, %v11446_v27  ;;  %v11461_v40 = vadd.f32 %v10809_v38, %v1423_v24  ;;  %v1602_v11 = vsel %vm1601_vm6, %v8660_v22, %v1598_v49  ;;  %v1777_v36 = vmul.f32 %v8664_v58, %v1776_v15 }
 0x1cd   : > { %v2736_v14 = vadd.f32 %v2712_v13, %v2640_v56  ;;  %v1607_v9 = vsel %vm11406_vm14, %v1606_v3, %v1602_v11  ;;  %v1763_v4 = vadd.f32 %v8662_v44, %v1762_v23  ;;  %8665 = vpow2.f32 %v8248_v29 }
 0x1ce   : > { %v2737_v30 = vadd.f32 %v2713_v37, %v2641_v20  ;;  %v8260_v26 = vmul.f32 -1.442695, %v11461_v40  ;;  %v1898_v24 = vmul.f32 %v1607_v9, %v11271_v28  ;;  %v1778_v22 = vadd.f32 %v8664_v58, %v1777_v36 }
 0x1cf   : > { %8667 = vpow2.f32 %v8249_v8  ;;  %v1767_v63 = vsel %vm11466_vm7, %v8662_v44, %v1763_v4  ;;  %v2064_v3 = vmul.f32 %v11064_v12, %v9236_v16  ;;  %v2065_v60 = vmul.f32 %v11058_v61, %v9236_v16  ;;  %v11505_v48 = vld [vmem:[#allocation2 + $0x180] sm:$0xff] }
 0x1d0   : > { %v2752_v20 = vpack.c.bf16 %v2737_v30, %v2736_v14  ;;  %8669 = vpow2.f32 %v8260_v26  ;;  %1953 = vst.msk [vmem:[#allocation3 + $0x38] sm:$0xff] %vm290_vm0, %v1898_v24  ;;  %v1772_v32 = vsel %vm11412_vm15, %v1771_v62, %v1767_v63  ;;  %v1782_v28 = vsel %vm11477_vm8, %v8664_v58, %v1778_v22  ;;  %v11510_v15 = vld [vmem:[#allocation2 + $0x188] sm:$0xff]  ;;  %v11514_v53 = vpop.f32.mrf.mxu1 }
 0x1d1   : > { %v2088_v44 = vmul.f32 %v11032_v54, %v9238_v17  ;;  %v1909_v56 = vmul.f32 %v1772_v32, %v11314_v35  ;;  %v1787_v12 = vsel %vm11425_vm3, %v11410_v59, %v1782_v28  ;;  %v2089_v61 = vmul.f32 %v11034_v47, %v9238_v17  ;;  %v11512_v35 = vpop.f32.mrf.mxu0  ;;  %v1428_v23 = vpop.f32.mrf.mxu2 }
 0x1d2   : > { %8274 = vmatmul.msk.bf16.gmra.mxu3 %vm290_vm0, %v2752_v20  ;;  %v2184_v62 = vmul.f32 %v11102_v1, %v9251_v25  ;;  %v1910_v58 = vmul.f32 %v1787_v12, %v11317_v18  ;;  %v2185_v54 = vmul.f32 %v11096_v52, %v9251_v25  ;;  %v2305_v37 = vmul.f32 %v11287_v19, %v9296_v43 }
 0x1d3   : > { %v2112_v49 = vadd.f32 %v2088_v44, %v2064_v3  ;;  %v8666_v59 = vpop.eup %8665  ;;  %1964 = vst.msk [vmem:[#allocation3 + $0x90] sm:$0xff] %vm290_vm0, %v1909_v56  ;;  %v2113_v47 = vadd.f32 %v2089_v61, %v2065_v60  ;;  %v2510_v52 = vrot.slane %v11505_v48, 7  ;;  %v2306_v39 = vmul.f32 %v11402_v42, %v9296_v43  ;;  %v8469_v61 = vld [vmem:[%s17023_s2 + $0x20] sm:$0xff] }
 0x1d4   : > { %1965 = vst.msk [vmem:[#allocation3 + $0x98] sm:$0xff] %vm290_vm0, %v1910_v58  ;;  %v11518_v1 = vadd.f32 1.0, %v8666_v59  ;;  %v17126_v36 = vrot.slane %v11510_v15, 7  ;;  %v2353_v30 = vmul.f32 %v11252_v10, %v9290_v41  ;;  %v2354_v19 = vmul.f32 %v11266_v6, %v9290_v41  ;;  %4264 = vmatpush.bf16.msrb.mxu2 %v8469_v61  ;;  %5679 = vmatpush.bf16.msrb.mxu3 %v8469_v61 }
 0x1d5   : > { %v8668_v13 = vpop.eup %8667  ;;  %v2208_v18 = vadd.f32 %v2184_v62, %v2112_v49  ;;  %v2209_v11 = vadd.f32 %v2185_v54, %v2113_v47  ;;  %v2449_v4 = vmul.f32 %v11301_v33, %v9299_v45  ;;  %v17127_v42 = vrot.slane %v11338_v21, 7 }
 0x1d6   : > { %v8670_v29 = vpop.eup %8669  ;;  %v11523_v8 = vadd.f32 1.0, %v8668_v13  ;;  %8671 = vrcp.f32 %v11518_v1  ;;  %v1635_v14 = vand.u32 2147483648, %v11518_v1  ;;  %v1633_v38 = vand.u32 2147483647, %v11518_v1 }
 0x1d7   : > { %v11540_v26 = vadd.f32 1.0, %v8670_v29  ;;  %v2329_v24 = vadd.f32 %v2305_v37, %v2208_v18  ;;  %v2450_v10 = vmul.f32 %v11439_v0, %v9299_v45  ;;  %v2330_v20 = vadd.f32 %v2306_v39, %v2209_v11 }
 0x1d8   : > { %8673 = vrcp.f32 %v11523_v8  ;;  %v1650_v9 = vand.u32 2147483648, %v11523_v8  ;;  %v11544_v22 = vor.u32 1.1754944e-38, %v1635_v14  ;;  %v1648_v6 = vand.u32 2147483647, %v11523_v8  ;;  %v2806_v32 = vpop.f32.mrf.mxu1 }
 0x1d9   : > { %v11551_v33 = vsel %vm17130_vm1, %v2510_v52, %v17126_v36  ;;  %8675 = vrcp.f32 %v11540_v26  ;;  %v1813_v3 = vand.u32 2147483647, %v11540_v26  ;;  %v1815_v60 = vand.u32 2147483648, %v11540_v26  ;;  %v11558_v0 = vpop.f32.mrf.mxu0 }
 0x1da   : > { %17535 = vst [vmem:[#allocation33_spill] sm:$0xff] %v11551_v33  ;;  %v11553_v63 = vor.u32 1.1754944e-38, %v1650_v9  ;;  %vm1629_vm9 = vweird.f32 %v11518_v1  ;;  %v2377_v28 = vadd.f32 %v2353_v30, %v2329_v24  ;;  %v2378_v44 = vadd.f32 %v2354_v19, %v2330_v20 }
 0x1db   : > { %v11565_v56 = vsel %vm17130_vm1, %v17127_v42, %v2510_v52  ;;  %v2571_v12 = vmul.f32 %v11551_v33, %v9301_v46  ;;  %vm1644_vm10 = vweird.f32 %v11523_v8  ;;  %vm1809_vm11 = vweird.f32 %v11540_v26 }
 0x1dc   : > { %v8672_v62 = vpop.eup %8671  ;;  %v11574_v58 = vor.u32 1.1754944e-38, %v1815_v60  ;;  %v2570_v49 = vmul.f32 %v11565_v56, %v9301_v46  ;;  %v2618_v54 = vmul.f32 %v11505_v48, %v9310_v51  ;;  %vm11581_vm13 = vcmp.eq.f32.partialorder %v1633_v38, 8.507059e+37 }
 0x1dd   : > { %v1625_v47 = vmul.f32 %v8672_v62, %v11518_v1  ;;  %vm1630_vm12 = vweird.f32 %v8672_v62  ;;  %v2473_v18 = vadd.f32 %v2449_v4, %v2377_v28  ;;  %v2474_v37 = vadd.f32 %v2450_v10, %v2378_v44  ;;  %v11602_v10 = vld [vmem:[%s17024_s3] ss:$0 sm:$0xff] }
 0x1de   : > { %v8674_v59 = vpop.eup %8673  ;;  %vm11586_vm15 = vcmp.eq.f32.partialorder %v1648_v6, 8.507059e+37  ;;  %v2619_v29 = vmul.f32 %v11510_v15, %v9310_v51  ;;  %v17125_v11 = vrot.slane %v11505_v48, 1  ;;  %vm11593_vm3 = vcmp.eq.f32.partialorder %v1813_v3, 8.507059e+37  ;;  %17542 = vst [vmem:[#allocation35_spill] sm:$0xff] %v11602_v10  ;;  %vm1631_vm5 = vmor %vm1629_vm9, %vm1630_vm12 }
 0x1df   : > { %v1640_v52 = vmul.f32 %v8674_v59, %v11523_v8  ;;  %vm1645_vm14 = vweird.f32 %v8674_v59  ;;  %v1626_v39 = vsub.f32 1.0, %v1625_v47  ;;  %v2594_v30 = vadd.f32 %v2570_v49, %v2473_v18  ;;  %v8676_v4 = vpop.eup %8675  ;;  %v11652_v8 = vld [vmem:[#allocation3] sm:$0xff] }
 0x1e0   : > { %v2595_v19 = vadd.f32 %v2571_v12, %v2474_v37  ;;  %v2662_v9 = vrot.slane %v11510_v15, 1  ;;  %v17123_v24 = vrot.slane %v11338_v21, 1  ;;  %v11606_v6 = vadd.f32 %v11602_v10, %v11453_v57  ;;  %vm1646_vm6 = vmor %vm1644_vm10, %vm1645_vm14  ;;  %17546 = vst [vmem:[#allocation36_spill] sm:$0xff] %v11652_v8 }
 0x1e1   : > { %v1641_v38 = vsub.f32 1.0, %v1640_v52  ;;  %v11610_v20 = vadd.f32 %v11602_v10, %v11470_v34  ;;  %v1627_v3 = vmul.f32 %v8672_v62, %v1626_v39  ;;  %v1805_v60 = vmul.f32 %v8676_v4, %v11540_v26  ;;  %v1405_v34 = vpop.f32.mrf.mxu0 }
 0x1e2   : > { %vm1810_vm4 = vweird.f32 %v8676_v4  ;;  %v2642_v32 = vadd.f32 %v2618_v54, %v2594_v30  ;;  %v2643_v44 = vadd.f32 %v2619_v29, %v2595_v19  ;;  %v11617_v12 = vsel %vm17137_vm2, %v2662_v9, %v17123_v24 }
 0x1e3   : > { %v1642_v28 = vmul.f32 %v8674_v59, %v1641_v38  ;;  %17543 = vst [vmem:[#allocation20_spill] sm:$0xff] %v11617_v12  ;;  %v11623_v57 = vsel %vm17137_vm2, %v17125_v11, %v2662_v9  ;;  %v1628_v61 = vadd.f32 %v8672_v62, %v1627_v3  ;;  %v1806_v49 = vsub.f32 1.0, %v1805_v60  ;;  %vm11647_vm7 = vmor %vm1809_vm11, %vm1810_vm4 }
 0x1e4   : > { %v2714_v54 = vmul.f32 %v11108_v55, %v11623_v57  ;;  %v2715_v47 = vmul.f32 %v11108_v55, %v11617_v12  ;;  %v8278_v37 = vmul.f32 -1.442695, %v11606_v6  ;;  %v8261_v52 = vmul.f32 -1.442695, %v11610_v20 }
 0x1e5   : > { %v1643_v18 = vadd.f32 %v8674_v59, %v1642_v28  ;;  %v11636_v29 = vadd.f32 %v11602_v10, %v11512_v35  ;;  %v1632_v39 = vsel %vm1631_vm5, %v8672_v62, %v1628_v61  ;;  %v1807_v30 = vmul.f32 %v8676_v4, %v1806_v49 }
 0x1e6   : > { %v2738_v55 = vadd.f32 %v2714_v54, %v2642_v32  ;;  %v2739_v19 = vadd.f32 %v2715_v47, %v2643_v44  ;;  %v1637_v1 = vsel %vm11581_vm13, %v11544_v22, %v1632_v39  ;;  %8677 = vpow2.f32 %v8278_v37  ;;  %v1430_v32 = vpop.f32.mrf.mxu2 }
 0x1e7   : > { %v1647_v9 = vsel %vm1646_vm6, %v8674_v59, %v1643_v18  ;;  %v8251_v35 = vmul.f32 -1.442695, %v11636_v29  ;;  %v1900_v62 = vmul.f32 %v1637_v1, %v11423_v7  ;;  %v1808_v22 = vadd.f32 %v8676_v4, %v1807_v30  ;;  %v11670_v7 = vld [vmem:[%s17022_s1 + $0x10] sm:$0xff] }
 0x1e8   : > { %v1652_v13 = vsel %vm11586_vm15, %v11553_v63, %v1647_v9  ;;  %v2753_v59 = vpack.c.bf16 %v2739_v19, %v2738_v55  ;;  %8679 = vpow2.f32 %v8261_v52  ;;  %v11661_v26 = vadd.f32 %v11602_v10, %v11514_v53  ;;  %v11672_v63 = vld [vmem:[#allocation3 + $0x10] sm:$0xff] }
 0x1e9   : > { %v1901_v3 = vmul.f32 %v1652_v13, %v11431_v31  ;;  %v11665_v60 = vadd.f32 %v11602_v10, %v11558_v0  ;;  %17547 = vst [vmem:[#allocation37_spill] sm:$0xff] %v11672_v63  ;;  %v1812_v31 = vsel %vm11647_vm7, %v8676_v4, %v1808_v22  ;;  %8681 = vpow2.f32 %v8251_v35  ;;  %v11681_v0 = vld [vmem:[#allocation3 + $0x8] sm:$0xff] }
 0x1ea   : > { %1955 = vst.msk [vmem:[#allocation3 + $0x48] sm:$0xff] %vm290_vm0, %v1900_v62  ;;  %8275 = vmatmul.msk.bf16.gmra.mxu3 %vm290_vm0, %v2753_v59  ;;  %v11679_v53 = vadd.f32 %v11602_v10, %v1430_v32  ;;  %v3428_v23 = vrot.slane %v11652_v8, 7  ;;  %v1817_v28 = vsel %vm11593_vm3, %v11574_v58, %v1812_v31  ;;  %v8279_v44 = vmul.f32 -1.442695, %v11661_v26 }
 0x1eb   : > { %17548 = vst [vmem:[#allocation21_spill] sm:$0xff] %v11681_v0  ;;  %v8252_v4 = vmul.f32 -1.442695, %v11665_v60  ;;  %v17121_v34 = vrot.slane %v11681_v0, 7  ;;  %v1912_v61 = vmul.f32 %v1817_v28, %v11461_v40  ;;  %v17122_v54 = vrot.slane %v11672_v63, 7 }
 0x1ec   : > { %1956 = vst.msk [vmem:[#allocation3 + $0x50] sm:$0xff] %vm290_vm0, %v1901_v3  ;;  %v8263_v49 = vmul.f32 -1.442695, %v11679_v53  ;;  %v11695_v47 = vperm.slane %v11670_v7, 0  ;;  %v8678_v18 = vpop.eup %8677  ;;  %8683 = vpow2.f32 %v8279_v44  ;;  %v11702_v14 = vperm.slane %v11670_v7, 1 }
 0x1ed   : > { %v3460_v58 = vsel %vm17130_vm1, %v3428_v23, %v17121_v34  ;;  %1967 = vst.msk [vmem:[#allocation3 + $0xa8] sm:$0xff] %vm290_vm0, %v1912_v61  ;;  %v2933_v40 = vadd.f32 1.0, %v8678_v18  ;;  %8685 = vpow2.f32 %v8252_v4  ;;  %v3468_v37 = vsel %vm17130_vm1, %v17122_v54, %v3428_v23 }
 0x1ee   : > { %17549 = vst [vmem:[#allocation38_spill] sm:$0xff] %v11695_v47  ;;  %v3478_v52 = vmul.f32 %v11695_v47, %v3460_v58  ;;  %v8680_v39 = vpop.eup %8679  ;;  %8687 = vpow2.f32 %v8263_v49  ;;  %v3477_v30 = vmul.f32 %v11695_v47, %v3468_v37  ;;  %v3502_v55 = vmul.f32 %v11702_v14, %v11652_v8 }
 0x1ef   : > { %17550 = vst [vmem:[#allocation40_spill] sm:$0xff] %v11702_v14  ;;  %v3503_v19 = vmul.f32 %v11702_v14, %v11681_v0  ;;  %v8682_v1 = vpop.eup %8681  ;;  %8689 = vrcp.f32 %v2933_v40  ;;  %v2966_v9 = vand.u32 2147483647, %v2933_v40  ;;  %v2968_v38 = vand.u32 2147483648, %v2933_v40 }
 0x1f0   : > { %v11715_v35 = vadd.f32 1.0, %v8680_v39  ;;  %v11717_v62 = vadd.f32 1.0, %v8682_v1  ;;  %vm2962_vm8 = vweird.f32 %v2933_v40  ;;  %v11722_v3 = vadd.f32 %v3502_v55, %v3477_v30 }
 0x1f1   : > { %v11724_v32 = vadd.f32 %v3503_v19, %v3478_v52  ;;  %v17124_v44 = vrot.slane %v11672_v63, 1  ;;  %vm11730_vm9 = vcmp.eq.f32.partialorder %v2966_v9, 8.507059e+37  ;;  %v2969_v49 = vor.u32 1.1754944e-38, %v2968_v38 }
 0x1f2   : > { %v8684_v22 = vpop.eup %8683  ;;  %8691 = vrcp.f32 %v11715_v35  ;;  %v1830_v59 = vand.u32 2147483648, %v11715_v35  ;;  %v1828_v23 = vand.u32 2147483647, %v11715_v35  ;;  %v1680_v28 = vand.u32 2147483648, %v11717_v62 }
 0x1f3   : > { %v8686_v31 = vpop.eup %8685  ;;  %8693 = vrcp.f32 %v11717_v62  ;;  %v11734_v18 = vadd.f32 1.0, %v8684_v22  ;;  %vm1824_vm10 = vweird.f32 %v11715_v35  ;;  %v1678_v52 = vand.u32 2147483647, %v11717_v62 }
 0x1f4   : > { %v8688_v4 = vpop.eup %8687  ;;  %v11736_v58 = vadd.f32 1.0, %v8686_v31  ;;  %v3558_v30 = vrot.slane %v11681_v0, 1  ;;  %v11743_v19 = vor.u32 1.1754944e-38, %v1830_v59  ;;  %v11745_v1 = vor.u32 1.1754944e-38, %v1680_v28 }
 0x1f5   : > { %v8690_v37 = vpop.eup %8689  ;;  %v11740_v39 = vadd.f32 1.0, %v8688_v4  ;;  %8695 = vrcp.f32 %v11734_v18  ;;  %vm11748_vm11 = vcmp.eq.f32.partialorder %v1828_v23, 8.507059e+37  ;;  %v2981_v38 = vand.u32 2147483647, %v11734_v18 }
 0x1f6   : > { %v2958_v55 = vmul.f32 %v8690_v37, %v2933_v40  ;;  %v2983_v22 = vand.u32 2147483648, %v11734_v18  ;;  %8697 = vrcp.f32 %v11736_v58  ;;  %v11759_v59 = vsel %vm17137_vm2, %v3558_v30, %v17124_v44 }
 0x1f7   : > { %vm2963_vm12 = vweird.f32 %v8690_v37  ;;  %vm1674_vm13 = vweird.f32 %v11717_v62  ;;  %v1695_v23 = vand.u32 2147483648, %v11736_v58  ;;  %8699 = vrcp.f32 %v11740_v39 }
 0x1f8   : > { %v8692_v31 = vpop.eup %8691  ;;  %v2959_v28 = vsub.f32 1.0, %v2958_v55  ;;  %vm2977_vm15 = vweird.f32 %v11734_v18  ;;  %v1693_v54 = vand.u32 2147483647, %v11736_v58  ;;  %vm11768_vm4 = vcmp.eq.f32.partialorder %v1678_v52, 8.507059e+37  ;;  %vm11775_vm5 = vmor %vm2962_vm8, %vm2963_vm12 }
 0x1f9   : > { %v8694_v4 = vpop.eup %8693  ;;  %v1820_v34 = vmul.f32 %v8692_v31, %v11715_v35  ;;  %vm1825_vm14 = vweird.f32 %v8692_v31  ;;  %v11772_v11 = vor.u32 1.1754944e-38, %v2983_v22  ;;  %vm11779_vm6 = vcmp.eq.f32.partialorder %v2981_v38, 8.507059e+37 }
 0x1fa   : > { %v2960_v24 = vmul.f32 %v8690_v37, %v2959_v28  ;;  %v1670_v44 = vmul.f32 %v8694_v4, %v11717_v62  ;;  %vm1675_vm3 = vweird.f32 %v8694_v4  ;;  %v11783_v28 = vor.u32 1.1754944e-38, %v1695_v23  ;;  %vm11803_vm1 = vmor %vm1824_vm10, %vm1825_vm14 }
 0x1fb   : > { %v1821_v42 = vsub.f32 1.0, %v1820_v34  ;;  %v1858_v52 = vand.u32 2147483647, %v11740_v39  ;;  %v8696_v12 = vpop.eup %8695  ;;  %v1860_v40 = vand.u32 2147483648, %v11740_v39  ;;  %v17561_v14 = vrot.slane %v11652_v8, 1  ;;  %vm1676_vm14 = vmor %vm1674_vm13, %vm1675_vm3 }
 0x1fc   : > { %v2961_v33 = vadd.f32 %v8690_v37, %v2960_v24  ;;  %v1671_v22 = vsub.f32 1.0, %v1670_v44  ;;  %v8698_v38 = vpop.eup %8697  ;;  %v2973_v23 = vmul.f32 %v8696_v12, %v11734_v18  ;;  %vm2978_vm8 = vweird.f32 %v8696_v12 }
 0x1fd   : > { %v3582_v34 = vsel %vm17137_vm2, %v17561_v14, %v3558_v30  ;;  %v1822_v47 = vmul.f32 %v8692_v31, %v1821_v42  ;;  %vm11794_vm12 = vcmp.eq.f32.partialorder %v1858_v52, 8.507059e+37  ;;  %v8700_v24 = vpop.eup %8699  ;;  %v1685_v42 = vmul.f32 %v8698_v38, %v11736_v58 }
 0x1fe   : > { %v2965_v44 = vsel %vm11775_vm5, %v8690_v37, %v2961_v33  ;;  %v1672_v14 = vmul.f32 %v8694_v4, %v1671_v22  ;;  %vm1690_vm2 = vweird.f32 %v8698_v38  ;;  %vm11808_vm7 = vcmp.eq.f32.partialorder %v1693_v54, 8.507059e+37 }
 0x1ff   : > { %v2970_v52 = vsel %vm11730_vm9, %v2969_v49, %v2965_v44  ;;  %v1823_v36 = vadd.f32 %v8692_v31, %v1822_v47  ;;  %v2974_v33 = vsub.f32 1.0, %v2973_v23  ;;  %v1850_v37 = vmul.f32 %v8700_v24, %v11740_v39  ;;  %vm11828_vm9 = vmor %vm2977_vm15, %vm2978_vm8 }
 0x200   : > { %v3317_v35 = vmul.f32 %v2970_v52, %v11606_v6  ;;  %v1673_v63 = vadd.f32 %v8694_v4, %v1672_v14  ;;  %v1686_v46 = vsub.f32 1.0, %v1685_v42  ;;  %vm1855_vm10 = vweird.f32 %v8700_v24  ;;  %v11854_v14 = vld [vmem:[#allocation3 + $0x28] sm:$0xff] }
 0x201   : > { %v1827_v22 = vsel %vm11803_vm1, %v8692_v31, %v1823_v36  ;;  %v2975_v54 = vmul.f32 %v8696_v12, %v2974_v33  ;;  %v1851_v51 = vsub.f32 1.0, %v1850_v37  ;;  %v1861_v61 = vor.u32 1.1754944e-38, %v1860_v40  ;;  %v11835_v31 = vld [vmem:[#allocation3 + $0x18] sm:$0xff]  ;;  %v11837_v40 = vld [vmem:[#allocation3 + $0x20] sm:$0xff]  ;;  %v11877_v33 = vld [vmem:[#allocation2 + $0x178] sm:$0xff] }
 0x202   : > { %3366 = vst.msk [vmem:[#allocation3 + $0xd8] sm:$0xff] %vm290_vm0, %v3317_v35  ;;  %v1832_v47 = vsel %vm11748_vm11, %v11743_v19, %v1827_v22  ;;  %v1677_v6 = vsel %vm1676_vm14, %v8694_v4, %v1673_v63  ;;  %v1687_v49 = vmul.f32 %v8698_v38, %v1686_v46  ;;  %v11833_v62 = vperm.slane %v11670_v7, 2  ;;  %v11914_v35 = vld [vmem:[#allocation3 + $0x38] sm:$0xff]  ;;  %v11916_v22 = vld [vmem:[#allocation3 + $0x40] sm:$0xff] }
 0x203   : > { %v1913_v23 = vmul.f32 %v1832_v47, %v11610_v20  ;;  %v1682_v63 = vsel %vm11768_vm4, %v11745_v1, %v1677_v6  ;;  %v2976_v19 = vadd.f32 %v8696_v12, %v2975_v54  ;;  %v1852_v18 = vmul.f32 %v8700_v24, %v1851_v51  ;;  %6265 = vst.msk [vmem:[#allocation2 + $0x178] sm:$0xff] %vm290_vm0, %v17519_v5 }
 0x204   : > { %v1903_v9 = vmul.f32 %v1682_v63, %v11636_v29  ;;  %v1688_v4 = vadd.f32 %v8698_v38, %v1687_v49  ;;  %vm17570_vm1 = vweird.f32 %v11740_v39  ;;  %v3599_v44 = vmul.f32 %v11833_v62, %v3582_v34 }
 0x205   : > { %vm11847_vm11 = vmor %vm17570_vm1, %vm1855_vm10  ;;  %v3600_v20 = vmul.f32 %v11833_v62, %v11759_v59  ;;  %1968 = vst.msk [vmem:[#allocation3 + $0xb0] sm:$0xff] %vm290_vm0, %v1913_v23  ;;  %v2980_v51 = vsel %vm11828_vm9, %v8696_v12, %v2976_v19  ;;  %vm17573_vm13 = vweird.f32 %v11736_v58  ;;  %v1853_v29 = vadd.f32 %v8700_v24, %v1852_v18 }
 0x206   : > { %vm1691_vm15 = vmor %vm17573_vm13, %vm1690_vm2  ;;  %v3671_v39 = vrot.slane %v11835_v31, 7  ;;  %v17154_v1 = vrot.slane %v11837_v40, 7  ;;  %1958 = vst.msk [vmem:[#allocation3 + $0x60] sm:$0xff] %vm290_vm0, %v1903_v9  ;;  %v2985_v59 = vsel %vm11779_vm6, %v11772_v11, %v2980_v51  ;;  %v3623_v34 = vadd.f32 %v3599_v44, %v11722_v3 }
 0x207   : > { %v1692_v55 = vsel %vm1691_vm15, %v8698_v38, %v1688_v4  ;;  %v3624_v12 = vadd.f32 %v3600_v20, %v11724_v32  ;;  %v3318_v42 = vmul.f32 %v2985_v59, %v11661_v26  ;;  %v1857_v52 = vsel %vm11847_vm11, %v8700_v24, %v1853_v29  ;;  %v11891_v32 = vld [vmem:[#allocation3 + $0x30] sm:$0xff]  ;;  %v2808_v24 = vpop.f32.mrf.mxu1 }
 0x208   : > { %v1697_v58 = vsel %vm11808_vm7, %v11783_v28, %v1692_v55  ;;  %v17155_v36 = vrot.slane %v11854_v14, 7  ;;  %v1862_v13 = vsel %vm11794_vm12, %v1861_v61, %v1857_v52  ;;  %vm17574_vm2 = vcmp.lt.s32.totalorder %v9204_v2, 1  ;;  %v11974_v52 = vld [vmem:[#allocation2 + $0x168] sm:$0xff] }
 0x209   : > { %v1904_v11 = vmul.f32 %v1697_v58, %v11665_v60  ;;  %v11886_v26 = vsel %vm17574_vm2, %v3671_v39, %v17154_v1  ;;  %v11889_v3 = vperm.slane %v11670_v7, 3  ;;  %3367 = vst.msk [vmem:[#allocation3 + $0xe0] sm:$0xff] %vm290_vm0, %v3318_v42  ;;  %v1915_v60 = vmul.f32 %v1862_v13, %v11679_v53  ;;  %vm17576_vm3 = vmmov %vm17574_vm2  ;;  %v11972_v58 = vld [vmem:[%s17022_s1 + $0x18] ss:$0 sm:$0xff] }
 0x20a   : > { %17575 = vst [vmem:[#allocation39_spill] sm:$0xff] %v11886_v26  ;;  %v11901_v0 = vsel %vm17576_vm3, %v17155_v36, %v3671_v39  ;;  %v11904_v28 = vperm.slane %v11670_v7, 4  ;;  %v17153_v38 = vrot.slane %v11835_v31, 1  ;;  %v3825_v30 = vrot.slane %v11837_v40, 1  ;;  %vm17580_vm6 = vmmov %vm17574_vm2  ;;  %v17598_v1 = vld [vmem:[#allocation16_spill] sm:$0xff] }
 0x20b   : > { %1959 = vst.msk [vmem:[#allocation3 + $0x68] sm:$0xff] %vm290_vm0, %v1904_v11  ;;  %v3720_v5 = vmul.f32 %v11889_v3, %v11901_v0  ;;  %v3721_v53 = vmul.f32 %v11889_v3, %v11886_v26  ;;  %v17148_v37 = vrot.slane %v11854_v14, 1  ;;  %v11924_v47 = vperm.slane %v11670_v7, 5  ;;  %vm17582_vm7 = vmmov %vm17574_vm2 }
 0x20c   : > { %1970 = vst.msk [vmem:[#allocation3 + $0xc0] sm:$0xff] %vm290_vm0, %v1915_v60  ;;  %v3769_v54 = vmul.f32 %v11904_v28, %v11835_v31  ;;  %v3770_v61 = vmul.f32 %v11904_v28, %v11837_v40  ;;  %v3939_v6 = vrot.slane %v11891_v32, 7  ;;  %vm17577_vm4 = vcmp.lt.s32.totalorder %v9204_v2, 7  ;;  %vm17586_vm10 = vmmov %vm17574_vm2 }
 0x20d   : > { %v3744_v8 = vadd.f32 %v3720_v5, %v3623_v34  ;;  %v3745_v49 = vadd.f32 %v3721_v53, %v3624_v12  ;;  %v11931_v23 = vsel %vm17577_vm4, %v3825_v30, %v17148_v37  ;;  %vm17579_vm5 = vmmov %vm17577_vm4  ;;  %v17146_v9 = vrot.slane %v11914_v35, 7 }
 0x20e   : > { %17578 = vst [vmem:[#allocation31_spill] sm:$0xff] %v11931_v23  ;;  %v11937_v63 = vsel %vm17579_vm5, %v17153_v38, %v3825_v30  ;;  %v3867_v18 = vmul.f32 %v11924_v47, %v11931_v23  ;;  %v17147_v4 = vrot.slane %v11916_v22, 7  ;;  %v11946_v20 = vperm.slane %v11670_v7, 6  ;;  %vm17583_vm8 = vmmov %vm17577_vm4 }
 0x20f   : > { %v3866_v19 = vmul.f32 %v11924_v47, %v11937_v63  ;;  %v3793_v46 = vadd.f32 %v3769_v54, %v3744_v8  ;;  %v3794_v44 = vadd.f32 %v3770_v61, %v3745_v49  ;;  %v11949_v51 = vperm.slane %v11670_v7, 7  ;;  %vm17584_vm12 = vmmov %vm17577_vm4 }
 0x210   : > { %v11955_v29 = vsel %vm17580_vm6, %v3939_v6, %v17146_v9  ;;  %v11961_v39 = vsel %vm17582_vm7, %v17147_v4, %v3939_v6  ;;  %v17145_v59 = vrot.slane %v11891_v32, 1  ;;  %v4093_v55 = vrot.slane %v11914_v35, 1  ;;  %v1433_v6 = vpop.f32.mrf.mxu2  ;;  %vm17592_vm14 = vmmov %vm17577_vm4 }
 0x211   : > { %17581 = vst [vmem:[#allocation29_spill] sm:$0xff] %v11955_v29  ;;  %v3890_v34 = vadd.f32 %v3866_v19, %v3793_v46  ;;  %v3891_v12 = vadd.f32 %v3867_v18, %v3794_v44  ;;  %v3988_v7 = vmul.f32 %v11946_v20, %v11961_v39  ;;  %v3989_v42 = vmul.f32 %v11946_v20, %v11955_v29  ;;  %v12003_v46 = vpop.f32.mrf.mxu1  ;;  %vm17597_vm9 = vmmov %vm17574_vm2 }
 0x212   : > { %v4037_v11 = vmul.f32 %v11949_v51, %v11891_v32  ;;  %v4038_v13 = vmul.f32 %v11949_v51, %v11914_v35  ;;  %v17144_v60 = vrot.slane %v11916_v22, 1  ;;  %v11985_v5 = vsel %vm17583_vm8, %v17145_v59, %v4093_v55  ;;  %vm17601_vm1 = vmmov %vm17574_vm2 }
 0x213   : > { %v4012_v53 = vadd.f32 %v3988_v7, %v3890_v34  ;;  %v4013_v30 = vadd.f32 %v3989_v42, %v3891_v12  ;;  %v4134_v54 = vmul.f32 %v11972_v58, %v11985_v5  ;;  %v11990_v61 = vadd.f32 %v11602_v10, %v2808_v24  ;;  %vm17605_vm15 = vmmov %vm17577_vm4 }
 0x214   : > { %v11996_v8 = vsel %vm17584_vm12, %v4093_v55, %v17144_v60  ;;  %v11999_v49 = vadd.f32 %v11602_v10, %v1433_v6  ;;  %v17149_v19 = vrot.slane %v11974_v52, 7  ;;  %v17150_v18 = vrot.slane %v11877_v33, 7  ;;  %v12009_v55 = vld [vmem:[#allocation2 + $0x170] sm:$0xff]  ;;  %vm17608_vm2 = vmmov %vm17577_vm4 }
 0x215   : > { %17585 = vst [vmem:[#allocation30_spill] sm:$0xff] %v11996_v8  ;;  %v4061_v44 = vadd.f32 %v4037_v11, %v4012_v53  ;;  %v4062_v34 = vadd.f32 %v4038_v13, %v4013_v30  ;;  %v4135_v24 = vmul.f32 %v11972_v58, %v11996_v8  ;;  %v8281_v12 = vmul.f32 -1.442695, %v11990_v61  ;;  %v17587_v30 = vld [vmem:[#allocation23_spill] sm:$0xff]  ;;  %vm17618_vm4 = vmmov %vm17601_vm1 }
 0x216   : > { %v8264_v7 = vmul.f32 -1.442695, %v11999_v49  ;;  %v2045_v42 = vsel %vm17586_vm10, %v17150_v18, %v17149_v19  ;;  %v2090_v11 = vmul.f32 %v10849_v50, %v9238_v17  ;;  %v2066_v6 = vmul.f32 %v17587_v30, %v9236_v16  ;;  %v12026_v18 = vld [vmem:[#allocation2 + $0x198] sm:$0xff]  ;;  %v12048_v30 = vld [vmem:[#allocation2 + $0x1a0] sm:$0xff]  ;;  %vm17624_vm7 = vmmov %vm17608_vm2 }
 0x217   : > { %v4158_v13 = vadd.f32 %v4134_v54, %v4061_v44  ;;  %v4159_v53 = vadd.f32 %v4135_v24, %v4062_v34  ;;  %8701 = vpow2.f32 %v8281_v12  ;;  %v2067_v60 = vmul.f32 %v2045_v42, %v9236_v16  ;;  %17588 = vst [vmem:[#allocation22_spill] sm:$0xff] %v12026_v18  ;;  %v17589_v54 = vld [vmem:[#allocation24_spill] sm:$0xff]  ;;  %v17590_v34 = vld [vmem:[#allocation27_spill] sm:$0xff]  ;;  %v12032_v12 = vld [vmem:[#allocation2 + $0x1a8] sm:$0xff] }
 0x218   : > { %8703 = vpow2.f32 %v8264_v7  ;;  %v2091_v59 = vmul.f32 %v11974_v52, %v9238_v17  ;;  %v17151_v9 = vrot.slane %v11974_v52, 1  ;;  %v2114_v37 = vadd.f32 %v2090_v11, %v2066_v6  ;;  %17591 = vst [vmem:[#allocation18_spill] sm:$0xff] %v12032_v12  ;;  %v1435_v11 = vpop.f32.mrf.mxu2  ;;  %vm17627_vm8 = vmmov %vm17601_vm1 }
 0x219   : > { %v4182_v4 = vpack.c.bf16 %v4159_v53, %v4158_v13  ;;  %v17152_v19 = vrot.slane %v12009_v55, 1  ;;  %v2186_v44 = vmul.f32 %v17589_v54, %v9251_v25  ;;  %v2307_v24 = vmul.f32 %v17590_v34, %v9296_v43  ;;  %17594 = vst [vmem:[#allocation32_spill] sm:$0xff] %v12048_v30  ;;  %v2813_v54 = vpop.f32.mrf.mxu1 }
 0x21a   : > { %v2115_v50 = vadd.f32 %v2091_v59, %v2067_v60  ;;  %v2308_v59 = vmul.f32 %v11565_v56, %v9296_v43  ;;  %v17593_v60 = vld [vmem:[#allocation26_spill] sm:$0xff]  ;;  %v2452_v56 = vmul.f32 %v11623_v57, %v9299_v45  ;;  %v2621_v57 = vmul.f32 %v12026_v18, %v17598_v1 }
 0x21b   : > { %8329 = vmatmul.msk.bf16.vlgmr.msrb.gmra.mxu2 %vm290_vm0, %v4182_v4  ;;  %v2157_v7 = vsel %vm17592_vm14, %v17151_v9, %v17152_v19  ;;  %v2355_v42 = vmul.f32 %v17593_v60, %v9290_v41  ;;  %v2210_v53 = vadd.f32 %v2186_v44, %v2114_v37  ;;  %v2356_v4 = vmul.f32 %v11505_v48, %v9290_v41 }
 0x21c   : > { %v2187_v13 = vmul.f32 %v2157_v7, %v9251_v25  ;;  %v2451_v9 = vmul.f32 %v11446_v27, %v9299_v45  ;;  %v17595_v7 = vrot.slane %v11338_v21, 7  ;;  %v17596_v37 = vrot.slane %v11510_v15, 7 }
 0x21d   : > { %v8702_v34 = vpop.eup %8701  ;;  %v2331_v38 = vadd.f32 %v2307_v24, %v2210_v53  ;;  %v2620_v27 = vmul.f32 %v11338_v21, %v17598_v1  ;;  %v17602_v24 = vld [vmem:[#allocation15_spill] sm:$0xff]  ;;  %v17604_v23 = vrot.slane %v12026_v18, 1  ;;  %v17606_v45 = vrot.slane %v11505_v48, 1 }
 0x21e   : > { %v12062_v44 = vsel %vm17597_vm9, %v17596_v37, %v17595_v7  ;;  %v8704_v11 = vpop.eup %8703  ;;  %v2936_v19 = vadd.f32 1.0, %v8702_v34  ;;  %v2211_v54 = vadd.f32 %v2187_v13, %v2115_v50  ;;  %v17599_v7 = vrot.slane %v12026_v18, 7  ;;  %v17621_v18 = vld [vmem:[#allocation36_spill] sm:$0xff]  ;;  %vm17634_vm9 = vmmov %vm17608_vm2 }
 0x21f   : > { %v12066_v36 = vadd.f32 1.0, %v8704_v11  ;;  %v17600_v34 = vrot.slane %v12032_v12, 7  ;;  %v2572_v13 = vmul.f32 %v12062_v44, %v17602_v24  ;;  %v2379_v15 = vadd.f32 %v2355_v42, %v2331_v38 }
 0x220   : > { %8705 = vrcp.f32 %v2936_v19  ;;  %v3013_v6 = vand.u32 2147483648, %v2936_v19  ;;  %vm3007_vm11 = vweird.f32 %v2936_v19  ;;  %v3011_v53 = vand.u32 2147483647, %v2936_v19 }
 0x221   : > { %v2551_v50 = vsel %vm17601_vm1, %v17600_v34, %v17599_v7  ;;  %8707 = vrcp.f32 %v12066_v36  ;;  %v1875_v37 = vand.u32 2147483648, %v12066_v36  ;;  %vm1869_vm13 = vweird.f32 %v12066_v36 }
 0x222   : > { %v1873_v11 = vand.u32 2147483647, %v12066_v36  ;;  %v2332_v60 = vadd.f32 %v2308_v59, %v2211_v54  ;;  %v3014_v8 = vor.u32 1.1754944e-38, %v3013_v6  ;;  %v2573_v7 = vmul.f32 %v2551_v50, %v17602_v24  ;;  %v12104_v59 = vld [vmem:[%s17022_s1 + $0x8] ss:$0 sm:$0xff] }
 0x223   : > { %v12084_v29 = vor.u32 1.1754944e-38, %v1875_v37  ;;  %v17603_v34 = vrot.slane %v12048_v30, 1  ;;  %v2475_v1 = vadd.f32 %v2451_v9, %v2379_v15  ;;  %v17607_v41 = vrot.slane %v11338_v21, 1  ;;  %17610 = vst [vmem:[#allocation19_spill] sm:$0xff] %v12104_v59  ;;  %v17616_v9 = vld [vmem:[#allocation21_spill] sm:$0xff]  ;;  %v17619_v54 = vld [vmem:[#allocation38_spill] sm:$0xff] }
 0x224   : > { %v2380_v12 = vadd.f32 %v2356_v4, %v2332_v60  ;;  %vm12107_vm3 = vcmp.eq.f32.partialorder %v3011_v53, 8.507059e+37  ;;  %v17617_v4 = vrot.slane %v17616_v9, 7  ;;  %v17622_v30 = vrot.slane %v17621_v18, 1 }
 0x225   : > { %v2687_v26 = vsel %vm17605_vm15, %v17604_v23, %v17603_v34  ;;  %v12099_v38 = vsel %vm17608_vm2, %v17607_v41, %v17606_v45  ;;  %v12115_v23 = vadd.f32 %v11602_v10, %v12003_v46  ;;  %v17614_v41 = vld [vmem:[#allocation37_spill] sm:$0xff]  ;;  %v2596_v53 = vadd.f32 %v2572_v13, %v2475_v1  ;;  %v17620_v34 = vld [vmem:[#allocation40_spill] sm:$0xff]  ;;  %vm17641_vm15 = vmmov %vm17608_vm2 }
 0x226   : > { %17609 = vst [vmem:[#allocation17_spill] sm:$0xff] %v12099_v38  ;;  %v2717_v42 = vmul.f32 %v12104_v59, %v2687_v26  ;;  %v2716_v48 = vmul.f32 %v12104_v59, %v12099_v38  ;;  %v17615_v45 = vrot.slane %v17614_v41, 7  ;;  %v3480_v26 = vmul.f32 %v11901_v0, %v17619_v54  ;;  %v8706_v15 = vpop.eup %8705 }
 0x227   : > { %17613 = vst [vmem:[#allocation34_spill] sm:$0xff] %v12115_v23  ;;  %v2476_v50 = vadd.f32 %v2452_v56, %v2380_v12  ;;  %v3504_v59 = vmul.f32 %v17620_v34, %v17614_v41  ;;  %v8708_v46 = vpop.eup %8707  ;;  %v3003_v24 = vmul.f32 %v8706_v15, %v2936_v19  ;;  %vm3008_vm5 = vweird.f32 %v8706_v15 }
 0x228   : > { %v3452_v60 = vsel %vm17618_vm4, %v17617_v4, %v17615_v45  ;;  %v8282_v10 = vmul.f32 -1.442695, %v12115_v23  ;;  %v3505_v9 = vmul.f32 %v11835_v31, %v17620_v34  ;;  %v1865_v45 = vmul.f32 %v8708_v46, %v12066_v36  ;;  %vm12151_vm12 = vmor %vm3007_vm11, %vm3008_vm5 }
 0x229   : > { %v3479_v37 = vmul.f32 %v17619_v54, %v3452_v60  ;;  %vm1870_vm6 = vweird.f32 %v8708_v46  ;;  %v2597_v0 = vadd.f32 %v2573_v7, %v2476_v50  ;;  %v2644_v4 = vadd.f32 %v2620_v27, %v2596_v53  ;;  %vm17637_vm11 = vmmov %vm17618_vm4 }
 0x22a   : > { %v3004_v12 = vsub.f32 1.0, %v3003_v24  ;;  %8709 = vpow2.f32 %v8282_v10  ;;  %v3529_v56 = vadd.f32 %v3505_v9, %v3480_v26  ;;  %v1866_v13 = vsub.f32 1.0, %v1865_v45  ;;  %vm12162_vm10 = vmor %vm1869_vm13, %vm1870_vm6 }
 0x22b   : > { %v3528_v1 = vadd.f32 %v3504_v59, %v3479_v37  ;;  %v2645_v60 = vadd.f32 %v2621_v57, %v2597_v0  ;;  %v2740_v54 = vadd.f32 %v2716_v48, %v2644_v4  ;;  %v17623_v38 = vrot.slane %v17614_v41, 1  ;;  %v12187_v4 = vld [vmem:[#allocation3 + $0x48] sm:$0xff]  ;;  %vm17638_vm13 = vmmov %vm17618_vm4 }
 0x22c   : > { %v3005_v34 = vmul.f32 %v8706_v15, %v3004_v12  ;;  %v3602_v27 = vmul.f32 %v11937_v63, %v11833_v62  ;;  %v17625_v10 = vrot.slane %v11854_v14, 7  ;;  %v17626_v24 = vrot.slane %v11837_v40, 7  ;;  %vm17647_vm5 = vmmov %vm17618_vm4 }
 0x22d   : > { %v3590_v23 = vsel %vm17624_vm7, %v17623_v38, %v17622_v30  ;;  %v1867_v30 = vmul.f32 %v8708_v46, %v1866_v13  ;;  %v2741_v7 = vadd.f32 %v2717_v42, %v2645_v60  ;;  %v3723_v63 = vmul.f32 %v11961_v39, %v11889_v3 }
 0x22e   : > { %v3601_v21 = vmul.f32 %v11833_v62, %v3590_v23  ;;  %v12147_v57 = vsel %vm17627_vm8, %v17626_v24, %v17625_v10  ;;  %v3006_v59 = vadd.f32 %v8706_v15, %v3005_v34  ;;  %v3626_v23 = vadd.f32 %v3602_v27, %v3529_v56  ;;  %v12197_v10 = vld [vmem:[#allocation3 + $0x50] sm:$0xff] }
 0x22f   : > { %v3722_v38 = vmul.f32 %v11889_v3, %v12147_v57  ;;  %v3771_v41 = vmul.f32 %v11904_v28, %v11854_v14  ;;  %v1868_v42 = vadd.f32 %v8708_v46, %v1867_v30  ;;  %vm1874_vm14 = vcmp.eq.f32.partialorder %v1873_v11, 8.507059e+37 }
 0x230   : > { %v3625_v19 = vadd.f32 %v3601_v21, %v3528_v1  ;;  %v2754_v26 = vpack.c.bf16 %v2741_v7, %v2740_v54  ;;  %v17632_v50 = vrot.slane %v11835_v31, 1  ;;  %v17633_v53 = vrot.slane %v11854_v14, 1  ;;  %v8710_v36 = vpop.eup %8709 }
 0x231   : > { %v3010_v34 = vsel %vm12151_vm12, %v8706_v15, %v3006_v59  ;;  %v3747_v9 = vadd.f32 %v3723_v63, %v3626_v23  ;;  %v3772_v45 = vmul.f32 %v11891_v32, %v11904_v28  ;;  %v1872_v31 = vsel %vm12162_vm10, %v8708_v46, %v1868_v42  ;;  %vm17664_vm10 = vmmov %vm17618_vm4 }
 0x232   : > { %v12174_v37 = vsel %vm17634_vm9, %v17633_v53, %v17632_v50  ;;  %v3746_v21 = vadd.f32 %v3722_v38, %v3625_v19  ;;  %v3015_v11 = vsel %vm12107_vm3, %v3014_v8, %v3010_v34  ;;  %8276 = vmatmul.msk.bf16.gmra.mxu3 %vm290_vm0, %v2754_v26  ;;  %v2937_v54 = vadd.f32 1.0, %v8710_v36  ;;  %v12193_v8 = vld [vmem:[#allocation3 + $0x58] sm:$0xff]  ;;  %vm17644_vm3 = vmmov %vm17624_vm7  ;;  %v17670_v53 = vld [vmem:[#allocation15_spill] sm:$0xff] }
 0x233   : > { %v3869_v0 = vmul.f32 %v11985_v5, %v11924_v47  ;;  %v3320_v15 = vmul.f32 %v3015_v11, %v11990_v61  ;;  %v1877_v12 = vsel %vm1874_vm14, %v12084_v29, %v1872_v31  ;;  %v3868_v6 = vmul.f32 %v11924_v47, %v12174_v37  ;;  %vm17650_vm7 = vmmov %vm17644_vm3 }
 0x234   : > { %v3795_v1 = vadd.f32 %v3771_v41, %v3746_v21  ;;  %v1916_v46 = vmul.f32 %v1877_v12, %v11999_v49  ;;  %8711 = vrcp.f32 %v2937_v54  ;;  %v3796_v56 = vadd.f32 %v3772_v45, %v3747_v9  ;;  %vm17652_vm8 = vmmov %vm17644_vm3 }
 0x235   : > { %3369 = vst.msk [vmem:[#allocation3 + $0xf0] sm:$0xff] %vm290_vm0, %v3320_v15  ;;  %vm3022_vm1 = vweird.f32 %v2937_v54  ;;  %v3026_v13 = vand.u32 2147483647, %v2937_v54  ;;  %v3028_v60 = vand.u32 2147483648, %v2937_v54  ;;  %v3940_v29 = vrot.slane %v12187_v4, 7  ;;  %vm17667_vm14 = vmmov %vm17618_vm4 }
 0x236   : > { %v3892_v27 = vadd.f32 %v3868_v6, %v3795_v1  ;;  %1971 = vst.msk [vmem:[#allocation3 + $0xc8] sm:$0xff] %vm290_vm0, %v1916_v46  ;;  %v3893_v61 = vadd.f32 %v3869_v0, %v3796_v56  ;;  %v3956_v24 = vrot.slane %v12193_v8, 7  ;;  %v17635_v18 = vrot.slane %v11916_v22, 7  ;;  %v2816_v6 = vpop.f32.mrf.mxu1  ;;  %vm17672_vm9 = vmmov %vm17644_vm3 }
 0x237   : > { %v17636_v49 = vrot.slane %v11914_v35, 7  ;;  %v4039_v7 = vmul.f32 %v11949_v51, %v11916_v22  ;;  %v3029_v38 = vor.u32 1.1754944e-38, %v3028_v60  ;;  %v4040_v59 = vmul.f32 %v11949_v51, %v12187_v4 }
 0x238   : > { %v4086_v48 = vrot.slane %v12187_v4, 1  ;;  %v12223_v19 = vsel %vm17638_vm13, %v3956_v24, %v3940_v29  ;;  %v4094_v23 = vrot.slane %v12197_v10, 1  ;;  %v17639_v41 = vrot.slane %v11891_v32, 1  ;;  %vm17683_vm13 = vmmov %vm17618_vm4 }
 0x239   : > { %v12208_v30 = vsel %vm17637_vm11, %v17636_v49, %v17635_v18  ;;  %v17640_v42 = vrot.slane %v11916_v22, 1  ;;  %v2013_v50 = vrot.slane %v12009_v55, 7  ;;  %vm12235_vm2 = vcmp.eq.f32.partialorder %v3026_v13, 8.507059e+37  ;;  %vm17682_vm11 = vmmov %vm17618_vm4 }
 0x23a   : > { %v3990_v63 = vmul.f32 %v11946_v20, %v12208_v30  ;;  %v3991_v36 = vmul.f32 %v11946_v20, %v12223_v19  ;;  %v2092_v9 = vmul.f32 %v12009_v55, %v9238_v17  ;;  %v8712_v45 = vpop.eup %8711  ;;  %v12251_v11 = vsel %vm17644_vm3, %v4086_v48, %v4094_v23 }
 0x23b   : > { %v12232_v26 = vsel %vm17641_vm15, %v17640_v42, %v17639_v41  ;;  %v17645_v31 = vrot.slane %v11877_v33, 7  ;;  %v17646_v15 = vrot.slane %v11974_v52, 7  ;;  %v2093_v1 = vmul.f32 %v11877_v33, %v9238_v17 }
 0x23c   : > { %v4014_v34 = vadd.f32 %v3990_v63, %v3892_v27  ;;  %v4136_v21 = vmul.f32 %v11972_v58, %v12232_v26  ;;  %v3018_v46 = vmul.f32 %v8712_v45, %v2937_v54  ;;  %vm3023_vm6 = vweird.f32 %v8712_v45 }
 0x23d   : > { %v2029_v0 = vsel %vm17618_vm4, %v2013_v50, %v17645_v31  ;;  %v2037_v12 = vsel %vm17647_vm5, %v17646_v15, %v2013_v50  ;;  %v4015_v56 = vadd.f32 %v3991_v36, %v3893_v61  ;;  %v4137_v60 = vmul.f32 %v11972_v58, %v12251_v11  ;;  %v17648_v50 = vld [vmem:[#allocation33_spill] sm:$0xff]  ;;  %vm12282_vm12 = vmor %vm3022_vm1, %vm3023_vm6 }
 0x23e   : > { %v4063_v13 = vadd.f32 %v4039_v7, %v4014_v34  ;;  %v2068_v27 = vmul.f32 %v2037_v12, %v9236_v16  ;;  %v2069_v18 = vmul.f32 %v2029_v0, %v9236_v16  ;;  %v2141_v49 = vrot.slane %v11877_v33, 1  ;;  %v8893_v0 = vld [vmem:[#allocation2 + $0x188] sm:$0xff]  ;;  %vm17674_vm1 = vmmov %vm17644_vm3 }
 0x23f   : > { %v3019_v63 = vsub.f32 1.0, %v3018_v46  ;;  %v4064_v41 = vadd.f32 %v4040_v59, %v4015_v56  ;;  %v2309_v17 = vmul.f32 %v17648_v50, %v9296_v43  ;;  %v17649_v61 = vrot.slane %v12009_v55, 1  ;;  %v17657_v56 = vld [vmem:[#allocation14_spill] sm:$0xff]  ;;  %vm17684_vm15 = vmmov %vm17674_vm1 }
 0x240   : > { %v4160_v42 = vadd.f32 %v4136_v21, %v4063_v13  ;;  %v2116_v31 = vadd.f32 %v2092_v9, %v2068_v27  ;;  %v2117_v15 = vadd.f32 %v2093_v1, %v2069_v18  ;;  %v17651_v36 = vrot.slane %v11974_v52, 1  ;;  %v17655_v52 = vld [vmem:[#allocation13_spill] sm:$0xff]  ;;  %v17656_v1 = vld [vmem:[#allocation28_spill] sm:$0xff] }
 0x241   : > { %v2149_v7 = vsel %vm17650_vm7, %v17649_v61, %v2141_v49  ;;  %v3020_v34 = vmul.f32 %v8712_v45, %v3019_v63  ;;  %v4161_v33 = vadd.f32 %v4137_v60, %v4064_v41  ;;  %v2310_v55 = vmul.f32 %v12062_v44, %v9296_v43  ;;  %v17658_v13 = vld [vmem:[#allocation20_spill] sm:$0xff]  ;;  %v17662_v44 = vld [vmem:[#allocation18_spill] sm:$0xff] }
 0x242   : > { %v2165_v16 = vsel %vm17652_vm8, %v2141_v49, %v17651_v36  ;;  %v2188_v59 = vmul.f32 %v2149_v7, %v9251_v25  ;;  %v2357_v12 = vmul.f32 %v8893_v0, %v17655_v52  ;;  %v2358_v46 = vmul.f32 %v17656_v1, %v17655_v52  ;;  %v17659_v49 = vld [vmem:[#allocation17_spill] sm:$0xff]  ;;  %v17660_v41 = vld [vmem:[#allocation32_spill] sm:$0xff] }
 0x243   : > { %v2189_v21 = vmul.f32 %v2165_v16, %v9251_v25  ;;  %v2453_v60 = vmul.f32 %v17658_v13, %v17657_v56  ;;  %v3021_v27 = vadd.f32 %v8712_v45, %v3020_v34  ;;  %v4183_v25 = vpack.c.bf16 %v4161_v33, %v4160_v42  ;;  %v17661_v61 = vld [vmem:[#allocation16_spill] sm:$0xff] }
 0x244   : > { %v2212_v18 = vadd.f32 %v2188_v59, %v2116_v31  ;;  %v2454_v63 = vmul.f32 %v17659_v49, %v17657_v56  ;;  %v2519_v50 = vrot.slane %v17660_v41, 7  ;;  %v2622_v43 = vmul.f32 %v17660_v41, %v17661_v61  ;;  %v17665_v59 = vld [vmem:[#allocation22_spill] sm:$0xff]  ;;  %v17675_v49 = vld [vmem:[#allocation19_spill] sm:$0xff] }
 0x245   : > { %v2213_v54 = vadd.f32 %v2189_v21, %v2117_v15  ;;  %v2623_v7 = vmul.f32 %v17662_v44, %v17661_v61  ;;  %v3025_v36 = vsel %vm12282_vm12, %v8712_v45, %v3021_v27  ;;  %8330 = vmatmul.msk.bf16.gmra.mxu2 %vm290_vm0, %v4183_v25  ;;  %v2671_v31 = vrot.slane %v17662_v44, 1  ;;  %v17668_v45 = vld [vmem:[#allocation35_spill] sm:$0xff] }
 0x246   : > { %v2333_v16 = vadd.f32 %v2309_v17, %v2212_v18  ;;  %v3030_v15 = vsel %vm12235_vm2, %v3029_v38, %v3025_v36  ;;  %v17663_v34 = vrot.slane %v17662_v44, 7  ;;  %v17666_v21 = vrot.slane %v17665_v59, 7  ;;  %v2818_v17 = vpop.f32.mrf.mxu1  ;;  %v17676_v44 = vld [vmem:[#allocation38_spill] sm:$0xff]  ;;  %v17677_v36 = vld [vmem:[#allocation39_spill] sm:$0xff]  ;;  %vm17685_vm2 = vmmov %vm17674_vm1 }
 0x247   : > { %v2334_v42 = vadd.f32 %v2310_v55, %v2213_v54  ;;  %v12315_v0 = vadd.f32 %v17668_v45, %v2816_v6  ;;  %v17669_v55 = vld [vmem:[#allocation34_spill] sm:$0xff]  ;;  %v17671_v27 = vrot.slane %v17660_v41, 1  ;;  %v17673_v18 = vrot.slane %v17665_v59, 1  ;;  %v17679_v59 = vld [vmem:[#allocation31_spill] sm:$0xff] }
 0x248   : > { %v2535_v33 = vsel %vm17664_vm10, %v2519_v50, %v17663_v34  ;;  %v2543_v9 = vsel %vm17667_vm14, %v17666_v21, %v2519_v50  ;;  %v3321_v52 = vmul.f32 %v3030_v15, %v17669_v55  ;;  %v2381_v1 = vadd.f32 %v2357_v12, %v2333_v16  ;;  %v17678_v34 = vld [vmem:[#allocation40_spill] sm:$0xff]  ;;  %vm17694_vm14 = vmmov %vm17682_vm11 }
 0x249   : > { %v2382_v56 = vadd.f32 %v2358_v46, %v2334_v42  ;;  %v2574_v38 = vmul.f32 %v2543_v9, %v17670_v53  ;;  %v2575_v13 = vmul.f32 %v2535_v33, %v17670_v53  ;;  %v2679_v25 = vsel %vm17672_vm9, %v17671_v27, %v2671_v31  ;;  %vm17695_vm9 = vmmov %vm17682_vm11 }
 0x24a   : > { %v2695_v6 = vsel %vm17674_vm1, %v2671_v31, %v17673_v18  ;;  %v8284_v54 = vmul.f32 -1.442695, %v12315_v0  ;;  %3370 = vst.msk [vmem:[#allocation3 + $0xf8] sm:$0xff] %vm290_vm0, %v3321_v52  ;;  %v2477_v12 = vadd.f32 %v2453_v60, %v2381_v1  ;;  %v2718_v50 = vmul.f32 %v17675_v49, %v2679_v25 }
 0x24b   : > { %v2478_v46 = vadd.f32 %v2454_v63, %v2382_v56  ;;  %v2719_v61 = vmul.f32 %v17675_v49, %v2695_v6  ;;  %v12333_v41 = vadd.f32 %v17668_v45, %v2818_v17  ;;  %v3481_v16 = vmul.f32 %v17677_v36, %v17676_v44  ;;  %v17680_v45 = vld [vmem:[#allocation29_spill] sm:$0xff] }
 0x24c   : > { %8713 = vpow2.f32 %v8284_v54  ;;  %v3482_v42 = vmul.f32 %v12147_v57, %v17676_v44  ;;  %v2598_v31 = vadd.f32 %v2574_v38, %v2477_v12  ;;  %v3506_v60 = vmul.f32 %v11837_v40, %v17678_v34  ;;  %v17681_v12 = vld [vmem:[#allocation30_spill] sm:$0xff] }
 0x24d   : > { %v2599_v15 = vadd.f32 %v2575_v13, %v2478_v46  ;;  %v3507_v63 = vmul.f32 %v11854_v14, %v17678_v34  ;;  %v8285_v33 = vmul.f32 -1.442695, %v12333_v41  ;;  %v3603_v21 = vmul.f32 %v17679_v59, %v11833_v62 }
 0x24e   : > { %v3604_v9 = vmul.f32 %v12174_v37, %v11833_v62  ;;  %v3724_v17 = vmul.f32 %v17680_v45, %v11889_v3  ;;  %v2646_v57 = vadd.f32 %v2622_v43, %v2598_v31  ;;  %v3530_v52 = vadd.f32 %v3506_v60, %v3481_v16  ;;  %v2821_v14 = vpop.f32.mrf.mxu1 }
 0x24f   : > { %v2647_v55 = vadd.f32 %v2623_v7, %v2599_v15  ;;  %v3531_v1 = vadd.f32 %v3507_v63, %v3482_v42  ;;  %8715 = vpow2.f32 %v8285_v33  ;;  %v3725_v40 = vmul.f32 %v12208_v30, %v11889_v3 }
 0x250   : > { %v2742_v56 = vadd.f32 %v2718_v50, %v2646_v57  ;;  %v3627_v38 = vadd.f32 %v3603_v21, %v3530_v52  ;;  %v3773_v37 = vmul.f32 %v11914_v35, %v11904_v28  ;;  %v3774_v25 = vmul.f32 %v11916_v22, %v11904_v28 }
 0x251   : > { %v2743_v53 = vadd.f32 %v2719_v61, %v2647_v55  ;;  %v3628_v13 = vadd.f32 %v3604_v9, %v3531_v1  ;;  %v3948_v43 = vrot.slane %v12197_v10, 7  ;;  %v3870_v46 = vmul.f32 %v17681_v12, %v11924_v47 }
 0x252   : > { %v8714_v27 = vpop.eup %8713  ;;  %v3748_v6 = vadd.f32 %v3724_v17, %v3627_v38  ;;  %v4102_v61 = vrot.slane %v12193_v8, 1  ;;  %v4041_v33 = vmul.f32 %v11949_v51, %v12197_v10  ;;  %v4042_v17 = vmul.f32 %v11949_v51, %v12193_v8 }
 0x253   : > { %v2755_v7 = vpack.c.bf16 %v2743_v53, %v2742_v56  ;;  %v12357_v18 = vadd.f32 1.0, %v8714_v27  ;;  %v3749_v54 = vadd.f32 %v3725_v40, %v3628_v13  ;;  %v12365_v49 = vsel %vm17682_vm11, %v3948_v43, %v3956_v24  ;;  %v12415_v56 = vld [vmem:[%s17024_s3] ss:$0 sm:$0xff]  ;;  %vm17696_vm11 = vmmov %vm17685_vm2 }
 0x254   : > { %v12371_v50 = vsel %vm17683_vm13, %v3940_v29, %v3948_v43  ;;  %v3871_v24 = vmul.f32 %v12232_v26, %v11924_v47  ;;  %v3797_v31 = vadd.f32 %v3773_v37, %v3748_v6  ;;  %v3993_v60 = vmul.f32 %v11946_v20, %v12365_v49  ;;  %vm17697_vm13 = vmmov %vm17685_vm2 }
 0x255   : > { %8277 = vmatmul.msk.bf16.gmra.mxu3 %vm290_vm0, %v2755_v7  ;;  %8717 = vrcp.f32 %v12357_v18  ;;  %v3056_v36 = vand.u32 2147483647, %v12357_v18  ;;  %v3058_v16 = vand.u32 2147483648, %v12357_v18  ;;  %v8716_v42 = vpop.eup %8715  ;;  %v3798_v15 = vadd.f32 %v3774_v25, %v3749_v54 }
 0x256   : > { %v3992_v29 = vmul.f32 %v11946_v20, %v12371_v50  ;;  %v12384_v63 = vadd.f32 1.0, %v8716_v42  ;;  %v12392_v59 = vsel %vm17684_vm15, %v4094_v23, %v4102_v61  ;;  %v3894_v21 = vadd.f32 %v3870_v46, %v3797_v31  ;;  %v2823_v52 = vpop.f32.mrf.mxu1 }
 0x257   : > { %v3895_v9 = vadd.f32 %v3871_v24, %v3798_v15  ;;  %v12400_v57 = vsel %vm17685_vm2, %v4102_v61, %v4086_v48  ;;  %vm3052_vm3 = vweird.f32 %v12357_v18  ;;  %v3059_v55 = vor.u32 1.1754944e-38, %v3058_v16 }
 0x258   : > { %8719 = vrcp.f32 %v12384_v63  ;;  %v4138_v23 = vmul.f32 %v11972_v58, %v12392_v59  ;;  %vm12406_vm4 = vcmp.eq.f32.partialorder %v3056_v36, 8.507059e+37  ;;  %vm3067_vm5 = vweird.f32 %v12384_v63 }
 0x259   : > { %v3071_v40 = vand.u32 2147483647, %v12384_v63  ;;  %v4016_v14 = vadd.f32 %v3992_v29, %v3894_v21  ;;  %v4017_v48 = vadd.f32 %v3993_v60, %v3895_v9  ;;  %v12418_v53 = vadd.f32 %v12415_v56, %v2823_v52  ;;  %v12444_v21 = vld [vmem:[#allocation3 + $0x60] sm:$0xff]  ;;  %v12455_v52 = vld [vmem:[#allocation3 + $0x68] sm:$0xff] }
 0x25a   : > { %v3073_v13 = vand.u32 2147483648, %v12384_v63  ;;  %v4139_v27 = vmul.f32 %v11972_v58, %v12400_v57  ;;  %v3483_v37 = vmul.f32 %v11961_v39, %v17676_v44  ;;  %v3484_v25 = vmul.f32 %v17680_v45, %v17676_v44 }
 0x25b   : > { %v8718_v38 = vpop.eup %8717  ;;  %v4065_v7 = vadd.f32 %v4041_v33, %v4016_v14  ;;  %v4066_v6 = vadd.f32 %v4042_v17, %v4017_v48  ;;  %v8287_v54 = vmul.f32 -1.442695, %v12418_v53  ;;  %v3508_v46 = vmul.f32 %v11891_v32, %v17678_v34 }
 0x25c   : > { %v3048_v43 = vmul.f32 %v8718_v38, %v12357_v18  ;;  %vm3053_vm6 = vweird.f32 %v8718_v38  ;;  %v3509_v61 = vmul.f32 %v11914_v35, %v17678_v34  ;;  %v3605_v36 = vmul.f32 %v11985_v5, %v11833_v62 }
 0x25d   : > { %vm12435_vm7 = vcmp.eq.f32.partialorder %v3071_v40, 8.507059e+37  ;;  %v4162_v45 = vadd.f32 %v4138_v23, %v4065_v7  ;;  %v4163_v24 = vadd.f32 %v4139_v27, %v4066_v6  ;;  %v3606_v42 = vmul.f32 %v17681_v12, %v11833_v62  ;;  %vm12449_vm8 = vmor %vm3052_vm3, %vm3053_vm6  ;;  %v12457_v40 = vld [vmem:[#allocation3 + $0x70] sm:$0xff]  ;;  %v2831_v7 = vpop.f32.mrf.mxu3 }
 0x25e   : > { %v3049_v39 = vsub.f32 1.0, %v3048_v43  ;;  %v8720_v31 = vpop.eup %8719  ;;  %8721 = vpow2.f32 %v8287_v54  ;;  %v3532_v15 = vadd.f32 %v3508_v46, %v3483_v37  ;;  %v3533_v32 = vadd.f32 %v3509_v61, %v3484_v25 }
 0x25f   : > { %v3726_v35 = vmul.f32 %v12223_v19, %v11889_v3  ;;  %v3063_v5 = vmul.f32 %v8720_v31, %v12384_v63  ;;  %v3074_v60 = vor.u32 1.1754944e-38, %v3073_v13  ;;  %v4184_v33 = vpack.c.bf16 %v4163_v24, %v4162_v45 }
 0x260   : > { %v3050_v29 = vmul.f32 %v8718_v38, %v3049_v39  ;;  %vm3068_vm12 = vweird.f32 %v8720_v31  ;;  %v3629_v12 = vadd.f32 %v3605_v36, %v3532_v15  ;;  %v3630_v17 = vadd.f32 %v3606_v42, %v3533_v32 }
 0x261   : > { %v3727_v23 = vmul.f32 %v12371_v50, %v11889_v3  ;;  %v3064_v48 = vsub.f32 1.0, %v3063_v5  ;;  %8331 = vmatmul.msk.bf16.gmra.mxu2 %vm290_vm0, %v4184_v33  ;;  %v3775_v18 = vmul.f32 %v12187_v4, %v11904_v28  ;;  %v3776_v13 = vmul.f32 %v12197_v10, %v11904_v28  ;;  %vm12476_vm10 = vmor %vm3067_vm5, %vm3068_vm12 }
 0x262   : > { %v3051_v14 = vadd.f32 %v8718_v38, %v3050_v29  ;;  %v3750_v27 = vadd.f32 %v3726_v35, %v3629_v12  ;;  %v3872_v25 = vmul.f32 %v12251_v11, %v11924_v47  ;;  %v3941_v43 = vrot.slane %v12444_v21, 7 }
 0x263   : > { %v3751_v37 = vadd.f32 %v3727_v23, %v3630_v17  ;;  %v3065_v54 = vmul.f32 %v8720_v31, %v3064_v48  ;;  %v3949_v46 = vrot.slane %v12455_v52, 7  ;;  %v3957_v61 = vrot.slane %v12457_v40, 7 }
 0x264   : > { %v3055_v6 = vsel %vm12449_vm8, %v8718_v38, %v3051_v14  ;;  %v8722_v36 = vpop.eup %8721  ;;  %v3799_v24 = vadd.f32 %v3775_v18, %v3750_v27  ;;  %v3873_v38 = vmul.f32 %v12392_v59, %v11924_v47  ;;  %v4043_v33 = vmul.f32 %v11949_v51, %v12444_v21 }
 0x265   : > { %v3060_v39 = vsel %vm12406_vm4, %v3059_v55, %v3055_v6  ;;  %v3800_v42 = vadd.f32 %v3776_v13, %v3751_v37  ;;  %v3066_v32 = vadd.f32 %v8720_v31, %v3065_v54  ;;  %v12483_v35 = vadd.f32 1.0, %v8722_v36  ;;  %vm17701_vm4 = vmmov %vm17695_vm9 }
 0x266   : > { %v3323_v15 = vmul.f32 %v3060_v39, %v12315_v0  ;;  %v12489_v55 = vsel %vm17694_vm14, %v3941_v43, %v3949_v46  ;;  %v12495_v1 = vsel %vm17695_vm9, %v3957_v61, %v3941_v43  ;;  %v3896_v5 = vadd.f32 %v3872_v25, %v3799_v24  ;;  %vm17702_vm5 = vmmov %vm17701_vm4 }
 0x267   : > { %v3897_v63 = vadd.f32 %v3873_v38, %v3800_v42  ;;  %v3995_v29 = vmul.f32 %v11946_v20, %v12489_v55  ;;  %v3070_v0 = vsel %vm12476_vm10, %v8720_v31, %v3066_v32  ;;  %8723 = vrcp.f32 %v12483_v35  ;;  %vm17709_vm14 = vmmov %vm17696_vm11 }
 0x268   : > { %3372 = vst.msk [vmem:[#allocation3 + $0x108] sm:$0xff] %vm290_vm0, %v3323_v15  ;;  %v3075_v9 = vsel %vm12435_vm7, %v3074_v60, %v3070_v0  ;;  %vm3097_vm1 = vweird.f32 %v12483_v35  ;;  %v3994_v12 = vmul.f32 %v11946_v20, %v12495_v1  ;;  %v3101_v14 = vand.u32 2147483647, %v12483_v35 }
 0x269   : > { %v4019_v17 = vadd.f32 %v3995_v29, %v3897_v63  ;;  %v3324_v23 = vmul.f32 %v3075_v9, %v12333_v41  ;;  %v3103_v31 = vand.u32 2147483648, %v12483_v35  ;;  %v4044_v48 = vmul.f32 %v11949_v51, %v12455_v52  ;;  %v2826_v41 = vpop.f32.mrf.mxu1 }
 0x26a   : > { %v4018_v18 = vadd.f32 %v3994_v12, %v3896_v5  ;;  %v4087_v13 = vrot.slane %v12444_v21, 1  ;;  %v4095_v16 = vrot.slane %v12455_v52, 1  ;;  %v4103_v60 = vrot.slane %v12457_v40, 1 }
 0x26b   : > { %3373 = vst.msk [vmem:[#allocation3 + $0x110] sm:$0xff] %vm290_vm0, %v3324_v23  ;;  %v4068_v27 = vadd.f32 %v4044_v48, %v4019_v17  ;;  %v12520_v37 = vadd.f32 %v12415_v56, %v2831_v7  ;;  %v3485_v25 = vmul.f32 %v12208_v30, %v17676_v44  ;;  %v3486_v43 = vmul.f32 %v12223_v19, %v17676_v44  ;;  %v2833_v30 = vpop.f32.mrf.mxu3 }
 0x26c   : > { %v4067_v6 = vadd.f32 %v4043_v33, %v4018_v18  ;;  %v12530_v54 = vsel %vm17696_vm11, %v4095_v16, %v4103_v60  ;;  %v12536_v7 = vsel %vm17697_vm13, %v4087_v13, %v4095_v16  ;;  %v12539_v36 = vadd.f32 %v12415_v56, %v2826_v41  ;;  %v12562_v16 = vld [vmem:[#allocation3 + $0x78] sm:$0xff]  ;;  %v12576_v41 = vld [vmem:[#allocation3 + $0x88] sm:$0xff] }
 0x26d   : > { %v8724_v39 = vpop.eup %8723  ;;  %v4140_v19 = vmul.f32 %v11972_v58, %v12536_v7  ;;  %v4141_v45 = vmul.f32 %v11972_v58, %v12530_v54  ;;  %v8290_v24 = vmul.f32 -1.442695, %v12520_v37  ;;  %v12547_v42 = vadd.f32 %v12415_v56, %v2833_v30  ;;  %17700 = vst [vmem:[#allocation25_spill] sm:$0xff] %v12576_v41 }
 0x26e   : > { %v3093_v38 = vmul.f32 %v8724_v39, %v12483_v35  ;;  %vm3098_vm15 = vweird.f32 %v8724_v39  ;;  %v8288_v15 = vmul.f32 -1.442695, %v12539_v36  ;;  %v3510_v32 = vmul.f32 %v11916_v22, %v17678_v34 }
 0x26f   : > { %v4164_v63 = vadd.f32 %v4140_v19, %v4067_v6  ;;  %v4165_v29 = vadd.f32 %v4141_v45, %v4068_v27  ;;  %8725 = vpow2.f32 %v8290_v24  ;;  %v8291_v0 = vmul.f32 -1.442695, %v12547_v42  ;;  %vm12567_vm2 = vmor %vm3097_vm1, %vm3098_vm15 }
 0x270   : > { %v3094_v5 = vsub.f32 1.0, %v3093_v38  ;;  %8727 = vpow2.f32 %v8288_v15  ;;  %v3511_v33 = vmul.f32 %v12187_v4, %v17678_v34  ;;  %v3534_v9 = vadd.f32 %v3510_v32, %v3485_v25 }
 0x271   : > { %v4185_v12 = vpack.c.bf16 %v4165_v29, %v4164_v63  ;;  %8729 = vpow2.f32 %v8291_v0  ;;  %v3607_v17 = vmul.f32 %v12232_v26, %v11833_v62  ;;  %v3608_v23 = vmul.f32 %v12251_v11, %v11833_v62  ;;  %v2828_v25 = vpop.f32.mrf.mxu1 }
 0x272   : > { %v3095_v22 = vmul.f32 %v8724_v39, %v3094_v5  ;;  %v3104_v48 = vor.u32 1.1754944e-38, %v3103_v31  ;;  %v3728_v18 = vmul.f32 %v12365_v49, %v11889_v3  ;;  %v3535_v26 = vadd.f32 %v3511_v33, %v3486_v43 }
 0x273   : > { %8332 = vmatmul.msk.bf16.gmra.mxu2 %vm290_vm0, %v4185_v12  ;;  %v3631_v27 = vadd.f32 %v3607_v17, %v3534_v9  ;;  %v3729_v11 = vmul.f32 %v12495_v1, %v11889_v3  ;;  %v3777_v31 = vmul.f32 %v12193_v8, %v11904_v28  ;;  %vm3102_vm3 = vcmp.eq.f32.partialorder %v3101_v14, 8.507059e+37  ;;  %v2836_v30 = vpop.f32.mrf.mxu3 }
 0x274   : > { %v3096_v6 = vadd.f32 %v8724_v39, %v3095_v22  ;;  %v3778_v35 = vmul.f32 %v12444_v21, %v11904_v28  ;;  %v3632_v45 = vadd.f32 %v3608_v23, %v3535_v26  ;;  %v3874_v43 = vmul.f32 %v12400_v57, %v11924_v47 }
 0x275   : > { %v8726_v19 = vpop.eup %8725  ;;  %v3752_v24 = vadd.f32 %v3728_v18, %v3631_v27  ;;  %v17183_v38 = vrot.slane %v12562_v16, 7  ;;  %v17184_v14 = vrot.slane %v12576_v41, 7  ;;  %v12594_v29 = vsel %vm17701_vm4, %v3949_v46, %v3957_v61 }
 0x276   : > { %v8728_v15 = vpop.eup %8727  ;;  %v3100_v32 = vsel %vm12567_vm2, %v8724_v39, %v3096_v6  ;;  %v12585_v63 = vadd.f32 1.0, %v8726_v19  ;;  %v3753_v9 = vadd.f32 %v3729_v11, %v3632_v45  ;;  %v3875_v17 = vmul.f32 %v12536_v7, %v11924_v47  ;;  %v12638_v45 = vld [vmem:[#allocation3 + $0x80] sm:$0xff] }
 0x277   : > { %v8730_v0 = vpop.eup %8729  ;;  %v3105_v5 = vsel %vm3102_vm3, %v3104_v48, %v3100_v32  ;;  %v12596_v33 = vadd.f32 1.0, %v8728_v15  ;;  %v3801_v12 = vadd.f32 %v3777_v31, %v3752_v24  ;;  %v4045_v23 = vmul.f32 %v11949_v51, %v12457_v40  ;;  %17706 = vst [vmem:[#allocation24_spill] sm:$0xff] %v12638_v45  ;;  %vm17715_vm3 = vmmov %vm17701_vm4 }
 0x278   : > { %v3326_v39 = vmul.f32 %v3105_v5, %v12418_v53  ;;  %8731 = vrcp.f32 %v12585_v63  ;;  %v3146_v22 = vand.u32 2147483647, %v12585_v63  ;;  %v3148_v46 = vand.u32 2147483648, %v12585_v63  ;;  %vm17716_vm4 = vmmov %vm17715_vm3 }
 0x279   : > { %8733 = vrcp.f32 %v12596_v33  ;;  %v3996_v61 = vmul.f32 %v11946_v20, %v12594_v29  ;;  %v3116_v53 = vand.u32 2147483647, %v12596_v33  ;;  %v3118_v48 = vand.u32 2147483648, %v12596_v33 }
 0x27a   : > { %3375 = vst.msk [vmem:[#allocation3 + $0x120] sm:$0xff] %vm290_vm0, %v3326_v39  ;;  %v12612_v18 = vadd.f32 1.0, %v8730_v0  ;;  %v12620_v4 = vsel %vm17702_vm5, %v17184_v14, %v17183_v38  ;;  %vm3142_vm6 = vweird.f32 %v12585_v63  ;;  %vm3112_vm7 = vweird.f32 %v12596_v33 }
 0x27b   : > { %17703 = vst [vmem:[#allocation23_spill] sm:$0xff] %v12620_v4  ;;  %v3802_v26 = vadd.f32 %v3778_v35, %v3753_v9  ;;  %v3898_v27 = vadd.f32 %v3874_v43, %v3801_v12  ;;  %v12624_v11 = vor.u32 1.1754944e-38, %v3148_v46  ;;  %v12626_v31 = vor.u32 1.1754944e-38, %v3118_v48  ;;  %v12659_v46 = vld [vmem:[#allocation3 + $0xc0] sm:$0xff] }
 0x27c   : > { %8735 = vrcp.f32 %v12612_v18  ;;  %v3997_v25 = vmul.f32 %v11946_v20, %v12620_v4  ;;  %vm12631_vm8 = vcmp.eq.f32.partialorder %v3146_v22, 8.507059e+37  ;;  %vm3157_vm12 = vweird.f32 %v12612_v18  ;;  %v12718_v4 = vld [vmem:[#allocation3 + $0xd8] sm:$0xff] }
 0x27d   : > { %v3161_v30 = vand.u32 2147483647, %v12612_v18  ;;  %v3163_v35 = vand.u32 2147483648, %v12612_v18  ;;  %v3899_v19 = vadd.f32 %v3875_v17, %v3802_v26  ;;  %v4020_v24 = vadd.f32 %v3996_v61, %v3898_v27  ;;  %v12661_v61 = vld [vmem:[#allocation3 + $0xc8] sm:$0xff] }
 0x27e   : > { %v8732_v43 = vpop.eup %8731  ;;  %vm12640_vm10 = vcmp.eq.f32.partialorder %v3116_v53, 8.507059e+37  ;;  %v4046_v32 = vmul.f32 %v11949_v51, %v12562_v16  ;;  %v17185_v0 = vrot.slane %v12562_v16, 1  ;;  %v17186_v5 = vrot.slane %v12638_v45, 1  ;;  %v12663_v53 = vld [vmem:[#allocation3 + $0xd0] sm:$0xff] }
 0x27f   : > { %v12654_v9 = vsel %vm17709_vm14, %v4103_v60, %v4087_v13  ;;  %v8734_v12 = vpop.eup %8733  ;;  %v3138_v39 = vmul.f32 %v8732_v43, %v12585_v63  ;;  %vm3143_vm9 = vweird.f32 %v8732_v43  ;;  %v12657_v17 = vor.u32 1.1754944e-38, %v3163_v35 }
 0x280   : > { %v4021_v22 = vadd.f32 %v3997_v25, %v3899_v19  ;;  %v3108_v48 = vmul.f32 %v8734_v12, %v12596_v33  ;;  %vm3113_vm1 = vweird.f32 %v8734_v12  ;;  %v4069_v26 = vadd.f32 %v4045_v23, %v4020_v24  ;;  %vm12689_vm2 = vmor %vm3142_vm6, %vm3143_vm9 }
 0x281   : > { %v12672_v13 = vsel %vm17696_vm11, %v17185_v0, %v17186_v5  ;;  %v3139_v60 = vsub.f32 1.0, %v3138_v39  ;;  %vm12674_vm13 = vcmp.eq.f32.partialorder %v3161_v30, 8.507059e+37  ;;  %v4142_v35 = vmul.f32 %v11972_v58, %v12654_v9  ;;  %vm12704_vm5 = vmor %vm3112_vm7, %vm3113_vm1 }
 0x282   : > { %17710 = vst [vmem:[#allocation27_spill] sm:$0xff] %v12672_v13  ;;  %v4070_v25 = vadd.f32 %v4046_v32, %v4021_v22  ;;  %v4143_v23 = vmul.f32 %v11972_v58, %v12672_v13  ;;  %v8736_v19 = vpop.eup %8735  ;;  %v3109_v24 = vsub.f32 1.0, %v3108_v48  ;;  %v4879_v38 = vrot.slane %v12659_v46, 7  ;;  %vm17721_vm7 = vmmov %vm17696_vm11 }
 0x283   : > { %v17187_v14 = vrot.slane %v12661_v61, 7  ;;  %v17190_v0 = vrot.slane %v12663_v53, 7  ;;  %v3140_v39 = vmul.f32 %v8732_v43, %v3139_v60  ;;  %v3153_v30 = vmul.f32 %v8736_v19, %v12612_v18  ;;  %vm17725_vm14 = vmmov %vm17721_vm7 }
 0x284   : > { %vm3158_vm15 = vweird.f32 %v8736_v19  ;;  %v4166_v5 = vadd.f32 %v4142_v35, %v4069_v26  ;;  %v3110_v58 = vmul.f32 %v8734_v12, %v3109_v24  ;;  %v4167_v22 = vadd.f32 %v4143_v23, %v4070_v25  ;;  %vm17726_vm9 = vmmov %vm17721_vm7 }
 0x285   : > { %v4911_v48 = vsel %vm17715_vm3, %v4879_v38, %v17187_v14  ;;  %v4919_v60 = vsel %vm17716_vm4, %v17190_v0, %v4879_v38  ;;  %v3141_v26 = vadd.f32 %v8732_v43, %v3140_v39  ;;  %v3154_v35 = vsub.f32 1.0, %v3153_v30  ;;  %vm12730_vm6 = vmor %vm3157_vm12, %vm3158_vm15 }
 0x286   : > { %v4927_v25 = vmul.f32 %v4919_v60, %v17676_v44  ;;  %v4928_v23 = vmul.f32 %v4911_v48, %v17676_v44  ;;  %v3111_v24 = vadd.f32 %v8734_v12, %v3110_v58  ;;  %v4186_v14 = vpack.c.bf16 %v4167_v22, %v4166_v5  ;;  %v12720_v60 = vld [vmem:[#allocation3 + $0xe0] sm:$0xff]  ;;  %v12735_v48 = vld [vmem:[#allocation3 + $0xe8] sm:$0xff]  ;;  %vm17723_vm12 = vmmov %vm17715_vm3 }
 0x287   : > { %v4951_v13 = vmul.f32 %v12659_v46, %v17678_v34  ;;  %v4952_v38 = vmul.f32 %v12661_v61, %v17678_v34  ;;  %v3145_v33 = vsel %vm12689_vm2, %v8732_v43, %v3141_v26  ;;  %v3155_v39 = vmul.f32 %v8736_v19, %v3154_v35  ;;  %vm17727_vm1 = vmmov %vm17715_vm3 }
 0x288   : > { %v17202_v0 = vrot.slane %v12659_v46, 1  ;;  %v5007_v30 = vrot.slane %v12661_v61, 1  ;;  %v3150_v5 = vsel %vm12631_vm8, %v12624_v11, %v3145_v33  ;;  %v3115_v58 = vsel %vm12704_vm5, %v8734_v12, %v3111_v24  ;;  %8333 = vmatmul.msk.bf16.gmra.mxu2 %vm290_vm0, %v4186_v14  ;;  %vm17722_vm8 = vmmov %vm17721_vm7  ;;  %v12771_v24 = vld [vmem:[#allocation3 + $0xf0] sm:$0xff] }
 0x289   : > { %v4975_v32 = vadd.f32 %v4951_v13, %v4927_v25  ;;  %v4976_v22 = vadd.f32 %v4952_v38, %v4928_v23  ;;  %v3329_v26 = vmul.f32 %v3150_v5, %v12520_v37  ;;  %v3120_v11 = vsel %vm12640_vm10, %v12626_v31, %v3115_v58  ;;  %v12773_v38 = vld [vmem:[#allocation3 + $0xf8] sm:$0xff]  ;;  %vm17724_vm10 = vmmov %vm17715_vm3 }
 0x28a   : > { %v3156_v6 = vadd.f32 %v8736_v19, %v3155_v39  ;;  %v17201_v12 = vrot.slane %v12663_v53, 1  ;;  %v3327_v18 = vmul.f32 %v3120_v11, %v12539_v36  ;;  %v5031_v14 = vsel %vm17721_vm7, %v17202_v0, %v5007_v30  ;;  %vm17728_vm11 = vmmov %vm17727_vm1 }
 0x28b   : > { %v5119_v13 = vrot.slane %v12718_v4, 7  ;;  %v17199_v63 = vrot.slane %v12720_v60, 7  ;;  %3378 = vst.msk [vmem:[#allocation3 + $0x138] sm:$0xff] %vm290_vm0, %v3329_v26  ;;  %v5047_v36 = vmul.f32 %v5031_v14, %v11833_v62  ;;  %v17200_v15 = vrot.slane %v12735_v48, 7  ;;  %vm17731_vm15 = vmmov %vm17721_vm7 }
 0x28c   : > { %v3160_v37 = vsel %vm12730_vm6, %v8736_v19, %v3156_v6  ;;  %v5023_v31 = vsel %vm17722_vm8, %v5007_v30, %v17201_v12  ;;  %3376 = vst.msk [vmem:[#allocation3 + $0x128] sm:$0xff] %vm290_vm0, %v3327_v18  ;;  %v5215_v23 = vmul.f32 %v12718_v4, %v11904_v28  ;;  %v12784_v30 = vld [vmem:[#allocation3 + $0x100] sm:$0xff]  ;;  %v5216_v43 = vmul.f32 %v12720_v60, %v11904_v28  ;;  %vm17734_vm2 = vmmov %vm17727_vm1 }
 0x28d   : > { %v3165_v35 = vsel %vm12674_vm13, %v12657_v17, %v3160_v37  ;;  %v5048_v25 = vmul.f32 %v5023_v31, %v11833_v62  ;;  %v12767_v19 = vsel %vm17723_vm12, %v5119_v13, %v17199_v63  ;;  %v5071_v39 = vadd.f32 %v5047_v36, %v4975_v32  ;;  %v2838_v32 = vpop.f32.mrf.mxu3  ;;  %vm17729_vm13 = vmmov %vm17721_vm7 }
 0x28e   : > { %v3330_v33 = vmul.f32 %v3165_v35, %v12547_v42  ;;  %v12780_v17 = vsel %vm17724_vm10, %v17200_v15, %v5119_v13  ;;  %v5168_v27 = vmul.f32 %v12767_v19, %v11889_v3  ;;  %v17196_v42 = vrot.slane %v12718_v4, 1  ;;  %vm17737_vm3 = vmmov %vm17727_vm1 }
 0x28f   : > { %v5072_v5 = vadd.f32 %v5048_v25, %v4976_v22  ;;  %v5167_v58 = vmul.f32 %v12780_v17, %v11889_v3  ;;  %v5271_v26 = vrot.slane %v12720_v60, 1  ;;  %v17194_v11 = vrot.slane %v12735_v48, 1  ;;  %vm17740_vm4 = vmmov %vm17727_vm1 }
 0x290   : > { %3379 = vst.msk [vmem:[#allocation3 + $0x140] sm:$0xff] %vm290_vm0, %v3330_v33  ;;  %v5384_v6 = vrot.slane %v12771_v24, 7  ;;  %v17193_v18 = vrot.slane %v12773_v38, 7  ;;  %v17195_v13 = vrot.slane %v12784_v30, 7  ;;  %v5480_v37 = vmul.f32 %v12771_v24, %v11949_v51  ;;  %vm17742_vm5 = vmmov %vm17721_vm7 }
 0x291   : > { %v5191_v22 = vadd.f32 %v5167_v58, %v5071_v39  ;;  %v5192_v14 = vadd.f32 %v5168_v27, %v5072_v5  ;;  %v12803_v31 = vsel %vm17725_vm14, %v5271_v26, %v17194_v11  ;;  %v12809_v36 = vsel %vm17726_vm9, %v17196_v42, %v5271_v26  ;;  %vm17745_vm6 = vmmov %vm17742_vm5 }
 0x292   : > { %v12815_v35 = vsel %vm17727_vm1, %v5384_v6, %v17193_v18  ;;  %v5481_v25 = vmul.f32 %v12773_v38, %v11949_v51  ;;  %v5311_v27 = vmul.f32 %v12809_v36, %v11924_v47  ;;  %v5312_v5 = vmul.f32 %v12803_v31, %v11924_v47  ;;  %vm17749_vm8 = vmmov %vm17742_vm5 }
 0x293   : > { %v5239_v33 = vadd.f32 %v5215_v23, %v5191_v22  ;;  %v5240_v39 = vadd.f32 %v5216_v43, %v5192_v14  ;;  %v12827_v58 = vsel %vm17728_vm11, %v17195_v13, %v5384_v6  ;;  %v5433_v26 = vmul.f32 %v12815_v35, %v11946_v20  ;;  %vm17752_vm12 = vmmov %vm17727_vm1 }
 0x294   : > { %v17197_v18 = vrot.slane %v12771_v24, 1  ;;  %v5536_v23 = vrot.slane %v12773_v38, 1  ;;  %v5432_v14 = vmul.f32 %v12827_v58, %v11946_v20  ;;  %v17198_v11 = vrot.slane %v12784_v30, 1  ;;  %vm17757_vm14 = vmmov %vm17742_vm5 }
 0x295   : > { %v5335_v43 = vadd.f32 %v5311_v27, %v5239_v33  ;;  %v5336_v22 = vadd.f32 %v5312_v5, %v5240_v39  ;;  %v12843_v13 = vadd.f32 %v12415_v56, %v2838_v32  ;;  %v3487_v42 = vmul.f32 %v12371_v50, %v17676_v44  ;;  %v12873_v63 = vpop.f32.mrf.mxu3  ;;  %vm17762_vm11 = vmmov %vm17727_vm1 }
 0x296   : > { %v12840_v6 = vsel %vm17729_vm13, %v17197_v18, %v5536_v23  ;;  %v3488_v33 = vmul.f32 %v12365_v49, %v17676_v44  ;;  %v12853_v5 = vsel %vm17731_vm15, %v5536_v23, %v17198_v11  ;;  %v12858_v18 = vld [vmem:[%s17022_s1 + $0x18] ss:$0 sm:$0xff]  ;;  %v3513_v23 = vmul.f32 %v12193_v8, %v17678_v34  ;;  %vm17767_vm15 = vmmov %vm17742_vm5 }
 0x297   : > { %17730 = vst [vmem:[#allocation26_spill] sm:$0xff] %v12840_v6  ;;  %v5456_v39 = vadd.f32 %v5432_v14, %v5335_v43  ;;  %v5457_v27 = vadd.f32 %v5433_v26, %v5336_v22  ;;  %v5576_v32 = vmul.f32 %v12858_v18, %v12840_v6  ;;  %v5577_v50 = vmul.f32 %v12858_v18, %v12853_v5 }
 0x298   : > { %17732 = vst [vmem:[#allocation37_spill] sm:$0xff] %v12853_v5  ;;  %v8293_v49 = vmul.f32 -1.442695, %v12843_v13  ;;  %v3512_v26 = vmul.f32 %v12197_v10, %v17678_v34  ;;  %v3609_v14 = vmul.f32 %v12392_v59, %v11833_v62  ;;  %v3610_v11 = vmul.f32 %v12400_v57, %v11833_v62 }
 0x299   : > { %v5504_v43 = vadd.f32 %v5480_v37, %v5456_v39  ;;  %v5505_v22 = vadd.f32 %v5481_v25, %v5457_v27  ;;  %v3537_v12 = vadd.f32 %v3513_v23, %v3488_v33  ;;  %v3730_v0 = vmul.f32 %v12489_v55, %v11889_v3 }
 0x29a   : > { %8737 = vpow2.f32 %v8293_v49  ;;  %v3536_v15 = vadd.f32 %v3512_v26, %v3487_v42  ;;  %v3731_v8 = vmul.f32 %v12594_v29, %v11889_v3  ;;  %v3779_v59 = vmul.f32 %v12455_v52, %v11904_v28 }
 0x29b   : > { %v5600_v10 = vadd.f32 %v5576_v32, %v5504_v43  ;;  %v5601_v5 = vadd.f32 %v5577_v50, %v5505_v22  ;;  %v3634_v25 = vadd.f32 %v3610_v11, %v3537_v12  ;;  %v3780_v57 = vmul.f32 %v12457_v40, %v11904_v28 }
 0x29c   : > { %v3633_v37 = vadd.f32 %v3609_v14, %v3536_v15  ;;  %v3876_v42 = vmul.f32 %v12530_v54, %v11924_v47  ;;  %v3877_v33 = vmul.f32 %v12654_v9, %v11924_v47  ;;  %v3950_v27 = vrot.slane %v12638_v45, 7 }
 0x29d   : > { %v5624_v39 = vpack.c.bf16 %v5601_v5, %v5600_v10  ;;  %v3755_v50 = vadd.f32 %v3731_v8, %v3634_v25  ;;  %v4047_v12 = vmul.f32 %v11949_v51, %v12638_v45  ;;  %v4104_v15 = vrot.slane %v12576_v41, 1 }
 0x29e   : > { %v3754_v32 = vadd.f32 %v3730_v0, %v3633_v37  ;;  %v17733_v11 = vrot.slane %v12576_v41, 7  ;;  %v17736_v49 = vrot.slane %v12562_v16, 7  ;;  %v4048_v0 = vmul.f32 %v11949_v51, %v12576_v41 }
 0x29f   : > { %8365 = vmatmul.msk.bf16.vlgmr.msrb.gmra.mxu3 %vm290_vm0, %v5624_v39  ;;  %v17738_v23 = vrot.slane %v12663_v53, 7  ;;  %v17739_v43 = vrot.slane %v12661_v61, 7  ;;  %v3804_v8 = vadd.f32 %v3780_v57, %v3755_v50  ;;  %v4930_v25 = vmul.f32 %v12780_v17, %v17676_v44 }
 0x2a0   : > { %v12896_v5 = vsel %vm17734_vm2, %v3950_v27, %v17733_v11  ;;  %v12902_v26 = vsel %vm17737_vm3, %v17736_v49, %v3950_v27  ;;  %v8738_v14 = vpop.eup %8737  ;;  %v3803_v10 = vadd.f32 %v3779_v59, %v3754_v32  ;;  %v17741_v11 = vrot.slane %v12638_v45, 1  ;;  %v2843_v32 = vpop.f32.mrf.mxu3  ;;  %vm17768_vm2 = vmmov %vm17742_vm5 }
 0x2a1   : > { %17735 = vst [vmem:[#allocation21_spill] sm:$0xff] %v12896_v5  ;;  %v4903_v22 = vsel %vm17740_vm4, %v17739_v43, %v17738_v23  ;;  %v3998_v37 = vmul.f32 %v11946_v20, %v12902_v26  ;;  %v12916_v39 = vadd.f32 1.0, %v8738_v14  ;;  %v3999_v27 = vmul.f32 %v11946_v20, %v12896_v5  ;;  %vm17772_vm3 = vmmov %vm17727_vm1 }
 0x2a2   : > { %v12924_v61 = vsel %vm17742_vm5, %v17741_v11, %v4104_v15  ;;  %v17744_v59 = vrot.slane %v12562_v16, 1  ;;  %v3900_v50 = vadd.f32 %v3876_v42, %v3803_v10  ;;  %v3901_v17 = vadd.f32 %v3877_v33, %v3804_v8  ;;  %vm17774_vm4 = vmmov %vm17727_vm1 }
 0x2a3   : > { %17743 = vst [vmem:[#allocation36_spill] sm:$0xff] %v12924_v61  ;;  %v4144_v49 = vmul.f32 %v12858_v18, %v12924_v61  ;;  %v4929_v23 = vmul.f32 %v4903_v22, %v17676_v44  ;;  %8739 = vrcp.f32 %v12916_v39  ;;  %v3191_v43 = vand.u32 2147483647, %v12916_v39  ;;  %vm17776_vm5 = vmmov %vm17768_vm2 }
 0x2a4   : > { %v12930_v57 = vsel %vm17745_vm6, %v4104_v15, %v17744_v59  ;;  %v3193_v14 = vand.u32 2147483648, %v12916_v39  ;;  %v4022_v41 = vadd.f32 %v3998_v37, %v3900_v50  ;;  %v4023_v15 = vadd.f32 %v3999_v27, %v3901_v17 }
 0x2a5   : > { %17746 = vst [vmem:[#allocation33_spill] sm:$0xff] %v12930_v57  ;;  %v4145_v11 = vmul.f32 %v12858_v18, %v12930_v57  ;;  %v4953_v42 = vmul.f32 %v12663_v53, %v17678_v34  ;;  %v4954_v33 = vmul.f32 %v12718_v4, %v17678_v34  ;;  %vm3187_vm7 = vweird.f32 %v12916_v39 }
 0x2a6   : > { %v12945_v22 = vor.u32 1.1754944e-38, %v3193_v14  ;;  %v17747_v10 = vrot.slane %v12659_v46, 1  ;;  %v17748_v8 = vrot.slane %v12663_v53, 1  ;;  %v5050_v37 = vmul.f32 %v12809_v36, %v11833_v62 }
 0x2a7   : > { %v4071_v27 = vadd.f32 %v4047_v12, %v4022_v41  ;;  %v4072_v32 = vadd.f32 %v4048_v0, %v4023_v15  ;;  %v4977_v50 = vadd.f32 %v4953_v42, %v4929_v23  ;;  %v4978_v17 = vadd.f32 %v4954_v33, %v4930_v25  ;;  %v12974_v15 = vld [vmem:[#allocation3 + $0x108] sm:$0xff]  ;;  %v13078_v41 = vld [vmem:[#allocation3 + $0xa0] sm:$0xff] }
 0x2a8   : > { %v5039_v59 = vsel %vm17749_vm8, %v17748_v8, %v17747_v10  ;;  %v17750_v5 = vrot.slane %v12735_v48, 7  ;;  %v17751_v14 = vrot.slane %v12720_v60, 7  ;;  %v5170_v53 = vmul.f32 %v12827_v58, %v11889_v3 }
 0x2a9   : > { %v5049_v57 = vmul.f32 %v5039_v59, %v11833_v62  ;;  %v5217_v36 = vmul.f32 %v12735_v48, %v11904_v28  ;;  %vm12968_vm10 = vcmp.eq.f32.partialorder %v3191_v43, 8.507059e+37  ;;  %v4168_v12 = vadd.f32 %v4144_v49, %v4071_v27  ;;  %v8740_v42 = vpop.eup %8739 }
 0x2aa   : > { %v12962_v46 = vsel %vm17752_vm12, %v17751_v14, %v17750_v5  ;;  %v4169_v0 = vadd.f32 %v4145_v11, %v4072_v32  ;;  %v5074_v25 = vadd.f32 %v5050_v37, %v4978_v17  ;;  %v12976_v5 = vld [vmem:[#allocation3 + $0x118] sm:$0xff]  ;;  %v5218_v10 = vmul.f32 %v12771_v24, %v11904_v28 }
 0x2ab   : > { %v5169_v23 = vmul.f32 %v12962_v46, %v11889_v3  ;;  %v5073_v33 = vadd.f32 %v5049_v57, %v4977_v50  ;;  %v17755_v43 = vrot.slane %v12718_v4, 1  ;;  %v17756_v8 = vrot.slane %v12735_v48, 1 }
 0x2ac   : > { %v5314_v11 = vmul.f32 %v12840_v6, %v11924_v47  ;;  %v3183_v59 = vmul.f32 %v8740_v42, %v12916_v39  ;;  %vm3188_vm9 = vweird.f32 %v8740_v42  ;;  %v4187_v37 = vpack.c.bf16 %v4169_v0, %v4168_v12 }
 0x2ad   : > { %v12986_v49 = vsel %vm17757_vm14, %v17756_v8, %v17755_v43  ;;  %v5194_v27 = vadd.f32 %v5170_v53, %v5074_v25  ;;  %v5193_v57 = vadd.f32 %v5169_v23, %v5073_v33  ;;  %v17211_v4 = vrot.slane %v12974_v15, 7  ;;  %v12996_v43 = vld [vmem:[#allocation3 + $0x110] sm:$0xff]  ;;  %vm13026_vm13 = vmor %vm3187_vm7, %vm3188_vm9 }
 0x2ae   : > { %v5313_v32 = vmul.f32 %v12986_v49, %v11924_v47  ;;  %v17212_v50 = vrot.slane %v12976_v5, 7  ;;  %v3184_v17 = vsub.f32 1.0, %v3183_v59  ;;  %8334 = vmatmul.msk.bf16.gmra.mxu2 %vm290_vm0, %v4187_v37  ;;  %17758 = vst [vmem:[#allocation13_spill] sm:$0xff] %v12996_v43  ;;  %v17759_v8 = vrot.slane %v12784_v30, 7  ;;  %vm17778_vm7 = vmmov %vm17768_vm2 }
 0x2af   : > { %v5242_v14 = vadd.f32 %v5218_v10, %v5194_v27  ;;  %v17760_v6 = vrot.slane %v12773_v38, 7  ;;  %v5482_v12 = vmul.f32 %v12784_v30, %v11949_v51  ;;  %v5241_v0 = vadd.f32 %v5217_v36, %v5193_v57  ;;  %vm17786_vm14 = vmmov %vm17727_vm1 }
 0x2b0   : > { %v13014_v25 = vsel %vm17762_vm11, %v17212_v50, %v17211_v4  ;;  %v5483_v33 = vmul.f32 %v12974_v15, %v11949_v51  ;;  %v17213_v36 = vrot.slane %v12974_v15, 1  ;;  %v17216_v57 = vrot.slane %v12996_v43, 1 }
 0x2b1   : > { %v13004_v53 = vsel %vm17727_vm1, %v17760_v6, %v17759_v8  ;;  %v3185_v6 = vmul.f32 %v8740_v42, %v3184_v17  ;;  %v5338_v10 = vadd.f32 %v5314_v11, %v5242_v14  ;;  %v5435_v59 = vmul.f32 %v13014_v25, %v11946_v20 }
 0x2b2   : > { %17761 = vst [vmem:[#allocation28_spill] sm:$0xff] %v13004_v53  ;;  %v5434_v23 = vmul.f32 %v13004_v53, %v11946_v20  ;;  %v5337_v27 = vadd.f32 %v5313_v32, %v5241_v0  ;;  %v17765_v8 = vrot.slane %v12771_v24, 1  ;;  %v17766_v17 = vrot.slane %v12784_v30, 1 }
 0x2b3   : > { %v13041_v14 = vadd.f32 %v12415_v56, %v12873_v63  ;;  %v3186_v39 = vadd.f32 %v8740_v42, %v3185_v6  ;;  %v5459_v4 = vadd.f32 %v5435_v59, %v5338_v10  ;;  %v3489_v32 = vmul.f32 %v12495_v1, %v17676_v44 }
 0x2b4   : > { %v13037_v11 = vsel %vm17767_vm15, %v17766_v17, %v17765_v8  ;;  %v5458_v0 = vadd.f32 %v5434_v23, %v5337_v27  ;;  %v13053_v8 = vsel %vm17768_vm2, %v17213_v36, %v17216_v57  ;;  %v3490_v63 = vmul.f32 %v12489_v55, %v17676_v44  ;;  %v13074_v36 = vld [vmem:[#allocation3 + $0x90] sm:$0xff]  ;;  %vm17804_vm15 = vmmov %vm17772_vm3 }
 0x2b5   : > { %v5578_v50 = vmul.f32 %v12858_v18, %v13037_v11  ;;  %v8294_v56 = vmul.f32 -1.442695, %v13041_v14  ;;  %v3190_v6 = vsel %vm13026_vm13, %v8740_v42, %v3186_v39  ;;  %v5507_v10 = vadd.f32 %v5483_v33, %v5459_v4  ;;  %17769 = vst [vmem:[#allocation14_spill] sm:$0xff] %v13074_v36  ;;  %vm17803_vm13 = vmmov %vm17772_vm3 }
 0x2b6   : > { %v5579_v1 = vmul.f32 %v12858_v18, %v13053_v8  ;;  %v3514_v23 = vmul.f32 %v12444_v21, %v17678_v34  ;;  %v3195_v59 = vsel %vm12968_vm10, %v12945_v22, %v3190_v6  ;;  %v5506_v27 = vadd.f32 %v5482_v12, %v5458_v0  ;;  %v13076_v22 = vld [vmem:[#allocation3 + $0x98] sm:$0xff]  ;;  %vm17784_vm10 = vmmov %vm17727_vm1 }
 0x2b7   : > { %8741 = vpow2.f32 %v8294_v56  ;;  %v3515_v17 = vmul.f32 %v12455_v52, %v17678_v34  ;;  %v3332_v55 = vmul.f32 %v3195_v59, %v12843_v13  ;;  %v3611_v4 = vmul.f32 %v12536_v7, %v11833_v62  ;;  %v17770_v13 = vld [vmem:[#allocation23_spill] sm:$0xff]  ;;  %vm17791_vm1 = vmmov %vm17768_vm2 }
 0x2b8   : > { %v5603_v37 = vadd.f32 %v5579_v1, %v5507_v10  ;;  %v3538_v42 = vadd.f32 %v3514_v23, %v3489_v32  ;;  %v5602_v33 = vadd.f32 %v5578_v50, %v5506_v27  ;;  %v3612_v21 = vmul.f32 %v12530_v54, %v11833_v62  ;;  %v17771_v56 = vld [vmem:[#allocation27_spill] sm:$0xff]  ;;  %vm17793_vm11 = vmmov %vm17791_vm1 }
 0x2b9   : > { %v3539_v39 = vadd.f32 %v3515_v17, %v3490_v63  ;;  %3381 = vst.msk [vmem:[#allocation3 + $0x150] sm:$0xff] %vm290_vm0, %v3332_v55  ;;  %v3732_v12 = vmul.f32 %v17770_v13, %v11889_v3  ;;  %v3733_v7 = vmul.f32 %v12902_v26, %v11889_v3  ;;  %v3781_v50 = vmul.f32 %v12562_v16, %v11904_v28 }
 0x2ba   : > { %v3635_v52 = vadd.f32 %v3611_v4, %v3538_v42  ;;  %v5625_v32 = vpack.c.bf16 %v5603_v37, %v5602_v33  ;;  %v3782_v0 = vmul.f32 %v12638_v45, %v11904_v28  ;;  %v3878_v63 = vmul.f32 %v17771_v56, %v11924_v47 }
 0x2bb   : > { %v3636_v54 = vadd.f32 %v3612_v21, %v3539_v39  ;;  %v3943_v10 = vrot.slane %v13074_v36, 7  ;;  %v17214_v1 = vrot.slane %v13076_v22, 7  ;;  %v17215_v23 = vrot.slane %v13078_v41, 7 }
 0x2bc   : > { %v3756_v6 = vadd.f32 %v3732_v12, %v3635_v52  ;;  %8366 = vmatmul.msk.bf16.gmra.mxu3 %vm290_vm0, %v5625_v32  ;;  %v3879_v17 = vmul.f32 %v12924_v61, %v11924_v47  ;;  %v4049_v55 = vmul.f32 %v11949_v51, %v13074_v36  ;;  %v17217_v37 = vrot.slane %v13074_v36, 1 }
 0x2bd   : > { %v8742_v59 = vpop.eup %8741  ;;  %v3757_v27 = vadd.f32 %v3733_v7, %v3636_v54  ;;  %v13104_v33 = vsel %vm17772_vm3, %v17215_v23, %v3943_v10  ;;  %v4050_v39 = vmul.f32 %v11949_v51, %v13076_v22  ;;  %v13112_v52 = vsel %vm17774_vm4, %v3943_v10, %v17214_v1  ;;  %vm17806_vm3 = vmmov %vm17791_vm1 }
 0x2be   : > { %v2949_v42 = vadd.f32 1.0, %v8742_v59  ;;  %v3805_v4 = vadd.f32 %v3781_v50, %v3756_v6  ;;  %17773 = vst [vmem:[#allocation20_spill] sm:$0xff] %v13104_v33  ;;  %v4000_v12 = vmul.f32 %v11946_v20, %v13104_v33  ;;  %v4097_v7 = vrot.slane %v13076_v22, 1  ;;  %vm17810_vm4 = vmmov %vm17791_vm1 }
 0x2bf   : > { %v3806_v21 = vadd.f32 %v3782_v0, %v3757_v27  ;;  %17775 = vst [vmem:[#allocation17_spill] sm:$0xff] %v13112_v52  ;;  %v4001_v54 = vmul.f32 %v11946_v20, %v13112_v52  ;;  %v17218_v0 = vrot.slane %v13078_v41, 1  ;;  %v4931_v23 = vmul.f32 %v12767_v19, %v17676_v44 }
 0x2c0   : > { %8743 = vrcp.f32 %v2949_v42  ;;  %v3206_v50 = vand.u32 2147483647, %v2949_v42  ;;  %v3208_v32 = vand.u32 2147483648, %v2949_v42  ;;  %v3902_v6 = vadd.f32 %v3878_v63, %v3805_v4 }
 0x2c1   : > { %v3903_v59 = vadd.f32 %v3879_v17, %v3806_v21  ;;  %v13124_v10 = vsel %vm17776_vm5, %v17217_v37, %v4097_v7  ;;  %vm3202_vm6 = vweird.f32 %v2949_v42  ;;  %v13136_v17 = vsel %vm17778_vm7, %v4097_v7, %v17218_v0  ;;  %v2846_v21 = vpop.f32.mrf.mxu3 }
 0x2c2   : > { %17777 = vst [vmem:[#allocation32_spill] sm:$0xff] %v13124_v10  ;;  %v13126_v27 = vor.u32 1.1754944e-38, %v3208_v32  ;;  %v4146_v1 = vmul.f32 %v12858_v18, %v13124_v10  ;;  %v4024_v57 = vadd.f32 %v4000_v12, %v3902_v6  ;;  %v4932_v4 = vmul.f32 %v12962_v46, %v17676_v44 }
 0x2c3   : > { %v4025_v63 = vadd.f32 %v4001_v54, %v3903_v59  ;;  %17779 = vst [vmem:[#allocation16_spill] sm:$0xff] %v13136_v17  ;;  %v4147_v32 = vmul.f32 %v12858_v18, %v13136_v17  ;;  %v4955_v37 = vmul.f32 %v12720_v60, %v17678_v34  ;;  %v4956_v19 = vmul.f32 %v12735_v48, %v17678_v34  ;;  %v13243_v54 = vld [vmem:[#allocation3 + $0xa8] sm:$0xff] }
 0x2c4   : > { %v5051_v12 = vmul.f32 %v12803_v31, %v11833_v62  ;;  %vm13148_vm8 = vcmp.eq.f32.partialorder %v3206_v50, 8.507059e+37  ;;  %v4073_v7 = vadd.f32 %v4049_v55, %v4024_v57  ;;  %v5052_v46 = vmul.f32 %v12986_v49, %v11833_v62 }
 0x2c5   : > { %v4074_v6 = vadd.f32 %v4050_v39, %v4025_v63  ;;  %v5171_v59 = vmul.f32 %v12815_v35, %v11889_v3  ;;  %v4979_v60 = vadd.f32 %v4955_v37, %v4931_v23  ;;  %v4980_v17 = vadd.f32 %v4956_v19, %v4932_v4  ;;  %v17782_v63 = vld [vmem:[#allocation37_spill] sm:$0xff] }
 0x2c6   : > { %v8744_v0 = vpop.eup %8743  ;;  %v5172_v48 = vmul.f32 %v13004_v53, %v11889_v3  ;;  %v5219_v31 = vmul.f32 %v12773_v38, %v11904_v28  ;;  %v4170_v52 = vadd.f32 %v4146_v1, %v4073_v7  ;;  %v5220_v49 = vmul.f32 %v12784_v30, %v11904_v28 }
 0x2c7   : > { %v3198_v50 = vmul.f32 %v8744_v0, %v2949_v42  ;;  %vm3203_vm12 = vweird.f32 %v8744_v0  ;;  %v4171_v57 = vadd.f32 %v4147_v32, %v4074_v6  ;;  %v5075_v55 = vadd.f32 %v5051_v12, %v4979_v60 }
 0x2c8   : > { %v5076_v39 = vadd.f32 %v5052_v46, %v4980_v17  ;;  %v5315_v61 = vmul.f32 %v17782_v63, %v11924_v47  ;;  %v5316_v4 = vmul.f32 %v13037_v11, %v11924_v47  ;;  %v5393_v19 = vrot.slane %v12996_v43, 7  ;;  %vm13187_vm9 = vmor %vm3202_vm6, %vm3203_vm12 }
 0x2c9   : > { %v3199_v23 = vsub.f32 1.0, %v3198_v50  ;;  %v4188_v37 = vpack.c.bf16 %v4171_v57, %v4170_v52  ;;  %v5195_v53 = vadd.f32 %v5171_v59, %v5075_v55  ;;  %v5484_v1 = vmul.f32 %v12996_v43, %v11949_v51 }
 0x2ca   : > { %v5196_v45 = vadd.f32 %v5172_v48, %v5076_v39  ;;  %v5485_v17 = vmul.f32 %v12976_v5, %v11949_v51  ;;  %v17783_v12 = vrot.slane %v12976_v5, 7  ;;  %v17785_v7 = vrot.slane %v12974_v15, 7 }
 0x2cb   : > { %v3200_v32 = vmul.f32 %v8744_v0, %v3199_v23  ;;  %8335 = vmatmul.msk.bf16.gmra.mxu2 %vm290_vm0, %v4188_v37  ;;  %v5545_v46 = vrot.slane %v12976_v5, 1  ;;  %v5243_v60 = vadd.f32 %v5219_v31, %v5195_v53  ;;  %v17790_v39 = vrot.slane %v12996_v43, 1  ;;  %v2848_v31 = vpop.f32.mrf.mxu3 }
 0x2cc   : > { %v13176_v52 = vsel %vm17784_vm10, %v5393_v19, %v17783_v12  ;;  %v13182_v6 = vsel %vm17786_vm14, %v17785_v7, %v5393_v19  ;;  %v5244_v48 = vadd.f32 %v5220_v49, %v5196_v45  ;;  %v17792_v42 = vrot.slane %v12974_v15, 1  ;;  %v13210_v45 = vld [vmem:[%s17024_s3] ss:$0 sm:$0xff] }
 0x2cd   : > { %17787 = vst [vmem:[#allocation18_spill] sm:$0xff] %v13182_v6  ;;  %v5436_v50 = vmul.f32 %v13182_v6, %v11946_v20  ;;  %v5437_v57 = vmul.f32 %v13176_v52, %v11946_v20  ;;  %v3201_v55 = vadd.f32 %v8744_v0, %v3200_v32  ;;  %v13199_v23 = vsel %vm17791_vm1, %v17790_v39, %v5545_v46 }
 0x2ce   : > { %v13205_v37 = vsel %vm17793_vm11, %v5545_v46, %v17792_v42  ;;  %17795 = vst [vmem:[#allocation35_spill] sm:$0xff] %v13210_v45  ;;  %v13213_v53 = vadd.f32 %v13210_v45, %v2846_v21  ;;  %v5339_v49 = vadd.f32 %v5315_v61, %v5243_v60  ;;  %v5340_v19 = vadd.f32 %v5316_v4, %v5244_v48  ;;  %vm17824_vm11 = vmmov %vm17806_vm3 }
 0x2cf   : > { %17794 = vst [vmem:[#allocation22_spill] sm:$0xff] %v13205_v37  ;;  %v5580_v32 = vmul.f32 %v12858_v18, %v13199_v23  ;;  %v5581_v12 = vmul.f32 %v12858_v18, %v13205_v37  ;;  %v3205_v7 = vsel %vm13187_vm9, %v8744_v0, %v3201_v55  ;;  %v13223_v39 = vadd.f32 %v13210_v45, %v2848_v31  ;;  %vm17821_vm9 = vmmov %vm17803_vm13 }
 0x2d0   : > { %v8296_v46 = vmul.f32 -1.442695, %v13213_v53  ;;  %v3491_v21 = vmul.f32 %v12594_v29, %v17676_v44  ;;  %v3210_v61 = vsel %vm13148_vm8, %v13126_v27, %v3205_v7  ;;  %v5460_v4 = vadd.f32 %v5436_v50, %v5339_v49  ;;  %v17797_v49 = vld [vmem:[#allocation21_spill] sm:$0xff]  ;;  %vm17822_vm1 = vmmov %vm17821_vm9 }
 0x2d1   : > { %v5461_v60 = vadd.f32 %v5437_v57, %v5340_v19  ;;  %v3492_v48 = vmul.f32 %v17770_v13, %v17676_v44  ;;  %v3333_v59 = vmul.f32 %v3210_v61, %v13041_v14  ;;  %v8297_v0 = vmul.f32 -1.442695, %v13223_v39  ;;  %v17798_v7 = vld [vmem:[#allocation25_spill] sm:$0xff] }
 0x2d2   : > { %8745 = vpow2.f32 %v8296_v46  ;;  %v3516_v55 = vmul.f32 %v12457_v40, %v17678_v34  ;;  %v5508_v42 = vadd.f32 %v5484_v1, %v5460_v4  ;;  %v3517_v29 = vmul.f32 %v12562_v16, %v17678_v34 }
 0x2d3   : > { %v5509_v31 = vadd.f32 %v5485_v17, %v5461_v60  ;;  %3382 = vst.msk [vmem:[#allocation3 + $0x158] sm:$0xff] %vm290_vm0, %v3333_v59  ;;  %8747 = vpow2.f32 %v8297_v0  ;;  %v3613_v13 = vmul.f32 %v12654_v9, %v11833_v62  ;;  %v3614_v14 = vmul.f32 %v17771_v56, %v11833_v62  ;;  %v13247_v17 = vld [vmem:[#allocation3 + $0xb8] sm:$0xff]  ;;  %v2851_v46 = vpop.f32.mrf.mxu3  ;;  %v17799_v60 = vld [vmem:[#allocation33_spill] sm:$0xff] }
 0x2d4   : > { %v3540_v27 = vadd.f32 %v3516_v55, %v3491_v21  ;;  %v5604_v50 = vadd.f32 %v5580_v32, %v5508_v42  ;;  %v3541_v40 = vadd.f32 %v3517_v29, %v3492_v48  ;;  %v3735_v1 = vmul.f32 %v13104_v33, %v11889_v3  ;;  %17796 = vst [vmem:[#allocation34_spill] sm:$0xff] %v13247_v17 }
 0x2d5   : > { %v5605_v57 = vadd.f32 %v5581_v12, %v5509_v31  ;;  %v3734_v19 = vmul.f32 %v17797_v49, %v11889_v3  ;;  %v3783_v9 = vmul.f32 %v17798_v7, %v11904_v28  ;;  %v17228_v61 = vrot.slane %v13243_v54, 7  ;;  %v13264_v31 = vld [vmem:[#allocation3 + $0xb0] sm:$0xff] }
 0x2d6   : > { %v3637_v16 = vadd.f32 %v3613_v13, %v3540_v27  ;;  %v3638_v56 = vadd.f32 %v3614_v14, %v3541_v40  ;;  %v3784_v4 = vmul.f32 %v13074_v36, %v11904_v28  ;;  %v3880_v48 = vmul.f32 %v17799_v60, %v11924_v47  ;;  %17800 = vst [vmem:[#allocation15_spill] sm:$0xff] %v13264_v31 }
 0x2d7   : > { %v5626_v21 = vpack.c.bf16 %v5605_v57, %v5604_v50  ;;  %v17229_v59 = vrot.slane %v13247_v17, 7  ;;  %v3881_v42 = vmul.f32 %v13124_v10, %v11924_v47  ;;  %v17801_v29 = vrot.slane %v13078_v41, 7 }
 0x2d8   : > { %v8746_v32 = vpop.eup %8745  ;;  %v3758_v12 = vadd.f32 %v3734_v19, %v3637_v16  ;;  %v3759_v55 = vadd.f32 %v3735_v1, %v3638_v56  ;;  %v17802_v27 = vrot.slane %v13076_v22, 7  ;;  %v17226_v40 = vrot.slane %v13243_v54, 1 }
 0x2d9   : > { %8367 = vmatmul.msk.bf16.gmra.mxu3 %vm290_vm0, %v5626_v21  ;;  %v13260_v0 = vadd.f32 1.0, %v8746_v32  ;;  %v8748_v14 = vpop.eup %8747  ;;  %v13280_v57 = vsel %vm17804_vm15, %v17229_v59, %v17228_v61  ;;  %v17227_v1 = vrot.slane %v13264_v31, 1  ;;  %v4051_v7 = vmul.f32 %v11949_v51, %v13078_v41  ;;  %vm17833_vm15 = vmmov %vm17822_vm1 }
 0x2da   : > { %v13272_v13 = vsel %vm17803_vm13, %v17802_v27, %v17801_v29  ;;  %v3807_v50 = vadd.f32 %v3783_v9, %v3758_v12  ;;  %17805 = vst [vmem:[#allocation19_spill] sm:$0xff] %v13280_v57  ;;  %v13291_v46 = vadd.f32 1.0, %v8748_v14  ;;  %v3808_v21 = vadd.f32 %v3784_v4, %v3759_v55  ;;  %vm17825_vm13 = vmmov %vm17806_vm3 }
 0x2db   : > { %8749 = vrcp.f32 %v13260_v0  ;;  %v3238_v16 = vand.u32 2147483648, %v13260_v0  ;;  %v4002_v19 = vmul.f32 %v11946_v20, %v13272_v13  ;;  %v3236_v9 = vand.u32 2147483647, %v13260_v0 }
 0x2dc   : > { %v3904_v56 = vadd.f32 %v3880_v48, %v3807_v50  ;;  %vm3232_vm2 = vweird.f32 %v13260_v0  ;;  %v4003_v32 = vmul.f32 %v11946_v20, %v13280_v57  ;;  %v4052_v12 = vmul.f32 %v11949_v51, %v13243_v54 }
 0x2dd   : > { %v13304_v29 = vsel %vm17806_vm3, %v17226_v40, %v17227_v1  ;;  %v13306_v27 = vor.u32 1.1754944e-38, %v3238_v16  ;;  %8751 = vrcp.f32 %v13291_v46  ;;  %v3253_v4 = vand.u32 2147483648, %v13291_v46 }
 0x2de   : > { %17807 = vst [vmem:[#allocation38_spill] sm:$0xff] %v13304_v29  ;;  %v17808_v48 = vrot.slane %v13074_v36, 1  ;;  %v17809_v55 = vrot.slane %v13078_v41, 1  ;;  %vm3247_vm5 = vweird.f32 %v13291_v46  ;;  %v3251_v50 = vand.u32 2147483647, %v13291_v46 }
 0x2df   : > { %v3905_v40 = vadd.f32 %v3881_v42, %v3808_v21  ;;  %v4026_v1 = vadd.f32 %v4002_v19, %v3904_v56  ;;  %vm13322_vm6 = vcmp.eq.f32.partialorder %v3236_v9, 8.507059e+37  ;;  %v13326_v59 = vor.u32 1.1754944e-38, %v3253_v4 }
 0x2e0   : > { %v13316_v14 = vsel %vm17810_vm4, %v17809_v55, %v17808_v48  ;;  %v4149_v57 = vmul.f32 %v12858_v18, %v13304_v29  ;;  %v4933_v48 = vmul.f32 %v12827_v58, %v17676_v44  ;;  %v4934_v55 = vmul.f32 %v12815_v35, %v17676_v44  ;;  %v17813_v29 = vld [vmem:[#allocation26_spill] sm:$0xff]  ;;  %vm17840_vm4 = vmmov %vm17806_vm3 }
 0x2e1   : > { %v4148_v16 = vmul.f32 %v12858_v18, %v13316_v14  ;;  %v8750_v42 = vpop.eup %8749  ;;  %v4027_v19 = vadd.f32 %v4003_v32, %v3905_v40  ;;  %v4075_v21 = vadd.f32 %v4051_v7, %v4026_v1  ;;  %v4957_v9 = vmul.f32 %v12771_v24, %v17678_v34 }
 0x2e2   : > { %v4958_v56 = vmul.f32 %v12773_v38, %v17678_v34  ;;  %v3228_v4 = vmul.f32 %v8750_v42, %v13260_v0  ;;  %vm3233_vm7 = vweird.f32 %v8750_v42  ;;  %v5053_v10 = vmul.f32 %v17813_v29, %v11833_v62 }
 0x2e3   : > { %v5054_v58 = vmul.f32 %v17782_v63, %v11833_v62  ;;  %vm13343_vm8 = vcmp.eq.f32.partialorder %v3251_v50, 8.507059e+37  ;;  %v4076_v40 = vadd.f32 %v4052_v12, %v4027_v19  ;;  %v4172_v1 = vadd.f32 %v4148_v16, %v4075_v21  ;;  %v8752_v32 = vpop.eup %8751  ;;  %v13354_v12 = vld [vmem:[#allocation3 + $0x120] sm:$0xff]  ;;  %v13356_v16 = vld [vmem:[#allocation3 + $0x128] sm:$0xff]  ;;  %vm13367_vm10 = vmor %vm3232_vm2, %vm3233_vm7 }
 0x2e4   : > { %v4981_v7 = vadd.f32 %v4957_v9, %v4933_v48  ;;  %v4982_v24 = vadd.f32 %v4958_v56, %v4934_v55  ;;  %v3229_v36 = vsub.f32 1.0, %v3228_v4  ;;  %v5173_v38 = vmul.f32 %v13014_v25, %v11889_v3  ;;  %17816 = vst [vmem:[#allocation39_spill] sm:$0xff] %v13354_v12  ;;  %v13362_v9 = vld [vmem:[#allocation3 + $0x130] sm:$0xff]  ;;  %v4266_v56 = vpop.f32.mrf.mxu2  ;;  %vm17835_vm2 = vmmov %vm17822_vm1 }
 0x2e5   : > { %v5174_v33 = vmul.f32 %v13182_v6, %v11889_v3  ;;  %v5221_v29 = vmul.f32 %v12974_v15, %v11904_v28  ;;  %v3243_v63 = vmul.f32 %v8752_v32, %v13291_v46  ;;  %vm3248_vm12 = vweird.f32 %v8752_v32 }
 0x2e6   : > { %v4173_v50 = vadd.f32 %v4149_v57, %v4076_v40  ;;  %v5077_v45 = vadd.f32 %v5053_v10, %v4981_v7  ;;  %v3230_v48 = vmul.f32 %v8750_v42, %v3229_v36  ;;  %v5078_v55 = vadd.f32 %v5054_v58, %v4982_v24  ;;  %vm13384_vm14 = vmor %vm3247_vm5, %vm3248_vm12 }
 0x2e7   : > { %v5222_v19 = vmul.f32 %v12996_v43, %v11904_v28  ;;  %v5317_v21 = vmul.f32 %v13053_v8, %v11924_v47  ;;  %v3244_v57 = vsub.f32 1.0, %v3243_v63  ;;  %v5318_v58 = vmul.f32 %v13199_v23, %v11924_v47  ;;  %vm17849_vm12 = vmmov %vm17822_vm1 }
 0x2e8   : > { %v4189_v4 = vpack.c.bf16 %v4173_v50, %v4172_v1  ;;  %v5197_v36 = vadd.f32 %v5173_v38, %v5077_v45  ;;  %v3231_v40 = vadd.f32 %v8750_v42, %v3230_v48  ;;  %v5198_v7 = vadd.f32 %v5174_v33, %v5078_v55 }
 0x2e9   : > { %v5386_v24 = vrot.slane %v13354_v12, 7  ;;  %v17245_v43 = vrot.slane %v13356_v16, 7  ;;  %v3245_v6 = vmul.f32 %v8752_v32, %v3244_v57  ;;  %v17246_v37 = vrot.slane %v13362_v9, 7 }
 0x2ea   : > { %8336 = vmatmul.msk.bf16.gmra.mxu2 %vm290_vm0, %v4189_v4  ;;  %v5245_v0 = vadd.f32 %v5221_v29, %v5197_v36  ;;  %v5486_v63 = vmul.f32 %v13354_v12, %v11949_v51  ;;  %v3235_v45 = vsel %vm13367_vm10, %v8750_v42, %v3231_v40  ;;  %v5246_v1 = vadd.f32 %v5222_v19, %v5198_v7  ;;  %v13399_v42 = vld [vmem:[%s17024_s3 + $0x1] ss:$0 sm:$0xff]  ;;  %vm17853_vm10 = vmmov %vm17806_vm3 }
 0x2eb   : > { %v13392_v38 = vsel %vm17821_vm9, %v5386_v24, %v17245_v43  ;;  %v5487_v29 = vmul.f32 %v13356_v16, %v11949_v51  ;;  %v3240_v46 = vsel %vm13322_vm6, %v13306_v27, %v3235_v45  ;;  %v3246_v50 = vadd.f32 %v8752_v32, %v3245_v6  ;;  %vm17846_vm6 = vmmov %vm17822_vm1 }
 0x2ec   : > { %v5341_v48 = vadd.f32 %v5317_v21, %v5245_v0  ;;  %v13408_v55 = vsel %vm17822_vm1, %v17246_v37, %v5386_v24  ;;  %v3335_v19 = vmul.f32 %v3240_v46, %v13213_v53  ;;  %v5342_v10 = vadd.f32 %v5318_v58, %v5246_v1  ;;  %v13446_v45 = vpop.f32.mrf.mxu2  ;;  %v17827_v46 = vld [vmem:[#allocation24_spill] sm:$0xff] }
 0x2ed   : > { %17823 = vst [vmem:[#allocation40_spill] sm:$0xff] %v13408_v55  ;;  %v5438_v57 = vmul.f32 %v13408_v55, %v11946_v20  ;;  %v5439_v4 = vmul.f32 %v13392_v38, %v11946_v20  ;;  %v3250_v61 = vsel %vm13384_vm14, %v8752_v32, %v3246_v50  ;;  %v17244_v6 = vrot.slane %v13354_v12, 1  ;;  %vm17854_vm14 = vmmov %vm17806_vm3 }
 0x2ee   : > { %v5538_v27 = vrot.slane %v13356_v16, 1  ;;  %v17243_v21 = vrot.slane %v13362_v9, 1  ;;  %3384 = vst.msk [vmem:[#allocation3 + $0x168] sm:$0xff] %vm290_vm0, %v3335_v19  ;;  %v3255_v53 = vsel %vm13343_vm8, %v13326_v59, %v3250_v61  ;;  %v13425_v40 = vadd.f32 %v13399_v42, %v4266_v56  ;;  %v17828_v19 = vld [vmem:[#allocation36_spill] sm:$0xff] }
 0x2ef   : > { %v5462_v36 = vadd.f32 %v5438_v57, %v5341_v48  ;;  %v5463_v58 = vadd.f32 %v5439_v4, %v5342_v10  ;;  %v3336_v7 = vmul.f32 %v3255_v53, %v13223_v39  ;;  %v3493_v59 = vmul.f32 %v12902_v26, %v17676_v44 }
 0x2f0   : > { %v13432_v32 = vsel %vm17824_vm11, %v5538_v27, %v17243_v21  ;;  %v13438_v24 = vsel %vm17825_vm13, %v17244_v6, %v5538_v27  ;;  %v8341_v33 = vmul.f32 -1.442695, %v13425_v40  ;;  %v3494_v1 = vmul.f32 %v17797_v49, %v17676_v44  ;;  %v17829_v27 = vld [vmem:[#allocation17_spill] sm:$0xff]  ;;  %vm17866_vm11 = vmmov %vm17822_vm1 }
 0x2f1   : > { %17826 = vst [vmem:[#allocation31_spill] sm:$0xff] %v13438_v24  ;;  %v5510_v35 = vadd.f32 %v5486_v63, %v5462_v36  ;;  %v5511_v56 = vadd.f32 %v5487_v29, %v5463_v58  ;;  %v5582_v39 = vmul.f32 %v12858_v18, %v13438_v24  ;;  %v5583_v0 = vmul.f32 %v12858_v18, %v13432_v32  ;;  %v8897_v63 = vld [vmem:[#allocation3 + $0x88] sm:$0xff] }
 0x2f2   : > { %3385 = vst.msk [vmem:[#allocation3 + $0x170] sm:$0xff] %vm290_vm0, %v3336_v7  ;;  %v3518_v26 = vmul.f32 %v17827_v46, %v17678_v34  ;;  %v3519_v29 = vmul.f32 %v8897_v63, %v17678_v34  ;;  %v3615_v10 = vmul.f32 %v17828_v19, %v11833_v62  ;;  %v3616_v57 = vmul.f32 %v17799_v60, %v11833_v62  ;;  %v17830_v60 = vld [vmem:[#allocation16_spill] sm:$0xff] }
 0x2f3   : > { %v5606_v50 = vadd.f32 %v5582_v39, %v5510_v35  ;;  %v5607_v48 = vadd.f32 %v5583_v0, %v5511_v56  ;;  %8753 = vpow2.f32 %v8341_v33  ;;  %v3736_v49 = vmul.f32 %v17829_v27, %v11889_v3 }
 0x2f4   : > { %v3542_v4 = vadd.f32 %v3518_v26, %v3493_v59  ;;  %v3543_v61 = vadd.f32 %v3519_v29, %v3494_v1  ;;  %v3737_v36 = vmul.f32 %v13272_v13, %v11889_v3  ;;  %v3785_v35 = vmul.f32 %v13076_v22, %v11904_v28  ;;  %v17831_v26 = vld [vmem:[#allocation28_spill] sm:$0xff] }
 0x2f5   : > { %v5627_v53 = vpack.c.bf16 %v5607_v48, %v5606_v50  ;;  %v3786_v56 = vmul.f32 %v13078_v41, %v11904_v28  ;;  %v3882_v59 = vmul.f32 %v17830_v60, %v11924_v47  ;;  %v3883_v39 = vmul.f32 %v13316_v14, %v11924_v47 }
 0x2f6   : > { %v3639_v58 = vadd.f32 %v3615_v10, %v3542_v4  ;;  %v3640_v7 = vadd.f32 %v3616_v57, %v3543_v61  ;;  %v3952_v0 = vrot.slane %v13264_v31, 7  ;;  %v4106_v33 = vrot.slane %v13247_v17, 1 }
 0x2f7   : > { %8368 = vmatmul.msk.bf16.gmra.mxu3 %vm290_vm0, %v5627_v53  ;;  %v4935_v63 = vmul.f32 %v17831_v26, %v17676_v44  ;;  %v4936_v29 = vmul.f32 %v13014_v25, %v17676_v44  ;;  %v17832_v50 = vrot.slane %v13247_v17, 7  ;;  %v17834_v19 = vrot.slane %v13243_v54, 7 }
 0x2f8   : > { %v3760_v1 = vadd.f32 %v3736_v49, %v3639_v58  ;;  %v3761_v46 = vadd.f32 %v3737_v36, %v3640_v7  ;;  %v17837_v57 = vrot.slane %v13264_v31, 1  ;;  %v17839_v25 = vrot.slane %v13243_v54, 1  ;;  %v4271_v49 = vpop.f32.mrf.mxu2 }
 0x2f9   : > { %v13482_v48 = vsel %vm17833_vm15, %v3952_v0, %v17832_v50  ;;  %v13488_v10 = vsel %vm17835_vm2, %v17834_v19, %v3952_v0  ;;  %v8754_v53 = vpop.eup %8753  ;;  %v4053_v50 = vmul.f32 %v11949_v51, %v13264_v31  ;;  %v4054_v19 = vmul.f32 %v11949_v51, %v13247_v17  ;;  %vm17870_vm2 = vmmov %vm17806_vm3 }
 0x2fa   : > { %17836 = vst [vmem:[#allocation29_spill] sm:$0xff] %v13488_v10  ;;  %v13494_v4 = vsel %vm17806_vm3, %v17837_v57, %v4106_v33  ;;  %v13500_v61 = vsel %vm17840_vm4, %v4106_v33, %v17839_v25  ;;  %v3809_v36 = vadd.f32 %v3785_v35, %v3760_v1  ;;  %v3810_v58 = vadd.f32 %v3786_v56, %v3761_v46  ;;  %vm17875_vm4 = vmmov %vm17870_vm2 }
 0x2fb   : > { %17838 = vst [vmem:[#allocation30_spill] sm:$0xff] %v13494_v4  ;;  %v4004_v7 = vmul.f32 %v11946_v20, %v13488_v10  ;;  %v4005_v0 = vmul.f32 %v11946_v20, %v13482_v48  ;;  %v13506_v26 = vadd.f32 1.0, %v8754_v53  ;;  %v4959_v33 = vmul.f32 %v12784_v30, %v17678_v34 }
 0x2fc   : > { %17841 = vst [vmem:[#allocation23_spill] sm:$0xff] %v13500_v61  ;;  %v3906_v57 = vadd.f32 %v3882_v59, %v3809_v36  ;;  %v3907_v35 = vadd.f32 %v3883_v39, %v3810_v58  ;;  %v4960_v56 = vmul.f32 %v12974_v15, %v17678_v34  ;;  %v5055_v1 = vmul.f32 %v13037_v11, %v11833_v62 }
 0x2fd   : > { %8755 = vrcp.f32 %v13506_v26  ;;  %v4433_v46 = vand.u32 2147483648, %v13506_v26  ;;  %v4150_v25 = vmul.f32 %v12858_v18, %v13494_v4  ;;  %v4151_v49 = vmul.f32 %v12858_v18, %v13500_v61 }
 0x2fe   : > { %v4028_v53 = vadd.f32 %v4004_v7, %v3906_v57  ;;  %v4029_v30 = vadd.f32 %v4005_v0, %v3907_v35  ;;  %v4983_v59 = vadd.f32 %v4959_v33, %v4935_v63  ;;  %v4984_v39 = vadd.f32 %v4960_v56, %v4936_v29  ;;  %v13533_v7 = vld [vmem:[#allocation3 + $0x138] sm:$0xff]  ;;  %v13535_v63 = vld [vmem:[#allocation3 + $0x148] sm:$0xff] }
 0x2ff   : > { %v4431_v36 = vand.u32 2147483647, %v13506_v26  ;;  %v13525_v15 = vor.u32 1.1754944e-38, %v4433_v46  ;;  %v5056_v11 = vmul.f32 %v13053_v8, %v11833_v62  ;;  %v5175_v58 = vmul.f32 %v13176_v52, %v11889_v3  ;;  %17842 = vst [vmem:[#allocation27_spill] sm:$0xff] %v13535_v63  ;;  %v17843_v33 = vld [vmem:[#allocation22_spill] sm:$0xff] }
 0x300   : > { %v4077_v21 = vadd.f32 %v4053_v50, %v4028_v53  ;;  %v4078_v6 = vadd.f32 %v4054_v19, %v4029_v30  ;;  %v5079_v43 = vadd.f32 %v5055_v1, %v4983_v59  ;;  %v5176_v37 = vmul.f32 %v13408_v55, %v11889_v3 }
 0x301   : > { %v5080_v29 = vadd.f32 %v5056_v11, %v4984_v39  ;;  %v5223_v0 = vmul.f32 %v12976_v5, %v11904_v28  ;;  %v5224_v8 = vmul.f32 %v13354_v12, %v11904_v28  ;;  %v5319_v57 = vmul.f32 %v17843_v33, %v11924_v47 }
 0x302   : > { %vm4427_vm5 = vweird.f32 %v13506_v26  ;;  %v4174_v50 = vadd.f32 %v4150_v25, %v4077_v21  ;;  %v4175_v19 = vadd.f32 %v4151_v49, %v4078_v6  ;;  %v5199_v35 = vadd.f32 %v5175_v58, %v5079_v43  ;;  %v13561_v25 = vld [vmem:[#allocation3 + $0x140] sm:$0xff] }
 0x303   : > { %v5320_v56 = vmul.f32 %v13438_v24, %v11924_v47  ;;  %v8756_v1 = vpop.eup %8755  ;;  %v5200_v46 = vadd.f32 %v5176_v37, %v5080_v29  ;;  %v17247_v53 = vrot.slane %v13533_v7, 7  ;;  %v17248_v30 = vrot.slane %v13535_v63, 7 }
 0x304   : > { %v17844_v59 = vrot.slane %v13362_v9, 7  ;;  %v17845_v39 = vrot.slane %v13356_v16, 7  ;;  %v4423_v6 = vmul.f32 %v8756_v1, %v13506_v26  ;;  %vm4428_vm7 = vweird.f32 %v8756_v1 }
 0x305   : > { %vm13557_vm8 = vcmp.eq.f32.partialorder %v4431_v36, 8.507059e+37  ;;  %v4190_v37 = vpack.c.bf16 %v4175_v19, %v4174_v50  ;;  %v5247_v21 = vadd.f32 %v5223_v0, %v5199_v35  ;;  %v5248_v49 = vadd.f32 %v5224_v8, %v5200_v46  ;;  %vm4429_vm9 = vmor %vm4427_vm5, %vm4428_vm7 }
 0x306   : > { %v13554_v11 = vsel %vm17846_vm6, %v17845_v39, %v17844_v59  ;;  %v13569_v58 = vsel %vm17849_vm12, %v17248_v30, %v17247_v53  ;;  %v5488_v36 = vmul.f32 %v13362_v9, %v11949_v51  ;;  %v4424_v59 = vsub.f32 1.0, %v4423_v6 }
 0x307   : > { %17850 = vst [vmem:[#allocation37_spill] sm:$0xff] %v13569_v58  ;;  %v5440_v29 = vmul.f32 %v13554_v11, %v11946_v20  ;;  %8337 = vmatmul.msk.bf16.gmra.mxu2 %vm290_vm0, %v4190_v37  ;;  %v5343_v0 = vadd.f32 %v5319_v57, %v5247_v21  ;;  %v5441_v8 = vmul.f32 %v13569_v58, %v11946_v20  ;;  %v17252_v35 = vrot.slane %v13533_v7, 1 }
 0x308   : > { %v5489_v50 = vmul.f32 %v13533_v7, %v11949_v51  ;;  %v5344_v19 = vadd.f32 %v5320_v56, %v5248_v49  ;;  %v17253_v46 = vrot.slane %v13561_v25, 1  ;;  %v17851_v39 = vrot.slane %v13354_v12, 1  ;;  %v2853_v49 = vpop.f32.mrf.mxu3 }
 0x309   : > { %v17852_v53 = vrot.slane %v13362_v9, 1  ;;  %v4425_v57 = vmul.f32 %v8756_v1, %v4424_v59  ;;  %v5464_v37 = vadd.f32 %v5440_v29, %v5343_v0  ;;  %v13594_v56 = vadd.f32 %v13399_v42, %v13446_v45  ;;  %v17857_v29 = vld [vmem:[#allocation20_spill] sm:$0xff] }
 0x30a   : > { %v5465_v30 = vadd.f32 %v5441_v8, %v5344_v19  ;;  %v13602_v58 = vsel %vm17854_vm14, %v17252_v35, %v17253_v46  ;;  %v3495_v0 = vmul.f32 %v17857_v29, %v17676_v44  ;;  %v17858_v46 = vld [vmem:[#allocation14_spill] sm:$0xff]  ;;  %v5177_v17 = vmul.f32 %v13392_v38, %v11889_v3  ;;  %vm17884_vm14 = vmmov %vm17822_vm1 }
 0x30b   : > { %v13588_v6 = vsel %vm17853_vm10, %v17852_v53, %v17851_v39  ;;  %17855 = vst [vmem:[#allocation21_spill] sm:$0xff] %v13602_v58  ;;  %v17856_v53 = vld [vmem:[#allocation35_spill] sm:$0xff]  ;;  %v4426_v39 = vadd.f32 %v8756_v1, %v4425_v57  ;;  %v5512_v24 = vadd.f32 %v5488_v36, %v5464_v37  ;;  %v5585_v45 = vmul.f32 %v12858_v18, %v13602_v58  ;;  %vm17882_vm10 = vmmov %vm17822_vm1 }
 0x30c   : > { %v5584_v21 = vmul.f32 %v12858_v18, %v13588_v6  ;;  %v13605_v59 = vadd.f32 %v17856_v53, %v2853_v49  ;;  %v8342_v8 = vmul.f32 -1.442695, %v13594_v56  ;;  %v5513_v19 = vadd.f32 %v5489_v50, %v5465_v30 }
 0x30d   : > { %v3496_v49 = vmul.f32 %v17829_v27, %v17676_v44  ;;  %v3520_v29 = vmul.f32 %v17858_v46, %v17678_v34  ;;  %v4430_v57 = vsel %vm4429_vm9, %v8756_v1, %v4426_v39  ;;  %v3521_v18 = vmul.f32 %v13076_v22, %v17678_v34  ;;  %v17859_v27 = vld [vmem:[#allocation32_spill] sm:$0xff]  ;;  %v13630_v1 = vld [vmem:[#allocation3 + $0xc0] sm:$0xff]  ;;  %v13634_v22 = vld [vmem:[#allocation3 + $0xd0] sm:$0xff] }
 0x30e   : > { %v8299_v35 = vmul.f32 -1.442695, %v13605_v59  ;;  %v5608_v36 = vadd.f32 %v5584_v21, %v5512_v24  ;;  %8757 = vpow2.f32 %v8342_v8  ;;  %v4435_v26 = vsel %vm13557_vm8, %v13525_v15, %v4430_v57  ;;  %17860 = vst [vmem:[#allocation25_spill] sm:$0xff] %v13630_v1  ;;  %v13632_v46 = vld [vmem:[#allocation3 + $0xc8] sm:$0xff]  ;;  %v17863_v15 = vld [vmem:[#allocation19_spill] sm:$0xff]  ;;  %vm17886_vm9 = vmmov %vm17870_vm2 }
 0x30f   : > { %v5609_v37 = vadd.f32 %v5585_v45, %v5513_v19  ;;  %v3544_v30 = vadd.f32 %v3520_v29, %v3495_v0  ;;  %v4782_v50 = vmul.f32 %v4435_v26, %v13425_v40  ;;  %v3545_v58 = vadd.f32 %v3521_v18, %v3496_v49  ;;  %17861 = vst [vmem:[#allocation33_spill] sm:$0xff] %v13632_v46 }
 0x310   : > { %8759 = vpow2.f32 %v8299_v35  ;;  %v3617_v12 = vmul.f32 %v17859_v27, %v11833_v62  ;;  %v3618_v24 = vmul.f32 %v17830_v60, %v11833_v62  ;;  %17862 = vst [vmem:[#allocation26_spill] sm:$0xff] %v13634_v22  ;;  %v3738_v35 = vmul.f32 %v17863_v15, %v11889_v3  ;;  %v13645_v45 = vpop.f32.mrf.mxu3 }
 0x311   : > { %v5628_v43 = vpack.c.bf16 %v5609_v37, %v5608_v36  ;;  %v3739_v40 = vmul.f32 %v13488_v10, %v11889_v3  ;;  %4830 = vst.msk [vmem:[#allocation2 + $0x18] sm:$0xff] %vm290_vm0, %v4782_v50  ;;  %v3787_v60 = vmul.f32 %v13243_v54, %v11904_v28  ;;  %v3788_v39 = vmul.f32 %v13264_v31, %v11904_v28 }
 0x312   : > { %v3641_v21 = vadd.f32 %v3617_v12, %v3544_v30  ;;  %v3642_v0 = vadd.f32 %v3618_v24, %v3545_v58  ;;  %v3945_v8 = vrot.slane %v13630_v1, 7  ;;  %v17258_v19 = vrot.slane %v13632_v46, 7  ;;  %v17864_v58 = vld [vmem:[#allocation38_spill] sm:$0xff] }
 0x313   : > { %8369 = vmatmul.msk.bf16.gmra.mxu3 %vm290_vm0, %v5628_v43  ;;  %v17257_v49 = vrot.slane %v13634_v22, 7  ;;  %v3884_v36 = vmul.f32 %v17864_v58, %v11924_v47  ;;  %v3885_v37 = vmul.f32 %v13494_v4, %v11924_v47  ;;  %v4055_v30 = vmul.f32 %v11949_v51, %v13630_v1 }
 0x314   : > { %v8758_v29 = vpop.eup %8757  ;;  %v3762_v57 = vadd.f32 %v3738_v35, %v3641_v21  ;;  %v3763_v12 = vadd.f32 %v3739_v40, %v3642_v0  ;;  %v4056_v50 = vmul.f32 %v11949_v51, %v13632_v46  ;;  %v13675_v21 = vsel %vm17866_vm11, %v3945_v8, %v17258_v19  ;;  %vm17898_vm11 = vmmov %vm17882_vm10 }
 0x315   : > { %v13653_v26 = vadd.f32 1.0, %v8758_v29  ;;  %v13667_v35 = vsel %vm17822_vm1, %v17257_v49, %v3945_v8  ;;  %17867 = vst [vmem:[#allocation36_spill] sm:$0xff] %v13675_v21  ;;  %v4007_v19 = vmul.f32 %v11946_v20, %v13675_v21  ;;  %v4099_v4 = vrot.slane %v13632_v46, 1  ;;  %v17868_v29 = vld [vmem:[#allocation18_spill] sm:$0xff]  ;;  %vm17888_vm1 = vmmov %vm17870_vm2 }
 0x316   : > { %v8760_v18 = vpop.eup %8759  ;;  %v3811_v24 = vadd.f32 %v3787_v60, %v3762_v57  ;;  %v3812_v43 = vadd.f32 %v3788_v39, %v3763_v12  ;;  %17865 = vst [vmem:[#allocation24_spill] sm:$0xff] %v13667_v35  ;;  %v4006_v0 = vmul.f32 %v11946_v20, %v13667_v35  ;;  %v17265_v55 = vrot.slane %v13634_v22, 1 }
 0x317   : > { %v13661_v27 = vadd.f32 1.0, %v8760_v18  ;;  %8761 = vrcp.f32 %v13653_v26  ;;  %v4448_v40 = vand.u32 2147483648, %v13653_v26  ;;  %v4446_v60 = vand.u32 2147483647, %v13653_v26 }
 0x318   : > { %v3908_v12 = vadd.f32 %v3884_v36, %v3811_v24  ;;  %v3909_v18 = vadd.f32 %v3885_v37, %v3812_v43  ;;  %v2858_v31 = vpop.f32.mrf.mxu3  ;;  %v4937_v61 = vmul.f32 %v17868_v29, %v17676_v44  ;;  %v4938_v36 = vmul.f32 %v13176_v52, %v17676_v44 }
 0x319   : > { %8763 = vrcp.f32 %v13661_v27  ;;  %v3283_v39 = vand.u32 2147483648, %v13661_v27  ;;  %vm3277_vm13 = vweird.f32 %v13661_v27  ;;  %v3281_v57 = vand.u32 2147483647, %v13661_v27  ;;  %v17872_v31 = vld [vmem:[#allocation13_spill] sm:$0xff] }
 0x31a   : > { %v13685_v49 = vor.u32 1.1754944e-38, %v4448_v40  ;;  %v4030_v10 = vadd.f32 %v4006_v0, %v3908_v12  ;;  %vm4442_vm15 = vweird.f32 %v13653_v26  ;;  %v4031_v37 = vadd.f32 %v4007_v19, %v3909_v18  ;;  %v13721_v12 = vld [vmem:[%s17022_s1 + $0x18] ss:$0 sm:$0xff] }
 0x31b   : > { %v13687_v8 = vor.u32 1.1754944e-38, %v3283_v39  ;;  %v17869_v24 = vrot.slane %v13630_v1, 1  ;;  %v4961_v40 = vmul.f32 %v17872_v31, %v17678_v34  ;;  %v4962_v0 = vmul.f32 %v12976_v5, %v17678_v34 }
 0x31c   : > { %vm13708_vm3 = vcmp.eq.f32.partialorder %v3281_v57, 8.507059e+37  ;;  %v4079_v52 = vadd.f32 %v4055_v30, %v4030_v10  ;;  %v13716_v19 = vsel %vm17875_vm4, %v4099_v4, %v17265_v55  ;;  %v5057_v57 = vmul.f32 %v13199_v23, %v11833_v62 }
 0x31d   : > { %v13702_v43 = vsel %vm17870_vm2, %v17869_v24, %v4099_v4  ;;  %v8762_v39 = vpop.eup %8761  ;;  %17876 = vst [vmem:[#allocation16_spill] sm:$0xff] %v13716_v19  ;;  %vm13728_vm6 = vcmp.eq.f32.partialorder %v4446_v60, 8.507059e+37  ;;  %v4080_v4 = vadd.f32 %v4056_v50, %v4031_v37  ;;  %v4153_v24 = vmul.f32 %v13721_v12, %v13716_v19 }
 0x31e   : > { %17871 = vst [vmem:[#allocation17_spill] sm:$0xff] %v13702_v43  ;;  %v4152_v5 = vmul.f32 %v13721_v12, %v13702_v43  ;;  %v4438_v10 = vmul.f32 %v8762_v39, %v13653_v26  ;;  %vm4443_vm5 = vweird.f32 %v8762_v39  ;;  %v4985_v21 = vadd.f32 %v4961_v40, %v4937_v61 }
 0x31f   : > { %v8764_v18 = vpop.eup %8763  ;;  %v4177_v46 = vadd.f32 %v4153_v24, %v4080_v4  ;;  %v4986_v23 = vadd.f32 %v4962_v0, %v4938_v36  ;;  %v5058_v22 = vmul.f32 %v17843_v33, %v11833_v62  ;;  %v5178_v50 = vmul.f32 %v13554_v11, %v11889_v3  ;;  %vm4444_vm12 = vmor %vm4442_vm15, %vm4443_vm5 }
 0x320   : > { %v3273_v31 = vmul.f32 %v8764_v18, %v13661_v27  ;;  %vm3278_vm7 = vweird.f32 %v8764_v18  ;;  %v4176_v55 = vadd.f32 %v4152_v5, %v4079_v52  ;;  %v4439_v43 = vsub.f32 1.0, %v4438_v10  ;;  %vm17903_vm15 = vmmov %vm17888_vm1 }
 0x321   : > { %v5081_v60 = vadd.f32 %v5057_v57, %v4985_v21  ;;  %v5082_v35 = vadd.f32 %v5058_v22, %v4986_v23  ;;  %v5225_v61 = vmul.f32 %v13356_v16, %v11904_v28  ;;  %v5226_v36 = vmul.f32 %v13362_v9, %v11904_v28  ;;  %vm13750_vm8 = vmor %vm3277_vm13, %vm3278_vm7 }
 0x322   : > { %v3274_v1 = vsub.f32 1.0, %v3273_v31  ;;  %v4440_v37 = vmul.f32 %v8762_v39, %v4439_v43  ;;  %v4191_v19 = vpack.c.bf16 %v4177_v46, %v4176_v55  ;;  %v5321_v33 = vmul.f32 %v13432_v32, %v11924_v47  ;;  %vm17900_vm13 = vmmov %vm17882_vm10 }
 0x323   : > { %v5201_v52 = vadd.f32 %v5177_v17, %v5081_v60  ;;  %v5202_v55 = vadd.f32 %v5178_v50, %v5082_v35  ;;  %v5322_v17 = vmul.f32 %v13588_v6, %v11924_v47  ;;  %v5490_v27 = vmul.f32 %v13561_v25, %v11949_v51 }
 0x324   : > { %v3275_v40 = vmul.f32 %v8764_v18, %v3274_v1  ;;  %v4441_v21 = vadd.f32 %v8762_v39, %v4440_v37  ;;  %8338 = vmatmul.msk.bf16.gmra.mxu2 %vm290_vm0, %v4191_v19  ;;  %v5395_v1 = vrot.slane %v13561_v25, 7  ;;  %v5491_v43 = vmul.f32 %v13535_v63, %v11949_v51 }
 0x325   : > { %v5249_v22 = vadd.f32 %v5225_v61, %v5201_v52  ;;  %v5250_v19 = vadd.f32 %v5226_v36, %v5202_v55  ;;  %v17881_v35 = vrot.slane %v13535_v63, 7  ;;  %v17883_v10 = vrot.slane %v13533_v7, 7 }
 0x326   : > { %v3276_v46 = vadd.f32 %v8764_v18, %v3275_v40  ;;  %v4445_v5 = vsel %vm4444_vm12, %v8762_v39, %v4441_v21  ;;  %v5547_v61 = vrot.slane %v13535_v63, 1  ;;  %v4273_v40 = vpop.f32.mrf.mxu2  ;;  %v17885_v36 = vrot.slane %v13561_v25, 1  ;;  %v13938_v63 = vld [vmem:[#allocation3 + $0x158] sm:$0xff] }
 0x327   : > { %v13769_v57 = vsel %vm17882_vm10, %v5395_v1, %v17881_v35  ;;  %v13775_v26 = vsel %vm17884_vm14, %v17883_v10, %v5395_v1  ;;  %v4450_v4 = vsel %vm13728_vm6, %v13685_v49, %v4445_v5  ;;  %v5345_v24 = vadd.f32 %v5321_v33, %v5249_v22  ;;  %v13831_v5 = vld [vmem:[#allocation3 + $0xd8] sm:$0xff] }
 0x328   : > { %v3280_v39 = vsel %vm13750_vm8, %v8764_v18, %v3276_v46  ;;  %v5442_v31 = vmul.f32 %v13775_v26, %v11946_v20  ;;  %v4783_v23 = vmul.f32 %v4450_v4, %v13594_v56  ;;  %v5346_v50 = vadd.f32 %v5322_v17, %v5250_v19 }
 0x329   : > { %v3285_v60 = vsel %vm13708_vm3, %v13687_v8, %v3280_v39  ;;  %v5443_v37 = vmul.f32 %v13769_v57, %v11946_v20  ;;  %v13794_v18 = vadd.f32 %v17856_v53, %v13645_v45  ;;  %v13798_v29 = vadd.f32 %v13399_v42, %v4273_v40  ;;  %vm17904_vm3 = vmmov %vm17888_vm1 }
 0x32a   : > { %v3338_v30 = vmul.f32 %v3285_v60, %v13605_v59  ;;  %v5466_v49 = vadd.f32 %v5442_v31, %v5345_v24  ;;  %4831 = vst.msk [vmem:[#allocation2 + $0x20] sm:$0xff] %vm290_vm0, %v4783_v23  ;;  %v3497_v8 = vmul.f32 %v13272_v13, %v17676_v44  ;;  %v3498_v59 = vmul.f32 %v17863_v15, %v17676_v44 }
 0x32b   : > { %v5467_v56 = vadd.f32 %v5443_v37, %v5346_v50  ;;  %v13809_v53 = vsel %vm17886_vm9, %v17885_v36, %v5547_v61  ;;  %v17887_v45 = vrot.slane %v13533_v7, 1  ;;  %v8300_v13 = vmul.f32 -1.442695, %v13794_v18  ;;  %vm17916_vm9 = vmmov %vm17882_vm10 }
 0x32c   : > { %3387 = vst.msk [vmem:[#allocation3 + $0x180] sm:$0xff] %vm290_vm0, %v3338_v30  ;;  %v5514_v52 = vadd.f32 %v5490_v27, %v5466_v49  ;;  %v5586_v15 = vmul.f32 %v13721_v12, %v13809_v53  ;;  %v8344_v55 = vmul.f32 -1.442695, %v13798_v29  ;;  %v3522_v17 = vmul.f32 %v13078_v41, %v17678_v34  ;;  %v17890_v41 = vld [vmem:[#allocation24_spill] sm:$0xff]  ;;  %v17893_v30 = vld [vmem:[#allocation23_spill] sm:$0xff] }
 0x32d   : > { %v13815_v33 = vsel %vm17888_vm1, %v5547_v61, %v17887_v45  ;;  %v5515_v21 = vadd.f32 %v5491_v43, %v5467_v56  ;;  %8765 = vpow2.f32 %v8300_v13  ;;  %v3523_v1 = vmul.f32 %v13243_v54, %v17678_v34  ;;  %v13837_v54 = vld [vmem:[#allocation3 + $0xe8] sm:$0xff]  ;;  %v13849_v61 = vld [vmem:[#allocation3 + $0xe0] sm:$0xff]  ;;  %v17894_v56 = vld [vmem:[#allocation26_spill] sm:$0xff] }
 0x32e   : > { %17889 = vst [vmem:[#allocation28_spill] sm:$0xff] %v13815_v33  ;;  %v5587_v0 = vmul.f32 %v13721_v12, %v13815_v33  ;;  %v3619_v46 = vmul.f32 %v13316_v14, %v11833_v62  ;;  %v5610_v22 = vadd.f32 %v5586_v15, %v5514_v52  ;;  %8767 = vpow2.f32 %v8344_v55  ;;  %v17891_v14 = vld [vmem:[#allocation34_spill] sm:$0xff]  ;;  %v13844_v37 = vpop.f32.mrf.mxu2  ;;  %v17899_v15 = vld [vmem:[#allocation17_spill] sm:$0xff] }
 0x32f   : > { %v3620_v43 = vmul.f32 %v17864_v58, %v11833_v62  ;;  %v3546_v19 = vadd.f32 %v3522_v17, %v3497_v8  ;;  %v3547_v35 = vadd.f32 %v3523_v1, %v3498_v59  ;;  %v3740_v10 = vmul.f32 %v13482_v48, %v11889_v3  ;;  %v17892_v58 = vld [vmem:[#allocation25_spill] sm:$0xff] }
 0x330   : > { %v5611_v27 = vadd.f32 %v5587_v0, %v5515_v21  ;;  %v3741_v4 = vmul.f32 %v17890_v41, %v11889_v3  ;;  %v3789_v24 = vmul.f32 %v17891_v14, %v11904_v28  ;;  %v3790_v60 = vmul.f32 %v17892_v58, %v11904_v28  ;;  %v17896_v59 = vld [vmem:[#allocation33_spill] sm:$0xff] }
 0x331   : > { %v3643_v31 = vadd.f32 %v3619_v46, %v3546_v19  ;;  %v3644_v23 = vadd.f32 %v3620_v43, %v3547_v35  ;;  %v17279_v50 = vrot.slane %v13831_v5, 7  ;;  %v3886_v49 = vmul.f32 %v17893_v30, %v11924_v47  ;;  %v13936_v33 = vld [vmem:[#allocation3 + $0x150] sm:$0xff] }
 0x332   : > { %v5629_v39 = vpack.c.bf16 %v5611_v27, %v5610_v22  ;;  %v17280_v40 = vrot.slane %v13837_v54, 7  ;;  %v17895_v8 = vrot.slane %v17894_v56, 7  ;;  %v17897_v52 = vrot.slane %v17896_v59, 7 }
 0x333   : > { %v8766_v45 = vpop.eup %8765  ;;  %v3764_v13 = vadd.f32 %v3740_v10, %v3643_v31  ;;  %v3765_v21 = vadd.f32 %v3741_v4, %v3644_v23  ;;  %v3887_v0 = vmul.f32 %v17899_v15, %v11924_v47  ;;  %v4057_v55 = vmul.f32 %v11949_v51, %v17894_v56 }
 0x334   : > { %8370 = vmatmul.msk.bf16.gmra.mxu3 %vm290_vm0, %v5629_v39  ;;  %v13858_v36 = vsel %vm17898_vm11, %v17897_v52, %v17895_v8  ;;  %v8768_v17 = vpop.eup %8767  ;;  %v13864_v1 = vadd.f32 1.0, %v8766_v45  ;;  %v3986_v46 = vsel %vm17900_vm13, %v17280_v40, %v17279_v50  ;;  %v17277_v27 = vrot.slane %v13831_v5, 1  ;;  %vm17918_vm11 = vmmov %vm17888_vm1 }
 0x335   : > { %v4008_v22 = vmul.f32 %v11946_v20, %v13858_v36  ;;  %v13875_v43 = vadd.f32 1.0, %v8768_v17  ;;  %v3813_v19 = vadd.f32 %v3789_v24, %v3764_v13  ;;  %v3814_v35 = vadd.f32 %v3790_v60, %v3765_v21  ;;  %vm17924_vm13 = vmmov %vm17916_vm9 }
 0x336   : > { %v17278_v10 = vrot.slane %v13849_v61, 1  ;;  %8769 = vrcp.f32 %v13864_v1  ;;  %v3298_v41 = vand.u32 2147483648, %v13864_v1  ;;  %v4009_v4 = vmul.f32 %v11946_v20, %v3986_v46  ;;  %v4278_v17 = vpop.f32.mrf.mxu2 }
 0x337   : > { %v17901_v39 = vrot.slane %v17892_v58, 1  ;;  %v17902_v14 = vrot.slane %v17894_v56, 1  ;;  %v3296_v23 = vand.u32 2147483647, %v13864_v1  ;;  %8771 = vrcp.f32 %v13875_v43 }
 0x338   : > { %v4478_v24 = vand.u32 2147483648, %v13875_v43  ;;  %v4058_v60 = vmul.f32 %v11949_v51, %v13831_v5  ;;  %vm3292_vm2 = vweird.f32 %v13864_v1  ;;  %v4476_v8 = vand.u32 2147483647, %v13875_v43 }
 0x339   : > { %v13887_v31 = vsel %vm17903_vm15, %v17902_v14, %v17901_v39  ;;  %v3910_v58 = vadd.f32 %v3886_v49, %v3813_v19  ;;  %v3911_v52 = vadd.f32 %v3887_v0, %v3814_v35  ;;  %v13896_v45 = vor.u32 1.1754944e-38, %v3298_v41  ;;  %v17905_v0 = vld [vmem:[#allocation40_spill] sm:$0xff]  ;;  %v17908_v14 = vld [vmem:[#allocation39_spill] sm:$0xff]  ;;  %vm17926_vm15 = vmmov %vm17916_vm9 }
 0x33a   : > { %v13898_v13 = vor.u32 1.1754944e-38, %v4478_v24  ;;  %v4124_v21 = vsel %vm17904_vm3, %v17277_v27, %v17278_v10  ;;  %v4154_v15 = vmul.f32 %v13721_v12, %v13887_v31  ;;  %v4939_v19 = vmul.f32 %v17905_v0, %v17676_v44  ;;  %v17910_v0 = vld [vmem:[#allocation37_spill] sm:$0xff]  ;;  %vm17930_vm3 = vmmov %vm17888_vm1 }
 0x33b   : > { %v4032_v46 = vadd.f32 %v4008_v22, %v3910_v58  ;;  %v4033_v39 = vadd.f32 %v4009_v4, %v3911_v52  ;;  %v4155_v49 = vmul.f32 %v13721_v12, %v4124_v21  ;;  %vm13911_vm4 = vcmp.eq.f32.partialorder %v3296_v23, 8.507059e+37  ;;  %v17909_v22 = vld [vmem:[#allocation31_spill] sm:$0xff] }
 0x33c   : > { %v4940_v41 = vmul.f32 %v13392_v38, %v17676_v44  ;;  %v4963_v24 = vmul.f32 %v17908_v14, %v17678_v34  ;;  %v4964_v17 = vmul.f32 %v13356_v16, %v17678_v34  ;;  %v5059_v4 = vmul.f32 %v17909_v22, %v11833_v62  ;;  %v8770_v58 = vpop.eup %8769  ;;  %v17917_v22 = vld [vmem:[#allocation29_spill] sm:$0xff] }
 0x33d   : > { %vm4472_vm5 = vweird.f32 %v13875_v43  ;;  %v4081_v52 = vadd.f32 %v4057_v55, %v4032_v46  ;;  %v4082_v23 = vadd.f32 %v4058_v60, %v4033_v39  ;;  %v5060_v21 = vmul.f32 %v13432_v32, %v11833_v62  ;;  %v8772_v27 = vpop.eup %8771 }
 0x33e   : > { %v5179_v38 = vmul.f32 %v17910_v0, %v11889_v3  ;;  %v3288_v14 = vmul.f32 %v8770_v58, %v13864_v1  ;;  %vm3293_vm6 = vweird.f32 %v8770_v58  ;;  %v4987_v10 = vadd.f32 %v4963_v24, %v4939_v19 }
 0x33f   : > { %v4988_v16 = vadd.f32 %v4964_v17, %v4940_v41  ;;  %v4468_v50 = vmul.f32 %v8772_v27, %v13875_v43  ;;  %vm4473_vm7 = vweird.f32 %v8772_v27  ;;  %vm13930_vm8 = vcmp.eq.f32.partialorder %v4476_v8, 8.507059e+37  ;;  %vm13951_vm12 = vmor %vm3292_vm2, %vm3293_vm6 }
 0x340   : > { %v4178_v55 = vadd.f32 %v4154_v15, %v4081_v52  ;;  %v4179_v60 = vadd.f32 %v4155_v49, %v4082_v23  ;;  %v3289_v46 = vsub.f32 1.0, %v3288_v14  ;;  %v5083_v32 = vadd.f32 %v5059_v4, %v4987_v10  ;;  %v13944_v15 = vld [vmem:[#allocation3 + $0x160] sm:$0xff]  ;;  %v17913_v4 = vld [vmem:[#allocation21_spill] sm:$0xff]  ;;  %vm4474_vm14 = vmor %vm4472_vm5, %vm4473_vm7 }
 0x341   : > { %v5084_v39 = vadd.f32 %v5060_v21, %v4988_v16  ;;  %v5180_v40 = vmul.f32 %v13775_v26, %v11889_v3  ;;  %v4469_v19 = vsub.f32 1.0, %v4468_v50  ;;  %v5227_v8 = vmul.f32 %v13533_v7, %v11904_v28  ;;  %vm17928_vm2 = vmmov %vm17888_vm1 }
 0x342   : > { %v4192_v41 = vpack.c.bf16 %v4179_v60, %v4178_v55  ;;  %v5228_v24 = vmul.f32 %v13561_v25, %v11904_v28  ;;  %v3290_v49 = vmul.f32 %v8770_v58, %v3289_v46  ;;  %v5203_v10 = vadd.f32 %v5179_v38, %v5083_v32  ;;  %vm17933_vm5 = vmmov %vm17916_vm9 }
 0x343   : > { %v5204_v17 = vadd.f32 %v5180_v40, %v5084_v39  ;;  %v5323_v52 = vmul.f32 %v17913_v4, %v11924_v47  ;;  %v4470_v23 = vmul.f32 %v8772_v27, %v4469_v19  ;;  %v5324_v21 = vmul.f32 %v13809_v53, %v11924_v47 }
 0x344   : > { %8339 = vmatmul.msk.bf16.gmra.mxu2 %vm290_vm0, %v4192_v41  ;;  %v5388_v14 = vrot.slane %v13936_v33, 7  ;;  %v5396_v40 = vrot.slane %v13938_v63, 7  ;;  %v3291_v38 = vadd.f32 %v8770_v58, %v3290_v49  ;;  %v5251_v16 = vadd.f32 %v5227_v8, %v5203_v10 }
 0x345   : > { %v5252_v55 = vadd.f32 %v5228_v24, %v5204_v17  ;;  %v5404_v60 = vrot.slane %v13944_v15, 7  ;;  %v4471_v1 = vadd.f32 %v8772_v27, %v4470_v23  ;;  %v5492_v32 = vmul.f32 %v13936_v33, %v11949_v51 }
 0x346   : > { %v13965_v46 = vsel %vm17882_vm10, %v5388_v14, %v5396_v40  ;;  %v5493_v39 = vmul.f32 %v13938_v63, %v11949_v51  ;;  %v3295_v19 = vsel %vm13951_vm12, %v8770_v58, %v3291_v38  ;;  %v5347_v41 = vadd.f32 %v5323_v52, %v5251_v16  ;;  %vm17937_vm12 = vmmov %vm17888_vm1 }
 0x347   : > { %v5348_v8 = vadd.f32 %v5324_v21, %v5252_v55  ;;  %v13980_v24 = vsel %vm17916_vm9, %v5404_v60, %v5388_v14  ;;  %v3300_v49 = vsel %vm13911_vm4, %v13896_v45, %v3295_v19  ;;  %v4475_v10 = vsel %vm4474_vm14, %v8772_v27, %v4471_v1  ;;  %vm17938_vm10 = vmmov %vm17888_vm1 }
 0x348   : > { %v5444_v58 = vmul.f32 %v13980_v24, %v11946_v20  ;;  %v5445_v43 = vmul.f32 %v13965_v46, %v11946_v20  ;;  %v3339_v17 = vmul.f32 %v3300_v49, %v13794_v18  ;;  %v4480_v52 = vsel %vm13930_vm8, %v13898_v13, %v4475_v10  ;;  %vm17936_vm8 = vmmov %vm17933_vm5 }
 0x349   : > { %v5532_v50 = vrot.slane %v13936_v33, 1  ;;  %v5540_v23 = vrot.slane %v13938_v63, 1  ;;  %v4785_v35 = vmul.f32 %v4480_v52, %v13798_v29  ;;  %v5548_v21 = vrot.slane %v13944_v15, 1  ;;  %vm17939_vm9 = vmmov %vm17933_vm5 }
 0x34a   : > { %v5468_v45 = vadd.f32 %v5444_v58, %v5347_v41  ;;  %v5469_v27 = vadd.f32 %v5445_v43, %v5348_v8  ;;  %3388 = vst.msk [vmem:[#allocation3 + $0x188] sm:$0xff] %vm290_vm0, %v3339_v17  ;;  %v14006_v13 = vadd.f32 %v13399_v42, %v13844_v37  ;;  %v3499_v14 = vmul.f32 %v17917_v22, %v17676_v44  ;;  %v8899_v41 = vld [vmem:[#allocation3 + $0xb8] sm:$0xff]  ;;  %v17921_v58 = vld [vmem:[#allocation36_spill] sm:$0xff] }
 0x34b   : > { %v14002_v18 = vsel %vm17888_vm1, %v5532_v50, %v5540_v23  ;;  %v3500_v29 = vmul.f32 %v13482_v48, %v17676_v44  ;;  %4833 = vst.msk [vmem:[#allocation2 + $0x30] sm:$0xff] %vm290_vm0, %v4785_v35  ;;  %v14017_v55 = vsel %vm17918_vm11, %v5540_v23, %v5548_v21  ;;  %v17919_v48 = vld [vmem:[#allocation15_spill] sm:$0xff]  ;;  %v17920_v8 = vld [vmem:[#allocation30_spill] sm:$0xff]  ;;  %v3622_v10 = vmul.f32 %v17893_v30, %v11833_v62  ;;  %v17922_v30 = vld [vmem:[#allocation16_spill] sm:$0xff] }
 0x34c   : > { %v5516_v38 = vadd.f32 %v5492_v32, %v5468_v45  ;;  %v5517_v16 = vadd.f32 %v5493_v39, %v5469_v27  ;;  %v5588_v42 = vmul.f32 %v13721_v12, %v14002_v18  ;;  %v5589_v37 = vmul.f32 %v13721_v12, %v14017_v55  ;;  %vm17941_vm1 = vmmov %vm17933_vm5 }
 0x34d   : > { %v8345_v1 = vmul.f32 -1.442695, %v14006_v13  ;;  %v3524_v19 = vmul.f32 %v17919_v48, %v17678_v34  ;;  %v3525_v32 = vmul.f32 %v8899_v41, %v17678_v34  ;;  %v3621_v49 = vmul.f32 %v17920_v8, %v11833_v62  ;;  %vm17942_vm11 = vmmov %vm17928_vm2 }
 0x34e   : > { %v5612_v39 = vadd.f32 %v5588_v42, %v5516_v38  ;;  %v3742_v43 = vmul.f32 %v17921_v58, %v11889_v3  ;;  %v5613_v17 = vadd.f32 %v5589_v37, %v5517_v16  ;;  %v3743_v35 = vmul.f32 %v13858_v36, %v11889_v3 }
 0x34f   : > { %8773 = vpow2.f32 %v8345_v1  ;;  %v3548_v52 = vadd.f32 %v3524_v19, %v3499_v14  ;;  %v3549_v23 = vadd.f32 %v3525_v32, %v3500_v29  ;;  %v3791_v45 = vmul.f32 %v17896_v59, %v11904_v28 }
 0x350   : > { %v5630_v27 = vpack.c.bf16 %v5613_v17, %v5612_v39  ;;  %v3792_v42 = vmul.f32 %v17894_v56, %v11904_v28  ;;  %v3888_v48 = vmul.f32 %v17922_v30, %v11924_v47  ;;  %v3889_v16 = vmul.f32 %v13887_v31, %v11924_v47 }
 0x351   : > { %v3645_v22 = vadd.f32 %v3621_v49, %v3548_v52  ;;  %v3646_v38 = vadd.f32 %v3622_v10, %v3549_v23  ;;  %v3954_v14 = vrot.slane %v13849_v61, 7  ;;  %v4108_v29 = vrot.slane %v13837_v54, 1 }
 0x352   : > { %8371 = vmatmul.msk.bf16.gmra.mxu3 %vm290_vm0, %v5630_v27  ;;  %v4941_v37 = vmul.f32 %v13554_v11, %v17676_v44  ;;  %v4942_v56 = vmul.f32 %v17910_v0, %v17676_v44  ;;  %v17923_v1 = vrot.slane %v13837_v54, 7  ;;  %v17925_v31 = vrot.slane %v13831_v5, 7 }
 0x353   : > { %v3766_v36 = vadd.f32 %v3742_v43, %v3645_v22  ;;  %v3767_v59 = vadd.f32 %v3743_v35, %v3646_v38  ;;  %v17927_v32 = vrot.slane %v13849_v61, 1  ;;  %v17929_v11 = vrot.slane %v13831_v5, 1 }
 0x354   : > { %v3970_v19 = vsel %vm17924_vm13, %v3954_v14, %v17923_v1  ;;  %v3978_v41 = vsel %vm17926_vm15, %v17925_v31, %v3954_v14  ;;  %v4059_v52 = vmul.f32 %v11949_v51, %v13849_v61  ;;  %v4060_v23 = vmul.f32 %v11949_v51, %v13837_v54  ;;  %v14093_v31 = vld [vmem:[#allocation3 + $0x168] sm:$0xff]  ;;  %vm17944_vm13 = vmmov %vm17928_vm2 }
 0x355   : > { %v4116_v39 = vsel %vm17928_vm2, %v17927_v32, %v4108_v29  ;;  %v4132_v0 = vsel %vm17930_vm3, %v4108_v29, %v17929_v11  ;;  %v8774_v8 = vpop.eup %8773  ;;  %v3815_v49 = vadd.f32 %v3791_v45, %v3766_v36  ;;  %v3816_v10 = vadd.f32 %v3792_v42, %v3767_v59 }
 0x356   : > { %v4010_v58 = vmul.f32 %v11946_v20, %v3978_v41  ;;  %v4011_v43 = vmul.f32 %v11946_v20, %v3970_v19  ;;  %v14068_v17 = vadd.f32 1.0, %v8774_v8  ;;  %v4965_v5 = vmul.f32 %v13362_v9, %v17678_v34  ;;  %v17931_v41 = vld [vmem:[#allocation27_spill] sm:$0xff] }
 0x357   : > { %v3912_v35 = vadd.f32 %v3888_v48, %v3815_v49  ;;  %v3913_v27 = vadd.f32 %v3889_v16, %v3816_v10  ;;  %v4966_v45 = vmul.f32 %v13533_v7, %v17678_v34  ;;  %v5061_v22 = vmul.f32 %v13588_v6, %v11833_v62  ;;  %v4281_v48 = vpop.f32.mrf.mxu2 }
 0x358   : > { %8775 = vrcp.f32 %v14068_v17  ;;  %v4493_v38 = vand.u32 2147483648, %v14068_v17  ;;  %v4156_v61 = vmul.f32 %v13721_v12, %v4116_v39  ;;  %v4157_v42 = vmul.f32 %v13721_v12, %v4132_v0  ;;  %v17932_v39 = vld [vmem:[#allocation28_spill] sm:$0xff] }
 0x359   : > { %v4034_v54 = vadd.f32 %v4010_v58, %v3912_v35  ;;  %v4035_v30 = vadd.f32 %v4011_v43, %v3913_v27  ;;  %v4989_v14 = vadd.f32 %v4965_v5, %v4941_v37  ;;  %v4990_v9 = vadd.f32 %v4966_v45, %v4942_v56  ;;  %v14095_v37 = vld [vmem:[#allocation3 + $0x178] sm:$0xff] }
 0x35a   : > { %v4491_v16 = vand.u32 2147483647, %v14068_v17  ;;  %v14085_v29 = vor.u32 1.1754944e-38, %v4493_v38  ;;  %v5062_v7 = vmul.f32 %v17913_v4, %v11833_v62  ;;  %v5181_v6 = vmul.f32 %v13769_v57, %v11889_v3  ;;  %v14121_v38 = vld [vmem:[#allocation3 + $0x170] sm:$0xff] }
 0x35b   : > { %v4083_v36 = vadd.f32 %v4059_v52, %v4034_v54  ;;  %v4084_v59 = vadd.f32 %v4060_v23, %v4035_v30  ;;  %v5085_v1 = vadd.f32 %v5061_v22, %v4989_v14  ;;  %v5182_v19 = vmul.f32 %v13980_v24, %v11889_v3 }
 0x35c   : > { %v5086_v56 = vadd.f32 %v5062_v7, %v4990_v9  ;;  %v5229_v32 = vmul.f32 %v17931_v41, %v11904_v28  ;;  %v5230_v4 = vmul.f32 %v13936_v33, %v11904_v28  ;;  %v5325_v11 = vmul.f32 %v17932_v39, %v11924_v47 }
 0x35d   : > { %vm4487_vm4 = vweird.f32 %v14068_v17  ;;  %v4180_v0 = vadd.f32 %v4156_v61, %v4083_v36  ;;  %v4181_v8 = vadd.f32 %v4157_v42, %v4084_v59  ;;  %v5205_v49 = vadd.f32 %v5181_v6, %v5085_v1 }
 0x35e   : > { %v5326_v10 = vmul.f32 %v14002_v18, %v11924_v47  ;;  %v8776_v58 = vpop.eup %8775  ;;  %v5206_v43 = vadd.f32 %v5182_v19, %v5086_v56  ;;  %v5389_v52 = vrot.slane %v14093_v31, 7  ;;  %v5405_v23 = vrot.slane %v14095_v37, 7  ;;  %v14155_v56 = vld [vmem:[%s17024_s3 + $0x1] ss:$0 sm:$0xff] }
 0x35f   : > { %v14114_v5 = vsel %vm17933_vm5, %v5396_v40, %v5404_v60  ;;  %v4483_v35 = vmul.f32 %v8776_v58, %v14068_v17  ;;  %vm4488_vm6 = vweird.f32 %v8776_v58  ;;  %vm14117_vm7 = vcmp.eq.f32.partialorder %v4491_v16, 8.507059e+37 }
 0x360   : > { %v4193_v45 = vpack.c.bf16 %v4181_v8, %v4180_v0  ;;  %v5253_v22 = vadd.f32 %v5229_v32, %v5205_v49  ;;  %v5254_v61 = vadd.f32 %v5230_v4, %v5206_v43  ;;  %v14129_v40 = vsel %vm17936_vm8, %v5405_v23, %v5389_v52  ;;  %v4283_v4 = vpop.f32.mrf.mxu2  ;;  %vm4489_vm14 = vmor %vm4487_vm4, %vm4488_vm6 }
 0x361   : > { %v5446_v60 = vmul.f32 %v14114_v5, %v11946_v20  ;;  %v5494_v42 = vmul.f32 %v13944_v15, %v11949_v51  ;;  %v4484_v54 = vsub.f32 1.0, %v4483_v35  ;;  %v5447_v14 = vmul.f32 %v14129_v40, %v11946_v20 }
 0x362   : > { %8340 = vmatmul.msk.bf16.gmra.mxu2 %vm290_vm0, %v4193_v45  ;;  %v5349_v30 = vadd.f32 %v5325_v11, %v5253_v22  ;;  %v5495_v9 = vmul.f32 %v14093_v31, %v11949_v51  ;;  %v5350_v16 = vadd.f32 %v5326_v10, %v5254_v61  ;;  %v5533_v7 = vrot.slane %v14093_v31, 1 }
 0x363   : > { %v5541_v6 = vrot.slane %v14121_v38, 1  ;;  %v14148_v36 = vsel %vm17937_vm12, %v5548_v21, %v5532_v50  ;;  %v4485_v59 = vmul.f32 %v8776_v58, %v4484_v54  ;;  %v14158_v32 = vadd.f32 %v14155_v56, %v4281_v48 }
 0x364   : > { %v5470_v1 = vadd.f32 %v5446_v60, %v5349_v30  ;;  %v5590_v19 = vmul.f32 %v13721_v12, %v14148_v36  ;;  %v5471_v11 = vadd.f32 %v5447_v14, %v5350_v16  ;;  %v14169_v21 = vadd.f32 %v14155_v56, %v4283_v4 }
 0x365   : > { %v14166_v50 = vsel %vm17938_vm10, %v5533_v7, %v5541_v6  ;;  %v4943_v0 = vmul.f32 %v13775_v26, %v17676_v44  ;;  %v4486_v8 = vadd.f32 %v8776_v58, %v4485_v59  ;;  %v8347_v10 = vmul.f32 -1.442695, %v14158_v32  ;;  %v5681_v59 = vpop.f32.mrf.mxu3 }
 0x366   : > { %v5518_v49 = vadd.f32 %v5494_v42, %v5470_v1  ;;  %v5591_v48 = vmul.f32 %v13721_v12, %v14166_v50  ;;  %v5519_v43 = vadd.f32 %v5495_v9, %v5471_v11  ;;  %v8348_v35 = vmul.f32 -1.442695, %v14169_v21 }
 0x367   : > { %v4944_v45 = vmul.f32 %v13769_v57, %v17676_v44  ;;  %v4967_v26 = vmul.f32 %v13561_v25, %v17678_v34  ;;  %v4490_v22 = vsel %vm4489_vm14, %v8776_v58, %v4486_v8  ;;  %8777 = vpow2.f32 %v8347_v10 }
 0x368   : > { %v5614_v61 = vadd.f32 %v5590_v19, %v5518_v49  ;;  %v4968_v60 = vmul.f32 %v17931_v41, %v17678_v34  ;;  %v4495_v17 = vsel %vm14117_vm7, %v14085_v29, %v4490_v22  ;;  %v5615_v42 = vadd.f32 %v5591_v48, %v5519_v43  ;;  %v4286_v16 = vpop.f32.mrf.mxu2 }
 0x369   : > { %8779 = vpow2.f32 %v8348_v35  ;;  %v4991_v54 = vadd.f32 %v4967_v26, %v4943_v0  ;;  %v4786_v30 = vmul.f32 %v4495_v17, %v14006_v13  ;;  %v5063_v57 = vmul.f32 %v13809_v53, %v11833_v62 }
 0x36a   : > { %v4992_v14 = vadd.f32 %v4968_v60, %v4944_v45  ;;  %v5064_v25 = vmul.f32 %v17932_v39, %v11833_v62  ;;  %v5631_v58 = vpack.c.bf16 %v5615_v42, %v5614_v61  ;;  %v5183_v41 = vmul.f32 %v13965_v46, %v11889_v3 }
 0x36b   : > { %v5184_v27 = vmul.f32 %v14114_v5, %v11889_v3  ;;  %4834 = vst.msk [vmem:[#allocation2 + $0x38] sm:$0xff] %vm290_vm0, %v4786_v30  ;;  %v5087_v29 = vadd.f32 %v5063_v57, %v4991_v54  ;;  %v5231_v13 = vmul.f32 %v13938_v63, %v11904_v28  ;;  %v5232_v53 = vmul.f32 %v13944_v15, %v11904_v28 }
 0x36c   : > { %v5088_v9 = vadd.f32 %v5064_v25, %v4992_v14  ;;  %8372 = vmatmul.msk.bf16.gmra.mxu3 %vm290_vm0, %v5631_v58  ;;  %v5397_v39 = vrot.slane %v14121_v38, 7  ;;  %v5327_v8 = vmul.f32 %v14017_v55, %v11924_v47  ;;  %v5328_v49 = vmul.f32 %v14148_v36, %v11924_v47 }
 0x36d   : > { %v8778_v1 = vpop.eup %8777  ;;  %v5207_v19 = vadd.f32 %v5183_v41, %v5087_v29  ;;  %v5549_v45 = vrot.slane %v14095_v37, 1  ;;  %v5496_v61 = vmul.f32 %v14121_v38, %v11949_v51  ;;  %v5497_v54 = vmul.f32 %v14095_v37, %v11949_v51 }
 0x36e   : > { %v5208_v4 = vadd.f32 %v5184_v27, %v5088_v9  ;;  %v14205_v0 = vadd.f32 1.0, %v8778_v1  ;;  %v14215_v48 = vsel %vm17939_vm9, %v5389_v52, %v5397_v39  ;;  %v14225_v26 = vsel %vm17941_vm1, %v5397_v39, %v5405_v23  ;;  %v8476_v23 = vld [vmem:[#allocation7 + $0x18] sm:$0xff] }
 0x36f   : > { %v8780_v11 = vpop.eup %8779  ;;  %17940 = vst [vmem:[#allocation22_spill] sm:$0xff] %v14215_v48  ;;  %v5255_v43 = vadd.f32 %v5231_v13, %v5207_v19  ;;  %v5448_v22 = vmul.f32 %v14215_v48, %v11946_v20  ;;  %v14230_v52 = vadd.f32 %v14155_v56, %v5681_v59  ;;  %v5449_v57 = vmul.f32 %v14225_v26, %v11946_v20 }
 0x370   : > { %v14217_v10 = vadd.f32 1.0, %v8780_v11  ;;  %v5256_v35 = vadd.f32 %v5232_v53, %v5208_v4  ;;  %8781 = vrcp.f32 %v14205_v0  ;;  %v4523_v60 = vand.u32 2147483648, %v14205_v0  ;;  %v4288_v58 = vpop.f32.mrf.mxu2  ;;  %7137 = vmatpush.bf16.msrb.mxu0 %v8476_v23  ;;  %8030 = vmatpush.bf16.msrb.mxu1 %v8476_v23  ;;  %v8475_v4 = vld [vmem:[#allocation7 + $0x10] sm:$0xff] }
 0x371   : > { %v5351_v17 = vadd.f32 %v5327_v8, %v5255_v43  ;;  %v4521_v30 = vand.u32 2147483647, %v14205_v0  ;;  %v14246_v25 = vsel %vm17942_vm11, %v5541_v6, %v5549_v45  ;;  %v14252_v27 = vsel %vm17944_vm13, %v5549_v45, %v5533_v7  ;;  %v5683_v7 = vpop.f32.mrf.mxu3 }
 0x372   : > { %8783 = vrcp.f32 %v14217_v10  ;;  %v5352_v42 = vadd.f32 %v5328_v49, %v5256_v35  ;;  %v4536_v14 = vand.u32 2147483647, %v14217_v10  ;;  %17943 = vst [vmem:[#allocation35_spill] sm:$0xff] %v14246_v25  ;;  %v5592_v29 = vmul.f32 %v13721_v12, %v14246_v25 }
 0x373   : > { %v5472_v41 = vadd.f32 %v5448_v22, %v5351_v17  ;;  %v8377_v9 = vmul.f32 -1.442695, %v14230_v52  ;;  %vm4517_vm15 = vweird.f32 %v14205_v0  ;;  %v4538_v6 = vand.u32 2147483648, %v14217_v10 }
 0x374   : > { %v5473_v13 = vadd.f32 %v5449_v57, %v5352_v42  ;;  %v5593_v53 = vmul.f32 %v13721_v12, %v14252_v27  ;;  %v14262_v16 = vadd.f32 %v14155_v56, %v4288_v58  ;;  %v4524_v39 = vor.u32 1.1754944e-38, %v4523_v60  ;;  %7138 = vmatpush.bf16.msrb.mxu0 %v8475_v4  ;;  %v8474_v60 = vld [vmem:[#allocation7 + $0x8] sm:$0xff]  ;;  %8031 = vmatpush.bf16.msrb.mxu1 %v8475_v4 }
 0x375   : > { %vm4532_vm2 = vweird.f32 %v14217_v10  ;;  %v5520_v1 = vadd.f32 %v5496_v61, %v5472_v41  ;;  %8785 = vpow2.f32 %v8377_v9  ;;  %v14266_v19 = vadd.f32 %v14155_v56, %v5683_v7 }
 0x376   : > { %v8782_v59 = vpop.eup %8781  ;;  %vm14269_vm3 = vcmp.eq.f32.partialorder %v4521_v30, 8.507059e+37  ;;  %v5521_v12 = vadd.f32 %v5497_v54, %v5473_v13  ;;  %v8350_v43 = vmul.f32 -1.442695, %v14262_v16  ;;  %v4945_v35 = vmul.f32 %v13980_v24, %v17676_v44 }
 0x377   : > { %v4513_v8 = vmul.f32 %v8782_v59, %v14205_v0  ;;  %vm4518_vm4 = vweird.f32 %v8782_v59  ;;  %v5616_v22 = vadd.f32 %v5592_v29, %v5520_v1  ;;  %v8378_v61 = vmul.f32 -1.442695, %v14266_v19 }
 0x378   : > { %v8784_v11 = vpop.eup %8783  ;;  %v5617_v42 = vadd.f32 %v5593_v53, %v5521_v12  ;;  %8787 = vpow2.f32 %v8350_v43  ;;  %v4946_v54 = vmul.f32 %v13965_v46, %v17676_v44  ;;  %v4969_v24 = vmul.f32 %v13936_v33, %v17678_v34  ;;  %v14288_v9 = vpop.f32.mrf.mxu2  ;;  %7139 = vmatpush.bf16.msrb.mxu0 %v8474_v60  ;;  %8032 = vmatpush.bf16.msrb.mxu1 %v8474_v60  ;;  %vm4519_vm7 = vmor %vm4517_vm15, %vm4518_vm4 }
 0x379   : > { %v4528_v45 = vmul.f32 %v8784_v11, %v14217_v10  ;;  %v4514_v17 = vsub.f32 1.0, %v4513_v8  ;;  %8789 = vpow2.f32 %v8378_v61  ;;  %v4970_v30 = vmul.f32 %v13938_v63, %v17678_v34  ;;  %v5686_v4 = vpop.f32.mrf.mxu3 }
 0x37a   : > { %v5632_v58 = vpack.c.bf16 %v5617_v42, %v5616_v22  ;;  %v5065_v41 = vmul.f32 %v14002_v18, %v11833_v62  ;;  %v5066_v29 = vmul.f32 %v14017_v55, %v11833_v62  ;;  %vm4533_vm5 = vweird.f32 %v8784_v11 }
 0x37b   : > { %v4529_v23 = vsub.f32 1.0, %v4528_v45  ;;  %v4515_v57 = vmul.f32 %v8782_v59, %v4514_v17  ;;  %v8786_v13 = vpop.eup %8785  ;;  %v4993_v53 = vadd.f32 %v4969_v24, %v4945_v35  ;;  %v4994_v7 = vadd.f32 %v4970_v30, %v4946_v54  ;;  %vm4534_vm8 = vmor %vm4532_vm2, %vm4533_vm5 }
 0x37c   : > { %vm14290_vm6 = vcmp.eq.f32.partialorder %v4536_v14, 8.507059e+37  ;;  %v4539_v63 = vor.u32 1.1754944e-38, %v4538_v6  ;;  %8373 = vmatmul.msk.bf16.gmra.mxu3 %vm290_vm0, %v5632_v58  ;;  %v14295_v18 = vadd.f32 1.0, %v8786_v13  ;;  %v5185_v12 = vmul.f32 %v14129_v40, %v11889_v3  ;;  %v14336_v58 = vld [vmem:[#allocation3 + $0x180] sm:$0xff] }
 0x37d   : > { %v4530_v46 = vmul.f32 %v8784_v11, %v4529_v23  ;;  %v4516_v33 = vadd.f32 %v8782_v59, %v4515_v57  ;;  %v5089_v8 = vadd.f32 %v5065_v41, %v4993_v53  ;;  %v5186_v14 = vmul.f32 %v14215_v48, %v11889_v3  ;;  %v14338_v41 = vld [vmem:[#allocation3 + $0x188] sm:$0xff] }
 0x37e   : > { %v8788_v43 = vpop.eup %8787  ;;  %8791 = vrcp.f32 %v14295_v18  ;;  %v5846_v35 = vand.u32 2147483647, %v14295_v18  ;;  %v5090_v0 = vadd.f32 %v5066_v29, %v4994_v7  ;;  %v5848_v60 = vand.u32 2147483648, %v14295_v18  ;;  %v14346_v7 = vld [vmem:[#allocation3 + $0x190] sm:$0xff] }
 0x37f   : > { %v4531_v55 = vadd.f32 %v8784_v11, %v4530_v46  ;;  %v4520_v6 = vsel %vm4519_vm7, %v8782_v59, %v4516_v33  ;;  %v8790_v45 = vpop.eup %8789  ;;  %v14312_v17 = vadd.f32 1.0, %v8788_v43  ;;  %v5233_v49 = vmul.f32 %v14093_v31, %v11904_v28 }
 0x380   : > { %v4525_v22 = vsel %vm14269_vm3, %v4524_v39, %v4520_v6  ;;  %v14317_v42 = vadd.f32 1.0, %v8790_v45  ;;  %v5234_v39 = vmul.f32 %v14121_v38, %v11904_v28  ;;  %vm5842_vm12 = vweird.f32 %v14295_v18  ;;  %v4293_v23 = vpop.f32.mrf.mxu2 }
 0x381   : > { %v4535_v61 = vsel %vm4534_vm8, %v8784_v11, %v4531_v55  ;;  %v4788_v59 = vmul.f32 %v4525_v22, %v14158_v32  ;;  %8793 = vrcp.f32 %v14312_v17  ;;  %v5849_v32 = vor.u32 1.1754944e-38, %v5848_v60  ;;  %v14482_v60 = vld [vmem:[#allocation2 + $0x18] sm:$0xff] }
 0x382   : > { %v4540_v10 = vsel %vm14290_vm6, %v4539_v63, %v4535_v61  ;;  %v4568_v11 = vand.u32 2147483648, %v14312_v17  ;;  %8795 = vrcp.f32 %v14317_v42  ;;  %vm14330_vm10 = vcmp.eq.f32.partialorder %v5846_v35, 8.507059e+37 }
 0x383   : > { %v4789_v54 = vmul.f32 %v4540_v10, %v14169_v21  ;;  %4836 = vst.msk [vmem:[#allocation2 + $0x48] sm:$0xff] %vm290_vm0, %v4788_v59  ;;  %v5861_v24 = vand.u32 2147483647, %v14317_v42  ;;  %v5863_v38 = vand.u32 2147483648, %v14317_v42  ;;  %v5209_v30 = vadd.f32 %v5185_v12, %v5089_v8 }
 0x384   : > { %v5210_v57 = vadd.f32 %v5186_v14, %v5090_v0  ;;  %v8792_v29 = vpop.eup %8791  ;;  %v4566_v13 = vand.u32 2147483647, %v14312_v17  ;;  %vm5857_vm14 = vweird.f32 %v14317_v42  ;;  %v5329_v46 = vmul.f32 %v14166_v50, %v11924_v47 }
 0x385   : > { %4837 = vst.msk [vmem:[#allocation2 + $0x50] sm:$0xff] %vm290_vm0, %v4789_v54  ;;  %v5330_v53 = vmul.f32 %v14246_v25, %v11924_v47  ;;  %v5838_v33 = vmul.f32 %v8792_v29, %v14295_v18  ;;  %vm5843_vm9 = vweird.f32 %v8792_v29  ;;  %v14349_v1 = vor.u32 1.1754944e-38, %v4568_v11  ;;  %v8473_v11 = vld [vmem:[#allocation7] sm:$0xff]  ;;  %v5688_v25 = vpop.f32.mrf.mxu3 }
 0x386   : > { %v14351_v63 = vor.u32 1.1754944e-38, %v5863_v38  ;;  %vm4562_vm1 = vweird.f32 %v14312_v17  ;;  %v5257_v4 = vadd.f32 %v5233_v49, %v5209_v30  ;;  %v5258_v55 = vadd.f32 %v5234_v39, %v5210_v57  ;;  %vm14380_vm4 = vmor %vm5842_vm12, %vm5843_vm9  ;;  %7140 = vmatpush.bf16.msrb.mxu0 %v8473_v11  ;;  %8033 = vmatpush.bf16.msrb.mxu1 %v8473_v11 }
 0x387   : > { %v5390_v8 = vrot.slane %v14336_v58, 7  ;;  %v17293_v12 = vrot.slane %v14338_v41, 7  ;;  %v8794_v14 = vpop.eup %8793  ;;  %v5839_v43 = vsub.f32 1.0, %v5838_v33  ;;  %vm14356_vm11 = vcmp.eq.f32.partialorder %v5861_v24, 8.507059e+37 }
 0x388   : > { %v17294_v35 = vrot.slane %v14346_v7, 7  ;;  %v5498_v0 = vmul.f32 %v14336_v58, %v11949_v51  ;;  %v5499_v45 = vmul.f32 %v14338_v41, %v11949_v51  ;;  %v8796_v22 = vpop.eup %8795  ;;  %v4558_v61 = vmul.f32 %v8794_v14, %v14312_v17 }
 0x389   : > { %vm4563_vm13 = vweird.f32 %v8794_v14  ;;  %vm14366_vm15 = vcmp.eq.f32.partialorder %v4566_v13, 8.507059e+37  ;;  %v5353_v59 = vadd.f32 %v5329_v46, %v5257_v4  ;;  %v5354_v10 = vadd.f32 %v5330_v53, %v5258_v55 }
 0x38a   : > { %v5840_v54 = vmul.f32 %v8792_v29, %v5839_v43  ;;  %v5853_v49 = vmul.f32 %v8796_v22, %v14317_v42  ;;  %vm5858_vm2 = vweird.f32 %v8796_v22  ;;  %vm17955_vm3 = vcmp.lt.s32.totalorder %v9204_v2, 1  ;;  %vm14430_vm12 = vmor %vm4562_vm1, %vm4563_vm13 }
 0x38b   : > { %v14375_v39 = vsel %vm17955_vm3, %v5390_v8, %v17293_v12  ;;  %v4559_v23 = vsub.f32 1.0, %v4558_v61  ;;  %vm17959_vm5 = vmmov %vm17955_vm3  ;;  %v17290_v30 = vrot.slane %v14336_v58, 1  ;;  %v5542_v46 = vrot.slane %v14338_v41, 1 }
 0x38c   : > { %17956 = vst [vmem:[#allocation20_spill] sm:$0xff] %v14375_v39  ;;  %v14388_v24 = vsel %vm17959_vm5, %v17294_v35, %v5390_v8  ;;  %v5451_v38 = vmul.f32 %v14375_v39, %v11946_v20  ;;  %v5841_v57 = vadd.f32 %v8792_v29, %v5840_v54  ;;  %v5854_v13 = vsub.f32 1.0, %v5853_v49  ;;  %vm14414_vm7 = vmor %vm5857_vm14, %vm5858_vm2 }
 0x38d   : > { %v5450_v18 = vmul.f32 %v14388_v24, %v11946_v20  ;;  %v4560_v53 = vmul.f32 %v8794_v14, %v4559_v23  ;;  %v17289_v4 = vrot.slane %v14346_v7, 1  ;;  %v14399_v55 = vadd.f32 %v14155_v56, %v14288_v9  ;;  %v14424_v23 = vld [vmem:[#allocation2] sm:$0xff]  ;;  %vm17968_vm14 = vmmov %vm17955_vm3 }
 0x38e   : > { %v5475_v33 = vadd.f32 %v5451_v38, %v5354_v10  ;;  %v5845_v8 = vsel %vm14380_vm4, %v8792_v29, %v5841_v57  ;;  %v5855_v43 = vmul.f32 %v8796_v22, %v5854_v13  ;;  %vm17960_vm6 = vcmp.lt.s32.totalorder %v9204_v2, 7  ;;  %v14437_v38 = vld [vmem:[%s17022_s1 + $0x18] ss:$0 sm:$0xff]  ;;  %v14484_v9 = vld [vmem:[#allocation2 + $0x20] sm:$0xff]  ;;  %vm17975_vm13 = vmmov %vm17955_vm3 }
 0x38f   : > { %v5474_v61 = vadd.f32 %v5450_v18, %v5353_v59  ;;  %v14407_v54 = vsel %vm17960_vm6, %v17290_v30, %v5542_v46  ;;  %v5850_v10 = vsel %vm14330_vm10, %v5849_v32, %v5845_v8  ;;  %v4561_v49 = vadd.f32 %v8794_v14, %v4560_v53  ;;  %vm17963_vm8 = vmmov %vm17960_vm6  ;;  %v14451_v18 = vld [vmem:[#allocation2 + $0x8] sm:$0xff] }
 0x390   : > { %v5523_v29 = vadd.f32 %v5499_v45, %v5475_v33  ;;  %v14422_v59 = vsel %vm17963_vm8, %v5542_v46, %v17289_v4  ;;  %v6197_v32 = vmul.f32 %v5850_v10, %v14230_v52  ;;  %v5856_v21 = vadd.f32 %v8796_v22, %v5855_v43  ;;  %v14453_v46 = vld [vmem:[#allocation2 + $0x10] sm:$0xff]  ;;  %vm17967_vm10 = vmmov %vm17955_vm3 }
 0x391   : > { %17964 = vst [vmem:[#allocation14_spill] sm:$0xff] %v14422_v59  ;;  %v5522_v45 = vadd.f32 %v5498_v0, %v5474_v61  ;;  %v5594_v57 = vmul.f32 %v14437_v38, %v14407_v54  ;;  %v4565_v52 = vsel %vm14430_vm12, %v8794_v14, %v4561_v49  ;;  %v5595_v17 = vmul.f32 %v14437_v38, %v14422_v59  ;;  %v14449_v0 = vld [vmem:[%s17022_s1 + $0x20] sm:$0xff]  ;;  %vm17969_vm9 = vmmov %vm17960_vm6 }
 0x392   : > { %v8351_v13 = vmul.f32 -1.442695, %v14399_v55  ;;  %v6305_v53 = vrot.slane %v14424_v23, 7  ;;  %6245 = vst.msk [vmem:[#allocation2 + $0xd8] sm:$0xff] %vm290_vm0, %v6197_v32  ;;  %v4570_v14 = vsel %vm14366_vm15, %v14349_v1, %v4565_v52  ;;  %v5860_v33 = vsel %vm14414_vm7, %v8796_v22, %v5856_v21  ;;  %vm17970_vm1 = vmmov %vm17960_vm6 }
 0x393   : > { %v5618_v8 = vadd.f32 %v5594_v57, %v5522_v45  ;;  %v17291_v43 = vrot.slane %v14451_v18, 7  ;;  %v4791_v61 = vmul.f32 %v4570_v14, %v14262_v16  ;;  %v5865_v10 = vsel %vm14356_vm11, %v14351_v63, %v5860_v33  ;;  %v14496_v57 = vld [vmem:[#allocation2 + $0x28] sm:$0xff]  ;;  %vm17971_vm11 = vmmov %vm17955_vm3 }
 0x394   : > { %v5619_v49 = vadd.f32 %v5595_v17, %v5523_v29  ;;  %8797 = vpow2.f32 %v8351_v13  ;;  %v6198_v11 = vmul.f32 %v5865_v10, %v14266_v19  ;;  %v17292_v32 = vrot.slane %v14453_v46, 7  ;;  %vm17979_vm15 = vmmov %vm17970_vm1 }
 0x395   : > { %v6337_v1 = vsel %vm17967_vm10, %v6305_v53, %v17291_v43  ;;  %v14474_v22 = vperm.slane %v14449_v0, 0  ;;  %4839 = vst.msk [vmem:[#allocation2 + $0x60] sm:$0xff] %vm290_vm0, %v4791_v61  ;;  %v14478_v6 = vperm.slane %v14449_v0, 1  ;;  %v17288_v63 = vrot.slane %v14424_v23, 1  ;;  %vm17981_vm2 = vmmov %vm17970_vm1 }
 0x396   : > { %v5633_v16 = vpack.c.bf16 %v5619_v49, %v5618_v8  ;;  %v6435_v19 = vrot.slane %v14451_v18, 1  ;;  %6246 = vst.msk [vmem:[#allocation2 + $0xe0] sm:$0xff] %vm290_vm0, %v6198_v11  ;;  %v6345_v29 = vsel %vm17968_vm14, %v17292_v32, %v6305_v53  ;;  %v17285_v21 = vrot.slane %v14453_v46, 1  ;;  %vm17982_vm4 = vmmov %vm17959_vm5 }
 0x397   : > { %v6355_v42 = vmul.f32 %v14474_v22, %v6337_v1  ;;  %v14494_v45 = vperm.slane %v14449_v0, 2  ;;  %v6354_v52 = vmul.f32 %v14474_v22, %v6345_v29  ;;  %v6379_v17 = vmul.f32 %v14478_v6, %v14424_v23  ;;  %vm17984_vm5 = vmmov %vm17982_vm4 }
 0x398   : > { %8374 = vmatmul.msk.bf16.gmra.mxu3 %vm290_vm0, %v5633_v16  ;;  %v6380_v13 = vmul.f32 %v14478_v6, %v14451_v18  ;;  %v6459_v53 = vsel %vm17969_vm9, %v17288_v63, %v6435_v19  ;;  %v6451_v14 = vsel %vm17970_vm1, %v6435_v19, %v17285_v21  ;;  %v6548_v8 = vrot.slane %v14482_v60, 7  ;;  %vm17990_vm8 = vmmov %vm17970_vm1 }
 0x399   : > { %v6476_v33 = vmul.f32 %v14494_v45, %v6459_v53  ;;  %v17286_v61 = vrot.slane %v14484_v9, 7  ;;  %v6403_v49 = vadd.f32 %v6379_v17, %v6354_v52  ;;  %v6477_v1 = vmul.f32 %v14494_v45, %v6451_v14  ;;  %v14539_v14 = vld [vmem:[#allocation2 + $0x30] sm:$0xff]  ;;  %vm17993_vm12 = vmmov %vm17970_vm1 }
 0x39a   : > { %v8798_v10 = vpop.eup %8797  ;;  %v6404_v11 = vadd.f32 %v6380_v13, %v6355_v42  ;;  %v17287_v16 = vrot.slane %v14496_v57, 7  ;;  %v14526_v53 = vperm.slane %v14449_v0, 3  ;;  %v14529_v21 = vperm.slane %v14449_v0, 4  ;;  %17976 = vst [vmem:[#allocation18_spill] sm:$0xff] %v14539_v14  ;;  %vm17997_vm14 = vmmov %vm17982_vm4 }
 0x39b   : > { %v14517_v29 = vadd.f32 1.0, %v8798_v10  ;;  %v14523_v19 = vsel %vm17971_vm11, %v6548_v8, %v17286_v61  ;;  %v6500_v52 = vadd.f32 %v6476_v33, %v6403_v49  ;;  %v17299_v13 = vrot.slane %v14482_v60, 1  ;;  %vm18000_vm9 = vmmov %vm17982_vm4 }
 0x39c   : > { %17972 = vst [vmem:[#allocation32_spill] sm:$0xff] %v14523_v19  ;;  %v6501_v42 = vadd.f32 %v6477_v1, %v6404_v11  ;;  %v14535_v17 = vsel %vm17975_vm13, %v17287_v16, %v6548_v8  ;;  %v6598_v49 = vmul.f32 %v14526_v53, %v14523_v19  ;;  %v14547_v11 = vld [vmem:[#allocation2 + $0x38] sm:$0xff]  ;;  %v14549_v8 = vld [vmem:[#allocation2 + $0x40] sm:$0xff]  ;;  %v6646_v1 = vmul.f32 %v14529_v21, %v14482_v60  ;;  %vm18001_vm1 = vmmov %vm17982_vm4 }
 0x39d   : > { %17973 = vst [vmem:[#allocation19_spill] sm:$0xff] %v14526_v53  ;;  %8799 = vrcp.f32 %v14517_v29  ;;  %v4581_v10 = vand.u32 2147483647, %v14517_v29  ;;  %v4583_v61 = vand.u32 2147483648, %v14517_v29  ;;  %v6597_v33 = vmul.f32 %v14526_v53, %v14535_v17  ;;  %vm18004_vm11 = vmmov %vm17981_vm2 }
 0x39e   : > { %17974 = vst [vmem:[#allocation38_spill] sm:$0xff] %v14529_v21  ;;  %v6647_v16 = vmul.f32 %v14529_v21, %v14484_v9  ;;  %v6702_v63 = vrot.slane %v14484_v9, 1  ;;  %v17297_v4 = vrot.slane %v14496_v57, 1  ;;  %v6622_v43 = vadd.f32 %v6598_v49, %v6501_v42  ;;  %vm18005_vm13 = vmmov %vm17981_vm2 }
 0x39f   : > { %17977 = vst [vmem:[#allocation13_spill] sm:$0xff] %v14547_v11  ;;  %v6621_v30 = vadd.f32 %v6597_v33, %v6500_v52  ;;  %v14558_v32 = vperm.slane %v14449_v0, 5  ;;  %v6815_v12 = vrot.slane %v14539_v14, 7  ;;  %v17300_v52 = vrot.slane %v14547_v11, 7 }
 0x3a0   : > { %v14565_v35 = vsel %vm17979_vm15, %v6702_v63, %v17297_v4  ;;  %v14571_v19 = vsel %vm17981_vm2, %v17299_v13, %v6702_v63  ;;  %v17304_v42 = vrot.slane %v14549_v8, 7  ;;  %vm4577_vm3 = vweird.f32 %v14517_v29  ;;  %vm18008_vm15 = vmmov %vm17981_vm2 }
 0x3a1   : > { %17978 = vst [vmem:[#allocation24_spill] sm:$0xff] %v14558_v32  ;;  %v6670_v33 = vadd.f32 %v6646_v1, %v6621_v30  ;;  %v6671_v49 = vadd.f32 %v6647_v16, %v6622_v43  ;;  %v6743_v59 = vmul.f32 %v14558_v32, %v14571_v19  ;;  %v6744_v4 = vmul.f32 %v14558_v32, %v14565_v35  ;;  %v14672_v1 = vld [vmem:[#allocation3 + $0x1a0] sm:$0xff]  ;;  %vm18011_vm2 = vmmov %vm18001_vm1 }
 0x3a2   : > { %17980 = vst [vmem:[#allocation34_spill] sm:$0xff] %v14565_v35  ;;  %v14584_v63 = vsel %vm17982_vm4, %v6815_v12, %v17300_v52  ;;  %v14590_v13 = vsel %vm17984_vm5, %v17304_v42, %v6815_v12  ;;  %v14593_v30 = vperm.slane %v14449_v0, 6  ;;  %v14596_v43 = vperm.slane %v14449_v0, 7  ;;  %vm18016_vm5 = vmmov %vm17990_vm8 }
 0x3a3   : > { %v8800_v39 = vpop.eup %8799  ;;  %17983 = vst [vmem:[#allocation25_spill] sm:$0xff] %v14584_v63  ;;  %vm14599_vm7 = vcmp.eq.f32.partialorder %v4581_v10, 8.507059e+37  ;;  %v4584_v52 = vor.u32 1.1754944e-38, %v4583_v61  ;;  %v6767_v35 = vadd.f32 %v6743_v59, %v6670_v33  ;;  %v6768_v48 = vadd.f32 %v6744_v4, %v6671_v49  ;;  %v14617_v33 = vld [vmem:[%s17022_s1 + $0x28] ss:$0 sm:$0xff] }
 0x3a4   : > { %17985 = vst [vmem:[#allocation23_spill] sm:$0xff] %v14590_v13  ;;  %v4573_v16 = vmul.f32 %v8800_v39, %v14517_v29  ;;  %vm4578_vm6 = vweird.f32 %v8800_v39  ;;  %v6864_v12 = vmul.f32 %v14593_v30, %v14590_v13  ;;  %v6865_v42 = vmul.f32 %v14593_v30, %v14584_v63 }
 0x3a5   : > { %17986 = vst [vmem:[#allocation26_spill] sm:$0xff] %v14593_v30  ;;  %v6913_v0 = vmul.f32 %v14596_v43, %v14539_v14  ;;  %v6969_v10 = vrot.slane %v14547_v11, 1  ;;  %v17315_v53 = vrot.slane %v14549_v8, 1  ;;  %v6914_v4 = vmul.f32 %v14596_v43, %v14547_v11  ;;  %vm4579_vm10 = vmor %vm4577_vm3, %vm4578_vm6 }
 0x3a6   : > { %17987 = vst [vmem:[#allocation33_spill] sm:$0xff] %v14596_v43  ;;  %v4574_v32 = vsub.f32 1.0, %v4573_v16  ;;  %v6888_v61 = vadd.f32 %v6864_v12, %v6767_v35  ;;  %v6889_v59 = vadd.f32 %v6865_v42, %v6768_v48  ;;  %v14620_v49 = vadd.f32 %v14155_v56, %v5688_v25 }
 0x3a7   : > { %v14626_v21 = vsel %vm17990_vm8, %v6969_v10, %v17315_v53  ;;  %v17992_v48 = vrot.slane %v14539_v14, 1  ;;  %v4947_v42 = vmul.f32 %v14114_v5, %v17676_v44  ;;  %v4948_v43 = vmul.f32 %v14129_v40, %v17676_v44 }
 0x3a8   : > { %v4575_v16 = vmul.f32 %v8800_v39, %v4574_v32  ;;  %17991 = vst [vmem:[#allocation17_spill] sm:$0xff] %v14626_v21  ;;  %v6937_v12 = vadd.f32 %v6913_v0, %v6888_v61  ;;  %v6938_v63 = vadd.f32 %v6914_v4, %v6889_v59  ;;  %v7011_v32 = vmul.f32 %v14617_v33, %v14626_v21 }
 0x3a9   : > { %v14632_v35 = vsel %vm17993_vm12, %v17992_v48, %v6969_v10  ;;  %v8380_v53 = vmul.f32 -1.442695, %v14620_v49  ;;  %v4971_v10 = vmul.f32 %v13944_v15, %v17678_v34  ;;  %v4972_v61 = vmul.f32 %v14093_v31, %v17678_v34  ;;  %v14660_v31 = vld [vmem:[#allocation3 + $0x1a8] sm:$0xff] }
 0x3aa   : > { %17994 = vst [vmem:[#allocation40_spill] sm:$0xff] %v14632_v35  ;;  %v7010_v25 = vmul.f32 %v14617_v33, %v14632_v35  ;;  %v4576_v30 = vadd.f32 %v8800_v39, %v4575_v16  ;;  %v7035_v0 = vadd.f32 %v7011_v32, %v6938_v63  ;;  %v5067_v59 = vmul.f32 %v14148_v36, %v11833_v62 }
 0x3ab   : > { %8801 = vpow2.f32 %v8380_v53  ;;  %v4995_v16 = vadd.f32 %v4971_v10, %v4947_v42  ;;  %v5068_v40 = vmul.f32 %v14166_v50, %v11833_v62  ;;  %v4996_v29 = vadd.f32 %v4972_v61, %v4948_v43 }
 0x3ac   : > { %v7034_v5 = vadd.f32 %v7010_v25, %v6937_v12  ;;  %v4580_v4 = vsel %vm4579_vm10, %v8800_v39, %v4576_v30  ;;  %v5187_v63 = vmul.f32 %v14225_v26, %v11889_v3  ;;  %v14658_v12 = vld [vmem:[#allocation3 + $0x198] sm:$0xff]  ;;  %v4296_v25 = vpop.f32.mrf.mxu2  ;;  %v5188_v53 = vmul.f32 %v14388_v24, %v11889_v3 }
 0x3ad   : > { %v4585_v15 = vsel %vm14599_vm7, %v4584_v52, %v4580_v4  ;;  %v5091_v39 = vadd.f32 %v5067_v59, %v4995_v16  ;;  %v5235_v50 = vmul.f32 %v14095_v37, %v11904_v28  ;;  %v5092_v52 = vadd.f32 %v5068_v40, %v4996_v29 }
 0x3ae   : > { %v7058_v48 = vpack.c.bf16 %v7035_v0, %v7034_v5  ;;  %v4792_v36 = vmul.f32 %v4585_v15, %v14399_v55  ;;  %v5236_v30 = vmul.f32 %v14336_v58, %v11904_v28  ;;  %v5331_v43 = vmul.f32 %v14252_v27, %v11924_v47 }
 0x3af   : > { %v5211_v55 = vadd.f32 %v5187_v63, %v5091_v39  ;;  %v17320_v42 = vrot.slane %v14658_v12, 7  ;;  %v17321_v24 = vrot.slane %v14660_v31, 7  ;;  %v17995_v37 = vrot.slane %v14346_v7, 7 }
 0x3b0   : > { %8419 = vmatmul.msk.bf16.vlgmr.msrb.gmra.mxu0 %vm290_vm0, %v7058_v48  ;;  %4840 = vst.msk [vmem:[#allocation2 + $0x68] sm:$0xff] %vm290_vm0, %v4792_v36  ;;  %v17996_v32 = vrot.slane %v14338_v41, 7  ;;  %v5212_v5 = vadd.f32 %v5188_v53, %v5092_v52  ;;  %v5332_v0 = vmul.f32 %v14407_v54, %v11924_v47  ;;  %v17998_v59 = vrot.slane %v14453_v46, 7 }
 0x3b1   : > { %v17999_v4 = vrot.slane %v14451_v18, 7  ;;  %v8802_v40 = vpop.eup %8801  ;;  %v5259_v15 = vadd.f32 %v5235_v50, %v5211_v55  ;;  %v5431_v48 = vsel %vm18001_vm1, %v17321_v24, %v17320_v42  ;;  %v17318_v54 = vrot.slane %v14658_v12, 1  ;;  %v14808_v42 = vld [vmem:[#allocation2 + $0x58] sm:$0xff] }
 0x3b2   : > { %v14683_v10 = vsel %vm17997_vm14, %v17996_v32, %v17995_v37  ;;  %v17319_v29 = vrot.slane %v14672_v1, 1  ;;  %v14703_v63 = vadd.f32 1.0, %v8802_v40  ;;  %v5260_v36 = vadd.f32 %v5236_v30, %v5212_v5  ;;  %18021 = vst [vmem:[#allocation31_spill] sm:$0xff] %v14808_v42 }
 0x3b3   : > { %v5452_v61 = vmul.f32 %v14683_v10, %v11946_v20  ;;  %v6329_v16 = vsel %vm18000_vm9, %v17999_v4, %v17998_v59  ;;  %v5500_v18 = vmul.f32 %v14346_v7, %v11949_v51  ;;  %v18002_v39 = vrot.slane %v14336_v58, 1  ;;  %v5691_v58 = vpop.f32.mrf.mxu3  ;;  %vm18026_vm9 = vmmov %vm18001_vm1 }
 0x3b4   : > { %v18003_v53 = vrot.slane %v14346_v7, 1  ;;  %v5355_v52 = vadd.f32 %v5331_v43, %v5259_v15  ;;  %v5453_v55 = vmul.f32 %v5431_v48, %v11946_v20  ;;  %v5567_v30 = vsel %vm18005_vm13, %v17318_v54, %v17319_v29 }
 0x3b5   : > { %v14723_v37 = vadd.f32 %v14155_v56, %v4296_v25  ;;  %8803 = vrcp.f32 %v14703_v63  ;;  %v5501_v32 = vmul.f32 %v14658_v12, %v11949_v51  ;;  %v5356_v5 = vadd.f32 %v5332_v0, %v5260_v36  ;;  %v4298_v25 = vpop.f32.mrf.mxu2 }
 0x3b6   : > { %v14713_v50 = vsel %vm18004_vm11, %v18003_v53, %v18002_v39  ;;  %v5476_v43 = vadd.f32 %v5452_v61, %v5355_v52  ;;  %v5597_v40 = vmul.f32 %v14437_v38, %v5567_v30  ;;  %v14733_v15 = vadd.f32 %v14155_v56, %v5691_v58 }
 0x3b7   : > { %v5596_v59 = vmul.f32 %v14437_v38, %v14713_v50  ;;  %v8353_v4 = vmul.f32 -1.442695, %v14723_v37  ;;  %v6356_v48 = vmul.f32 %v14474_v22, %v6329_v16  ;;  %v5477_v39 = vadd.f32 %v5453_v55, %v5356_v5 }
 0x3b8   : > { %v5524_v53 = vadd.f32 %v5500_v18, %v5476_v43  ;;  %v14737_v54 = vadd.f32 %v14155_v56, %v4298_v25  ;;  %v5891_v0 = vand.u32 2147483647, %v14703_v63  ;;  %v8381_v61 = vmul.f32 -1.442695, %v14733_v15 }
 0x3b9   : > { %8805 = vpow2.f32 %v8353_v4  ;;  %v6381_v36 = vmul.f32 %v14478_v6, %v14453_v46  ;;  %v5525_v52 = vadd.f32 %v5501_v32, %v5477_v39  ;;  %v18006_v29 = vrot.slane %v14424_v23, 1 }
 0x3ba   : > { %v5620_v30 = vadd.f32 %v5596_v59, %v5524_v53  ;;  %v8354_v58 = vmul.f32 -1.442695, %v14737_v54  ;;  %v18007_v16 = vrot.slane %v14453_v46, 1  ;;  %8807 = vpow2.f32 %v8381_v61 }
 0x3bb   : > { %v8804_v56 = vpop.eup %8803  ;;  %v6357_v55 = vmul.f32 %v14535_v17, %v14474_v22  ;;  %v6405_v5 = vadd.f32 %v6381_v36, %v6356_v48  ;;  %v5893_v59 = vand.u32 2147483648, %v14703_v63  ;;  %v5621_v4 = vadd.f32 %v5597_v40, %v5525_v52  ;;  %v5693_v23 = vpop.f32.mrf.mxu3  ;;  %v18012_v36 = vld [vmem:[#allocation19_spill] sm:$0xff] }
 0x3bc   : > { %v6467_v18 = vsel %vm18008_vm15, %v18007_v16, %v18006_v29  ;;  %v5883_v32 = vmul.f32 %v8804_v56, %v14703_v63  ;;  %8809 = vpow2.f32 %v8354_v58  ;;  %v6382_v46 = vmul.f32 %v14482_v60, %v14478_v6 }
 0x3bd   : > { %v6478_v43 = vmul.f32 %v14494_v45, %v6467_v18  ;;  %v6479_v29 = vmul.f32 %v14571_v19, %v14494_v45  ;;  %v18009_v39 = vrot.slane %v14496_v57, 7  ;;  %v18010_v17 = vrot.slane %v14484_v9, 7  ;;  %v4301_v18 = vpop.f32.mrf.mxu2 }
 0x3be   : > { %v5884_v61 = vsub.f32 1.0, %v5883_v32  ;;  %vm5887_vm3 = vweird.f32 %v14703_v63  ;;  %v5634_v40 = vpack.c.bf16 %v5621_v4, %v5620_v30  ;;  %vm5888_vm4 = vweird.f32 %v8804_v56  ;;  %v18013_v32 = vld [vmem:[#allocation38_spill] sm:$0xff] }
 0x3bf   : > { %v6502_v25 = vadd.f32 %v6478_v43, %v6405_v5  ;;  %v14765_v48 = vsel %vm18011_vm2, %v18010_v17, %v18009_v39  ;;  %v8806_v53 = vpop.eup %8805  ;;  %v6406_v19 = vadd.f32 %v6382_v46, %v6357_v55  ;;  %v6600_v16 = vmul.f32 %v14590_v13, %v18012_v36  ;;  %v14795_v18 = vld [vmem:[#allocation2 + $0x48] sm:$0xff]  ;;  %vm5889_vm7 = vmor %vm5887_vm3, %vm5888_vm4 }
 0x3c0   : > { %v6599_v52 = vmul.f32 %v18012_v36, %v14765_v48  ;;  %v14770_v58 = vadd.f32 1.0, %v8806_v53  ;;  %v5885_v5 = vmul.f32 %v8804_v56, %v5884_v61  ;;  %8375 = vmatmul.msk.bf16.gmra.mxu3 %vm290_vm0, %v5634_v40  ;;  %v6648_v23 = vmul.f32 %v18013_v32, %v14496_v57  ;;  %v8808_v55 = vpop.eup %8807  ;;  %v18031_v13 = vld [vmem:[#allocation26_spill] sm:$0xff]  ;;  %vm18036_vm4 = vmmov %vm18016_vm5 }
 0x3c1   : > { %v18014_v30 = vrot.slane %v14482_v60, 1  ;;  %v18015_v4 = vrot.slane %v14496_v57, 1  ;;  %vm14785_vm6 = vcmp.eq.f32.partialorder %v5891_v0, 8.507059e+37  ;;  %v5894_v17 = vor.u32 1.1754944e-38, %v5893_v59 }
 0x3c2   : > { %v6623_v43 = vadd.f32 %v6599_v52, %v6502_v25  ;;  %8811 = vrcp.f32 %v14770_v58  ;;  %v6503_v25 = vadd.f32 %v6479_v29, %v6406_v19  ;;  %v8810_v53 = vpop.eup %8809  ;;  %v5886_v61 = vadd.f32 %v8804_v56, %v5885_v5  ;;  %v18020_v29 = vld [vmem:[#allocation24_spill] sm:$0xff] }
 0x3c3   : > { %v14783_v39 = vsel %vm18016_vm5, %v18015_v4, %v18014_v30  ;;  %v4613_v40 = vand.u32 2147483648, %v14770_v58  ;;  %v14791_v60 = vadd.f32 1.0, %v8808_v55  ;;  %v6649_v52 = vmul.f32 %v14539_v14, %v18013_v32  ;;  %vm18039_vm5 = vmmov %vm18036_vm4 }
 0x3c4   : > { %18017 = vst [vmem:[#allocation39_spill] sm:$0xff] %v14783_v39  ;;  %v14800_v0 = vadd.f32 1.0, %v8810_v53  ;;  %v6624_v59 = vadd.f32 %v6600_v16, %v6503_v25  ;;  %v6745_v19 = vmul.f32 %v18020_v29, %v14783_v39  ;;  %v6746_v5 = vmul.f32 %v14632_v35, %v18020_v29  ;;  %v14831_v35 = vld [vmem:[#allocation2 + $0x50] sm:$0xff] }
 0x3c5   : > { %v5890_v30 = vsel %vm5889_vm7, %v8804_v56, %v5886_v61  ;;  %v4611_v4 = vand.u32 2147483647, %v14770_v58  ;;  %8813 = vrcp.f32 %v14791_v60  ;;  %v6672_v55 = vadd.f32 %v6648_v23, %v6623_v43 }
 0x3c6   : > { %v5895_v63 = vsel %vm14785_vm6, %v5894_v17, %v5890_v30  ;;  %v5908_v53 = vand.u32 2147483648, %v14791_v60  ;;  %8815 = vrcp.f32 %v14800_v0  ;;  %vm4607_vm8 = vweird.f32 %v14770_v58 }
 0x3c7   : > { %v6200_v25 = vmul.f32 %v5895_v63, %v14620_v49  ;;  %v4614_v56 = vor.u32 1.1754944e-38, %v4613_v40  ;;  %v5906_v61 = vand.u32 2147483647, %v14791_v60  ;;  %v4628_v43 = vand.u32 2147483648, %v14800_v0  ;;  %v5696_v49 = vpop.f32.mrf.mxu3 }
 0x3c8   : > { %v8812_v23 = vpop.eup %8811  ;;  %v14819_v24 = vor.u32 1.1754944e-38, %v5908_v53  ;;  %v4626_v46 = vand.u32 2147483647, %v14800_v0  ;;  %v6673_v17 = vadd.f32 %v6649_v52, %v6624_v59  ;;  %v17327_v30 = vrot.slane %v14808_v42, 7 }
 0x3c9   : > { %6248 = vst.msk [vmem:[#allocation2 + $0xf0] sm:$0xff] %vm290_vm0, %v6200_v25  ;;  %v4603_v16 = vmul.f32 %v8812_v23, %v14770_v58  ;;  %vm4608_vm12 = vweird.f32 %v8812_v23  ;;  %vm14825_vm10 = vcmp.eq.f32.partialorder %v4611_v4, 8.507059e+37  ;;  %v14829_v40 = vor.u32 1.1754944e-38, %v4628_v43 }
 0x3ca   : > { %v6769_v63 = vadd.f32 %v6745_v19, %v6672_v55  ;;  %vm5902_vm14 = vweird.f32 %v14791_v60  ;;  %v6770_v53 = vadd.f32 %v6746_v5, %v6673_v17  ;;  %v18024_v52 = vrot.slane %v14549_v8, 7  ;;  %v18030_v55 = vld [vmem:[#allocation33_spill] sm:$0xff]  ;;  %vm4609_vm6 = vmor %vm4607_vm8, %vm4608_vm12 }
 0x3cb   : > { %v18025_v59 = vrot.slane %v14547_v11, 7  ;;  %v18028_v4 = vrot.slane %v14795_v18, 7  ;;  %v6915_v43 = vmul.f32 %v18030_v55, %v14549_v8  ;;  %v8814_v5 = vpop.eup %8813  ;;  %v4604_v17 = vsub.f32 1.0, %v4603_v16  ;;  %vm18046_vm12 = vmmov %vm18001_vm1 }
 0x3cc   : > { %vm4622_vm11 = vweird.f32 %v14800_v0  ;;  %v8816_v29 = vpop.eup %8815  ;;  %vm5903_vm13 = vweird.f32 %v8814_v5  ;;  %vm14860_vm15 = vcmp.eq.f32.partialorder %v5906_v61, 8.507059e+37  ;;  %v17341_v16 = vrot.slane %v14795_v18, 1 }
 0x3cd   : > { %v14840_v25 = vsel %vm18026_vm9, %v18025_v59, %v18024_v52  ;;  %v14848_v19 = vsel %vm18001_vm1, %v17327_v30, %v18028_v4  ;;  %v6916_v59 = vmul.f32 %v18030_v55, %v14795_v18  ;;  %v5898_v4 = vmul.f32 %v8814_v5, %v14791_v60  ;;  %vm5904_vm7 = vmor %vm5902_vm14, %vm5903_vm13 }
 0x3ce   : > { %18027 = vst [vmem:[#allocation37_spill] sm:$0xff] %v14840_v25  ;;  %v6866_v21 = vmul.f32 %v18031_v13, %v14840_v25  ;;  %v6867_v52 = vmul.f32 %v18031_v13, %v14848_v19  ;;  %v17342_v42 = vrot.slane %v14831_v35, 1  ;;  %v4605_v11 = vmul.f32 %v8812_v23, %v4604_v17  ;;  %vm18050_vm14 = vmmov %vm18036_vm4 }
 0x3cf   : > { %18029 = vst [vmem:[#allocation21_spill] sm:$0xff] %v14848_v19  ;;  %v4618_v32 = vmul.f32 %v8816_v29, %v14800_v0  ;;  %vm4623_vm2 = vweird.f32 %v8816_v29  ;;  %vm14867_vm3 = vcmp.eq.f32.partialorder %v4626_v46, 8.507059e+37  ;;  %v5899_v13 = vsub.f32 1.0, %v5898_v4  ;;  %vm18052_vm9 = vmmov %vm18036_vm4 }
 0x3d0   : > { %v6890_v55 = vadd.f32 %v6866_v21, %v6769_v63  ;;  %v6891_v25 = vadd.f32 %v6867_v52, %v6770_v53  ;;  %v14877_v61 = vsel %vm18036_vm4, %v17341_v16, %v17342_v42  ;;  %v18037_v17 = vrot.slane %v14539_v14, 1  ;;  %v18041_v42 = vld [vmem:[#allocation22_spill] sm:$0xff]  ;;  %vm4624_vm8 = vmor %vm4622_vm11, %vm4623_vm2 }
 0x3d1   : > { %v18038_v36 = vrot.slane %v14549_v8, 1  ;;  %v4606_v39 = vadd.f32 %v8812_v23, %v4605_v11  ;;  %v4619_v21 = vsub.f32 1.0, %v4618_v32  ;;  %v5900_v52 = vmul.f32 %v8814_v5, %v5899_v13  ;;  %vm18064_vm11 = vmmov %vm18001_vm1 }
 0x3d2   : > { %v6939_v63 = vadd.f32 %v6915_v43, %v6890_v55  ;;  %v6940_v4 = vadd.f32 %v6916_v59, %v6891_v25  ;;  %v7013_v16 = vmul.f32 %v14617_v33, %v14877_v61  ;;  %v4949_v14 = vmul.f32 %v18041_v42, %v17676_v44 }
 0x3d3   : > { %v14885_v46 = vsel %vm18039_vm5, %v18038_v36, %v18037_v17  ;;  %v4610_v36 = vsel %vm4609_vm6, %v8812_v23, %v4606_v39  ;;  %v4620_v17 = vmul.f32 %v8816_v29, %v4619_v21  ;;  %v4950_v32 = vmul.f32 %v14225_v26, %v17676_v44  ;;  %v8903_v39 = vld [vmem:[#allocation3 + $0x178] sm:$0xff]  ;;  %v18042_v44 = vld [vmem:[#allocation35_spill] sm:$0xff]  ;;  %v18043_v21 = vld [vmem:[#allocation20_spill] sm:$0xff] }
 0x3d4   : > { %18040 = vst [vmem:[#allocation29_spill] sm:$0xff] %v14885_v46  ;;  %v7012_v53 = vmul.f32 %v14617_v33, %v14885_v46  ;;  %v4615_v55 = vsel %vm14825_vm10, %v4614_v56, %v4610_v36  ;;  %v5901_v43 = vadd.f32 %v8814_v5, %v5900_v52  ;;  %v7037_v58 = vadd.f32 %v7013_v16, %v6940_v4  ;;  %v8902_v46 = vld [vmem:[#allocation3 + $0x170] sm:$0xff]  ;;  %vm18048_vm10 = vmmov %vm18001_vm1 }
 0x3d5   : > { %v4973_v13 = vmul.f32 %v8902_v46, %v17678_v34  ;;  %v4794_v25 = vmul.f32 %v4615_v55, %v14723_v37  ;;  %v4621_v42 = vadd.f32 %v8816_v29, %v4620_v17  ;;  %v4974_v23 = vmul.f32 %v8903_v39, %v17678_v34  ;;  %v14954_v36 = vld [vmem:[%s17024_s3 + $0x1] ss:$0 sm:$0xff]  ;;  %v4303_v17 = vpop.f32.mrf.mxu2 }
 0x3d6   : > { %v7036_v11 = vadd.f32 %v7012_v53, %v6939_v63  ;;  %v5069_v26 = vmul.f32 %v18042_v44, %v11833_v62  ;;  %v5905_v56 = vsel %vm5904_vm7, %v8814_v5, %v5901_v43  ;;  %v5070_v37 = vmul.f32 %v14252_v27, %v11833_v62 }
 0x3d7   : > { %v4997_v16 = vadd.f32 %v4973_v13, %v4949_v14  ;;  %4842 = vst.msk [vmem:[#allocation2 + $0x78] sm:$0xff] %vm290_vm0, %v4794_v25  ;;  %v5910_v34 = vsel %vm14860_vm15, %v14819_v24, %v5905_v56  ;;  %v4625_v60 = vsel %vm4624_vm8, %v8816_v29, %v4621_v42  ;;  %v4998_v46 = vadd.f32 %v4974_v23, %v4950_v32 }
 0x3d8   : > { %v7059_v59 = vpack.c.bf16 %v7037_v58, %v7036_v11  ;;  %v5189_v5 = vmul.f32 %v18043_v21, %v11889_v3  ;;  %v6201_v63 = vmul.f32 %v5910_v34, %v14733_v15  ;;  %v4630_v14 = vsel %vm14867_vm3, %v14829_v40, %v4625_v60  ;;  %v18044_v40 = vld [vmem:[#allocation14_spill] sm:$0xff]  ;;  %vm18073_vm3 = vmmov %vm18036_vm4 }
 0x3d9   : > { %v5093_v62 = vadd.f32 %v5069_v26, %v4997_v16  ;;  %v5190_v27 = vmul.f32 %v14683_v10, %v11889_v3  ;;  %v4795_v0 = vmul.f32 %v4630_v14, %v14737_v54  ;;  %v5094_v24 = vadd.f32 %v5070_v37, %v4998_v46  ;;  %v18053_v26 = vld [vmem:[#allocation32_spill] sm:$0xff]  ;;  %v18054_v21 = vld [vmem:[#allocation34_spill] sm:$0xff]  ;;  %vm18075_vm4 = vmmov %vm18073_vm3 }
 0x3da   : > { %8420 = vmatmul.msk.bf16.gmra.mxu0 %vm290_vm0, %v7059_v59  ;;  %v5237_v29 = vmul.f32 %v14338_v41, %v11904_v28  ;;  %v5238_v30 = vmul.f32 %v14346_v7, %v11904_v28  ;;  %6249 = vst.msk [vmem:[#allocation2 + $0xf8] sm:$0xff] %vm290_vm0, %v6201_v63  ;;  %v5333_v19 = vmul.f32 %v18044_v40, %v11924_v47  ;;  %v5399_v3 = vrot.slane %v14672_v1, 7  ;;  %v18055_v63 = vld [vmem:[#allocation39_spill] sm:$0xff] }
 0x3db   : > { %v5213_v15 = vadd.f32 %v5189_v5, %v5093_v62  ;;  %v5334_v53 = vmul.f32 %v14713_v50, %v11924_v47  ;;  %4843 = vst.msk [vmem:[#allocation2 + $0x80] sm:$0xff] %vm290_vm0, %v4795_v0  ;;  %v5214_v10 = vadd.f32 %v5190_v27, %v5094_v24  ;;  %v5502_v41 = vmul.f32 %v14672_v1, %v11949_v51  ;;  %v18056_v24 = vld [vmem:[#allocation19_spill] sm:$0xff] }
 0x3dc   : > { %v5503_v28 = vmul.f32 %v14660_v31, %v11949_v51  ;;  %v5551_v7 = vrot.slane %v14660_v31, 1  ;;  %v18045_v52 = vrot.slane %v14660_v31, 7  ;;  %v18047_v47 = vrot.slane %v14658_v12, 7 }
 0x3dd   : > { %v5261_v54 = vadd.f32 %v5237_v29, %v5213_v15  ;;  %v14957_v51 = vadd.f32 %v14954_v36, %v5696_v49  ;;  %v5262_v11 = vadd.f32 %v5238_v30, %v5214_v10  ;;  %v18049_v55 = vrot.slane %v14672_v1, 1  ;;  %v5698_v1 = vpop.f32.mrf.mxu3  ;;  %v4306_v15 = vpop.f32.mrf.mxu2  ;;  %v18059_v10 = vld [vmem:[#allocation38_spill] sm:$0xff] }
 0x3de   : > { %v5415_v4 = vsel %vm18046_vm12, %v5399_v3, %v18045_v52  ;;  %v5423_v50 = vsel %vm18048_vm10, %v18047_v47, %v5399_v3  ;;  %v18051_v13 = vrot.slane %v14658_v12, 1  ;;  %v6358_v49 = vmul.f32 %v18053_v26, %v14474_v22  ;;  %v18065_v26 = vld [vmem:[#allocation24_spill] sm:$0xff] }
 0x3df   : > { %v5454_v31 = vmul.f32 %v5423_v50, %v11946_v20  ;;  %v5455_v32 = vmul.f32 %v5415_v4, %v11946_v20  ;;  %v5559_v43 = vsel %vm18050_vm14, %v18049_v55, %v5551_v7  ;;  %v5357_v58 = vadd.f32 %v5333_v19, %v5261_v54  ;;  %v18060_v50 = vld [vmem:[#allocation13_spill] sm:$0xff] }
 0x3e0   : > { %v5575_v25 = vsel %vm18052_vm9, %v5551_v7, %v18051_v13  ;;  %v5598_v42 = vmul.f32 %v14437_v38, %v5559_v43  ;;  %v8383_v39 = vmul.f32 -1.442695, %v14957_v51  ;;  %v5358_v23 = vadd.f32 %v5334_v53, %v5262_v11 }
 0x3e1   : > { %v5599_v44 = vmul.f32 %v14437_v38, %v5575_v25  ;;  %v14973_v20 = vadd.f32 %v14954_v36, %v4303_v17  ;;  %v5478_v56 = vadd.f32 %v5454_v31, %v5357_v58  ;;  %v14978_v12 = vadd.f32 %v14954_v36, %v5698_v1  ;;  %v18061_v31 = vld [vmem:[#allocation31_spill] sm:$0xff] }
 0x3e2   : > { %8817 = vpow2.f32 %v8383_v39  ;;  %v6359_v59 = vmul.f32 %v14765_v48, %v14474_v22  ;;  %v5479_v16 = vadd.f32 %v5455_v32, %v5358_v23  ;;  %v6383_v38 = vmul.f32 %v14484_v9, %v14478_v6  ;;  %v18057_v9 = vld [vmem:[#allocation25_spill] sm:$0xff] }
 0x3e3   : > { %v8356_v37 = vmul.f32 -1.442695, %v14973_v20  ;;  %v6384_v34 = vmul.f32 %v14496_v57, %v14478_v6  ;;  %v5526_v60 = vadd.f32 %v5502_v41, %v5478_v56  ;;  %v8384_v46 = vmul.f32 -1.442695, %v14978_v12  ;;  %v18058_v57 = vld [vmem:[#allocation37_spill] sm:$0xff] }
 0x3e4   : > { %v6480_v5 = vmul.f32 %v18054_v21, %v14494_v45  ;;  %v6481_v14 = vmul.f32 %v18055_v63, %v14494_v45  ;;  %v5527_v62 = vadd.f32 %v5503_v28, %v5479_v16  ;;  %v6407_v48 = vadd.f32 %v6383_v38, %v6358_v49  ;;  %v18066_v49 = vld [vmem:[#allocation17_spill] sm:$0xff]  ;;  %v18068_v38 = vld [vmem:[#allocation26_spill] sm:$0xff] }
 0x3e5   : > { %8819 = vpow2.f32 %v8356_v37  ;;  %v6408_v27 = vadd.f32 %v6384_v34, %v6359_v59  ;;  %v5622_v0 = vadd.f32 %v5598_v42, %v5526_v60  ;;  %v6601_v29 = vmul.f32 %v18057_v9, %v18056_v24  ;;  %v5701_v47 = vpop.f32.mrf.mxu3  ;;  %v18067_v59 = vld [vmem:[#allocation29_spill] sm:$0xff] }
 0x3e6   : > { %8821 = vpow2.f32 %v8384_v46  ;;  %v6602_v30 = vmul.f32 %v18058_v57, %v18056_v24  ;;  %v5623_v40 = vadd.f32 %v5599_v44, %v5527_v62  ;;  %v6504_v19 = vadd.f32 %v6480_v5, %v6407_v48  ;;  %v4308_v46 = vpop.f32.mrf.mxu2  ;;  %v18069_v5 = vld [vmem:[#allocation33_spill] sm:$0xff] }
 0x3e7   : > { %v6505_v53 = vadd.f32 %v6481_v14, %v6408_v27  ;;  %v6651_v41 = vmul.f32 %v14549_v8, %v18059_v10  ;;  %v6824_v28 = vrot.slane %v14831_v35, 7  ;;  %v6650_v17 = vmul.f32 %v18060_v50, %v18059_v10 }
 0x3e8   : > { %v8818_v3 = vpop.eup %8817  ;;  %v5635_v7 = vpack.c.bf16 %v5623_v40, %v5622_v0  ;;  %v6625_v52 = vadd.f32 %v6601_v29, %v6504_v19  ;;  %v18062_v32 = vrot.slane %v18061_v31, 7  ;;  %v18063_v43 = vrot.slane %v14795_v18, 7 }
 0x3e9   : > { %v14999_v54 = vadd.f32 1.0, %v8818_v3  ;;  %v6626_v4 = vadd.f32 %v6602_v30, %v6505_v53  ;;  %v6747_v56 = vmul.f32 %v18066_v49, %v18065_v26  ;;  %v6748_v16 = vmul.f32 %v18067_v59, %v18065_v26 }
 0x3ea   : > { %8376 = vmatmul.msk.bf16.gmra.mxu3 %vm290_vm0, %v5635_v7  ;;  %v15009_v55 = vsel %vm18001_vm1, %v6824_v28, %v18062_v32  ;;  %v15015_v58 = vsel %vm18064_vm11, %v18063_v43, %v6824_v28  ;;  %v6674_v39 = vadd.f32 %v6650_v17, %v6625_v52  ;;  %v6917_v63 = vmul.f32 %v18069_v5, %v14831_v35  ;;  %v18083_v28 = vld [vmem:[#allocation21_spill] sm:$0xff] }
 0x3eb   : > { %v8820_v11 = vpop.eup %8819  ;;  %8823 = vrcp.f32 %v14999_v54  ;;  %v5938_v25 = vand.u32 2147483648, %v14999_v54  ;;  %v6675_v23 = vadd.f32 %v6651_v41, %v6626_v4  ;;  %v5936_v44 = vand.u32 2147483647, %v14999_v54 }
 0x3ec   : > { %v8822_v13 = vpop.eup %8821  ;;  %v15018_v42 = vadd.f32 1.0, %v8820_v11  ;;  %v6868_v34 = vmul.f32 %v18068_v38, %v15015_v58  ;;  %v6869_v60 = vmul.f32 %v18068_v38, %v15009_v55  ;;  %v6918_v14 = vmul.f32 %v18069_v5, %v18061_v31 }
 0x3ed   : > { %v15021_v1 = vadd.f32 1.0, %v8822_v13  ;;  %vm5932_vm13 = vweird.f32 %v14999_v54  ;;  %v5939_v62 = vor.u32 1.1754944e-38, %v5938_v25  ;;  %v6771_v27 = vadd.f32 %v6747_v56, %v6674_v39  ;;  %v5703_v3 = vpop.f32.mrf.mxu3 }
 0x3ee   : > { %8825 = vrcp.f32 %v15018_v42  ;;  %v4658_v37 = vand.u32 2147483648, %v15018_v42  ;;  %v4656_v48 = vand.u32 2147483647, %v15018_v42  ;;  %v6772_v0 = vadd.f32 %v6748_v16, %v6675_v23 }
 0x3ef   : > { %8827 = vrcp.f32 %v15021_v1  ;;  %v5953_v21 = vand.u32 2147483648, %v15021_v1  ;;  %v5951_v40 = vand.u32 2147483647, %v15021_v1  ;;  %v6978_v19 = vrot.slane %v18061_v31, 1 }
 0x3f0   : > { %v15041_v30 = vor.u32 1.1754944e-38, %v4658_v37  ;;  %v15046_v53 = vadd.f32 %v14954_v36, %v4306_v15  ;;  %vm15049_vm15 = vcmp.eq.f32.partialorder %v5936_v44, 8.507059e+37  ;;  %v6892_v52 = vadd.f32 %v6868_v34, %v6771_v27 }
 0x3f1   : > { %v8824_v29 = vpop.eup %8823  ;;  %v15053_v7 = vor.u32 1.1754944e-38, %v5953_v21  ;;  %v6893_v4 = vadd.f32 %v6869_v60, %v6772_v0  ;;  %vm4652_vm2 = vweird.f32 %v15018_v42  ;;  %v18072_v47 = vrot.slane %v14831_v35, 1  ;;  %v18080_v0 = vld [vmem:[#allocation23_spill] sm:$0xff]  ;;  %v15137_v21 = vld [vmem:[#allocation2 + $0x60] sm:$0xff] }
 0x3f2   : > { %v5928_v41 = vmul.f32 %v8824_v29, %v14999_v54  ;;  %v18074_v15 = vrot.slane %v14795_v18, 1  ;;  %v8357_v32 = vmul.f32 -1.442695, %v15046_v53  ;;  %v15070_v43 = vadd.f32 %v14954_v36, %v5703_v3 }
 0x3f3   : > { %v15060_v17 = vsel %vm18073_vm3, %v18072_v47, %v6978_v19  ;;  %vm5947_vm5 = vweird.f32 %v15021_v1  ;;  %v6941_v39 = vadd.f32 %v6917_v63, %v6892_v52  ;;  %v6942_v23 = vadd.f32 %v6918_v14, %v6893_v4  ;;  %v18081_v4 = vld [vmem:[#allocation18_spill] sm:$0xff] }
 0x3f4   : > { %v15066_v11 = vsel %vm18075_vm4, %v6978_v19, %v18074_v15  ;;  %v8826_v13 = vpop.eup %8825  ;;  %v5929_v25 = vsub.f32 1.0, %v5928_v41  ;;  %v7014_v44 = vmul.f32 %v14617_v33, %v15060_v17  ;;  %vm5933_vm6 = vweird.f32 %v8824_v29 }
 0x3f5   : > { %v8828_v56 = vpop.eup %8827  ;;  %v4648_v16 = vmul.f32 %v8826_v13, %v15018_v42  ;;  %vm15076_vm7 = vcmp.eq.f32.partialorder %v4656_v48, 8.507059e+37  ;;  %v7015_v34 = vmul.f32 %v14617_v33, %v15066_v11  ;;  %8829 = vpow2.f32 %v8357_v32  ;;  %vm5934_vm10 = vmor %vm5932_vm13, %vm5933_vm6 }
 0x3f6   : > { %v5930_v60 = vmul.f32 %v8824_v29, %v5929_v25  ;;  %vm4653_vm8 = vweird.f32 %v8826_v13  ;;  %v5943_v46 = vmul.f32 %v8828_v56, %v15021_v1  ;;  %vm15083_vm12 = vcmp.eq.f32.partialorder %v5951_v40, 8.507059e+37 }
 0x3f7   : > { %v7038_v63 = vadd.f32 %v7014_v44, %v6941_v39  ;;  %v4649_v14 = vsub.f32 1.0, %v4648_v16  ;;  %v7039_v27 = vadd.f32 %v7015_v34, %v6942_v23  ;;  %v8386_v48 = vmul.f32 -1.442695, %v15070_v43  ;;  %v18082_v23 = vld [vmem:[#allocation40_spill] sm:$0xff]  ;;  %vm4654_vm9 = vmor %vm4652_vm2, %vm4653_vm8 }
 0x3f8   : > { %v6360_v19 = vmul.f32 %v18080_v0, %v14474_v22  ;;  %v5931_v3 = vadd.f32 %v8824_v29, %v5930_v60  ;;  %v5944_v41 = vsub.f32 1.0, %v5943_v46  ;;  %v6361_v52 = vmul.f32 %v18057_v9, %v14474_v22 }
 0x3f9   : > { %v6385_v47 = vmul.f32 %v18081_v4, %v14478_v6  ;;  %v4650_v40 = vmul.f32 %v8826_v13, %v4649_v14  ;;  %v7060_v15 = vpack.c.bf16 %v7039_v27, %v7038_v63  ;;  %8831 = vpow2.f32 %v8386_v48 }
 0x3fa   : > { %v6386_v32 = vmul.f32 %v18060_v50, %v14478_v6  ;;  %v5935_v25 = vsel %vm5934_vm10, %v8824_v29, %v5931_v3  ;;  %v5945_v39 = vmul.f32 %v8828_v56, %v5944_v41  ;;  %vm5948_vm14 = vweird.f32 %v8828_v56 }
 0x3fb   : > { %v6482_v44 = vmul.f32 %v18082_v23, %v14494_v45  ;;  %v8830_v9 = vpop.eup %8829  ;;  %v5940_v16 = vsel %vm15049_vm15, %v5939_v62, %v5935_v25  ;;  %v4651_v34 = vadd.f32 %v8826_v13, %v4650_v40  ;;  %8421 = vmatmul.msk.bf16.gmra.mxu0 %vm290_vm0, %v7060_v15  ;;  %v6409_v54 = vadd.f32 %v6385_v47, %v6360_v19  ;;  %vm5949_vm1 = vmor %vm5947_vm5, %vm5948_vm14  ;;  %v4311_v47 = vpop.f32.mrf.mxu2 }
 0x3fc   : > { %v6410_v60 = vadd.f32 %v6386_v32, %v6361_v52  ;;  %v6203_v46 = vmul.f32 %v5940_v16, %v14957_v51  ;;  %v5946_v50 = vadd.f32 %v8828_v56, %v5945_v39  ;;  %v15108_v29 = vadd.f32 1.0, %v8830_v9  ;;  %v15149_v39 = vld [vmem:[#allocation2 + $0x70] sm:$0xff] }
 0x3fd   : > { %v6483_v63 = vmul.f32 %v18066_v49, %v14494_v45  ;;  %v4655_v14 = vsel %vm4654_vm9, %v8826_v13, %v4651_v34  ;;  %v6506_v62 = vadd.f32 %v6482_v44, %v6409_v54  ;;  %v6603_v27 = vmul.f32 %v18083_v28, %v18056_v24 }
 0x3fe   : > { %v6604_v51 = vmul.f32 %v15015_v58, %v18056_v24  ;;  %6251 = vst.msk [vmem:[#allocation2 + $0x108] sm:$0xff] %vm290_vm0, %v6203_v46  ;;  %v4660_v42 = vsel %vm15076_vm7, %v15041_v30, %v4655_v14  ;;  %v5950_v48 = vsel %vm5949_vm1, %v8828_v56, %v5946_v50  ;;  %8833 = vrcp.f32 %v15108_v29 }
 0x3ff   : > { %v6507_v49 = vadd.f32 %v6483_v63, %v6410_v60  ;;  %v8832_v13 = vpop.eup %8831  ;;  %v4797_v1 = vmul.f32 %v4660_v42, %v14973_v20  ;;  %v5955_v0 = vsel %vm15083_vm12, %v15053_v7, %v5950_v48  ;;  %v4673_v19 = vand.u32 2147483648, %v15108_v29  ;;  %v15139_v7 = vld [vmem:[#allocation2 + $0x68] sm:$0xff] }
 0x400   : > { %v6204_v3 = vmul.f32 %v5955_v0, %v14978_v12  ;;  %v15129_v41 = vadd.f32 1.0, %v8832_v13  ;;  %v6627_v52 = vadd.f32 %v6603_v27, %v6506_v62  ;;  %v4671_v30 = vand.u32 2147483647, %v15108_v29 }
 0x401   : > { %v6628_v37 = vadd.f32 %v6604_v51, %v6507_v49  ;;  %4845 = vst.msk [vmem:[#allocation2 + $0x90] sm:$0xff] %vm290_vm0, %v4797_v1  ;;  %v6652_v56 = vmul.f32 %v14795_v18, %v18059_v10  ;;  %v6653_v20 = vmul.f32 %v14831_v35, %v18059_v10  ;;  %v4674_v12 = vor.u32 1.1754944e-38, %v4673_v19 }
 0x402   : > { %6252 = vst.msk [vmem:[#allocation2 + $0x110] sm:$0xff] %vm290_vm0, %v6204_v3  ;;  %8835 = vrcp.f32 %v15129_v41  ;;  %v5983_v4 = vand.u32 2147483648, %v15129_v41  ;;  %vm4667_vm11 = vweird.f32 %v15108_v29  ;;  %v6749_v32 = vmul.f32 %v14877_v61, %v18065_v26  ;;  %v5706_v3 = vpop.f32.mrf.mxu3 }
 0x403   : > { %v6676_v40 = vadd.f32 %v6652_v56, %v6627_v52  ;;  %v6677_v15 = vadd.f32 %v6653_v20, %v6628_v37  ;;  %v6750_v25 = vmul.f32 %v15060_v17, %v18065_v26  ;;  %v5981_v44 = vand.u32 2147483647, %v15129_v41 }
 0x404   : > { %v8834_v23 = vpop.eup %8833  ;;  %v15152_v9 = vor.u32 1.1754944e-38, %v5983_v4  ;;  %v6817_v16 = vrot.slane %v15137_v21, 7  ;;  %v6825_v34 = vrot.slane %v15139_v7, 7  ;;  %vm15157_vm15 = vcmp.eq.f32.partialorder %v4671_v30, 8.507059e+37 }
 0x405   : > { %v4663_v54 = vmul.f32 %v8834_v23, %v15108_v29  ;;  %vm4668_vm13 = vweird.f32 %v8834_v23  ;;  %v6773_v46 = vadd.f32 %v6749_v32, %v6676_v40  ;;  %v6774_v50 = vadd.f32 %v6750_v25, %v6677_v15 }
 0x406   : > { %v6833_v63 = vrot.slane %v15149_v39, 7  ;;  %vm18086_vm2 = vcmp.lt.s32.totalorder %v9204_v2, 1  ;;  %v6919_v62 = vmul.f32 %v18069_v5, %v15137_v21  ;;  %v6920_v27 = vmul.f32 %v18069_v5, %v15139_v7  ;;  %vm4669_vm12 = vmor %vm4667_vm11, %vm4668_vm13 }
 0x407   : > { %v15166_v14 = vsel %vm18086_vm2, %v6817_v16, %v6825_v34  ;;  %v4664_v51 = vsub.f32 1.0, %v4663_v54  ;;  %vm5977_vm3 = vweird.f32 %v15129_v41  ;;  %v6963_v48 = vrot.slane %v15137_v21, 1  ;;  %vm18087_vm4 = vmmov %vm18086_vm2 }
 0x408   : > { %v6871_v42 = vmul.f32 %v18068_v38, %v15166_v14  ;;  %v6971_v49 = vrot.slane %v15139_v7, 1  ;;  %v8836_v13 = vpop.eup %8835  ;;  %v15181_v1 = vsel %vm18087_vm4, %v6833_v63, %v6817_v16  ;;  %v6979_v0 = vrot.slane %v15149_v39, 1  ;;  %vm18092_vm9 = vmmov %vm18086_vm2 }
 0x409   : > { %v15185_v19 = vadd.f32 %v14954_v36, %v4311_v47  ;;  %v6362_v52 = vmul.f32 %v18058_v57, %v14474_v22  ;;  %v4665_v37 = vmul.f32 %v8834_v23, %v4664_v51  ;;  %v5973_v30 = vmul.f32 %v8836_v13, %v15129_v41  ;;  %v4313_v51 = vpop.f32.mrf.mxu2  ;;  %vm18095_vm13 = vmmov %vm18086_vm2 }
 0x40a   : > { %vm5978_vm5 = vweird.f32 %v8836_v13  ;;  %vm15190_vm6 = vcmp.eq.f32.partialorder %v5981_v44, 8.507059e+37  ;;  %v6870_v20 = vmul.f32 %v18068_v38, %v15181_v1  ;;  %v6895_v4 = vadd.f32 %v6871_v42, %v6774_v50 }
 0x40b   : > { %vm18090_vm7 = vcmp.lt.s32.totalorder %v9204_v2, 7  ;;  %v8359_v40 = vmul.f32 -1.442695, %v15185_v19  ;;  %v4666_v15 = vadd.f32 %v8834_v23, %v4665_v37  ;;  %v5974_v32 = vsub.f32 1.0, %v5973_v30  ;;  %vm5979_vm10 = vmor %vm5977_vm3, %vm5978_vm5 }
 0x40c   : > { %v15200_v47 = vsel %vm18090_vm7, %v6971_v49, %v6979_v0  ;;  %vm18091_vm8 = vmmov %vm18090_vm7  ;;  %v6894_v25 = vadd.f32 %v6870_v20, %v6773_v46  ;;  %v6944_v16 = vadd.f32 %v6920_v27, %v6895_v4  ;;  %v15217_v50 = vadd.f32 %v14954_v36, %v5706_v3 }
 0x40d   : > { %v15206_v57 = vsel %vm18091_vm8, %v6963_v48, %v6971_v49  ;;  %v7017_v54 = vmul.f32 %v14617_v33, %v15200_v47  ;;  %8837 = vpow2.f32 %v8359_v40  ;;  %v4670_v42 = vsel %vm4669_vm12, %v8834_v23, %v4666_v15  ;;  %vm18097_vm3 = vmmov %vm18090_vm7 }
 0x40e   : > { %v7016_v44 = vmul.f32 %v14617_v33, %v15206_v57  ;;  %v5975_v49 = vmul.f32 %v8836_v13, %v5974_v32  ;;  %v6943_v37 = vadd.f32 %v6919_v62, %v6894_v25  ;;  %v15220_v46 = vadd.f32 %v14954_v36, %v4313_v51  ;;  %v5708_v62 = vpop.f32.mrf.mxu3  ;;  %vm18102_vm8 = vmmov %vm18097_vm3 }
 0x40f   : > { %v4675_v30 = vsel %vm15157_vm15, %v4674_v12, %v4670_v42  ;;  %v7041_v29 = vadd.f32 %v7017_v54, %v6944_v16  ;;  %v8387_v27 = vmul.f32 -1.442695, %v15217_v50  ;;  %v6363_v33 = vmul.f32 %v18083_v28, %v14474_v22 }
 0x410   : > { %v4798_v20 = vmul.f32 %v4675_v30, %v15046_v53  ;;  %v5976_v3 = vadd.f32 %v8836_v13, %v5975_v49  ;;  %v7040_v4 = vadd.f32 %v7016_v44, %v6943_v37  ;;  %v8360_v23 = vmul.f32 -1.442695, %v15220_v46  ;;  %v15259_v49 = vld [vmem:[#allocation2 + $0x88] sm:$0xff] }
 0x411   : > { %8839 = vpow2.f32 %v8387_v27  ;;  %v6387_v12 = vmul.f32 %v14549_v8, %v14478_v6  ;;  %v6388_v60 = vmul.f32 %v14795_v18, %v14478_v6  ;;  %v6484_v28 = vmul.f32 %v18067_v59, %v14494_v45 }
 0x412   : > { %4846 = vst.msk [vmem:[#allocation2 + $0x98] sm:$0xff] %vm290_vm0, %v4798_v20  ;;  %v5980_v53 = vsel %vm5979_vm10, %v8836_v13, %v5976_v3  ;;  %v7061_v40 = vpack.c.bf16 %v7041_v29, %v7040_v4  ;;  %8841 = vpow2.f32 %v8360_v23  ;;  %v6485_v41 = vmul.f32 %v14877_v61, %v14494_v45 }
 0x413   : > { %v8838_v15 = vpop.eup %8837  ;;  %v5985_v32 = vsel %vm15190_vm6, %v15152_v9, %v5980_v53  ;;  %v6411_v8 = vadd.f32 %v6387_v12, %v6362_v52  ;;  %v6412_v25 = vadd.f32 %v6388_v60, %v6363_v33  ;;  %v6605_v18 = vmul.f32 %v15009_v55, %v18056_v24  ;;  %v4316_v9 = vpop.f32.mrf.mxu2 }
 0x414   : > { %v6206_v59 = vmul.f32 %v5985_v32, %v15070_v43  ;;  %8422 = vmatmul.msk.bf16.gmra.mxu0 %vm290_vm0, %v7061_v40  ;;  %v15248_v13 = vadd.f32 1.0, %v8838_v15  ;;  %v6606_v44 = vmul.f32 %v15181_v1, %v18056_v24  ;;  %v6654_v56 = vmul.f32 %v18061_v31, %v18059_v10  ;;  %v15257_v43 = vld [vmem:[#allocation2 + $0x78] sm:$0xff] }
 0x415   : > { %v6508_v61 = vadd.f32 %v6484_v28, %v6411_v8  ;;  %v6509_v16 = vadd.f32 %v6485_v41, %v6412_v25  ;;  %v6655_v27 = vmul.f32 %v15137_v21, %v18059_v10  ;;  %v6751_v33 = vmul.f32 %v15066_v11, %v18065_v26 }
 0x416   : > { %6254 = vst.msk [vmem:[#allocation2 + $0x120] sm:$0xff] %vm290_vm0, %v6206_v59  ;;  %8843 = vrcp.f32 %v15248_v13  ;;  %v4703_v52 = vand.u32 2147483648, %v15248_v13  ;;  %v4701_v30 = vand.u32 2147483647, %v15248_v13  ;;  %v6752_v4 = vmul.f32 %v15206_v57, %v18065_v26  ;;  %v5711_v41 = vpop.f32.mrf.mxu3  ;;  %v15293_v59 = vld [vmem:[#allocation2 + $0x80] sm:$0xff] }
 0x417   : > { %v8840_v54 = vpop.eup %8839  ;;  %v6629_v51 = vadd.f32 %v6605_v18, %v6508_v61  ;;  %v6630_v42 = vadd.f32 %v6606_v44, %v6509_v16  ;;  %v17348_v23 = vrot.slane %v15257_v43, 7  ;;  %v17349_v60 = vrot.slane %v15259_v49, 7 }
 0x418   : > { %v8842_v37 = vpop.eup %8841  ;;  %v15262_v29 = vadd.f32 1.0, %v8840_v54  ;;  %v15273_v62 = vor.u32 1.1754944e-38, %v4703_v52  ;;  %vm4697_vm14 = vweird.f32 %v15248_v13  ;;  %v15287_v40 = vsel %vm18092_vm9, %v6825_v34, %v6833_v63 }
 0x419   : > { %v15268_v20 = vadd.f32 1.0, %v8842_v37  ;;  %v6678_v3 = vadd.f32 %v6654_v56, %v6629_v51  ;;  %v6679_v53 = vadd.f32 %v6655_v27, %v6630_v42  ;;  %vm15296_vm11 = vcmp.eq.f32.partialorder %v4701_v30, 8.507059e+37 }
 0x41a   : > { %8845 = vrcp.f32 %v15262_v29  ;;  %v5998_v12 = vand.u32 2147483648, %v15262_v29  ;;  %v5996_v32 = vand.u32 2147483647, %v15262_v29  ;;  %v15308_v16 = vsel %vm18095_vm13, %v17349_v60, %v17348_v23 }
 0x41b   : > { %8847 = vrcp.f32 %v15268_v20  ;;  %v4718_v28 = vand.u32 2147483648, %v15268_v20  ;;  %v4716_v25 = vand.u32 2147483647, %v15268_v20  ;;  %v6775_v18 = vadd.f32 %v6751_v33, %v6678_v3  ;;  %18096 = vst [vmem:[#allocation15_spill] sm:$0xff] %v15308_v16 }
 0x41c   : > { %v8844_v15 = vpop.eup %8843  ;;  %v15290_v8 = vor.u32 1.1754944e-38, %v5998_v12  ;;  %v6776_v63 = vadd.f32 %v6752_v4, %v6679_v53  ;;  %v6872_v56 = vmul.f32 %v18068_v38, %v15287_v40  ;;  %v6921_v9 = vmul.f32 %v18069_v5, %v15149_v39 }
 0x41d   : > { %v4693_v44 = vmul.f32 %v8844_v15, %v15248_v13  ;;  %vm4698_vm1 = vweird.f32 %v8844_v15  ;;  %v15300_v34 = vor.u32 1.1754944e-38, %v4718_v28  ;;  %v6922_v52 = vmul.f32 %v18069_v5, %v15257_v43 }
 0x41e   : > { %vm5992_vm15 = vweird.f32 %v15262_v29  ;;  %v6873_v51 = vmul.f32 %v18068_v38, %v15308_v16  ;;  %v17346_v42 = vrot.slane %v15257_v43, 1  ;;  %v17347_v37 = vrot.slane %v15293_v59, 1  ;;  %vm4699_vm12 = vmor %vm4697_vm14, %vm4698_vm1 }
 0x41f   : > { %v4694_v54 = vsub.f32 1.0, %v4693_v44  ;;  %vm4712_vm2 = vweird.f32 %v15268_v20  ;;  %v6896_v27 = vadd.f32 %v6872_v56, %v6775_v18  ;;  %v15328_v33 = vsel %vm18097_vm3, %v6979_v0, %v6963_v48  ;;  %vm18106_vm1 = vmmov %vm18092_vm9 }
 0x420   : > { %v8846_v30 = vpop.eup %8845  ;;  %v15331_v3 = vadd.f32 %v14954_v36, %v5711_v41  ;;  %v6364_v4 = vmul.f32 %v15015_v58, %v14474_v22  ;;  %vm15336_vm5 = vcmp.eq.f32.partialorder %v5996_v32, 8.507059e+37  ;;  %v6897_v44 = vadd.f32 %v6873_v51, %v6776_v63  ;;  %v4318_v41 = vpop.f32.mrf.mxu2 }
 0x421   : > { %v8848_v12 = vpop.eup %8847  ;;  %v4695_v28 = vmul.f32 %v8844_v15, %v4694_v54  ;;  %v5988_v53 = vmul.f32 %v8846_v30, %v15262_v29  ;;  %vm5993_vm4 = vweird.f32 %v8846_v30  ;;  %vm15341_vm7 = vcmp.eq.f32.partialorder %v4716_v25, 8.507059e+37  ;;  %v15356_v25 = vld [vmem:[%s17022_s1 + $0x28] ss:$0 sm:$0xff] }
 0x422   : > { %v4708_v56 = vmul.f32 %v8848_v12, %v15268_v20  ;;  %vm4713_vm6 = vweird.f32 %v8848_v12  ;;  %v6945_v0 = vadd.f32 %v6921_v9, %v6896_v27  ;;  %v15351_v58 = vsel %vm18102_vm8, %v17346_v42, %v17347_v37  ;;  %v5713_v37 = vpop.f32.mrf.mxu3  ;;  %vm5994_vm10 = vmor %vm5992_vm15, %vm5993_vm4 }
 0x423   : > { %18103 = vst [vmem:[#allocation30_spill] sm:$0xff] %v15351_v58  ;;  %v4696_v32 = vadd.f32 %v8844_v15, %v4695_v28  ;;  %v5989_v54 = vsub.f32 1.0, %v5988_v53  ;;  %v6946_v63 = vadd.f32 %v6922_v52, %v6897_v44  ;;  %v7018_v9 = vmul.f32 %v15356_v25, %v15328_v33  ;;  %vm4714_vm14 = vmor %vm4712_vm2, %vm4713_vm6 }
 0x424   : > { %v4709_v51 = vsub.f32 1.0, %v4708_v56  ;;  %v7019_v27 = vmul.f32 %v15356_v25, %v15351_v58  ;;  %v8389_v28 = vmul.f32 -1.442695, %v15331_v3  ;;  %v15367_v52 = vadd.f32 %v14954_v36, %v4318_v41 }
 0x425   : > { %v4700_v53 = vsel %vm4699_vm12, %v8844_v15, %v4696_v32  ;;  %v5990_v44 = vmul.f32 %v8846_v30, %v5989_v54  ;;  %v7042_v42 = vadd.f32 %v7018_v9, %v6945_v0  ;;  %v6365_v23 = vmul.f32 %v15009_v55, %v14474_v22 }
 0x426   : > { %v4705_v13 = vsel %vm15296_vm11, %v15273_v62, %v4700_v53  ;;  %v4710_v56 = vmul.f32 %v8848_v12, %v4709_v51  ;;  %v7043_v60 = vadd.f32 %v7019_v27, %v6946_v63  ;;  %8849 = vpow2.f32 %v8389_v28 }
 0x427   : > { %v4800_v58 = vmul.f32 %v4705_v13, %v15185_v19  ;;  %v5991_v16 = vadd.f32 %v8846_v30, %v5990_v44  ;;  %v8362_v41 = vmul.f32 -1.442695, %v15367_v52  ;;  %v15377_v15 = vadd.f32 %v14954_v36, %v5713_v37 }
 0x428   : > { %v4711_v55 = vadd.f32 %v8848_v12, %v4710_v56  ;;  %v7062_v0 = vpack.c.bf16 %v7043_v60, %v7042_v42  ;;  %v6389_v62 = vmul.f32 %v14831_v35, %v14478_v6  ;;  %v6390_v61 = vmul.f32 %v18061_v31, %v14478_v6 }
 0x429   : > { %4848 = vst.msk [vmem:[#allocation2 + $0xa8] sm:$0xff] %vm290_vm0, %v4800_v58  ;;  %v5995_v19 = vsel %vm5994_vm10, %v8846_v30, %v5991_v16  ;;  %8851 = vpow2.f32 %v8362_v41  ;;  %v8390_v37 = vmul.f32 -1.442695, %v15377_v15  ;;  %v6486_v29 = vmul.f32 %v15060_v17, %v14494_v45  ;;  %v4321_v16 = vpop.f32.mrf.mxu2 }
 0x42a   : > { %v6000_v35 = vsel %vm15336_vm5, %v15290_v8, %v5995_v19  ;;  %v4715_v60 = vsel %vm4714_vm14, %v8848_v12, %v4711_v55  ;;  %8423 = vmatmul.msk.bf16.gmra.mxu0 %vm290_vm0, %v7062_v0  ;;  %v6413_v31 = vadd.f32 %v6389_v62, %v6364_v4  ;;  %v6414_v42 = vadd.f32 %v6390_v61, %v6365_v23  ;;  %v5716_v4 = vpop.f32.mrf.mxu3  ;;  %vm18112_vm5 = vmmov %vm18102_vm8 }
 0x42b   : > { %v6207_v30 = vmul.f32 %v6000_v35, %v15217_v50  ;;  %v4720_v20 = vsel %vm15341_vm7, %v15300_v34, %v4715_v60  ;;  %8853 = vpow2.f32 %v8390_v37  ;;  %v6487_v17 = vmul.f32 %v15066_v11, %v14494_v45  ;;  %vm18114_vm6 = vmmov %vm18112_vm5 }
 0x42c   : > { %v8850_v58 = vpop.eup %8849  ;;  %v4801_v18 = vmul.f32 %v4720_v20, %v15220_v46  ;;  %v6510_v8 = vadd.f32 %v6486_v29, %v6413_v31  ;;  %v6607_v12 = vmul.f32 %v15166_v14, %v18056_v24  ;;  %v6608_v23 = vmul.f32 %v15287_v40, %v18056_v24 }
 0x42d   : > { %6255 = vst.msk [vmem:[#allocation2 + $0x128] sm:$0xff] %vm290_vm0, %v6207_v30  ;;  %v15409_v50 = vadd.f32 1.0, %v8850_v58  ;;  %v6511_v34 = vadd.f32 %v6487_v17, %v6414_v42  ;;  %v6656_v11 = vmul.f32 %v15139_v7, %v18059_v10  ;;  %v6826_v46 = vrot.slane %v15293_v59, 7 }
 0x42e   : > { %4849 = vst.msk [vmem:[#allocation2 + $0xb0] sm:$0xff] %vm290_vm0, %v4801_v18  ;;  %v6631_v48 = vadd.f32 %v6607_v12, %v6510_v8  ;;  %v6657_v54 = vmul.f32 %v15149_v39, %v18059_v10  ;;  %v18104_v53 = vrot.slane %v15259_v49, 7  ;;  %v18105_v13 = vrot.slane %v15257_v43, 7 }
 0x42f   : > { %v8852_v32 = vpop.eup %8851  ;;  %8855 = vrcp.f32 %v15409_v50  ;;  %v6028_v63 = vand.u32 2147483648, %v15409_v50  ;;  %v6632_v51 = vadd.f32 %v6608_v23, %v6511_v34  ;;  %v6026_v41 = vand.u32 2147483647, %v15409_v50 }
 0x430   : > { %v15419_v9 = vadd.f32 1.0, %v8852_v32  ;;  %v6680_v27 = vadd.f32 %v6656_v11, %v6631_v48  ;;  %v15425_v44 = vsel %vm18092_vm9, %v6826_v46, %v18104_v53  ;;  %v15431_v56 = vsel %vm18106_vm1, %v18105_v13, %v6826_v46 }
 0x431   : > { %v8854_v28 = vpop.eup %8853  ;;  %v6753_v0 = vmul.f32 %v15200_v47, %v18065_v26  ;;  %v4323_v62 = vpop.f32.mrf.mxu2  ;;  %v6681_v19 = vadd.f32 %v6657_v54, %v6632_v51  ;;  %v6754_v37 = vmul.f32 %v15328_v33, %v18065_v26  ;;  %v6874_v29 = vmul.f32 %v18068_v38, %v15431_v56 }
 0x432   : > { %8857 = vrcp.f32 %v15419_v9  ;;  %v4748_v55 = vand.u32 2147483648, %v15419_v9  ;;  %v15438_v61 = vadd.f32 1.0, %v8854_v28  ;;  %vm6022_vm11 = vweird.f32 %v15409_v50 }
 0x433   : > { %v6029_v35 = vor.u32 1.1754944e-38, %v6028_v63  ;;  %v4746_v60 = vand.u32 2147483647, %v15419_v9  ;;  %v6777_v31 = vadd.f32 %v6753_v0, %v6680_v27  ;;  %v6875_v42 = vmul.f32 %v18068_v38, %v15425_v44 }
 0x434   : > { %v15448_v20 = vor.u32 1.1754944e-38, %v4748_v55  ;;  %8859 = vrcp.f32 %v15438_v61  ;;  %v6923_v17 = vmul.f32 %v18069_v5, %v15293_v59  ;;  %v6924_v58 = vmul.f32 %v18069_v5, %v15259_v49 }
 0x435   : > { %v8856_v30 = vpop.eup %8855  ;;  %vm15456_vm13 = vcmp.eq.f32.partialorder %v6026_v41, 8.507059e+37  ;;  %v6041_v12 = vand.u32 2147483647, %v15438_v61  ;;  %v6778_v23 = vadd.f32 %v6754_v37, %v6681_v19  ;;  %v6898_v4 = vadd.f32 %v6874_v29, %v6777_v31 }
 0x436   : > { %v6018_v18 = vmul.f32 %v8856_v30, %v15409_v50  ;;  %vm6023_vm15 = vweird.f32 %v8856_v30  ;;  %vm4742_vm2 = vweird.f32 %v15419_v9  ;;  %v6043_v34 = vand.u32 2147483648, %v15438_v61 }
 0x437   : > { %v6980_v48 = vrot.slane %v15259_v49, 1  ;;  %v15465_v11 = vadd.f32 %v14954_v36, %v4321_v16  ;;  %v6899_v54 = vadd.f32 %v6875_v42, %v6778_v23  ;;  %v6947_v63 = vadd.f32 %v6923_v17, %v6898_v4  ;;  %vm6024_vm8 = vmor %vm6022_vm11, %vm6023_vm15 }
 0x438   : > { %v8858_v46 = vpop.eup %8857  ;;  %v6019_v32 = vsub.f32 1.0, %v6018_v18  ;;  %v6366_v51 = vmul.f32 %v15181_v1, %v14474_v22  ;;  %vm15470_vm4 = vcmp.eq.f32.partialorder %v4746_v60, 8.507059e+37  ;;  %v18111_v53 = vrot.slane %v15293_v59, 1  ;;  %v5718_v1 = vpop.f32.mrf.mxu3 }
 0x439   : > { %v4738_v27 = vmul.f32 %v8858_v46, %v15419_v9  ;;  %vm4743_vm3 = vweird.f32 %v8858_v46  ;;  %v18113_v13 = vrot.slane %v15257_v43, 1  ;;  %v6948_v0 = vadd.f32 %v6924_v58, %v6899_v54 }
 0x43a   : > { %v15478_v16 = vsel %vm18112_vm5, %v18111_v53, %v6980_v48  ;;  %v6020_v55 = vmul.f32 %v8856_v30, %v6019_v32  ;;  %v8860_v37 = vpop.eup %8859  ;;  %v8363_v60 = vmul.f32 -1.442695, %v15465_v11  ;;  %v15492_v31 = vadd.f32 %v14954_v36, %v5718_v1  ;;  %vm4744_vm12 = vmor %vm4742_vm2, %vm4743_vm3 }
 0x43b   : > { %v15484_v41 = vsel %vm18114_vm6, %v6980_v48, %v18113_v13  ;;  %v7020_v62 = vmul.f32 %v15356_v25, %v15478_v16  ;;  %v4739_v29 = vsub.f32 1.0, %v4738_v27  ;;  %v6367_v42 = vmul.f32 %v15166_v14, %v14474_v22 }
 0x43c   : > { %v7021_v19 = vmul.f32 %v15356_v25, %v15484_v41  ;;  %v6021_v17 = vadd.f32 %v8856_v30, %v6020_v55  ;;  %v6033_v18 = vmul.f32 %v8860_v37, %v15438_v61  ;;  %vm6038_vm7 = vweird.f32 %v8860_v37 }
 0x43d   : > { %v7044_v58 = vadd.f32 %v7020_v62, %v6947_v63  ;;  %v4740_v23 = vmul.f32 %v8858_v46, %v4739_v29  ;;  %8861 = vpow2.f32 %v8363_v60  ;;  %v8392_v48 = vmul.f32 -1.442695, %v15492_v31 }
 0x43e   : > { %v7045_v4 = vadd.f32 %v7021_v19, %v6948_v0  ;;  %v6025_v32 = vsel %vm6024_vm8, %v8856_v30, %v6021_v17  ;;  %v6034_v36 = vsub.f32 1.0, %v6033_v18  ;;  %v6391_v54 = vmul.f32 %v15137_v21, %v14478_v6 }
 0x43f   : > { %v6392_v14 = vmul.f32 %v15139_v7, %v14478_v6  ;;  %v6030_v63 = vsel %vm15456_vm13, %v6029_v35, %v6025_v32  ;;  %v4741_v27 = vadd.f32 %v8858_v46, %v4740_v23  ;;  %8863 = vpow2.f32 %v8392_v48  ;;  %v18115_v35 = vld [vmem:[#allocation15_spill] sm:$0xff]  ;;  %vm18117_vm13 = vmmov %vm18106_vm1 }
 0x440   : > { %v7063_v53 = vpack.c.bf16 %v7045_v4, %v7044_v58  ;;  %v6209_v50 = vmul.f32 %v6030_v63, %v15331_v3  ;;  %v6035_v30 = vmul.f32 %v8860_v37, %v6034_v36  ;;  %v6415_v13 = vadd.f32 %v6391_v54, %v6366_v51  ;;  %v15518_v3 = vpop.f32.mrf.mxu3  ;;  %v15540_v58 = vld [vmem:[#allocation2 + $0xa0] sm:$0xff] }
 0x441   : > { %v6416_v1 = vadd.f32 %v6392_v14, %v6367_v42  ;;  %v4745_v55 = vsel %vm4744_vm12, %v8858_v46, %v4741_v27  ;;  %v6488_v21 = vmul.f32 %v15206_v57, %v14494_v45  ;;  %v6489_v7 = vmul.f32 %v15200_v47, %v14494_v45 }
 0x442   : > { %8424 = vmatmul.msk.bf16.gmra.mxu0 %vm290_vm0, %v7063_v53  ;;  %v6609_v8 = vmul.f32 %v18115_v35, %v18056_v24  ;;  %6257 = vst.msk [vmem:[#allocation2 + $0x138] sm:$0xff] %vm290_vm0, %v6209_v50  ;;  %v4750_v9 = vsel %vm15470_vm4, %v15448_v20, %v4745_v55  ;;  %v6036_v46 = vadd.f32 %v8860_v37, %v6035_v30  ;;  %vm6037_vm10 = vweird.f32 %v15438_v61  ;;  %v15533_v20 = vld [vmem:[#allocation2 + $0x90] sm:$0xff]  ;;  %vm18120_vm4 = vmmov %vm18112_vm5 }
 0x443   : > { %v6610_v57 = vmul.f32 %v15431_v56, %v18056_v24  ;;  %v8862_v51 = vpop.eup %8861  ;;  %v4803_v47 = vmul.f32 %v4750_v9, %v15367_v52  ;;  %vm6039_vm14 = vmor %vm6037_vm10, %vm6038_vm7  ;;  %v6044_v0 = vor.u32 1.1754944e-38, %v6043_v34  ;;  %v6512_v62 = vadd.f32 %v6488_v21, %v6415_v13  ;;  %v15538_v34 = vld [vmem:[#allocation2 + $0x98] sm:$0xff] }
 0x444   : > { %v6513_v19 = vadd.f32 %v6489_v7, %v6416_v1  ;;  %v6040_v29 = vsel %vm6039_vm14, %v8860_v37, %v6036_v46  ;;  %vm6042_vm9 = vcmp.eq.f32.partialorder %v6041_v12, 8.507059e+37  ;;  %v15531_v28 = vadd.f32 1.0, %v8862_v51  ;;  %v18116_v37 = vld [vmem:[#allocation30_spill] sm:$0xff]  ;;  %vm18121_vm5 = vmmov %vm18120_vm4 }
 0x445   : > { %v8864_v60 = vpop.eup %8863  ;;  %4851 = vst.msk [vmem:[#allocation2 + $0xc0] sm:$0xff] %vm290_vm0, %v4803_v47  ;;  %v6045_v42 = vsel %vm6042_vm9, %v6044_v0, %v6040_v29  ;;  %v6633_v17 = vadd.f32 %v6609_v8, %v6512_v62  ;;  %v6659_v52 = vmul.f32 %v15293_v59, %v18059_v10  ;;  %v6658_v12 = vmul.f32 %v15257_v43, %v18059_v10  ;;  %vm18124_vm10 = vmmov %vm18106_vm1 }
 0x446   : > { %v6634_v18 = vadd.f32 %v6610_v57, %v6513_v19  ;;  %v6210_v61 = vmul.f32 %v6045_v42, %v15377_v15  ;;  %8865 = vrcp.f32 %v15531_v28  ;;  %v6755_v23 = vmul.f32 %v18116_v37, %v18065_v26  ;;  %vm18125_vm14 = vmmov %vm18106_vm1 }
 0x447   : > { %v4763_v4 = vand.u32 2147483648, %v15531_v28  ;;  %v15549_v48 = vadd.f32 1.0, %v8864_v60  ;;  %v6819_v36 = vrot.slane %v15533_v20, 7  ;;  %v6682_v54 = vadd.f32 %v6658_v12, %v6633_v17  ;;  %vm18126_vm9 = vmmov %vm18120_vm4 }
 0x448   : > { %v6683_v32 = vadd.f32 %v6659_v52, %v6634_v18  ;;  %6258 = vst.msk [vmem:[#allocation2 + $0x140] sm:$0xff] %vm290_vm0, %v6210_v61  ;;  %v6756_v15 = vmul.f32 %v15478_v16, %v18065_v26  ;;  %v6827_v14 = vrot.slane %v15538_v34, 7  ;;  %v6835_v63 = vrot.slane %v15540_v58, 7  ;;  %v5723_v30 = vpop.f32.mrf.mxu3  ;;  %v15604_v52 = vld [vmem:[%s17024_s3 + $0x1] ss:$0 sm:$0xff] }
 0x449   : > { %v4761_v27 = vand.u32 2147483647, %v15531_v28  ;;  %v15558_v53 = vor.u32 1.1754944e-38, %v4763_v4  ;;  %8867 = vrcp.f32 %v15549_v48  ;;  %v6925_v50 = vmul.f32 %v18069_v5, %v15533_v20 }
 0x44a   : > { %v6071_v13 = vand.u32 2147483647, %v15549_v48  ;;  %v6073_v1 = vand.u32 2147483648, %v15549_v48  ;;  %v6779_v55 = vadd.f32 %v6755_v23, %v6682_v54  ;;  %v15569_v21 = vsel %vm18106_vm1, %v6819_v36, %v6827_v14  ;;  %vm18127_vm1 = vmmov %vm18120_vm4 }
 0x44b   : > { %vm4757_vm11 = vweird.f32 %v15531_v28  ;;  %v6780_v7 = vadd.f32 %v6756_v15, %v6683_v32  ;;  %v15576_v8 = vsel %vm18117_vm13, %v6835_v63, %v6819_v36  ;;  %v6877_v9 = vmul.f32 %v18068_v38, %v15569_v21 }
 0x44c   : > { %v6926_v46 = vmul.f32 %v18069_v5, %v15538_v34  ;;  %v8866_v57 = vpop.eup %8865  ;;  %v15582_v51 = vor.u32 1.1754944e-38, %v6073_v1  ;;  %v6876_v47 = vmul.f32 %v18068_v38, %v15576_v8  ;;  %v6965_v0 = vrot.slane %v15533_v20, 1 }
 0x44d   : > { %v6973_v62 = vrot.slane %v15538_v34, 1  ;;  %v4753_v19 = vmul.f32 %v8866_v57, %v15531_v28  ;;  %vm4758_vm15 = vweird.f32 %v8866_v57  ;;  %vm15589_vm2 = vcmp.eq.f32.partialorder %v4761_v27, 8.507059e+37 }
 0x44e   : > { %v6901_v60 = vadd.f32 %v6877_v9, %v6780_v7  ;;  %v6981_v42 = vrot.slane %v15540_v58, 1  ;;  %vm6067_vm3 = vweird.f32 %v15549_v48  ;;  %v6900_v17 = vadd.f32 %v6876_v47, %v6779_v55  ;;  %vm4759_vm8 = vmor %vm4757_vm11, %vm4758_vm15 }
 0x44f   : > { %v15599_v18 = vsel %vm18120_vm4, %v6965_v0, %v6973_v62  ;;  %v15608_v61 = vadd.f32 %v15604_v52, %v15518_v3  ;;  %v6368_v12 = vmul.f32 %v15287_v40, %v14474_v22  ;;  %v8868_v23 = vpop.eup %8867  ;;  %v4754_v4 = vsub.f32 1.0, %v4753_v19 }
 0x450   : > { %v6950_v32 = vadd.f32 %v6926_v46, %v6901_v60  ;;  %v15616_v36 = vsel %vm18121_vm5, %v6973_v62, %v6981_v42  ;;  %v7022_v54 = vmul.f32 %v15356_v25, %v15599_v18  ;;  %v6063_v15 = vmul.f32 %v8868_v23, %v15549_v48  ;;  %vm18132_vm5 = vmmov %vm18127_vm1 }
 0x451   : > { %vm6068_vm6 = vweird.f32 %v8868_v23  ;;  %vm15621_vm7 = vcmp.eq.f32.partialorder %v6071_v13, 8.507059e+37  ;;  %v6949_v40 = vadd.f32 %v6925_v50, %v6900_v17  ;;  %v7023_v27 = vmul.f32 %v15356_v25, %v15616_v36 }
 0x452   : > { %v4755_v30 = vmul.f32 %v8866_v57, %v4754_v4  ;;  %v8393_v1 = vmul.f32 -1.442695, %v15608_v61  ;;  %v6369_v55 = vmul.f32 %v18115_v35, %v14474_v22  ;;  %v6393_v7 = vmul.f32 %v15149_v39, %v14478_v6  ;;  %vm6069_vm12 = vmor %vm6067_vm3, %vm6068_vm6 }
 0x453   : > { %v6064_v9 = vsub.f32 1.0, %v6063_v15  ;;  %v7046_v46 = vadd.f32 %v7022_v54, %v6949_v40  ;;  %v7047_v47 = vadd.f32 %v7023_v27, %v6950_v32  ;;  %v6394_v13 = vmul.f32 %v15257_v43, %v14478_v6  ;;  %v15645_v54 = vld [vmem:[#allocation2 + $0xa8] sm:$0xff]  ;;  %vm18130_vm3 = vmmov %vm18124_vm10 }
 0x454   : > { %v4756_v62 = vadd.f32 %v8866_v57, %v4755_v30  ;;  %8869 = vpow2.f32 %v8393_v1  ;;  %v6417_v50 = vadd.f32 %v6393_v7, %v6368_v12  ;;  %v6490_v19 = vmul.f32 %v15328_v33, %v14494_v45  ;;  %v5726_v33 = vpop.f32.mrf.mxu3  ;;  %vm18131_vm4 = vmmov %vm18130_vm3 }
 0x455   : > { %v6065_v35 = vmul.f32 %v8868_v23, %v6064_v9  ;;  %v7064_v60 = vpack.c.bf16 %v7047_v47, %v7046_v46  ;;  %v6418_v17 = vadd.f32 %v6394_v13, %v6369_v55  ;;  %v6491_v39 = vmul.f32 %v18116_v37, %v14494_v45  ;;  %vm18133_vm6 = vmmov %vm18127_vm1 }
 0x456   : > { %v4760_v4 = vsel %vm4759_vm8, %v8866_v57, %v4756_v62  ;;  %v6514_v32 = vadd.f32 %v6490_v19, %v6417_v50  ;;  %v6611_v43 = vmul.f32 %v15425_v44, %v18056_v24  ;;  %v6612_v12 = vmul.f32 %v15576_v8, %v18056_v24  ;;  %v15653_v57 = vld [vmem:[#allocation2 + $0xb8] sm:$0xff]  ;;  %v15684_v19 = vld [vmem:[#allocation2 + $0xb0] sm:$0xff] }
 0x457   : > { %v4765_v28 = vsel %vm15589_vm2, %v15558_v53, %v4760_v4  ;;  %v6066_v15 = vadd.f32 %v8868_v23, %v6065_v35  ;;  %8425 = vmatmul.msk.bf16.gmra.mxu0 %vm290_vm0, %v7064_v60  ;;  %v6515_v40 = vadd.f32 %v6491_v39, %v6418_v17  ;;  %v6660_v37 = vmul.f32 %v15259_v49, %v18059_v10 }
 0x458   : > { %v4804_v27 = vmul.f32 %v4765_v28, %v15465_v11  ;;  %v6635_v30 = vadd.f32 %v6611_v43, %v6514_v32  ;;  %v6661_v29 = vmul.f32 %v15533_v20, %v18059_v10  ;;  %v6757_v53 = vmul.f32 %v15484_v41, %v18065_v26 }
 0x459   : > { %v6070_v1 = vsel %vm6069_vm12, %v8868_v23, %v6066_v15  ;;  %v6636_v55 = vadd.f32 %v6612_v12, %v6515_v40  ;;  %v6758_v7 = vmul.f32 %v15599_v18, %v18065_v26  ;;  %v6820_v9 = vrot.slane %v15645_v54, 7 }
 0x45a   : > { %v8870_v46 = vpop.eup %8869  ;;  %4852 = vst.msk [vmem:[#allocation2 + $0xc8] sm:$0xff] %vm290_vm0, %v4804_v27  ;;  %v6075_v11 = vsel %vm15621_vm7, %v15582_v51, %v6070_v1  ;;  %v6684_v48 = vadd.f32 %v6660_v37, %v6635_v30  ;;  %v6836_v47 = vrot.slane %v15653_v57, 7  ;;  %v15677_v23 = vsel %vm18124_vm10, %v6827_v14, %v6835_v63  ;;  %v15721_v37 = vld [vmem:[%s17026_s5] ss:$0 sm:$0xff]  ;;  %v7142_v27 = vpop.f32.mrf.mxu0 }
 0x45b   : > { %v6212_v13 = vmul.f32 %v6075_v11, %v15492_v31  ;;  %v15680_v62 = vadd.f32 1.0, %v8870_v46  ;;  %v6878_v50 = vmul.f32 %v18068_v38, %v15677_v23  ;;  %v6685_v51 = vadd.f32 %v6661_v29, %v6636_v55 }
 0x45c   : > { %v6781_v3 = vadd.f32 %v6757_v53, %v6684_v48  ;;  %v15692_v14 = vsel %vm18125_vm14, %v6836_v47, %v6820_v9  ;;  %v6927_v31 = vmul.f32 %v18069_v5, %v15540_v58  ;;  %v6928_v17 = vmul.f32 %v18069_v5, %v15645_v54  ;;  %v5728_v30 = vpop.f32.mrf.mxu3 }
 0x45d   : > { %6260 = vst.msk [vmem:[#allocation2 + $0x150] sm:$0xff] %vm290_vm0, %v6212_v13  ;;  %8871 = vrcp.f32 %v15680_v62  ;;  %v6782_v63 = vadd.f32 %v6758_v7, %v6685_v51  ;;  %v6879_v35 = vmul.f32 %v18068_v38, %v15692_v14  ;;  %v6086_v39 = vand.u32 2147483647, %v15680_v62 }
 0x45e   : > { %v6902_v60 = vadd.f32 %v6878_v50, %v6781_v3  ;;  %v6966_v4 = vrot.slane %v15645_v54, 1  ;;  %v6974_v32 = vrot.slane %v15684_v19, 1  ;;  %v15711_v43 = vsel %vm18126_vm9, %v6981_v42, %v6965_v0 }
 0x45f   : > { %v6088_v12 = vand.u32 2147483648, %v15680_v62  ;;  %v6903_v28 = vadd.f32 %v6879_v35, %v6782_v63  ;;  %v15716_v40 = vadd.f32 %v15604_v52, %v5726_v33  ;;  %v15732_v42 = vadd.f32 %v15604_v52, %v5728_v30 }
 0x460   : > { %v6951_v15 = vadd.f32 %v6927_v31, %v6902_v60  ;;  %v15729_v0 = vsel %vm18127_vm1, %v6966_v4, %v6974_v32  ;;  %v6370_v33 = vmul.f32 %v15431_v56, %v14474_v22  ;;  %v6371_v29 = vmul.f32 %v15425_v44, %v14474_v22 }
 0x461   : > { %v6952_v53 = vadd.f32 %v6928_v17, %v6903_v28  ;;  %v7024_v1 = vmul.f32 %v15356_v25, %v15711_v43  ;;  %v7025_v55 = vmul.f32 %v15356_v25, %v15729_v0  ;;  %v8395_v7 = vmul.f32 -1.442695, %v15716_v40 }
 0x462   : > { %v7143_v11 = vadd.f32 %v15721_v37, %v7142_v27  ;;  %v8396_v48 = vmul.f32 -1.442695, %v15732_v42  ;;  %v6395_v56 = vmul.f32 %v15293_v59, %v14478_v6  ;;  %v6396_v44 = vmul.f32 %v15259_v49, %v14478_v6  ;;  %v7144_v30 = vpop.f32.mrf.mxu0 }
 0x463   : > { %v8872_v46 = vpop.eup %8871  ;;  %v7048_v50 = vadd.f32 %v7024_v1, %v6951_v15  ;;  %v7049_v51 = vadd.f32 %v7025_v55, %v6952_v53  ;;  %8873 = vpow2.f32 %v8395_v7  ;;  %v6492_v63 = vmul.f32 %v15478_v16, %v14494_v45 }
 0x464   : > { %v6078_v13 = vmul.f32 %v8872_v46, %v15680_v62  ;;  %7194 = vst [vmem:[%s15750_s20] sm:$0xff] %v7143_v11  ;;  %8875 = vpow2.f32 %v8396_v48  ;;  %v6419_v3 = vadd.f32 %v6395_v56, %v6370_v33  ;;  %v6420_v31 = vadd.f32 %v6396_v44, %v6371_v29  ;;  %v5731_v33 = vpop.f32.mrf.mxu3 }
 0x465   : > { %v7065_v59 = vpack.c.bf16 %v7049_v51, %v7048_v50  ;;  %v6493_v49 = vmul.f32 %v15484_v41, %v14494_v45  ;;  %v6613_v60 = vmul.f32 %v15569_v21, %v18056_v24  ;;  %vm6082_vm11 = vweird.f32 %v15680_v62 }
 0x466   : > { %v6079_v35 = vsub.f32 1.0, %v6078_v13  ;;  %v6516_v17 = vadd.f32 %v6492_v63, %v6419_v3  ;;  %v6614_v28 = vmul.f32 %v15677_v23, %v18056_v24  ;;  %vm6083_vm13 = vweird.f32 %v8872_v46 }
 0x467   : > { %8426 = vmatmul.msk.bf16.gmra.mxu0 %vm290_vm0, %v7065_v59  ;;  %v6517_v27 = vadd.f32 %v6493_v49, %v6420_v31  ;;  %v6663_v16 = vmul.f32 %v15540_v58, %v18059_v10  ;;  %vm15765_vm15 = vcmp.eq.f32.partialorder %v6086_v39, 8.507059e+37  ;;  %v6662_v53 = vmul.f32 %v15538_v34, %v18059_v10  ;;  %vm6084_vm2 = vmor %vm6082_vm11, %vm6083_vm13 }
 0x468   : > { %v6080_v15 = vmul.f32 %v8872_v46, %v6079_v35  ;;  %v6637_v29 = vadd.f32 %v6613_v60, %v6516_v17  ;;  %v6828_v1 = vrot.slane %v15684_v19, 7  ;;  %v6089_v11 = vor.u32 1.1754944e-38, %v6088_v12  ;;  %vm18138_vm13 = vmmov %vm18130_vm3 }
 0x469   : > { %v8874_v55 = vpop.eup %8873  ;;  %v6638_v48 = vadd.f32 %v6614_v28, %v6517_v27  ;;  %v7145_v56 = vadd.f32 %v15721_v37, %v7144_v30  ;;  %v6759_v50 = vmul.f32 %v15616_v36, %v18065_v26  ;;  %v6982_v63 = vrot.slane %v15653_v57, 1 }
 0x46a   : > { %v6081_v7 = vadd.f32 %v8872_v46, %v6080_v15  ;;  %v8876_v44 = vpop.eup %8875  ;;  %v15776_v39 = vadd.f32 1.0, %v8874_v55  ;;  %v6686_v13 = vadd.f32 %v6662_v53, %v6637_v29  ;;  %v15784_v51 = vsel %vm18130_vm3, %v6820_v9, %v6828_v1 }
 0x46b   : > { %v15786_v3 = vadd.f32 1.0, %v8876_v44  ;;  %v6687_v31 = vadd.f32 %v6663_v16, %v6638_v48  ;;  %7195 = vst [vmem:[%s15750_s20 + $0x8] sm:$0xff] %v7145_v56  ;;  %v15797_v35 = vsel %vm18131_vm4, %v6828_v1, %v6836_v47  ;;  %v6880_v9 = vmul.f32 %v18068_v38, %v15784_v51  ;;  %v7147_v16 = vpop.f32.mrf.mxu0 }
 0x46c   : > { %v6085_v12 = vsel %vm6084_vm2, %v8872_v46, %v6081_v7  ;;  %8877 = vrcp.f32 %v15776_v39  ;;  %v6118_v59 = vand.u32 2147483648, %v15776_v39  ;;  %v6760_v49 = vmul.f32 %v15711_v43, %v18065_v26  ;;  %v5733_v30 = vpop.f32.mrf.mxu3 }
 0x46d   : > { %v6090_v62 = vsel %vm15765_vm15, %v6089_v11, %v6085_v12  ;;  %8879 = vrcp.f32 %v15786_v3  ;;  %v6783_v60 = vadd.f32 %v6759_v50, %v6686_v13  ;;  %v6929_v17 = vmul.f32 %v18069_v5, %v15684_v19  ;;  %vm18139_vm15 = vmmov %vm18130_vm3 }
 0x46e   : > { %v6213_v46 = vmul.f32 %v6090_v62, %v15608_v61  ;;  %v6930_v47 = vmul.f32 %v18069_v5, %v15653_v57  ;;  %v6116_v28 = vand.u32 2147483647, %v15776_v39  ;;  %v6784_v15 = vadd.f32 %v6760_v49, %v6687_v31  ;;  %vm18140_vm3 = vmmov %vm18132_vm5 }
 0x46f   : > { %v6881_v61 = vmul.f32 %v18068_v38, %v15797_v35  ;;  %v15818_v27 = vsel %vm18132_vm5, %v6974_v32, %v6982_v63  ;;  %v6131_v33 = vand.u32 2147483647, %v15786_v3  ;;  %v6133_v41 = vand.u32 2147483648, %v15786_v3  ;;  %vm18141_vm4 = vmmov %vm18140_vm3 }
 0x470   : > { %6261 = vst.msk [vmem:[#allocation2 + $0x158] sm:$0xff] %vm290_vm0, %v6213_v46  ;;  %v6904_v29 = vadd.f32 %v6880_v9, %v6783_v60  ;;  %v15826_v53 = vsel %vm18133_vm6, %v6982_v63, %v6966_v4  ;;  %vm6112_vm7 = vweird.f32 %v15776_v39  ;;  %v6119_v1 = vor.u32 1.1754944e-38, %v6118_v59 }
 0x471   : > { %v6905_v55 = vadd.f32 %v6881_v61, %v6784_v15  ;;  %v7026_v32 = vmul.f32 %v15356_v25, %v15818_v27  ;;  %v15832_v7 = vadd.f32 %v15604_v52, %v5733_v30  ;;  %vm6127_vm8 = vweird.f32 %v15786_v3 }
 0x472   : > { %v8878_v11 = vpop.eup %8877  ;;  %v6953_v48 = vadd.f32 %v6929_v17, %v6904_v29  ;;  %v7027_v56 = vmul.f32 %v15356_v25, %v15826_v53  ;;  %v6372_v4 = vmul.f32 %v15576_v8, %v14474_v22  ;;  %v6373_v44 = vmul.f32 %v15569_v21, %v14474_v22 }
 0x473   : > { %v8880_v13 = vpop.eup %8879  ;;  %v6108_v50 = vmul.f32 %v8878_v11, %v15776_v39  ;;  %vm15842_vm12 = vcmp.eq.f32.partialorder %v6116_v28, 8.507059e+37  ;;  %v6954_v31 = vadd.f32 %v6930_v47, %v6905_v55  ;;  %v8398_v63 = vmul.f32 -1.442695, %v15832_v7 }
 0x474   : > { %v6397_v62 = vmul.f32 %v15533_v20, %v14478_v6  ;;  %vm6113_vm10 = vweird.f32 %v8878_v11  ;;  %v6123_v9 = vmul.f32 %v8880_v13, %v15786_v3  ;;  %v7050_v8 = vadd.f32 %v7026_v32, %v6953_v48  ;;  %v5736_v16 = vpop.f32.mrf.mxu3  ;;  %v15860_v32 = vld [vmem:[#allocation2 + $0xc0] sm:$0xff]  ;;  %v15862_v48 = vld [vmem:[#allocation2 + $0xc8] sm:$0xff] }
 0x475   : > { %v6398_v21 = vmul.f32 %v15538_v34, %v14478_v6  ;;  %v6109_v46 = vsub.f32 1.0, %v6108_v50  ;;  %v7051_v59 = vadd.f32 %v7027_v56, %v6954_v31  ;;  %8881 = vpow2.f32 %v8398_v63  ;;  %v7148_v50 = vpop.f32.mrf.mxu0  ;;  %vm6114_vm1 = vmor %vm6112_vm7, %vm6113_vm10 }
 0x476   : > { %v6421_v49 = vadd.f32 %v6397_v62, %v6372_v4  ;;  %v6124_v60 = vsub.f32 1.0, %v6123_v9  ;;  %v6494_v47 = vmul.f32 %v15599_v18, %v14494_v45  ;;  %v6495_v28 = vmul.f32 %v15616_v36, %v14494_v45  ;;  %v15864_v18 = vld [vmem:[#allocation2 + $0xd0] sm:$0xff]  ;;  %vm18144_vm7 = vmmov %vm18138_vm13 }
 0x477   : > { %v6422_v17 = vadd.f32 %v6398_v21, %v6373_v44  ;;  %v6110_v20 = vmul.f32 %v8878_v11, %v6109_v46  ;;  %v7066_v15 = vpack.c.bf16 %v7051_v59, %v7050_v8  ;;  %v6615_v61 = vmul.f32 %v15692_v14, %v18056_v24  ;;  %vm18146_vm10 = vmmov %vm18140_vm3 }
 0x478   : > { %v6616_v34 = vmul.f32 %v15784_v51, %v18056_v24  ;;  %v6125_v30 = vmul.f32 %v8880_v13, %v6124_v60  ;;  %vm6128_vm14 = vweird.f32 %v8880_v13  ;;  %v6518_v29 = vadd.f32 %v6494_v47, %v6421_v49 }
 0x479   : > { %v6519_v55 = vadd.f32 %v6495_v28, %v6422_v17  ;;  %v6111_v36 = vadd.f32 %v8878_v11, %v6110_v20  ;;  %vm15866_vm9 = vcmp.eq.f32.partialorder %v6131_v33, 8.507059e+37  ;;  %v6134_v4 = vor.u32 1.1754944e-38, %v6133_v41  ;;  %8427 = vmatmul.msk.bf16.gmra.mxu0 %vm290_vm0, %v7066_v15  ;;  %vm6129_vm11 = vmor %vm6127_vm8, %vm6128_vm14 }
 0x47a   : > { %v6664_v44 = vmul.f32 %v15645_v54, %v18059_v10  ;;  %v6126_v31 = vadd.f32 %v8880_v13, %v6125_v30  ;;  %v6639_v63 = vadd.f32 %v6615_v61, %v6518_v29  ;;  %v6665_v33 = vmul.f32 %v15684_v19, %v18059_v10  ;;  %vm18145_vm8 = vmmov %vm18144_vm7 }
 0x47b   : > { %v6640_v62 = vadd.f32 %v6616_v34, %v6519_v55  ;;  %v8882_v9 = vpop.eup %8881  ;;  %v6115_v8 = vsel %vm6114_vm1, %v8878_v11, %v6111_v36  ;;  %v6821_v41 = vrot.slane %v15860_v32, 7  ;;  %v17364_v21 = vrot.slane %v15862_v48, 7  ;;  %vm18147_vm14 = vmmov %vm18140_vm3 }
 0x47c   : > { %v17365_v46 = vrot.slane %v15864_v18, 7  ;;  %v6120_v39 = vsel %vm15842_vm12, %v6119_v1, %v6115_v8  ;;  %v6130_v59 = vsel %vm6129_vm11, %v8880_v13, %v6126_v31  ;;  %v15886_v49 = vadd.f32 1.0, %v8882_v9  ;;  %v5738_v15 = vpop.f32.mrf.mxu3  ;;  %vm18150_vm1 = vmmov %vm18144_vm7 }
 0x47d   : > { %v6761_v60 = vmul.f32 %v15729_v0, %v18065_v26  ;;  %v6215_v11 = vmul.f32 %v6120_v39, %v15716_v40  ;;  %v6135_v3 = vsel %vm15866_vm9, %v6134_v4, %v6130_v59  ;;  %v6689_v17 = vadd.f32 %v6665_v33, %v6640_v62  ;;  %vm18148_vm9 = vmmov %vm18144_vm7 }
 0x47e   : > { %v15897_v47 = vsel %vm18138_vm13, %v6821_v41, %v17364_v21  ;;  %v6216_v1 = vmul.f32 %v6135_v3, %v15732_v42  ;;  %8883 = vrcp.f32 %v15886_v49  ;;  %v6688_v13 = vadd.f32 %v6664_v44, %v6639_v63  ;;  %vm18151_vm13 = vmmov %vm18140_vm3 }
 0x47f   : > { %v6762_v12 = vmul.f32 %v15818_v27, %v18065_v26  ;;  %6263 = vst.msk [vmem:[#allocation2 + $0x168] sm:$0xff] %vm290_vm0, %v6215_v11  ;;  %v6161_v40 = vand.u32 2147483647, %v15886_v49  ;;  %v6163_v28 = vand.u32 2147483648, %v15886_v49  ;;  %v15910_v20 = vsel %vm18139_vm15, %v17365_v46, %v6821_v41  ;;  %vm18152_vm15 = vmmov %vm18140_vm3 }
 0x480   : > { %v6931_v42 = vmul.f32 %v18069_v5, %v15860_v32  ;;  %6264 = vst.msk [vmem:[#allocation2 + $0x170] sm:$0xff] %vm290_vm0, %v6216_v1  ;;  %v6785_v61 = vadd.f32 %v6761_v60, %v6688_v13  ;;  %v6882_v30 = vmul.f32 %v18068_v38, %v15910_v20  ;;  %v6883_v29 = vmul.f32 %v18068_v38, %v15897_v47 }
 0x481   : > { %v6786_v34 = vadd.f32 %v6762_v12, %v6689_v17  ;;  %v6932_v55 = vmul.f32 %v18069_v5, %v15862_v48  ;;  %v17357_v36 = vrot.slane %v15860_v32, 1  ;;  %v6975_v56 = vrot.slane %v15862_v48, 1  ;;  %v15960_v12 = vld [vmem:[#allocation2 + $0xd8] sm:$0xff] }
 0x482   : > { %v17356_v4 = vrot.slane %v15864_v18, 1  ;;  %v6906_v44 = vadd.f32 %v6882_v30, %v6785_v61  ;;  %v7149_v63 = vadd.f32 %v15721_v37, %v7148_v50  ;;  %v15926_v62 = vadd.f32 %v15604_v52, %v5736_v16  ;;  %v15945_v16 = vpop.f32.mrf.mxu0 }
 0x483   : > { %v6907_v31 = vadd.f32 %v6883_v29, %v6786_v34  ;;  %vm6157_vm2 = vweird.f32 %v15886_v49  ;;  %v15939_v9 = vsel %vm18141_vm4, %v17357_v36, %v6975_v56  ;;  %v7282_v50 = vmul.f32 %v15910_v20, %v14474_v22  ;;  %v15968_v34 = vld [vmem:[#allocation2 + $0xe8] sm:$0xff]  ;;  %vm18157_vm4 = vmmov %vm18150_vm1 }
 0x484   : > { %v15933_v33 = vsel %vm18140_vm3, %v6975_v56, %v17356_v4  ;;  %v7283_v52 = vmul.f32 %v15897_v47, %v14474_v22  ;;  %v8884_v8 = vpop.eup %8883  ;;  %v6955_v41 = vadd.f32 %v6931_v42, %v6906_v44  ;;  %v7028_v59 = vmul.f32 %v15356_v25, %v15939_v9  ;;  %7196 = vst [vmem:[%s15750_s20 + $0x10] sm:$0xff] %v7149_v63  ;;  %v15962_v42 = vld [vmem:[#allocation2 + $0xe0] sm:$0xff] }
 0x485   : > { %v6956_v39 = vadd.f32 %v6932_v55, %v6907_v31  ;;  %v7029_v60 = vmul.f32 %v15356_v25, %v15933_v33  ;;  %v6153_v11 = vmul.f32 %v8884_v8, %v15886_v49  ;;  %vm15953_vm5 = vcmp.eq.f32.partialorder %v6161_v40, 8.507059e+37 }
 0x486   : > { %v6164_v17 = vor.u32 1.1754944e-38, %v6163_v28  ;;  %v8399_v1 = vmul.f32 -1.442695, %v15926_v62  ;;  %v7306_v13 = vmul.f32 %v15860_v32, %v14478_v6  ;;  %v7052_v15 = vadd.f32 %v7028_v59, %v6955_v41  ;;  %v15975_v59 = vld [vmem:[#allocation2 + $0xf0] sm:$0xff] }
 0x487   : > { %v7053_v61 = vadd.f32 %v7029_v60, %v6956_v39  ;;  %v7307_v25 = vmul.f32 %v15862_v48, %v14478_v6  ;;  %v7402_v40 = vmul.f32 %v15939_v9, %v14494_v45  ;;  %v6154_v28 = vsub.f32 1.0, %v6153_v11  ;;  %v15977_v60 = vld [vmem:[#allocation2 + $0xf8] sm:$0xff] }
 0x488   : > { %8885 = vpow2.f32 %v8399_v1  ;;  %v7330_v30 = vadd.f32 %v7306_v13, %v7282_v50  ;;  %v7403_v29 = vmul.f32 %v15933_v33, %v14494_v45  ;;  %v7474_v44 = vrot.slane %v15960_v12, 7  ;;  %v15989_v13 = vld [vmem:[#allocation2 + $0x100] sm:$0xff] }
 0x489   : > { %v7067_v55 = vpack.c.bf16 %v7053_v61, %v7052_v15  ;;  %v7331_v56 = vadd.f32 %v7307_v25, %v7283_v52  ;;  %v17354_v31 = vrot.slane %v15962_v42, 7  ;;  %v6155_v63 = vmul.f32 %v8884_v8, %v6154_v28 }
 0x48a   : > { %vm6158_vm6 = vweird.f32 %v8884_v8  ;;  %v7426_v41 = vadd.f32 %v7402_v40, %v7330_v30  ;;  %v17355_v39 = vrot.slane %v15968_v34, 7  ;;  %v7571_v11 = vmul.f32 %v15962_v42, %v18059_v10  ;;  %v7153_v28 = vpop.f32.mrf.mxu0 }
 0x48b   : > { %8428 = vmatmul.msk.bf16.gmra.mxu0 %vm290_vm0, %v7067_v55  ;;  %v7427_v50 = vadd.f32 %v7403_v29, %v7331_v56  ;;  %v15984_v52 = vsel %vm18144_vm7, %v7474_v44, %v17354_v31  ;;  %v17358_v1 = vrot.slane %v15960_v12, 1  ;;  %v6156_v15 = vadd.f32 %v8884_v8, %v6155_v63  ;;  %vm6159_vm12 = vmor %vm6157_vm2, %vm6158_vm6 }
 0x48c   : > { %v15995_v61 = vsel %vm18145_vm8, %v17355_v39, %v7474_v44  ;;  %v7523_v25 = vmul.f32 %v15984_v52, %v18056_v24  ;;  %v7626_v40 = vrot.slane %v15962_v42, 1  ;;  %v17361_v29 = vrot.slane %v15968_v34, 1  ;;  %vm18160_vm6 = vmmov %vm18146_vm10 }
 0x48d   : > { %v7522_v30 = vmul.f32 %v15995_v61, %v18056_v24  ;;  %v7738_v55 = vrot.slane %v15975_v59, 7  ;;  %v17359_v56 = vrot.slane %v15977_v60, 7  ;;  %v6160_v63 = vsel %vm6159_vm12, %v8884_v8, %v6156_v15  ;;  %vm18163_vm7 = vmmov %vm18150_vm1 }
 0x48e   : > { %v8886_v44 = vpop.eup %8885  ;;  %v7547_v31 = vadd.f32 %v7523_v25, %v7427_v50  ;;  %v16012_v28 = vsel %vm18146_vm10, %v17358_v1, %v7626_v40  ;;  %v17360_v49 = vrot.slane %v15989_v13, 7  ;;  %v6165_v39 = vsel %vm15953_vm5, %v6164_v17, %v6160_v63  ;;  %vm18166_vm8 = vmmov %vm18160_vm6 }
 0x48f   : > { %v16017_v4 = vadd.f32 1.0, %v8886_v44  ;;  %v7546_v36 = vadd.f32 %v7522_v30, %v7426_v41  ;;  %v16023_v8 = vsel %vm18147_vm14, %v7626_v40, %v17361_v29  ;;  %v6218_v50 = vmul.f32 %v6165_v39, %v15832_v7  ;;  %vm18169_vm12 = vmmov %vm18150_vm1 }
 0x490   : > { %v7570_v15 = vmul.f32 %v15960_v12, %v18059_v10  ;;  %v7595_v25 = vadd.f32 %v7571_v11, %v7547_v31  ;;  %v7667_v1 = vmul.f32 %v16023_v8, %v18065_v26  ;;  %v7666_v17 = vmul.f32 %v16012_v28, %v18065_v26  ;;  %vm18170_vm10 = vmmov %vm18150_vm1 }
 0x491   : > { %8887 = vrcp.f32 %v16017_v4  ;;  %v6178_v3 = vand.u32 2147483648, %v16017_v4  ;;  %6266 = vst.msk [vmem:[#allocation2 + $0x180] sm:$0xff] %vm290_vm0, %v6218_v50  ;;  %v16039_v7 = vsel %vm18148_vm9, %v7738_v55, %v17359_v56  ;;  %v16045_v31 = vsel %vm18150_vm1, %v17360_v49, %v7738_v55  ;;  %vm18173_vm14 = vmmov %vm18160_vm6 }
 0x492   : > { %v7594_v41 = vadd.f32 %v7570_v15, %v7546_v36  ;;  %v7691_v40 = vadd.f32 %v7667_v1, %v7595_v25  ;;  %18149 = vst [vmem:[#allocation36_spill] sm:$0xff] %v16039_v7  ;;  %v6176_v39 = vand.u32 2147483647, %v16017_v4  ;;  %v7786_v36 = vmul.f32 %v16045_v31, %v18068_v38  ;;  %vm18174_vm9 = vmmov %vm18160_vm6 }
 0x493   : > { %v16048_v11 = vor.u32 1.1754944e-38, %v6178_v3  ;;  %v7787_v1 = vmul.f32 %v16039_v7, %v18068_v38  ;;  %v7834_v44 = vmul.f32 %v15975_v59, %v18069_v5  ;;  %v7835_v63 = vmul.f32 %v15977_v60, %v18069_v5 }
 0x494   : > { %v7690_v30 = vadd.f32 %v7666_v17, %v7594_v41  ;;  %v17363_v55 = vrot.slane %v15975_v59, 1  ;;  %v7890_v15 = vrot.slane %v15977_v60, 1  ;;  %v17362_v25 = vrot.slane %v15989_v13, 1 }
 0x495   : > { %v7811_v50 = vadd.f32 %v7787_v1, %v7691_v40  ;;  %v7152_v3 = vadd.f32 %v15721_v37, %v15945_v16  ;;  %vm6172_vm11 = vweird.f32 %v16017_v4  ;;  %v6374_v41 = vmul.f32 %v15677_v23, %v14474_v22 }
 0x496   : > { %v7810_v17 = vadd.f32 %v7786_v36, %v7690_v30  ;;  %v6375_v56 = vmul.f32 %v15692_v14, %v14474_v22  ;;  %v6399_v49 = vmul.f32 %v15540_v58, %v14478_v6  ;;  %v16074_v29 = vsel %vm18151_vm13, %v7890_v15, %v17362_v25  ;;  %v16093_v30 = vld [vmem:[%s17022_s1 + $0x28] ss:$0 sm:$0xff]  ;;  %vm18177_vm13 = vmmov %vm18160_vm6 }
 0x497   : > { %v8888_v40 = vpop.eup %8887  ;;  %v7859_v1 = vadd.f32 %v7835_v63, %v7811_v50  ;;  %v16080_v16 = vsel %vm18152_vm15, %v17363_v55, %v7890_v15  ;;  %7197 = vst [vmem:[%s15750_s20 + $0x18] sm:$0xff] %v7152_v3  ;;  %v6400_v23 = vmul.f32 %v15645_v54, %v14478_v6  ;;  %vm16086_vm3 = vcmp.eq.f32.partialorder %v6176_v39, 8.507059e+37  ;;  %v16097_v50 = vpop.f32.mrf.mxu0  ;;  %vm18178_vm15 = vmmov %vm18160_vm6 }
 0x498   : > { %v6168_v58 = vmul.f32 %v8888_v40, %v16017_v4  ;;  %vm6173_vm2 = vweird.f32 %v8888_v40  ;;  %v7858_v36 = vadd.f32 %v7834_v44, %v7810_v17  ;;  %v7930_v63 = vmul.f32 %v16093_v30, %v16080_v16 }
 0x499   : > { %v7931_v54 = vmul.f32 %v16093_v30, %v16074_v29  ;;  %v6423_v15 = vadd.f32 %v6399_v49, %v6374_v41  ;;  %v6424_v3 = vadd.f32 %v6400_v23, %v6375_v56  ;;  %v6496_v39 = vmul.f32 %v15711_v43, %v14494_v45  ;;  %vm6174_vm5 = vmor %vm6172_vm11, %vm6173_vm2 }
 0x49a   : > { %v6169_v25 = vsub.f32 1.0, %v6168_v58  ;;  %v7954_v44 = vadd.f32 %v7930_v63, %v7858_v36  ;;  %v6497_v17 = vmul.f32 %v15729_v0, %v14494_v45  ;;  %v6617_v55 = vmul.f32 %v15797_v35, %v18056_v24  ;;  %vm18176_vm11 = vmmov %vm18150_vm1 }
 0x49b   : > { %v7955_v21 = vadd.f32 %v7931_v54, %v7859_v1  ;;  %v6520_v46 = vadd.f32 %v6496_v39, %v6423_v15  ;;  %v6618_v7 = vmul.f32 %v15910_v20, %v18056_v24  ;;  %v6666_v49 = vmul.f32 %v15653_v57, %v18059_v10  ;;  %vm18179_vm2 = vmmov %vm18150_vm1 }
 0x49c   : > { %v6170_v56 = vmul.f32 %v8888_v40, %v6169_v25  ;;  %v6521_v41 = vadd.f32 %v6497_v17, %v6424_v3  ;;  %v6667_v43 = vmul.f32 %v15860_v32, %v18059_v10  ;;  %v6763_v23 = vmul.f32 %v15826_v53, %v18065_v26 }
 0x49d   : > { %v7978_v0 = vpack.c.bf16 %v7955_v21, %v7954_v44  ;;  %v6641_v58 = vadd.f32 %v6617_v55, %v6520_v46  ;;  %v6764_v1 = vmul.f32 %v15939_v9, %v18065_v26  ;;  %v18155_v36 = vrot.slane %v15864_v18, 7 }
 0x49e   : > { %v18156_v20 = vrot.slane %v15862_v48, 7  ;;  %v6171_v25 = vadd.f32 %v8888_v40, %v6170_v56  ;;  %v6642_v54 = vadd.f32 %v6618_v7, %v6521_v41  ;;  %v6885_v21 = vmul.f32 %v15995_v61, %v18068_v38 }
 0x49f   : > { %8431 = vmatmul.msk.bf16.vlgmr.msrb.gmra.mxu1 %vm290_vm0, %v7978_v0  ;;  %v6690_v46 = vadd.f32 %v6666_v49, %v6641_v58  ;;  %v6933_v9 = vmul.f32 %v18069_v5, %v15864_v18  ;;  %v6934_v55 = vmul.f32 %v15960_v12, %v18069_v5  ;;  %v18158_v7 = vrot.slane %v15860_v32, 1 }
 0x4a0   : > { %v16123_v63 = vsel %vm18157_vm4, %v18156_v20, %v18155_v36  ;;  %v18159_v3 = vrot.slane %v15864_v18, 1  ;;  %v6175_v44 = vsel %vm6174_vm5, %v8888_v40, %v6171_v25  ;;  %v6691_v4 = vadd.f32 %v6667_v43, %v6642_v54  ;;  %v16161_v20 = vpop.f32.mrf.mxu0  ;;  %vm18181_vm4 = vmmov %vm18160_vm6 }
 0x4a1   : > { %v6884_v15 = vmul.f32 %v18068_v38, %v16123_v63  ;;  %v7031_v49 = vmul.f32 %v16093_v30, %v16012_v28  ;;  %v6180_v56 = vsel %vm16086_vm3, %v16048_v11, %v6175_v44  ;;  %v6787_v41 = vadd.f32 %v6763_v23, %v6690_v46  ;;  %vm18180_vm3 = vmmov %vm18150_vm1 }
 0x4a2   : > { %v16143_v39 = vsel %vm18160_vm6, %v18159_v3, %v18158_v7  ;;  %v7284_v32 = vmul.f32 %v16123_v63, %v14474_v22  ;;  %v7285_v0 = vmul.f32 %v15995_v61, %v14474_v22  ;;  %v6219_v40 = vmul.f32 %v6180_v56, %v15926_v62  ;;  %v16178_v7 = vld [vmem:[#allocation2 + $0x108] sm:$0xff]  ;;  %v16186_v56 = vld [vmem:[#allocation2 + $0x118] sm:$0xff]  ;;  %vm18182_vm5 = vmmov %vm18181_vm4 }
 0x4a3   : > { %v7030_v17 = vmul.f32 %v16093_v30, %v16143_v39  ;;  %v6788_v43 = vadd.f32 %v6764_v1, %v6691_v4  ;;  %v7308_v58 = vmul.f32 %v15864_v18, %v14478_v6  ;;  %v7309_v36 = vmul.f32 %v15960_v12, %v14478_v6  ;;  %vm18183_vm6 = vmmov %vm18150_vm1 }
 0x4a4   : > { %v6908_v14 = vadd.f32 %v6884_v15, %v6787_v41  ;;  %v7404_v11 = vmul.f32 %v16143_v39, %v14494_v45  ;;  %v7405_v23 = vmul.f32 %v16012_v28, %v14494_v45  ;;  %v18161_v61 = vrot.slane %v15968_v34, 7  ;;  %6267 = vst.msk [vmem:[#allocation2 + $0x188] sm:$0xff] %vm290_vm0, %v6219_v40 }
 0x4a5   : > { %v18162_v62 = vrot.slane %v15962_v42, 7  ;;  %v6909_v25 = vadd.f32 %v6885_v21, %v6788_v43  ;;  %v7332_v54 = vadd.f32 %v7308_v58, %v7284_v32  ;;  %v7333_v46 = vadd.f32 %v7309_v36, %v7285_v0 }
 0x4a6   : > { %v6957_v3 = vadd.f32 %v6933_v9, %v6908_v14  ;;  %v7525_v28 = vmul.f32 %v16045_v31, %v18056_v24  ;;  %v7572_v44 = vmul.f32 %v15968_v34, %v18059_v10  ;;  %v7573_v4 = vmul.f32 %v15975_v59, %v18059_v10 }
 0x4a7   : > { %v16173_v1 = vsel %vm18163_vm7, %v18162_v62, %v18161_v61  ;;  %v6958_v21 = vadd.f32 %v6934_v55, %v6909_v25  ;;  %v7428_v41 = vadd.f32 %v7404_v11, %v7332_v54  ;;  %v7429_v32 = vadd.f32 %v7405_v23, %v7333_v46  ;;  %v16201_v61 = vld [vmem:[#allocation2 + $0x110] sm:$0xff]  ;;  %vm18184_vm7 = vmmov %vm18150_vm1 }
 0x4a8   : > { %v7524_v15 = vmul.f32 %v16173_v1, %v18056_v24  ;;  %v18164_v0 = vrot.slane %v15960_v12, 1  ;;  %v18165_v40 = vrot.slane %v15968_v34, 1  ;;  %v7054_v43 = vadd.f32 %v7030_v17, %v6957_v3 }
 0x4a9   : > { %v7669_v36 = vmul.f32 %v16080_v16, %v18065_v26  ;;  %v7739_v14 = vrot.slane %v16178_v7, 7  ;;  %v7055_v55 = vadd.f32 %v7031_v49, %v6958_v21  ;;  %v7549_v23 = vadd.f32 %v7525_v28, %v7429_v32 }
 0x4aa   : > { %v16194_v9 = vsel %vm18166_vm8, %v18165_v40, %v18164_v0  ;;  %v7548_v11 = vadd.f32 %v7524_v15, %v7428_v41  ;;  %v7755_v12 = vrot.slane %v16186_v56, 7  ;;  %v18167_v62 = vrot.slane %v15989_v13, 7  ;;  %v7160_v41 = vpop.f32.mrf.mxu0  ;;  %vm18185_vm8 = vmmov %vm18181_vm4 }
 0x4ab   : > { %v7668_v58 = vmul.f32 %v16194_v9, %v18065_v26  ;;  %v18168_v25 = vrot.slane %v15977_v60, 7  ;;  %v7836_v54 = vmul.f32 %v15989_v13, %v18069_v5  ;;  %v7837_v49 = vmul.f32 %v16178_v7, %v18069_v5 }
 0x4ac   : > { %v7883_v46 = vrot.slane %v16178_v7, 1  ;;  %v7068_v15 = vpack.c.bf16 %v7055_v55, %v7054_v43  ;;  %v7596_v3 = vadd.f32 %v7572_v44, %v7548_v11  ;;  %v7597_v28 = vadd.f32 %v7573_v4, %v7549_v23 }
 0x4ad   : > { %v16210_v17 = vsel %vm18169_vm12, %v18168_v25, %v18167_v62  ;;  %v16223_v21 = vsel %vm18170_vm10, %v7755_v12, %v7739_v14  ;;  %v7891_v40 = vrot.slane %v16201_v61, 1  ;;  %v18171_v44 = vrot.slane %v15975_v59, 1  ;;  %vm18186_vm12 = vmmov %vm18181_vm4 }
 0x4ae   : > { %v7788_v32 = vmul.f32 %v16210_v17, %v18068_v38  ;;  %v7789_v0 = vmul.f32 %v16223_v21, %v18068_v38  ;;  %v18172_v4 = vrot.slane %v15989_v13, 1  ;;  %8429 = vmatmul.msk.bf16.gmra.mxu0 %vm290_vm0, %v7068_v15  ;;  %v7692_v55 = vadd.f32 %v7668_v58, %v7596_v3  ;;  %vm18187_vm10 = vmmov %vm18150_vm1 }
 0x4af   : > { %v7693_v11 = vadd.f32 %v7669_v36, %v7597_v28  ;;  %v7156_v62 = vadd.f32 %v15721_v37, %v16097_v50  ;;  %v16249_v25 = vsel %vm18174_vm9, %v7883_v46, %v7891_v40  ;;  %v6376_v41 = vmul.f32 %v15784_v51, %v14474_v22  ;;  %vm18189_vm9 = vmmov %vm18181_vm4 }
 0x4b0   : > { %v16236_v43 = vsel %vm18173_vm14, %v18172_v4, %v18171_v44  ;;  %v6377_v58 = vmul.f32 %v15797_v35, %v14474_v22  ;;  %v6401_v36 = vmul.f32 %v15684_v19, %v14478_v6  ;;  %v7812_v15 = vadd.f32 %v7788_v32, %v7692_v55  ;;  %vm18188_vm14 = vmmov %vm18150_vm1 }
 0x4b1   : > { %v7932_v23 = vmul.f32 %v16093_v30, %v16236_v43  ;;  %v7813_v3 = vadd.f32 %v7789_v0, %v7693_v11  ;;  %v7933_v50 = vmul.f32 %v16093_v30, %v16249_v25  ;;  %7198 = vst [vmem:[%s15750_s20 + $0x20] sm:$0xff] %v7156_v62  ;;  %v6402_v28 = vmul.f32 %v15653_v57, %v14478_v6 }
 0x4b2   : > { %v6425_v44 = vadd.f32 %v6401_v36, %v6376_v41  ;;  %v6498_v4 = vmul.f32 %v15818_v27, %v14494_v45  ;;  %v6499_v51 = vmul.f32 %v15826_v53, %v14494_v45  ;;  %v6619_v35 = vmul.f32 %v15897_v47, %v18056_v24 }
 0x4b3   : > { %v7860_v19 = vadd.f32 %v7836_v54, %v7812_v15  ;;  %v7861_v32 = vadd.f32 %v7837_v49, %v7813_v3  ;;  %v6426_v0 = vadd.f32 %v6402_v28, %v6377_v58  ;;  %v6620_v55 = vmul.f32 %v16123_v63, %v18056_v24  ;;  %v7161_v3 = vpop.f32.mrf.mxu0 }
 0x4b4   : > { %v6522_v11 = vadd.f32 %v6498_v4, %v6425_v44  ;;  %v6668_v57 = vmul.f32 %v15862_v48, %v18059_v10  ;;  %v6669_v27 = vmul.f32 %v15864_v18, %v18059_v10  ;;  %v6765_v47 = vmul.f32 %v15933_v33, %v18065_v26 }
 0x4b5   : > { %v7956_v62 = vadd.f32 %v7932_v23, %v7860_v19  ;;  %v7957_v41 = vadd.f32 %v7933_v50, %v7861_v32  ;;  %v6523_v36 = vadd.f32 %v6499_v51, %v6426_v0  ;;  %v6766_v54 = vmul.f32 %v16143_v39, %v18065_v26 }
 0x4b6   : > { %v6643_v53 = vadd.f32 %v6619_v35, %v6522_v11  ;;  %v6886_v63 = vmul.f32 %v15984_v52, %v18068_v38  ;;  %v6887_v48 = vmul.f32 %v16173_v1, %v18068_v38  ;;  %v6935_v23 = vmul.f32 %v15962_v42, %v18069_v5  ;;  %v18175_v35 = vld [vmem:[#allocation36_spill] sm:$0xff] }
 0x4b7   : > { %v7979_v49 = vpack.c.bf16 %v7957_v41, %v7956_v62  ;;  %v6644_v58 = vadd.f32 %v6620_v55, %v6523_v36  ;;  %v6936_v15 = vmul.f32 %v15968_v34, %v18069_v5  ;;  %v7158_v33 = vadd.f32 %v15721_v37, %v16161_v20 }
 0x4b8   : > { %v6692_v18 = vadd.f32 %v6668_v57, %v6643_v53  ;;  %v7286_v39 = vmul.f32 %v15984_v52, %v14474_v22  ;;  %v7287_v28 = vmul.f32 %v16173_v1, %v14474_v22  ;;  %v7310_v44 = vmul.f32 %v15962_v42, %v14478_v6 }
 0x4b9   : > { %8432 = vmatmul.msk.bf16.gmra.mxu1 %vm290_vm0, %v7979_v49  ;;  %v6693_v50 = vadd.f32 %v6669_v27, %v6644_v58  ;;  %v7311_v4 = vmul.f32 %v15968_v34, %v14478_v6  ;;  %7199 = vst [vmem:[%s15750_s20 + $0x28] sm:$0xff] %v7158_v33  ;;  %v7406_v20 = vmul.f32 %v16023_v8, %v14494_v45  ;;  %v7899_v58 = vrot.slane %v16186_v56, 1 }
 0x4ba   : > { %v6789_v51 = vadd.f32 %v6765_v47, %v6692_v18  ;;  %v7407_v52 = vmul.f32 %v16194_v9, %v14494_v45  ;;  %v7526_v19 = vmul.f32 %v18175_v35, %v18056_v24  ;;  %v7334_v0 = vadd.f32 %v7310_v44, %v7286_v39 }
 0x4bb   : > { %v6790_v32 = vadd.f32 %v6766_v54, %v6693_v50  ;;  %v7335_v1 = vadd.f32 %v7311_v4, %v7287_v28  ;;  %v7527_v42 = vmul.f32 %v16210_v17, %v18056_v24  ;;  %v7032_v34 = vmul.f32 %v16093_v30, %v16023_v8 }
 0x4bc   : > { %v6910_v55 = vadd.f32 %v6886_v63, %v6789_v51  ;;  %v7033_v11 = vmul.f32 %v16093_v30, %v16194_v9  ;;  %v7574_v57 = vmul.f32 %v15977_v60, %v18059_v10  ;;  %v7430_v41 = vadd.f32 %v7406_v20, %v7334_v0 }
 0x4bd   : > { %v6911_v62 = vadd.f32 %v6887_v48, %v6790_v32  ;;  %v7431_v36 = vadd.f32 %v7407_v52, %v7335_v1  ;;  %v7575_v27 = vmul.f32 %v15989_v13, %v18059_v10  ;;  %v7670_v47 = vmul.f32 %v16074_v29, %v18065_v26 }
 0x4be   : > { %v6959_v53 = vadd.f32 %v6935_v23, %v6910_v55  ;;  %v7671_v54 = vmul.f32 %v16236_v43, %v18065_v26  ;;  %v7747_v8 = vrot.slane %v16201_v61, 7  ;;  %v7550_v63 = vadd.f32 %v7526_v19, %v7430_v41 }
 0x4bf   : > { %v6960_v9 = vadd.f32 %v6936_v15, %v6911_v62  ;;  %v7551_v49 = vadd.f32 %v7527_v42, %v7431_v36  ;;  %v7162_v33 = vadd.f32 %v15721_v37, %v7161_v3  ;;  %v7288_v3 = vmul.f32 %v16045_v31, %v14474_v22  ;;  %v7164_v4 = vpop.f32.mrf.mxu0 }
 0x4c0   : > { %v7056_v48 = vadd.f32 %v7032_v34, %v6959_v53  ;;  %v16324_v23 = vsel %vm18150_vm1, %v7747_v8, %v7755_v12  ;;  %v16330_v18 = vsel %vm18176_vm11, %v7739_v14, %v7747_v8  ;;  %v7598_v39 = vadd.f32 %v7574_v57, %v7550_v63  ;;  %v16371_v57 = vld [vmem:[#allocation2 + $0x120] sm:$0xff]  ;;  %vm18190_vm1 = vmmov %vm18181_vm4 }
 0x4c1   : > { %v7057_v15 = vadd.f32 %v7033_v11, %v6960_v9  ;;  %v7599_v50 = vadd.f32 %v7575_v27, %v7551_v49  ;;  %v7790_v28 = vmul.f32 %v16330_v18, %v18068_v38  ;;  %v7791_v44 = vmul.f32 %v16324_v23, %v18068_v38  ;;  %7200 = vst [vmem:[%s15750_s20 + $0x30] sm:$0xff] %v7162_v33  ;;  %v16379_v27 = vld [vmem:[#allocation2 + $0x130] sm:$0xff]  ;;  %vm18191_vm11 = vmmov %vm18179_vm2 }
 0x4c2   : > { %v7838_v12 = vmul.f32 %v16201_v61, %v18069_v5  ;;  %v16343_v14 = vsel %vm18177_vm13, %v7891_v40, %v7899_v58  ;;  %v7694_v20 = vadd.f32 %v7670_v47, %v7598_v39  ;;  %v7839_v19 = vmul.f32 %v16186_v56, %v18069_v5  ;;  %vm18192_vm13 = vmmov %vm18179_vm2 }
 0x4c3   : > { %v7069_v51 = vpack.c.bf16 %v7057_v15, %v7056_v48  ;;  %v7695_v52 = vadd.f32 %v7671_v54, %v7599_v50  ;;  %v16354_v32 = vsel %vm18178_vm15, %v7899_v58, %v7883_v46  ;;  %v7289_v40 = vmul.f32 %v18175_v35, %v14474_v22  ;;  %vm18193_vm15 = vmmov %vm18190_vm1 }
 0x4c4   : > { %v7312_v0 = vmul.f32 %v15975_v59, %v14478_v6  ;;  %v7313_v31 = vmul.f32 %v15977_v60, %v14478_v6  ;;  %v7814_v1 = vadd.f32 %v7790_v28, %v7694_v20  ;;  %v7934_v55 = vmul.f32 %v16093_v30, %v16343_v14  ;;  %v16373_v60 = vld [vmem:[#allocation2 + $0x128] sm:$0xff] }
 0x4c5   : > { %8430 = vmatmul.msk.bf16.gmra.mxu0 %vm290_vm0, %v7069_v51  ;;  %v7815_v42 = vadd.f32 %v7791_v44, %v7695_v52  ;;  %v7408_v46 = vmul.f32 %v16080_v16, %v14494_v45  ;;  %v7409_v35 = vmul.f32 %v16074_v29, %v14494_v45  ;;  %v7529_v59 = vmul.f32 %v16330_v18, %v18056_v24 }
 0x4c6   : > { %v7336_v34 = vadd.f32 %v7312_v0, %v7288_v3  ;;  %v7337_v11 = vadd.f32 %v7313_v31, %v7289_v40  ;;  %v7862_v62 = vadd.f32 %v7838_v12, %v7814_v1  ;;  %v7935_v36 = vmul.f32 %v16093_v30, %v16354_v32 }
 0x4c7   : > { %v7863_v41 = vadd.f32 %v7839_v19, %v7815_v42  ;;  %v7528_v16 = vmul.f32 %v16223_v21, %v18056_v24  ;;  %v7740_v8 = vrot.slane %v16371_v57, 7  ;;  %v7748_v9 = vrot.slane %v16373_v60, 7  ;;  %v7166_v48 = vpop.f32.mrf.mxu0 }
 0x4c8   : > { %v7432_v53 = vadd.f32 %v7408_v46, %v7336_v34  ;;  %v7433_v47 = vadd.f32 %v7409_v35, %v7337_v11  ;;  %v7958_v29 = vadd.f32 %v7934_v55, %v7862_v62  ;;  %v7577_v49 = vmul.f32 %v16201_v61, %v18059_v10 }
 0x4c9   : > { %v7959_v54 = vadd.f32 %v7935_v36, %v7863_v41  ;;  %v7756_v58 = vrot.slane %v16379_v27, 7  ;;  %v16388_v39 = vsel %vm18179_vm2, %v7740_v8, %v7748_v9  ;;  %v7673_v28 = vmul.f32 %v16343_v14, %v18065_v26  ;;  %v16438_v41 = vld [vmem:[#allocation2 + $0x138] sm:$0xff]  ;;  %v16440_v36 = vld [vmem:[#allocation2 + $0x148] sm:$0xff]  ;;  %vm18194_vm2 = vmmov %vm18190_vm1 }
 0x4ca   : > { %v7553_v63 = vadd.f32 %v7529_v59, %v7433_v47  ;;  %v7552_v15 = vadd.f32 %v7528_v16, %v7432_v53  ;;  %v7793_v12 = vmul.f32 %v16388_v39, %v18068_v38  ;;  %v7576_v3 = vmul.f32 %v16178_v7, %v18059_v10 }
 0x4cb   : > { %v7980_v33 = vpack.c.bf16 %v7959_v54, %v7958_v29  ;;  %v16394_v44 = vsel %vm18180_vm3, %v7756_v58, %v7740_v8  ;;  %v7672_v51 = vmul.f32 %v16249_v25, %v18065_v26  ;;  %v7892_v20 = vrot.slane %v16373_v60, 1 }
 0x4cc   : > { %v7601_v50 = vadd.f32 %v7577_v49, %v7553_v63  ;;  %v7165_v52 = vadd.f32 %v15721_v37, %v7164_v4  ;;  %v7884_v40 = vrot.slane %v16371_v57, 1  ;;  %v7290_v0 = vmul.f32 %v16210_v17, %v14474_v22 }
 0x4cd   : > { %8433 = vmatmul.msk.bf16.gmra.mxu1 %vm290_vm0, %v7980_v33  ;;  %v7600_v31 = vadd.f32 %v7576_v3, %v7552_v15  ;;  %v7792_v1 = vmul.f32 %v16394_v44, %v18068_v38  ;;  %v7900_v42 = vrot.slane %v16379_v27, 1  ;;  %v7314_v55 = vmul.f32 %v15989_v13, %v14478_v6 }
 0x4ce   : > { %v7697_v19 = vadd.f32 %v7673_v28, %v7601_v50  ;;  %7201 = vst [vmem:[%s15750_s20 + $0x38] sm:$0xff] %v7165_v52  ;;  %v7841_v37 = vmul.f32 %v16373_v60, %v18069_v5  ;;  %v7291_v4 = vmul.f32 %v16223_v21, %v14474_v22  ;;  %v16428_v11 = vsel %vm18182_vm5, %v7884_v40, %v7892_v20  ;;  %vm18196_vm5 = vmmov %vm18190_vm1 }
 0x4cf   : > { %v7696_v34 = vadd.f32 %v7672_v51, %v7600_v31  ;;  %v16422_v17 = vsel %vm18181_vm4, %v7892_v20, %v7900_v42  ;;  %v7338_v13 = vadd.f32 %v7314_v55, %v7290_v0  ;;  %v7315_v35 = vmul.f32 %v16178_v7, %v14478_v6  ;;  %v16454_v51 = vld [vmem:[#allocation2 + $0x140] sm:$0xff]  ;;  %vm18195_vm4 = vmmov %vm18180_vm3 }
 0x4d0   : > { %v7817_v46 = vadd.f32 %v7793_v12, %v7697_v19  ;;  %v7410_v21 = vmul.f32 %v16236_v43, %v14494_v45  ;;  %v7411_v59 = vmul.f32 %v16249_v25, %v14494_v45  ;;  %v7530_v62 = vmul.f32 %v16324_v23, %v18056_v24  ;;  %v16467_v19 = vld [vmem:[%s17026_s5] ss:$0 sm:$0xff] }
 0x4d1   : > { %v7816_v16 = vadd.f32 %v7792_v1, %v7696_v34  ;;  %v7840_v47 = vmul.f32 %v16371_v57, %v18069_v5  ;;  %v7339_v29 = vadd.f32 %v7315_v35, %v7291_v4  ;;  %v7531_v43 = vmul.f32 %v16394_v44, %v18056_v24 }
 0x4d2   : > { %v7865_v53 = vadd.f32 %v7841_v37, %v7817_v46  ;;  %v7434_v7 = vadd.f32 %v7410_v21, %v7338_v13  ;;  %v7936_v25 = vmul.f32 %v16093_v30, %v16428_v11  ;;  %v7937_v54 = vmul.f32 %v16093_v30, %v16422_v17 }
 0x4d3   : > { %v7741_v8 = vrot.slane %v16438_v41, 7  ;;  %v7757_v63 = vrot.slane %v16440_v36, 7  ;;  %v7435_v49 = vadd.f32 %v7411_v59, %v7339_v29  ;;  %v7578_v33 = vmul.f32 %v16186_v56, %v18059_v10 }
 0x4d4   : > { %v7554_v48 = vadd.f32 %v7530_v62, %v7434_v7  ;;  %v7864_v15 = vadd.f32 %v7840_v47, %v7816_v16  ;;  %v7961_v50 = vadd.f32 %v7937_v54, %v7865_v53  ;;  %v7168_v28 = vpop.f32.mrf.mxu0  ;;  %v16458_v20 = vsel %vm18183_vm6, %v7748_v9, %v7756_v58  ;;  %vm18197_vm6 = vmmov %vm18190_vm1 }
 0x4d5   : > { %v7555_v12 = vadd.f32 %v7531_v43, %v7435_v49  ;;  %v16462_v52 = vsel %vm18184_vm7, %v7757_v63, %v7741_v8  ;;  %v7169_v0 = vadd.f32 %v16467_v19, %v7168_v28  ;;  %v7579_v31 = vmul.f32 %v16371_v57, %v18059_v10  ;;  %vm18198_vm7 = vmmov %vm18180_vm3 }
 0x4d6   : > { %v7960_v3 = vadd.f32 %v7936_v25, %v7864_v15  ;;  %v7602_v1 = vadd.f32 %v7578_v33, %v7554_v48  ;;  %v7674_v55 = vmul.f32 %v16354_v32, %v18065_v26  ;;  %v7675_v9 = vmul.f32 %v16428_v11, %v18065_v26 }
 0x4d7   : > { %7202 = vst [vmem:[%s15750_s20 + $0x40] sm:$0xff] %v7169_v0  ;;  %v7292_v46 = vmul.f32 %v16330_v18, %v14474_v22  ;;  %v7293_v37 = vmul.f32 %v16324_v23, %v14474_v22  ;;  %v7317_v4 = vmul.f32 %v16186_v56, %v14478_v6  ;;  %v7603_v34 = vadd.f32 %v7579_v31, %v7555_v12 }
 0x4d8   : > { %v7981_v58 = vpack.c.bf16 %v7961_v50, %v7960_v3  ;;  %v7794_v13 = vmul.f32 %v16458_v20, %v18068_v38  ;;  %v7795_v35 = vmul.f32 %v16462_v52, %v18068_v38  ;;  %v7893_v21 = vrot.slane %v16454_v51, 1 }
 0x4d9   : > { %v7316_v18 = vmul.f32 %v16201_v61, %v14478_v6  ;;  %v7698_v59 = vadd.f32 %v7674_v55, %v7602_v1  ;;  %v7699_v23 = vadd.f32 %v7675_v9, %v7603_v34  ;;  %v7885_v62 = vrot.slane %v16438_v41, 1 }
 0x4da   : > { %v7842_v56 = vmul.f32 %v16379_v27, %v18069_v5  ;;  %v7341_v47 = vadd.f32 %v7317_v4, %v7293_v37  ;;  %v7412_v61 = vmul.f32 %v16343_v14, %v14494_v45  ;;  %v7413_v54 = vmul.f32 %v16354_v32, %v14494_v45 }
 0x4db   : > { %v7340_v53 = vadd.f32 %v7316_v18, %v7292_v46  ;;  %v7818_v29 = vadd.f32 %v7794_v13, %v7698_v59  ;;  %v7819_v7 = vadd.f32 %v7795_v35, %v7699_v23  ;;  %v16496_v43 = vsel %vm18185_vm8, %v7885_v62, %v7893_v21  ;;  %vm18199_vm8 = vmmov %vm18180_vm3 }
 0x4dc   : > { %v7170_v16 = vpop.f32.mrf.mxu0  ;;  %v7532_v49 = vmul.f32 %v16388_v39, %v18056_v24  ;;  %v7533_v48 = vmul.f32 %v16458_v20, %v18056_v24  ;;  %v7843_v33 = vmul.f32 %v16438_v41, %v18069_v5  ;;  %v7939_v15 = vmul.f32 %v16093_v30, %v16496_v43 }
 0x4dd   : > { %8434 = vmatmul.msk.bf16.gmra.mxu1 %vm290_vm0, %v7981_v58  ;;  %v7171_v25 = vadd.f32 %v16467_v19, %v7170_v16  ;;  %v7436_v50 = vadd.f32 %v7412_v61, %v7340_v53  ;;  %v7437_v28 = vadd.f32 %v7413_v54, %v7341_v47  ;;  %v7866_v12 = vadd.f32 %v7842_v56, %v7818_v29 }
 0x4de   : > { %v16518_v14 = vsel %vm18186_vm12, %v7900_v42, %v7884_v40  ;;  %v7749_v32 = vrot.slane %v16454_v51, 7  ;;  %v7867_v3 = vadd.f32 %v7843_v33, %v7819_v7  ;;  %v7581_v1 = vmul.f32 %v16379_v27, %v18059_v10  ;;  %vm18200_vm12 = vmmov %vm18190_vm1 }
 0x4df   : > { %7203 = vst [vmem:[%s15750_s20 + $0x48] sm:$0xff] %v7171_v25  ;;  %v7556_v0 = vadd.f32 %v7532_v49, %v7436_v50  ;;  %v7557_v31 = vadd.f32 %v7533_v48, %v7437_v28  ;;  %v7938_v55 = vmul.f32 %v16093_v30, %v16518_v14  ;;  %v7580_v58 = vmul.f32 %v16373_v60, %v18059_v10  ;;  %v16558_v48 = vld [vmem:[#allocation2 + $0x158] sm:$0xff] }
 0x4e0   : > { %v7963_v9 = vadd.f32 %v7939_v15, %v7867_v3  ;;  %v16529_v46 = vsel %vm18187_vm10, %v7749_v32, %v7757_v63  ;;  %v16533_v40 = vsel %vm18188_vm14, %v7741_v8, %v7749_v32  ;;  %v7676_v13 = vmul.f32 %v16422_v17, %v18065_v26  ;;  %v16571_v32 = vld [vmem:[#allocation2 + $0x150] sm:$0xff]  ;;  %vm18201_vm10 = vmmov %vm18190_vm1 }
 0x4e1   : > { %v7962_v37 = vadd.f32 %v7938_v55, %v7866_v12  ;;  %v7604_v4 = vadd.f32 %v7580_v58, %v7556_v0  ;;  %v7605_v34 = vadd.f32 %v7581_v1, %v7557_v31  ;;  %v7677_v35 = vmul.f32 %v16518_v14, %v18065_v26  ;;  %v16577_v0 = vld [vmem:[#allocation2 + $0x160] sm:$0xff]  ;;  %vm18202_vm14 = vmmov %vm18180_vm3 }
 0x4e2   : > { %v7796_v59 = vmul.f32 %v16533_v40, %v18068_v38  ;;  %v7797_v63 = vmul.f32 %v16529_v46, %v18068_v38  ;;  %v7295_v8 = vmul.f32 %v16388_v39, %v14474_v22  ;;  %v7319_v16 = vmul.f32 %v16373_v60, %v14478_v6 }
 0x4e3   : > { %v7982_v18 = vpack.c.bf16 %v7963_v9, %v7962_v37  ;;  %v7700_v23 = vadd.f32 %v7676_v13, %v7604_v4  ;;  %v7701_v56 = vadd.f32 %v7677_v35, %v7605_v34  ;;  %v7901_v53 = vrot.slane %v16440_v36, 1 }
 0x4e4   : > { %v7173_v42 = vpop.f32.mrf.mxu0  ;;  %v7845_v7 = vmul.f32 %v16440_v36, %v18069_v5  ;;  %v7343_v25 = vadd.f32 %v7319_v16, %v7295_v8  ;;  %v7844_v39 = vmul.f32 %v16454_v51, %v18069_v5  ;;  %v7415_v49 = vmul.f32 %v16422_v17, %v14494_v45 }
 0x4e5   : > { %v7820_v47 = vadd.f32 %v7796_v59, %v7700_v23  ;;  %v7821_v29 = vadd.f32 %v7797_v63, %v7701_v56  ;;  %v7535_v60 = vmul.f32 %v16533_v40, %v18056_v24  ;;  %v16562_v33 = vsel %vm18189_vm9, %v7893_v21, %v7901_v53  ;;  %vm18203_vm9 = vmmov %vm18180_vm3 }
 0x4e6   : > { %v16566_v15 = vsel %vm18190_vm1, %v7901_v53, %v7885_v62  ;;  %v7294_v50 = vmul.f32 %v16394_v44, %v14474_v22  ;;  %v7439_v17 = vadd.f32 %v7415_v49, %v7343_v25  ;;  %v7318_v3 = vmul.f32 %v16371_v57, %v14478_v6 }
 0x4e7   : > { %v7868_v28 = vadd.f32 %v7844_v39, %v7820_v47  ;;  %v7869_v12 = vadd.f32 %v7845_v7, %v7821_v29  ;;  %v7414_v21 = vmul.f32 %v16428_v11, %v14494_v45  ;;  %v7750_v62 = vrot.slane %v16558_v48, 7 }
 0x4e8   : > { %v7940_v31 = vmul.f32 %v16093_v30, %v16562_v33  ;;  %v7941_v44 = vmul.f32 %v16093_v30, %v16566_v15  ;;  %v7559_v1 = vadd.f32 %v7535_v60, %v7439_v17  ;;  %v7342_v55 = vadd.f32 %v7318_v3, %v7294_v50 }
 0x4e9   : > { %v7534_v9 = vmul.f32 %v16462_v52, %v18056_v24  ;;  %v7742_v57 = vrot.slane %v16571_v32, 7  ;;  %v7583_v11 = vmul.f32 %v16454_v51, %v18059_v10  ;;  %v7758_v37 = vrot.slane %v16577_v0, 7 }
 0x4ea   : > { %v7964_v58 = vadd.f32 %v7940_v31, %v7868_v28  ;;  %v7965_v42 = vadd.f32 %v7941_v44, %v7869_v12  ;;  %v7438_v4 = vadd.f32 %v7414_v21, %v7342_v55  ;;  %v7582_v16 = vmul.f32 %v16438_v41, %v18059_v10 }
 0x4eb   : > { %v16594_v34 = vsel %vm18191_vm11, %v7742_v57, %v7750_v62  ;;  %v7607_v13 = vadd.f32 %v7583_v11, %v7559_v1  ;;  %v16600_v8 = vsel %vm18192_vm13, %v7758_v37, %v7742_v57  ;;  %v7678_v53 = vmul.f32 %v16496_v43, %v18065_v26  ;;  %v16646_v57 = vld [vmem:[#allocation2 + $0x178] sm:$0xff]  ;;  %vm18204_vm11 = vmmov %vm18190_vm1 }
 0x4ec   : > { %v7174_v61 = vpop.f32.mrf.mxu0  ;;  %v7558_v35 = vadd.f32 %v7534_v9, %v7438_v4  ;;  %v7983_v63 = vpack.c.bf16 %v7965_v42, %v7964_v58  ;;  %v7799_v23 = vmul.f32 %v16594_v34, %v18068_v38  ;;  %v7894_v29 = vrot.slane %v16558_v48, 1  ;;  %v16644_v9 = vld [vmem:[#allocation2 + $0x168] sm:$0xff]  ;;  %vm18205_vm13 = vmmov %vm18180_vm3 }
 0x4ed   : > { %8435 = vmatmul.msk.bf16.gmra.mxu1 %vm290_vm0, %v7982_v18  ;;  %v7175_v54 = vadd.f32 %v16467_v19, %v7174_v61  ;;  %v7679_v18 = vmul.f32 %v16562_v33, %v18065_v26  ;;  %v7296_v7 = vmul.f32 %v16458_v20, %v14474_v22  ;;  %v7320_v25 = vmul.f32 %v16379_v27, %v14478_v6 }
 0x4ee   : > { %v7606_v61 = vadd.f32 %v7582_v16, %v7558_v35  ;;  %v7798_v39 = vmul.f32 %v16600_v8, %v18068_v38  ;;  %v7886_v49 = vrot.slane %v16571_v32, 1  ;;  %v7902_v50 = vrot.slane %v16577_v0, 1 }
 0x4ef   : > { %7204 = vst [vmem:[%s15750_s20 + $0x50] sm:$0xff] %v7175_v54  ;;  %v7703_v47 = vadd.f32 %v7679_v18, %v7607_v13  ;;  %v7847_v28 = vmul.f32 %v16558_v48, %v18069_v5  ;;  %v7297_v27 = vmul.f32 %v16462_v52, %v14474_v22  ;;  %v7344_v12 = vadd.f32 %v7320_v25, %v7296_v7 }
 0x4f0   : > { %v7702_v60 = vadd.f32 %v7678_v53, %v7606_v61  ;;  %v16626_v20 = vsel %vm18193_vm15, %v7886_v49, %v7894_v29  ;;  %v16634_v3 = vsel %vm18194_vm2, %v7894_v29, %v7902_v50  ;;  %v7321_v31 = vmul.f32 %v16438_v41, %v14478_v6  ;;  %v16660_v53 = vld [vmem:[#allocation2 + $0x170] sm:$0xff]  ;;  %vm18206_vm15 = vmmov %vm18180_vm3 }
 0x4f1   : > { %v7823_v54 = vadd.f32 %v7799_v23, %v7703_v47  ;;  %v7416_v1 = vmul.f32 %v16518_v14, %v14494_v45  ;;  %v7417_v55 = vmul.f32 %v16496_v43, %v14494_v45  ;;  %v7536_v52 = vmul.f32 %v16529_v46, %v18056_v24  ;;  %vm18207_vm2 = vmmov %vm18190_vm1 }
 0x4f2   : > { %v7822_v17 = vadd.f32 %v7798_v39, %v7702_v60  ;;  %v7846_v58 = vmul.f32 %v16571_v32, %v18069_v5  ;;  %v7942_v41 = vmul.f32 %v16093_v30, %v16626_v20  ;;  %v7943_v42 = vmul.f32 %v16093_v30, %v16634_v3 }
 0x4f3   : > { %v7871_v44 = vadd.f32 %v7847_v28, %v7823_v54  ;;  %v7345_v14 = vadd.f32 %v7321_v31, %v7297_v27  ;;  %v7440_v11 = vadd.f32 %v7416_v1, %v7344_v12  ;;  %v7537_v43 = vmul.f32 %v16600_v8, %v18056_v24 }
 0x4f4   : > { %v7870_v4 = vadd.f32 %v7846_v58, %v7822_v17  ;;  %v7743_v13 = vrot.slane %v16644_v9, 7  ;;  %v7759_v35 = vrot.slane %v16646_v57, 7  ;;  %v7584_v23 = vmul.f32 %v16440_v36, %v18059_v10 }
 0x4f5   : > { %v7967_v18 = vadd.f32 %v7943_v42, %v7871_v44  ;;  %v16666_v47 = vsel %vm18180_vm3, %v7750_v62, %v7758_v37  ;;  %v7298_v7 = vmul.f32 %v16533_v40, %v14474_v22  ;;  %v7299_v25 = vmul.f32 %v16529_v46, %v14474_v22  ;;  %vm18208_vm3 = vmmov %vm18190_vm1 }
 0x4f6   : > { %v7177_v59 = vpop.f32.mrf.mxu0  ;;  %v16670_v29 = vsel %vm18195_vm4, %v7759_v35, %v7743_v13  ;;  %v7323_v61 = vmul.f32 %v16440_v36, %v14478_v6  ;;  %v7585_v54 = vmul.f32 %v16571_v32, %v18059_v10  ;;  %v7681_v37 = vmul.f32 %v16626_v20, %v18065_v26 }
 0x4f7   : > { %v7178_v56 = vadd.f32 %v16467_v19, %v7177_v59  ;;  %v7441_v59 = vadd.f32 %v7417_v55, %v7345_v14  ;;  %v7895_v28 = vrot.slane %v16660_v53, 1  ;;  %v7322_v46 = vmul.f32 %v16454_v51, %v14478_v6 }
 0x4f8   : > { %v7680_v36 = vmul.f32 %v16566_v15, %v18065_v26  ;;  %v7800_v12 = vmul.f32 %v16666_v47, %v18068_v38  ;;  %v7801_v17 = vmul.f32 %v16670_v29, %v18068_v38  ;;  %v7347_v44 = vadd.f32 %v7323_v61, %v7299_v25 }
 0x4f9   : > { %7205 = vst [vmem:[%s15750_s20 + $0x58] sm:$0xff] %v7178_v56  ;;  %v7966_v56 = vadd.f32 %v7942_v41, %v7870_v4  ;;  %v7561_v16 = vadd.f32 %v7537_v43, %v7441_v59  ;;  %v7346_v31 = vadd.f32 %v7322_v46, %v7298_v7  ;;  %v7419_v51 = vmul.f32 %v16566_v15, %v14494_v45 }
 0x4fa   : > { %v7418_v58 = vmul.f32 %v16562_v33, %v14494_v45  ;;  %v7538_v41 = vmul.f32 %v16594_v34, %v18056_v24  ;;  %v7539_v42 = vmul.f32 %v16666_v47, %v18056_v24  ;;  %v7848_v15 = vmul.f32 %v16577_v0, %v18069_v5 }
 0x4fb   : > { %v7984_v39 = vpack.c.bf16 %v7967_v18, %v7966_v56  ;;  %v7609_v27 = vadd.f32 %v7585_v54, %v7561_v16  ;;  %v7443_v4 = vadd.f32 %v7419_v51, %v7347_v44  ;;  %v7849_v18 = vmul.f32 %v16644_v9, %v18069_v5 }
 0x4fc   : > { %v7442_v43 = vadd.f32 %v7418_v58, %v7346_v31  ;;  %v16719_v33 = vsel %vm18197_vm6, %v7902_v50, %v7886_v49  ;;  %v7587_v25 = vmul.f32 %v16577_v0, %v18059_v10  ;;  %v7586_v49 = vmul.f32 %v16558_v48, %v18059_v10  ;;  %vm18210_vm6 = vmmov %vm18190_vm1 }
 0x4fd   : > { %8436 = vmatmul.msk.bf16.gmra.mxu1 %vm290_vm0, %v7983_v63  ;;  %v7560_v63 = vadd.f32 %v7536_v52, %v7440_v11  ;;  %v7705_v55 = vadd.f32 %v7681_v37, %v7609_v27  ;;  %v7563_v7 = vadd.f32 %v7539_v42, %v7443_v4  ;;  %v7944_v50 = vmul.f32 %v16093_v30, %v16719_v33 }
 0x4fe   : > { %v7179_v21 = vpop.f32.mrf.mxu0  ;;  %v7562_v16 = vadd.f32 %v7538_v41, %v7442_v43  ;;  %v7682_v27 = vmul.f32 %v16634_v3, %v18065_v26  ;;  %v7851_v41 = vmul.f32 %v16646_v57, %v18069_v5  ;;  %v7300_v43 = vmul.f32 %v16600_v8, %v14474_v22  ;;  %v16784_v8 = vld [vmem:[#allocation2 + $0x190] sm:$0xff] }
 0x4ff   : > { %v7608_v62 = vadd.f32 %v7584_v23, %v7560_v63  ;;  %v7887_v21 = vrot.slane %v16644_v9, 1  ;;  %v7825_v11 = vadd.f32 %v7801_v17, %v7705_v55  ;;  %v7751_v23 = vrot.slane %v16660_v53, 7 }
 0x500   : > { %v7325_v55 = vmul.f32 %v16558_v48, %v14478_v6  ;;  %v7421_v4 = vmul.f32 %v16634_v3, %v14494_v45 }
 0x501   : > { %v7704_v1 = vadd.f32 %v7680_v36, %v7608_v62  ;;  %v16701_v52 = vsel %vm18196_vm5, %v7887_v21, %v7895_v28  ;;  %v16734_v62 = vsel %vm18198_vm7, %v7751_v23, %v7759_v35  ;;  %v16738_v37 = vsel %vm18199_vm8, %v7743_v13, %v7751_v23  ;;  %vm18209_vm5 = vmmov %vm18195_vm4 }
 0x502   : > { %v7945_v59 = vmul.f32 %v16093_v30, %v16701_v52  ;;  %v7683_v36 = vmul.f32 %v16719_v33, %v18065_v26  ;;  %v7803_v35 = vmul.f32 %v16734_v62, %v18068_v38  ;;  %v7301_v13 = vmul.f32 %v16594_v34, %v14474_v22  ;;  %vm18211_vm7 = vmmov %vm18190_vm1 }
 0x503   : > { %v7824_v14 = vadd.f32 %v7800_v12, %v7704_v1  ;;  %v7802_v12 = vmul.f32 %v16738_v37, %v18068_v38  ;;  %v7903_v1 = vrot.slane %v16646_v57, 1  ;;  %v7850_v34 = vmul.f32 %v16660_v53, %v18069_v5 }
 0x505   : > { %v7872_v61 = vadd.f32 %v7848_v15, %v7824_v14  ;;  %v7349_v14 = vadd.f32 %v7325_v55, %v7301_v13  ;;  %v16763_v15 = vsel %vm18200_vm12, %v7895_v28, %v7903_v1  ;;  %v16767_v48 = vsel %vm18201_vm10, %v7903_v1, %v7887_v21 }
 0x506   : > { %v7324_v28 = vmul.f32 %v16571_v32, %v14478_v6  ;;  %v7420_v21 = vmul.f32 %v16626_v20, %v14494_v45  ;;  %v7946_v3 = vmul.f32 %v16093_v30, %v16763_v15  ;;  %v7540_v32 = vmul.f32 %v16670_v29, %v18056_v24 }
 0x507   : > { %v7968_v46 = vadd.f32 %v7944_v50, %v7872_v61  ;;  %v7588_v13 = vmul.f32 %v16644_v9, %v18059_v10 }
 0x508   : > { %v7181_v60 = vpop.f32.mrf.mxu0  ;;  %v7348_v61 = vadd.f32 %v7324_v28, %v7300_v43  ;;  %v7327_v43 = vmul.f32 %v16644_v9, %v14478_v6 }
 0x509   : > { %v7182_v40 = vadd.f32 %v16467_v19, %v7181_v60  ;;  %v7610_v60 = vadd.f32 %v7586_v49, %v7562_v16  ;;  %v16782_v16 = vld [vmem:[#allocation2 + $0x180] sm:$0xff] }
 0x50a   : > { %v7744_v50 = vrot.slane %v16782_v16, 7 }
 0x50b   : > { %7206 = vst [vmem:[%s15750_s20 + $0x60] sm:$0xff] %v7182_v40  ;;  %v7611_v40 = vadd.f32 %v7587_v25, %v7563_v7  ;;  %v7706_v31 = vadd.f32 %v7682_v27, %v7610_v60  ;;  %v7947_v7 = vmul.f32 %v16093_v30, %v16767_v48 }
 0x50d   : > { %8437 = vmatmul.msk.bf16.gmra.mxu1 %vm290_vm0, %v7984_v39  ;;  %v7873_v39 = vadd.f32 %v7849_v18, %v7825_v11  ;;  %v7707_v44 = vadd.f32 %v7683_v36, %v7611_v40  ;;  %v7826_v51 = vadd.f32 %v7802_v12, %v7706_v31  ;;  %v7541_v18 = vmul.f32 %v16738_v37, %v18056_v24 }
 0x50e   : > { %v7444_v40 = vadd.f32 %v7420_v21, %v7348_v61  ;;  %v7684_v31 = vmul.f32 %v16701_v52, %v18065_v26  ;;  %v16833_v21 = vld [vmem:[#allocation2 + $0x198] sm:$0xff]  ;;  %v7422_v61 = vmul.f32 %v16719_v33, %v14494_v45 }
 0x50f   : > { %v7969_v54 = vadd.f32 %v7945_v59, %v7873_v39  ;;  %v7827_v58 = vadd.f32 %v7803_v35, %v7707_v44  ;;  %v16775_v59 = vld [vmem:[#allocation2 + $0x188] sm:$0xff]  ;;  %v7685_v44 = vmul.f32 %v16763_v15, %v18065_v26 }
 0x510   : > { %v7183_v63 = vpop.f32.mrf.mxu0  ;;  %v7752_v25 = vrot.slane %v16775_v59, 7  ;;  %v7564_v36 = vadd.f32 %v7540_v32, %v7444_v40  ;;  %v7853_v9 = vmul.f32 %v16775_v59, %v18069_v5 }
 0x511   : > { %v7184_v56 = vadd.f32 %v16467_v19, %v7183_v63  ;;  %v7985_v17 = vpack.c.bf16 %v7969_v54, %v7968_v46  ;;  %v7874_v63 = vadd.f32 %v7850_v34, %v7826_v51  ;;  %v7875_v23 = vadd.f32 %v7851_v41, %v7827_v58 }
 0x512   : > { %v7760_v54 = vrot.slane %v16784_v8, 7  ;;  %v7589_v46 = vmul.f32 %v16660_v53, %v18059_v10  ;;  %v16802_v27 = vsel %vm18202_vm14, %v7744_v50, %v7752_v25  ;;  %v7302_v51 = vmul.f32 %v16666_v47, %v14474_v22 }
 0x513   : > { %7207 = vst [vmem:[%s15750_s20 + $0x68] sm:$0xff] %v7184_v56  ;;  %v7445_v56 = vadd.f32 %v7421_v4, %v7349_v14  ;;  %v7970_v20 = vadd.f32 %v7946_v3, %v7874_v63  ;;  %v7971_v49 = vadd.f32 %v7947_v7, %v7875_v23  ;;  %v7805_v1 = vmul.f32 %v16802_v27, %v18068_v38 }
 0x514   : > { %v7303_v58 = vmul.f32 %v16670_v29, %v14474_v22  ;;  %v7326_v41 = vmul.f32 %v16577_v0, %v14478_v6  ;;  %v7896_v34 = vrot.slane %v16775_v59, 1  ;;  %v7423_v47 = vmul.f32 %v16701_v52, %v14494_v45 }
 0x515   : > { %v7565_v39 = vadd.f32 %v7541_v18, %v7445_v56  ;;  %v7986_v35 = vpack.c.bf16 %v7971_v49, %v7970_v20  ;;  %v7888_v29 = vrot.slane %v16782_v16, 1  ;;  %v7904_v0 = vrot.slane %v16784_v8, 1  ;;  %v16835_v56 = vld [vmem:[#allocation2 + $0x1a8] sm:$0xff] }
 0x516   : > { %v7350_v63 = vadd.f32 %v7326_v41, %v7302_v51  ;;  %v7351_v23 = vadd.f32 %v7327_v43, %v7303_v58  ;;  %v7852_v20 = vmul.f32 %v16782_v16, %v18069_v5  ;;  %v16872_v58 = vld [vmem:[#allocation2 + $0x1a0] sm:$0xff]  ;;  %v7304_v43 = vmul.f32 %v16738_v37, %v14474_v22 }
 0x517   : > { %v7613_v12 = vadd.f32 %v7589_v46, %v7565_v39  ;;  %v7920_v52 = vsel %vm18190_vm1, %v7888_v29, %v7896_v34  ;;  %v16847_v7 = vsel %vm18204_vm11, %v7896_v34, %v7904_v0  ;;  %v7542_v39 = vmul.f32 %v16734_v62, %v18056_v24  ;;  %v16860_v46 = vld [vmem:[%s17022_s1 + $0x28] ss:$0 sm:$0xff] }
 0x518   : > { %v7447_v32 = vadd.f32 %v7423_v47, %v7351_v23  ;;  %v7948_v33 = vmul.f32 %v16860_v46, %v7920_v52  ;;  %v7889_v34 = vrot.slane %v16833_v21, 1  ;;  %v7305_v47 = vmul.f32 %v16734_v62, %v14474_v22 }
 0x519   : > { %v7709_v14 = vadd.f32 %v7685_v44, %v7613_v12  ;;  %v7590_v44 = vmul.f32 %v16646_v57, %v18059_v10  ;;  %v7425_v62 = vmul.f32 %v16767_v48, %v14494_v45 }
 0x51b   : > { %v7829_v18 = vadd.f32 %v7805_v1, %v7709_v14  ;;  %v7591_v1 = vmul.f32 %v16782_v16, %v18059_v10  ;;  %v7592_v16 = vmul.f32 %v16775_v59, %v18059_v10 }
 0x51c   : > { %v8035_v42 = vpop.f32.mrf.mxu1 }
 0x51d   : > { %8438 = vmatmul.msk.bf16.gmra.mxu1 %vm290_vm0, %v7985_v17  ;;  %v8036_v11 = vadd.f32 %v16467_v19, %v8035_v42  ;;  %v7784_v17 = vsel %vm18203_vm9, %v7760_v54, %v7744_v50  ;;  %v7612_v42 = vadd.f32 %v7588_v13, %v7564_v36  ;;  %v7877_v49 = vadd.f32 %v7853_v9, %v7829_v18 }
 0x51e   : > { %v7543_v28 = vmul.f32 %v7784_v17, %v18056_v24  ;;  %v7745_v50 = vrot.slane %v16833_v21, 7 }
 0x51f   : > { %8443 = vst [vmem:[%s15750_s20 + $0x80] sm:$0xff] %v8036_v11  ;;  %v7804_v11 = vmul.f32 %v7784_v17, %v18068_v38  ;;  %v7708_v4 = vadd.f32 %v7684_v31, %v7612_v42  ;;  %v7949_v17 = vmul.f32 %v16860_v46, %v16847_v7 }
 0x520   : > { %v7567_v36 = vadd.f32 %v7543_v28, %v7447_v32  ;;  %v7897_v28 = vrot.slane %v16872_v58, 1  ;;  %v7855_v32 = vmul.f32 %v16833_v21, %v18069_v5 }
 0x521   : > { %v7828_v3 = vadd.f32 %v7804_v11, %v7708_v4  ;;  %v7973_v51 = vadd.f32 %v7949_v17, %v7877_v49  ;;  %v7768_v11 = vsel %vm18206_vm15, %v7752_v25, %v7760_v54  ;;  %v7329_v4 = vmul.f32 %v16646_v57, %v14478_v6 }
 0x522   : > { %v7615_v14 = vadd.f32 %v7591_v1, %v7567_v36  ;;  %v7328_v25 = vmul.f32 %v16660_v53, %v14478_v6  ;;  %v7686_v54 = vmul.f32 %v16767_v48, %v18065_v26  ;;  %v7806_v37 = vmul.f32 %v7768_v11, %v18068_v38 }
 0x523   : > { %v7353_v57 = vadd.f32 %v7329_v4, %v7305_v47  ;;  %v7921_v6 = vsel %vm18207_vm2, %v7889_v34, %v7897_v28  ;;  %v7545_v48 = vmul.f32 %v7768_v11, %v18056_v24 }
 0x524   : > { %v8037_v60 = vpop.f32.mrf.mxu1  ;;  %v7352_v22 = vadd.f32 %v7328_v25, %v7304_v43 }
 0x525   : > { %v8038_v30 = vadd.f32 %v16467_v19, %v8037_v60  ;;  %v7761_v60 = vrot.slane %v16835_v56, 7 }
 0x527   : > { %8444 = vst [vmem:[%s15750_s20 + $0x88] sm:$0xff] %v8038_v30  ;;  %v7446_v30 = vadd.f32 %v7422_v61, %v7350_v63  ;;  %v7785_v41 = vsel %vm18205_vm13, %v7761_v60, %v7745_v50 }
 0x528   : > { %v7807_v23 = vmul.f32 %v7785_v41, %v18068_v38 }
 0x529   : > { %v7566_v31 = vadd.f32 %v7542_v39, %v7446_v30  ;;  %v7424_v39 = vmul.f32 %v16763_v15, %v14494_v45  ;;  %v7449_v30 = vadd.f32 %v7425_v62, %v7353_v57  ;;  %v7928_v45 = vsel %vm18208_vm3, %v7904_v0, %v7888_v29 }
 0x52a   : > { %v7951_v15 = vmul.f32 %v16860_v46, %v7921_v6  ;;  %v7689_v59 = vmul.f32 %v7928_v45, %v18065_v26 }
 0x52b   : > { %v7186_v55 = vpop.f32.mrf.mxu0  ;;  %v7614_v18 = vadd.f32 %v7590_v44, %v7566_v31  ;;  %v7569_v17 = vadd.f32 %v7545_v48, %v7449_v30  ;;  %v7950_v44 = vmul.f32 %v16860_v46, %v7928_v45 }
 0x52c   : > { %v7687_v55 = vmul.f32 %v7920_v52, %v18065_v26 }
 0x52d   : > { %8439 = vmatmul.msk.bf16.gmra.mxu1 %vm290_vm0, %v7986_v35  ;;  %v7876_v35 = vadd.f32 %v7852_v20, %v7828_v3  ;;  %v7710_v52 = vadd.f32 %v7686_v54, %v7614_v18  ;;  %v7544_v20 = vmul.f32 %v16802_v27, %v18056_v24  ;;  %v7593_v24 = vmul.f32 %v16784_v8, %v18059_v10 }
 0x52e   : > { %v7711_v63 = vadd.f32 %v7687_v55, %v7615_v14  ;;  %v7688_v10 = vmul.f32 %v16847_v7, %v18065_v26  ;;  %v7905_v18 = vrot.slane %v16835_v56, 1  ;;  %v7856_v26 = vmul.f32 %v16872_v58, %v18069_v5 }
 0x52f   : > { %v7972_v42 = vadd.f32 %v7948_v33, %v7876_v35  ;;  %v7830_v49 = vadd.f32 %v7806_v37, %v7710_v52  ;;  %v7448_v33 = vadd.f32 %v7424_v39, %v7352_v22  ;;  %v7617_v0 = vadd.f32 %v7593_v24, %v7569_v17 }
 0x530   : > { %v7831_v61 = vadd.f32 %v7807_v23, %v7711_v63  ;;  %v7857_v63 = vmul.f32 %v16835_v56, %v18069_v5  ;;  %v7913_v23 = vsel %vm18210_vm6, %v7897_v28, %v7905_v18 }
 0x531   : > { %v7987_v3 = vpack.c.bf16 %v7973_v51, %v7972_v42  ;;  %v7568_v35 = vadd.f32 %v7544_v20, %v7448_v33  ;;  %v7952_v37 = vmul.f32 %v16860_v46, %v7913_v23 }
 0x533   : > { %v7187_v40 = vpop.f32.mrf.mxu0  ;;  %v7616_v29 = vadd.f32 %v7592_v16, %v7568_v35 }
 0x534   : > { %v7188_v12 = vadd.f32 %v16467_v19, %v7187_v40  ;;  %v7854_v40 = vmul.f32 %v16784_v8, %v18069_v5 }
 0x535   : > { %v7712_v47 = vadd.f32 %v7688_v10, %v7616_v29 }
 0x536   : > { %v8040_v13 = vpop.f32.mrf.mxu1  ;;  %7208 = vst [vmem:[%s15750_s20 + $0x70] sm:$0xff] %v7188_v12  ;;  %v7879_v12 = vadd.f32 %v7855_v32, %v7831_v61  ;;  %v7878_v31 = vadd.f32 %v7854_v40, %v7830_v49 }
 0x537   : > { %v7753_v13 = vrot.slane %v16872_v58, 7 }
 0x538   : > { %v7975_v1 = vadd.f32 %v7951_v15, %v7879_v12  ;;  %v7974_v55 = vadd.f32 %v7950_v44, %v7878_v31 }
 0x539   : > { %v7777_v8 = vsel %vm18195_vm4, %v7745_v50, %v7753_v13  ;;  %v7769_v51 = vsel %vm18209_vm5, %v7753_v13, %v7761_v60  ;;  %v7713_v50 = vadd.f32 %v7689_v59, %v7617_v0 }
 0x53a   : > { %v7988_v14 = vpack.c.bf16 %v7975_v1, %v7974_v55  ;;  %v7808_v11 = vmul.f32 %v7777_v8, %v18068_v38  ;;  %v7809_v4 = vmul.f32 %v7769_v51, %v18068_v38  ;;  %v7929_v38 = vsel %vm18211_vm7, %v7905_v18, %v7889_v34 }
 0x53b   : > { %v7953_v58 = vmul.f32 %v16860_v46, %v7929_v38 }
 0x53c   : > { %v7832_v60 = vadd.f32 %v7808_v11, %v7712_v47  ;;  %v7833_v7 = vadd.f32 %v7809_v4, %v7713_v50 }
 0x53d   : > { %8440 = vmatmul.msk.bf16.gmra.mxu1 %vm290_vm0, %v7987_v3 }
 0x53e   : > { %v8041_v9 = vpop.f32.mrf.mxu1  ;;  %v7880_v25 = vadd.f32 %v7856_v26, %v7832_v60  ;;  %v7881_v54 = vadd.f32 %v7857_v63, %v7833_v7 }
 0x53f   : > { %v8042_v53 = vadd.f32 %v16467_v19, %v8041_v9 }
 0x540   : > { %v7976_v22 = vadd.f32 %v7952_v37, %v7880_v25  ;;  %v7977_v5 = vadd.f32 %v7953_v58, %v7881_v54 }
 0x541   : > { %8445 = vst [vmem:[%s15750_s20 + $0x90] sm:$0xff] %v8042_v53 }
 0x542   : > { %v7190_v36 = vpop.f32.mrf.mxu0  ;;  %v7989_v57 = vpack.c.bf16 %v7977_v5, %v7976_v22 }
 0x543   : > { %v7191_v27 = vadd.f32 %v16467_v19, %v7190_v36 }
 0x545   : > { %7209 = vst [vmem:[%s15750_s20 + $0x78] sm:$0xff] %v7191_v27 }
 0x54a   : > { %v8044_v41 = vpop.f32.mrf.mxu1  ;;  %v7192_v42 = vpop.f32.mrf.mxu0 }
 0x54b   : > { %v8045_v43 = vadd.f32 %v16467_v19, %v8044_v41 }
 0x54d   : > { %8446 = vst [vmem:[%s15750_s20 + $0x98] sm:$0xff] %v8045_v43  ;;  %8441 = vmatmul.msk.bf16.gmra.mxu1 %vm290_vm0, %v7988_v14 }
 0x552   : > { %v8046_v3 = vpop.f32.mrf.mxu1 }
 0x55a   : > { %v8048_v56 = vpop.f32.mrf.mxu1 }
 0x55b   : > { %v8049_v28 = vadd.f32 %v16467_v19, %v8048_v56 }
 0x55d   : > { %8447 = vst [vmem:[%s15750_s20 + $0xa0] sm:$0xff] %v8049_v28  ;;  %8442 = vmatmul.msk.bf16.gmra.mxu1 %vm290_vm0, %v7989_v57 }
 0x562   : > { %v8050_v2 = vpop.f32.mrf.mxu1 }
 0x563   : > { %v8051_v21 = vadd.f32 %v16467_v19, %v8050_v2 }
 0x565   : > { %8448 = vst [vmem:[%s15750_s20 + $0xa8] sm:$0xff] %v8051_v21 }
 0x56a   : > { %v8053_v34 = vpop.f32.mrf.mxu1 }
 0x572   : > { %v8054_v62 = vpop.f32.mrf.mxu1 }
 0x573   : > { %v8055_v46 = vadd.f32 %v16467_v19, %v8054_v62 }
 0x575   : > { %8449 = vst [vmem:[%s15750_s20 + $0xb0] sm:$0xff] %v8055_v46 }
 0x57a   : > { %v8057_v9 = vpop.f32.mrf.mxu1 }
 0x57b   : > { %v8058_v52 = vadd.f32 %v16467_v19, %v8057_v9 }
 0x57d   : > { %8450 = vst [vmem:[%s15750_s20 + $0xb8] sm:$0xff] %v8058_v52 }
 0x582   : > { %v8059_v61 = vpop.f32.mrf.mxu1 }
 0x58a   : > { %v8061_v32 = vpop.f32.mrf.mxu1 }
 0x58b   : > { %v8062_v6 = vadd.f32 %v16467_v19, %v8061_v32 }
 0x58d   : > { %8451 = vst [vmem:[%s15750_s20 + $0xc0] sm:$0xff] %v8062_v6 }
 0x592   : > { %v8063_v53 = vpop.f32.mrf.mxu1 }
 0x593   : > { %v8064_v39 = vadd.f32 %v16467_v19, %v8063_v53 }
 0x595   : > { %8452 = vst [vmem:[%s15750_s20 + $0xc8] sm:$0xff] %v8064_v39 }
 0x59a   : > { %v8066_v20 = vpop.f32.mrf.mxu1 }
 0x5a2   : > { %v8067_v48 = vpop.f32.mrf.mxu1 }
 0x5a3   : > { %v8068_v49 = vadd.f32 %v16467_v19, %v8067_v48 }
 0x5a5   : > { %8453 = vst [vmem:[%s15750_s20 + $0xd0] sm:$0xff] %v8068_v49 }
 0x5aa   : > { %v8070_v40 = vpop.f32.mrf.mxu1 }
 0x5ab   : > { %v8071_v33 = vadd.f32 %v16467_v19, %v8070_v40 }
 0x5ad   : > { %8454 = vst [vmem:[%s15750_s20 + $0xd8] sm:$0xff] %v8071_v33 }
 0x5b2   : > { %v8072_v30 = vpop.f32.mrf.mxu1 }
 0x5ba   : > { %v8074_v36 = vpop.f32.mrf.mxu1 }
 0x5bb   : > { %v8075_v12 = vadd.f32 %v16467_v19, %v8074_v36 }
 0x5bd   : > { %8455 = vst [vmem:[%s15750_s20 + $0xe0] sm:$0xff] %v8075_v12 }
 0x5c2   : > { %v8076_v45 = vpop.f32.mrf.mxu1 }
 0x5c3   : > { %v8077_v15 = vadd.f32 %v16467_v19, %v8076_v45 }
 0x5c5   : > { %8456 = vst [vmem:[%s15750_s20 + $0xe8] sm:$0xff] %v8077_v15 }
 0x5ca   : > { %v8079_v24 = vpop.f32.mrf.mxu1 }
 0x5d2   : > { %v8080_v27 = vpop.f32.mrf.mxu1 }
 0x5d3   : > { %v8081_v35 = vadd.f32 %v16467_v19, %v8080_v27 }
 0x5d5   : > { %8457 = vst [vmem:[%s15750_s20 + $0xf0] sm:$0xff] %v8081_v35 }
 0x5da   : > { %v8083_v17 = vpop.f32.mrf.mxu1 }
 0x5db   : > { %v8084_v13 = vadd.f32 %v16467_v19, %v8083_v17 }
 0x5dd   : > { %8458 = vst [vmem:[%s15750_s20 + $0xf8] sm:$0xff] %v8084_v13 }
 0x5de   : > { %8997 = shalt.err (!%p8994_p10)
}
 0x5df   : > { %s9046_s19 = smov 128   ;;  %s9047_s20 = smov 8  }
 0x5e0   : > { %8571 = dma.vmem_to_hbm [thread:$0]  (%p9152_p3), %s8118_s10, 4096, %s8120_s14, %s8105_s15, %s9046_s19, %s9046_s19, %s9047_s20  }
 0x5e2   : > { %v8085_v19 = vpop.f32.mrf.mxu1 }
 0x5e3 PF: > { %s8134_s13 = sand.u32 1, %s9028_s21   ;;  %p18212_p12 = scmp.ge.s32.totalorder %s9040_s24, 2 }
 0x5e4   : > { %s8135_s27 = scalar_lea.sflag [#allocation6], %s8134_s13 }
 0x5e5   : > { %p8582_p13 = pnand %p18212_p12, %p9118_p6 }
 0x5e7   : > { %p8583_p0 = pneg %p8582_p13 }
 0x5e9   : > { %9023 = dma.done.wait (%p8583_p0), %s8135_s27, 4096  }
 0x5ea   : > { %9025 = vsyncadd (%p8583_p0), %s8135_s27, 4294963200  ;;  %p20_p5 = scmp.ge.s32.totalorder %s9136_s11, 4   ;;  %s18213_s21 = smov %s9032_s22 }
 0x5eb   : > { %s18214_s22 = smov %s9036_s23  ;;  %s18215_s23 = smov %s9148_s16 }
 0x5ec   : > { %s18216_s24 = smov %s9136_s11  ;;  %22 = sbr.rel (!%p20_p5) target bundleno = 6 (0x6), region = 108 }
 0x5f1   :  { %8141 = vsyncpa [#allocation5], 1 }
 0x5f2   :  { %8143 = vsyncpa [#allocation5 + $0x1], 1 }
 0x5f3   :  { %8144 = vsyncpa [#allocation8], 1 }
 0x5f4   :  { %8145 = vsyncpa [#allocation6], 1 }
 0x5f5   :  { %8147 = vsyncpa [#allocation6 + $0x1], 1 }

</bundles_post_ra>
